<compile_context>
chip_gen: v5e
topology: v5e:2x2
jax: 0.10.0
libtpu: 0.0.40
codegen_flags: <defaults>
</compile_context>

<pallas_src>
import functools

import numpy as np
import jax
import jax.numpy as jnp
from jax import lax
from jax.experimental import pallas as pl
from jax.experimental.pallas import tpu as pltpu

_VMEM = pl.BlockSpec(memory_space=pltpu.MemorySpace.VMEM)
_EPS = 1e-5            # PyTorch BatchNorm1d default
_COUT_PAD = 8          # final Conv(H->3) channels zero-padded to 8 (lane-dense output)
_PREC = lax.Precision.HIGHEST   # reference precision (exact f32)


# ------------------------------ fused kernel ---------------------------------

def _generator_kernel(z_ref, slab_ref, out_ref, *, meta, B, L0):
    """Whole Generator forward, VMEM-resident, batch-stacked.

    Activations are (B, L*H): rows = batch, lanes = (position, channel)
    flattening.  Each conv / conv-transpose / linear layer is a single MXU dot
    against a pre-baked banded weight matrix sliced statically from the packed
    parameter slab.
    """
    L1, L2 = 2 * L0, 4 * L0

    def mat(name):
        o, r, c = meta[name]
        return slab_ref[o:o + r, :c]

    def vec(name):
        o, _, c = meta[name]
        return slab_ref[o:o + 1, :c]

    def dot(a, b):
        return jnp.dot(a, b, preferred_element_type=jnp.float32)

    def layer(x, wname, bname):
        # conv / conv-transpose / linear == one banded-matrix matmul + bias row.
        return dot(x, mat(wname)) + vec(bname)

    def bn_relu(x, L, gname, bname, sname):
        # Training-mode BatchNorm1d (stats over (N, L) per channel, biased
        # variance, eps=1e-5) fused with ReLU.  Per-channel sums via a 0/1
        # channel-selector matmul; scale/shift tiled back along lanes.
        inv_n = 1.0 / float(B * L)
        sel = mat(sname)                                              # (L*H, H)
        mean = jnp.sum(dot(x, sel), axis=0, keepdims=True) * inv_n    # (1, H)
        mean_t = jnp.concatenate([mean] * L, axis=1)                  # (1, L*H)
        xc = x - mean_t
        var = jnp.sum(dot(xc * xc, sel), axis=0, keepdims=True) * inv_n
        scale = vec(gname) * lax.rsqrt(var + _EPS)                    # (1, H)
        shift = vec(bname) - mean * scale
        scale_t = jnp.concatenate([scale] * L, axis=1)
        shift_t = jnp.concatenate([shift] * L, axis=1)
        return jnp.maximum(x * scale_t + shift_t, 0.0)

    def resblock(x, pre, L, sname):
        s = layer(x, pre + "sht_w", pre + "sht_b")                    # 1x1 shortcut
        h = bn_relu(x, L, pre + "bn1_g", pre + "bn1_b", sname)
        h = layer(h, pre + "c1_w", pre + "c1_b")
        h = bn_relu(h, L, pre + "bn2_g", pre + "bn2_b", sname)
        h = layer(h, pre + "c2_w", pre + "c2_b")
        # fused residual add + ReLU; torch's following ReLU is idempotent.
        return jnp.maximum(s + h, 0.0)

    # Linear (+ReLU): lin_w columns pre-permuted -> result is already in the
    # flattened channels-last layout (no per-batch slicing/concat).
    x = jnp.maximum(layer(z_ref[...], "lin_w", "lin_b"), 0.0)         # (B, L0*H)
    x = layer(x, "ct1_w", "ct1_b")                                    # (B, L1*H)
    x = resblock(x, "rb1_", L1, "sel1")
    x = layer(x, "ct2_w", "ct2_b")                                    # (B, L2*H)
    x = resblock(x, "rb2_", L2, "sel2")
    x = bn_relu(x, L2, "bn_g", "bn_b", "sel2")
    # Final conv (C_out zero-padded to 8 -> 128 lanes), tanh epilogue, 1 store.
    out_ref[...] = jnp.tanh(layer(x, "out_w", "out_b"))               # (B, L2*8)


def generator_forward(z, slab, *, meta, max_traj_len):
    B = z.shape[0]
    L2 = max_traj_len
    kernel = functools.partial(_generator_kernel, meta=meta, B=B,
                               L0=max_traj_len // 4)
    y = pl.pallas_call(
        kernel,
        out_shape=jax.ShapeDtypeStruct((B, L2 * _COUT_PAD), jnp.float32),
        in_specs=[_VMEM, _VMEM],
        out_specs=_VMEM,
        compiler_params=pltpu.CompilerParams(vmem_limit_bytes=32 * 1024 * 1024),
    )(z, slab)
    # Strip the channel padding (3 real channels) and return torch's (B, 3, L).
    return jnp.transpose(y.reshape(B, L2, _COUT_PAD)[:, :, :3], (0, 2, 1))


# ----------------------- banded-weight construction ---------------------------

def _conv_band(w, l_in, pad, cout_pad=None):
    # torch Conv1d weight (Cout, Cin, K), stride 1 -> banded (L_in*Cin, L_out*Cp).
    w = np.asarray(w, np.float32)
    cout, cin, k = w.shape
    l_out = l_in + 2 * pad - k + 1
    cp = cout if cout_pad is None else cout_pad
    m = np.zeros((l_in * cin, l_out * cp), np.float32)
    for lo in range(l_out):
        for kk in range(k):
            li = lo + kk - pad
            if 0 <= li < l_in:
                m[li * cin:(li + 1) * cin, lo * cp:lo * cp + cout] = w[:, :, kk].T
    return m


def _conv_transpose_band(w, l_in, stride, pad):
    # torch ConvTranspose1d weight (Cin, Cout, K) -> banded (L_in*Cin, L_out*Cout).
    w = np.asarray(w, np.float32)
    cin, cout, k = w.shape
    l_out = (l_in - 1) * stride - 2 * pad + k
    m = np.zeros((l_in * cin, l_out * cout), np.float32)
    for li in range(l_in):
        for kk in range(k):
            t = stride * li + kk - pad
            if 0 <= t < l_out:
                m[li * cin:(li + 1) * cin, t * cout:(t + 1) * cout] = w[:, :, kk]
    return m


def _tile_bias(b, l_out, cout_pad=None):
    b = np.asarray(b, np.float32)
    cout = b.shape[0]
    cp = cout if cout_pad is None else cout_pad
    row = np.zeros((1, l_out * cp), np.float32)
    for lo in range(l_out):
        row[0, lo * cp:lo * cp + cout] = b
    return row


def _channel_selector(l, c):
    # S[l*C + c, c'] = 1 iff c == c'  (per-channel lane reduction via matmul).
    return np.tile(np.eye(c, dtype=np.float32), (l, 1))


def prepare_params(raw, hidden_size, max_traj_len):
    """One-time conversion of PyTorch-layout params into ONE packed VMEM slab."""
    H = hidden_size
    L0 = max_traj_len // 4
    L1, L2 = 2 * L0, 4 * L0
    noise = np.asarray(raw["lin_w"]).shape[0]
    width = L2 * H                      # widest matrix (512 lanes at these shapes)

    mats, vecs = [], []

    def add_mat(name, a):
        mats.append((name, np.asarray(a, np.float32)))

    def add_vec(name, a):
        vecs.append((name, np.asarray(a, np.float32).reshape(1, -1)))

    # Linear: permute columns from torch's (h, l) order to channels-last (l, h).
    lin_w = np.asarray(raw["lin_w"], np.float32).reshape(noise, H, L0)
    add_mat("lin_w", lin_w.transpose(0, 2, 1).reshape(noise, L0 * H))
    add_vec("lin_b", np.asarray(raw["lin_b"], np.float32).reshape(H, L0).T.reshape(1, L0 * H))

    add_mat("ct1_w", _conv_transpose_band(raw["ct1_w"], L0, 2, 3))
    add_vec("ct1_b", _tile_bias(raw["ct1_b"], L1))

    def add_resblock(pre, rp, L, K):
        add_mat(pre + "sht_w", _conv_band(rp["sht_w"], L, 0))
        add_vec(pre + "sht_b", _tile_bias(rp["sht_b"], L))
        add_vec(pre + "bn1_g", rp["bn1_g"]); add_vec(pre + "bn1_b", rp["bn1_b"])
        add_mat(pre + "c1_w", _conv_band(rp["c1_w"], L, K // 2))
        add_vec(pre + "c1_b", _tile_bias(rp["c1_b"], L))
        add_vec(pre + "bn2_g", rp["bn2_g"]); add_vec(pre + "bn2_b", rp["bn2_b"])
        add_mat(pre + "c2_w", _conv_band(rp["c2_w"], L, K // 2))
        add_vec(pre + "c2_b", _tile_bias(rp["c2_b"], L))

    add_resblock("rb1_", raw["rb1"], L1, 7)
    add_mat("ct2_w", _conv_transpose_band(raw["ct2_w"], L1, 2, 3))
    add_vec("ct2_b", _tile_bias(raw["ct2_b"], L2))
    add_resblock("rb2_", raw["rb2"], L2, 11)
    add_vec("bn_g", raw["bn_g"]); add_vec("bn_b", raw["bn_b"])
    add_mat("out_w", _conv_band(raw["out_w"], L2, 3, cout_pad=_COUT_PAD))
    add_vec("out_b", _tile_bias(raw["out_b"], L2, cout_pad=_COUT_PAD))
    add_mat("sel1", _channel_selector(L1, H))
    add_mat("sel2", _channel_selector(L2, H))

    # Pack everything into one (rows, width) slab; all row offsets 8-aligned.
    meta, blocks, off = {}, [], 0
    for name, a in mats:
        r, c = a.shape
        assert c <= width and r % 8 == 0 and off % 8 == 0
        blocks.append(np.pad(a, ((0, 0), (0, width - c))))
        meta[name] = (off, r, c)
        off += r
    for name, a in vecs:
        _, c = a.shape
        blocks.append(np.pad(a, ((0, 7), (0, width - c))))   # 8-row aligned block
        meta[name] = (off, 1, c)
        off += 8
    slab = jnp.asarray(np.concatenate(blocks, axis=0))
    return slab, meta


# ----------------------- parameter init (torch layouts) -----------------------

def init_params(key, noise_size, hidden_size, max_traj_len):
    """Raw parameters in PyTorch layouts (Conv1d: (Co,Ci,K); ConvT: (Ci,Co,K))."""
    H = hidden_size
    L0 = max_traj_len // 4
    keys = iter(jax.random.split(key, 40))

    def rnd(shape, scale):
        return jax.random.normal(next(keys), shape, jnp.float32) * scale

    def conv_w(co, ci, k):
        return rnd((co, ci, k), 1.0 / float(ci * k) ** 0.5)

    def rb(kern):
        return {
            "sht_w": conv_w(H, H, 1), "sht_b": rnd((H,), 0.01),
            "bn1_g": jnp.ones((H,), jnp.float32), "bn1_b": jnp.zeros((H,), jnp.float32),
            "c1_w": conv_w(H, H, kern), "c1_b": rnd((H,), 0.01),
            "bn2_g": jnp.ones((H,), jnp.float32), "bn2_b": jnp.zeros((H,), jnp.float32),
            "c2_w": conv_w(H, H, kern), "c2_b": rnd((H,), 0.01),
        }

    return {
        "lin_w": rnd((noise_size, H * L0), 1.0 / float(noise_size) ** 0.5),
        "lin_b": rnd((H * L0,), 0.01),
        "ct1_w": rnd((H, H, 8), 1.0 / float(H * 8) ** 0.5),
        "ct1_b": rnd((H,), 0.01),
        "rb1": rb(7),
        "ct2_w": rnd((H, H, 8), 1.0 / float(H * 8) ** 0.5),
        "ct2_b": rnd((H,), 0.01),
        "rb2": rb(11),
        "bn_g": jnp.ones((H,), jnp.float32),
        "bn_b": jnp.zeros((H,), jnp.float32),
        "out_w": conv_w(3, H, 7),
        "out_b": rnd((3,), 0.01),
    }


# --------------------------- pure-JAX reference -------------------------------

def reference_forward(z, raw, *, hidden_size, max_traj_len):
    """Straightforward XLA implementation of the torch module (exact f32)."""
    B = z.shape[0]
    H = hidden_size
    L0 = max_traj_len // 4
    dn = ("NCH", "OIH", "NCH")

    def conv1d(x, w, b, pad):
        y = lax.conv_general_dilated(x, w, (1,), [(pad, pad)],
                                     dimension_numbers=dn, precision=_PREC)
        return y + b[None, :, None]

    def conv_t1d(x, w, b, stride, pad):
        K = w.shape[-1]
        w2 = jnp.flip(w, axis=2).transpose(1, 0, 2)
        y = lax.conv_general_dilated(x, w2, (1,), [(K - 1 - pad, K - 1 - pad)],
                                     lhs_dilation=(stride,),
                                     dimension_numbers=dn, precision=_PREC)
        return y + b[None, :, None]

    def bn(x, g, bt):
        mean = jnp.mean(x, axis=(0, 2), keepdims=True)
        var = jnp.mean((x - mean) ** 2, axis=(0, 2), keepdims=True)
        return (x - mean) / jnp.sqrt(var + _EPS) * g[None, :, None] + bt[None, :, None]

    def resblock(x, p, K):
        s = conv1d(x, p["sht_w"], p["sht_b"], 0)
        h = jax.nn.relu(bn(x, p["bn1_g"], p["bn1_b"]))
        h = conv1d(h, p["c1_w"], p["c1_b"], K // 2)
        h = jax.nn.relu(bn(h, p["bn2_g"], p["bn2_b"]))
        h = conv1d(h, p["c2_w"], p["c2_b"], K // 2)
        return jax.nn.relu(s + h)

    x = jnp.dot(z, raw["lin_w"], precision=_PREC) + raw["lin_b"]
    x = jax.nn.relu(x.reshape(B, H, L0))
    x = conv_t1d(x, raw["ct1_w"], raw["ct1_b"], 2, 3)
    x = resblock(x, raw["rb1"], 7)
    x = jax.nn.relu(x)
    x = conv_t1d(x, raw["ct2_w"], raw["ct2_b"], 2, 3)
    x = resblock(x, raw["rb2"], 11)
    x = jax.nn.relu(bn(x, raw["bn_g"], raw["bn_b"]))
    x = conv1d(x, raw["out_w"], raw["out_b"], 3)
    return jnp.tanh(x)


# ----------------------------------- main -------------------------------------

if __name__ == "__main__":
    noise_size, hidden_size, max_traj_len, batch = 16, 32, 16, 2
    assert max_traj_len % 4 == 0

    z = jax.random.normal(jax.random.PRNGKey(0), (batch, noise_size), jnp.float32)
    raw = init_params(jax.random.PRNGKey(1), noise_size, hidden_size, max_traj_len)
    slab, meta = prepare_params(raw, hidden_size, max_traj_len)

    fwd = jax.jit(functools.partial(generator_forward, meta=meta,
                                    max_traj_len=max_traj_len))
    out = jax.block_until_ready(fwd(z, slab))

    ref = jax.block_until_ready(
        jax.jit(functools.partial(reference_forward, hidden_size=hidden_size,
                                  max_traj_len=max_traj_len))(z, raw))

    assert out.shape == (batch, 3, max_traj_len), out.shape
    assert out.dtype == jnp.float32
    assert bool(jnp.all(jnp.isfinite(out)))
    assert bool(jnp.all(jnp.abs(out) <= 1.0))        # tanh output range
    err = float(jnp.max(jnp.abs(out - ref)))
    assert err < 1e-3, f"max |kernel - reference| = {err}"
    print("KERNEL_OK")
</pallas_src>

<mosaic_0001>
module attributes {stable_mosaic.version = 11 : i64} {
  func.func @_generator_kernel(%arg0: memref<2x16xf32, #tpu.memory_space<vmem>>, %arg1: memref<4144x512xf32, #tpu.memory_space<vmem>>, %arg2: memref<2x128xf32, #tpu.memory_space<vmem>>) attributes {dimension_semantics = [], scalar_prefetch = 0 : i64, scratch_operands = 0 : i64, tpu.core_type = #tpu.core_type<tc>} {
    %c0 = arith.constant 0 : index
    %c0_0 = arith.constant 0 : index
    %0 = vector.load %arg0[%c0, %c0_0] : memref<2x16xf32, #tpu.memory_space<vmem>>, vector<2x16xf32>
    %c0_1 = arith.constant 0 : index
    %c0_2 = arith.constant 0 : index
    %1 = vector.load %arg1[%c0_1, %c0_2] : memref<4144x512xf32, #tpu.memory_space<vmem>>, vector<16x128xf32>
    %cst = arith.constant dense<0.000000e+00> : vector<2x128xf32>
    %2 = tpu.matmul %0, %1, %cst {dimension_numbers = #tpu.dot_dimension_numbers<[1], [0], [0], [1], [0, 0, 1, 1], [], []>} : vector<2x16xf32>, vector<16x128xf32>, vector<2x128xf32> -> vector<2x128xf32>
    %c3984 = arith.constant 3984 : index
    %c0_3 = arith.constant 0 : index
    %3 = vector.load %arg1[%c3984, %c0_3] : memref<4144x512xf32, #tpu.memory_space<vmem>>, vector<1x128xf32>
    %4 = vector.broadcast %3 : vector<1x128xf32> to vector<2x128xf32>
    %5 = arith.addf %2, %4 : vector<2x128xf32>
    %cst_4 = arith.constant 0.000000e+00 : f32
    %6 = vector.broadcast %cst_4 : f32 to vector<2x128xf32>
    %7 = arith.maximumf %5, %6 : vector<2x128xf32>
    %c16 = arith.constant 16 : index
    %c0_5 = arith.constant 0 : index
    %8 = vector.load %arg1[%c16, %c0_5] : memref<4144x512xf32, #tpu.memory_space<vmem>>, vector<128x256xf32>
    %cst_6 = arith.constant dense<0.000000e+00> : vector<2x256xf32>
    %9 = tpu.matmul %7, %8, %cst_6 {dimension_numbers = #tpu.dot_dimension_numbers<[1], [0], [0], [1], [0, 0, 1, 1], [], []>} : vector<2x128xf32>, vector<128x256xf32>, vector<2x256xf32> -> vector<2x256xf32>
    %c3992 = arith.constant 3992 : index
    %c0_7 = arith.constant 0 : index
    %10 = vector.load %arg1[%c3992, %c0_7] : memref<4144x512xf32, #tpu.memory_space<vmem>>, vector<1x256xf32>
    %11 = vector.broadcast %10 : vector<1x256xf32> to vector<2x256xf32>
    %12 = arith.addf %9, %11 : vector<2x256xf32>
    %c144 = arith.constant 144 : index
    %c0_8 = arith.constant 0 : index
    %13 = vector.load %arg1[%c144, %c0_8] : memref<4144x512xf32, #tpu.memory_space<vmem>>, vector<256x256xf32>
    %cst_9 = arith.constant dense<0.000000e+00> : vector<2x256xf32>
    %14 = tpu.matmul %12, %13, %cst_9 {dimension_numbers = #tpu.dot_dimension_numbers<[1], [0], [0], [1], [0, 0, 1, 1], [], []>} : vector<2x256xf32>, vector<256x256xf32>, vector<2x256xf32> -> vector<2x256xf32>
    %c4000 = arith.constant 4000 : index
    %c0_10 = arith.constant 0 : index
    %15 = vector.load %arg1[%c4000, %c0_10] : memref<4144x512xf32, #tpu.memory_space<vmem>>, vector<1x256xf32>
    %16 = vector.broadcast %15 : vector<1x256xf32> to vector<2x256xf32>
    %17 = arith.addf %14, %16 : vector<2x256xf32>
    %c3216 = arith.constant 3216 : index
    %c0_11 = arith.constant 0 : index
    %18 = vector.load %arg1[%c3216, %c0_11] : memref<4144x512xf32, #tpu.memory_space<vmem>>, vector<256x32xf32>
    %cst_12 = arith.constant dense<0.000000e+00> : vector<2x32xf32>
    %19 = tpu.matmul %12, %18, %cst_12 {dimension_numbers = #tpu.dot_dimension_numbers<[1], [0], [0], [1], [0, 0, 1, 1], [], []>} : vector<2x256xf32>, vector<256x32xf32>, vector<2x32xf32> -> vector<2x32xf32>
    %cst_13 = arith.constant dense<0.000000e+00> : vector<32xf32>
    %20 = vector.multi_reduction <add>, %19, %cst_13 [0] : vector<2x32xf32> to vector<32xf32>
    %21 = vector.shape_cast %20 : vector<32xf32> to vector<1x32xf32>
    %cst_14 = arith.constant 6.250000e-02 : f32
    %22 = vector.broadcast %cst_14 : f32 to vector<1x32xf32>
    %23 = arith.mulf %21, %22 : vector<1x32xf32>
    %24 = tpu.concatenate %23, %23, %23, %23, %23, %23, %23, %23 in 1 : vector<1x32xf32>, vector<1x32xf32>, vector<1x32xf32>, vector<1x32xf32>, vector<1x32xf32>, vector<1x32xf32>, vector<1x32xf32>, vector<1x32xf32> -> vector<1x256xf32>
    %25 = vector.broadcast %24 : vector<1x256xf32> to vector<2x256xf32>
    %26 = arith.subf %12, %25 : vector<2x256xf32>
    %27 = arith.mulf %26, %26 : vector<2x256xf32>
    %cst_15 = arith.constant dense<0.000000e+00> : vector<2x32xf32>
    %28 = tpu.matmul %27, %18, %cst_15 {dimension_numbers = #tpu.dot_dimension_numbers<[1], [0], [0], [1], [0, 0, 1, 1], [], []>} : vector<2x256xf32>, vector<256x32xf32>, vector<2x32xf32> -> vector<2x32xf32>
    %cst_16 = arith.constant dense<0.000000e+00> : vector<32xf32>
    %29 = vector.multi_reduction <add>, %28, %cst_16 [0] : vector<2x32xf32> to vector<32xf32>
    %30 = vector.shape_cast %29 : vector<32xf32> to vector<1x32xf32>
    %cst_17 = arith.constant 6.250000e-02 : f32
    %31 = vector.broadcast %cst_17 : f32 to vector<1x32xf32>
    %32 = arith.mulf %30, %31 : vector<1x32xf32>
    %c4008 = arith.constant 4008 : index
    %c0_18 = arith.constant 0 : index
    %33 = vector.load %arg1[%c4008, %c0_18] : memref<4144x512xf32, #tpu.memory_space<vmem>>, vector<1x32xf32>
    %cst_19 = arith.constant 9.99999974E-6 : f32
    %34 = vector.broadcast %cst_19 : f32 to vector<1x32xf32>
    %35 = arith.addf %32, %34 : vector<1x32xf32>
    %36 = math.rsqrt %35 : vector<1x32xf32>
    %37 = arith.mulf %33, %36 : vector<1x32xf32>
    %c4016 = arith.constant 4016 : index
    %c0_20 = arith.constant 0 : index
    %38 = vector.load %arg1[%c4016, %c0_20] : memref<4144x512xf32, #tpu.memory_space<vmem>>, vector<1x32xf32>
    %39 = arith.mulf %23, %37 : vector<1x32xf32>
    %40 = arith.subf %38, %39 : vector<1x32xf32>
    %41 = tpu.concatenate %37, %37, %37, %37, %37, %37, %37, %37 in 1 : vector<1x32xf32>, vector<1x32xf32>, vector<1x32xf32>, vector<1x32xf32>, vector<1x32xf32>, vector<1x32xf32>, vector<1x32xf32>, vector<1x32xf32> -> vector<1x256xf32>
    %42 = tpu.concatenate %40, %40, %40, %40, %40, %40, %40, %40 in 1 : vector<1x32xf32>, vector<1x32xf32>, vector<1x32xf32>, vector<1x32xf32>, vector<1x32xf32>, vector<1x32xf32>, vector<1x32xf32>, vector<1x32xf32> -> vector<1x256xf32>
    %43 = vector.broadcast %41 : vector<1x256xf32> to vector<2x256xf32>
    %44 = arith.mulf %12, %43 : vector<2x256xf32>
    %45 = vector.broadcast %42 : vector<1x256xf32> to vector<2x256xf32>
    %46 = arith.addf %44, %45 : vector<2x256xf32>
    %cst_21 = arith.constant 0.000000e+00 : f32
    %47 = vector.broadcast %cst_21 : f32 to vector<2x256xf32>
    %48 = arith.maximumf %46, %47 : vector<2x256xf32>
    %c400 = arith.constant 400 : index
    %c0_22 = arith.constant 0 : index
    %49 = vector.load %arg1[%c400, %c0_22] : memref<4144x512xf32, #tpu.memory_space<vmem>>, vector<256x256xf32>
    %cst_23 = arith.constant dense<0.000000e+00> : vector<2x256xf32>
    %50 = tpu.matmul %48, %49, %cst_23 {dimension_numbers = #tpu.dot_dimension_numbers<[1], [0], [0], [1], [0, 0, 1, 1], [], []>} : vector<2x256xf32>, vector<256x256xf32>, vector<2x256xf32> -> vector<2x256xf32>
    %c4024 = arith.constant 4024 : index
    %c0_24 = arith.constant 0 : index
    %51 = vector.load %arg1[%c4024, %c0_24] : memref<4144x512xf32, #tpu.memory_space<vmem>>, vector<1x256xf32>
    %52 = vector.broadcast %51 : vector<1x256xf32> to vector<2x256xf32>
    %53 = arith.addf %50, %52 : vector<2x256xf32>
    %c3216_25 = arith.constant 3216 : index
    %c0_26 = arith.constant 0 : index
    %54 = vector.load %arg1[%c3216_25, %c0_26] : memref<4144x512xf32, #tpu.memory_space<vmem>>, vector<256x32xf32>
    %cst_27 = arith.constant dense<0.000000e+00> : vector<2x32xf32>
    %55 = tpu.matmul %53, %54, %cst_27 {dimension_numbers = #tpu.dot_dimension_numbers<[1], [0], [0], [1], [0, 0, 1, 1], [], []>} : vector<2x256xf32>, vector<256x32xf32>, vector<2x32xf32> -> vector<2x32xf32>
    %cst_28 = arith.constant dense<0.000000e+00> : vector<32xf32>
    %56 = vector.multi_reduction <add>, %55, %cst_28 [0] : vector<2x32xf32> to vector<32xf32>
    %57 = vector.shape_cast %56 : vector<32xf32> to vector<1x32xf32>
    %cst_29 = arith.constant 6.250000e-02 : f32
    %58 = vector.broadcast %cst_29 : f32 to vector<1x32xf32>
    %59 = arith.mulf %57, %58 : vector<1x32xf32>
    %60 = tpu.concatenate %59, %59, %59, %59, %59, %59, %59, %59 in 1 : vector<1x32xf32>, vector<1x32xf32>, vector<1x32xf32>, vector<1x32xf32>, vector<1x32xf32>, vector<1x32xf32>, vector<1x32xf32>, vector<1x32xf32> -> vector<1x256xf32>
    %61 = vector.broadcast %60 : vector<1x256xf32> to vector<2x256xf32>
    %62 = arith.subf %53, %61 : vector<2x256xf32>
    %63 = arith.mulf %62, %62 : vector<2x256xf32>
    %cst_30 = arith.constant dense<0.000000e+00> : vector<2x32xf32>
    %64 = tpu.matmul %63, %54, %cst_30 {dimension_numbers = #tpu.dot_dimension_numbers<[1], [0], [0], [1], [0, 0, 1, 1], [], []>} : vector<2x256xf32>, vector<256x32xf32>, vector<2x32xf32> -> vector<2x32xf32>
    %cst_31 = arith.constant dense<0.000000e+00> : vector<32xf32>
    %65 = vector.multi_reduction <add>, %64, %cst_31 [0] : vector<2x32xf32> to vector<32xf32>
    %66 = vector.shape_cast %65 : vector<32xf32> to vector<1x32xf32>
    %cst_32 = arith.constant 6.250000e-02 : f32
    %67 = vector.broadcast %cst_32 : f32 to vector<1x32xf32>
    %68 = arith.mulf %66, %67 : vector<1x32xf32>
    %c4032 = arith.constant 4032 : index
    %c0_33 = arith.constant 0 : index
    %69 = vector.load %arg1[%c4032, %c0_33] : memref<4144x512xf32, #tpu.memory_space<vmem>>, vector<1x32xf32>
    %cst_34 = arith.constant 9.99999974E-6 : f32
    %70 = vector.broadcast %cst_34 : f32 to vector<1x32xf32>
    %71 = arith.addf %68, %70 : vector<1x32xf32>
    %72 = math.rsqrt %71 : vector<1x32xf32>
    %73 = arith.mulf %69, %72 : vector<1x32xf32>
    %c4040 = arith.constant 4040 : index
    %c0_35 = arith.constant 0 : index
    %74 = vector.load %arg1[%c4040, %c0_35] : memref<4144x512xf32, #tpu.memory_space<vmem>>, vector<1x32xf32>
    %75 = arith.mulf %59, %73 : vector<1x32xf32>
    %76 = arith.subf %74, %75 : vector<1x32xf32>
    %77 = tpu.concatenate %73, %73, %73, %73, %73, %73, %73, %73 in 1 : vector<1x32xf32>, vector<1x32xf32>, vector<1x32xf32>, vector<1x32xf32>, vector<1x32xf32>, vector<1x32xf32>, vector<1x32xf32>, vector<1x32xf32> -> vector<1x256xf32>
    %78 = tpu.concatenate %76, %76, %76, %76, %76, %76, %76, %76 in 1 : vector<1x32xf32>, vector<1x32xf32>, vector<1x32xf32>, vector<1x32xf32>, vector<1x32xf32>, vector<1x32xf32>, vector<1x32xf32>, vector<1x32xf32> -> vector<1x256xf32>
    %79 = vector.broadcast %77 : vector<1x256xf32> to vector<2x256xf32>
    %80 = arith.mulf %53, %79 : vector<2x256xf32>
    %81 = vector.broadcast %78 : vector<1x256xf32> to vector<2x256xf32>
    %82 = arith.addf %80, %81 : vector<2x256xf32>
    %cst_36 = arith.constant 0.000000e+00 : f32
    %83 = vector.broadcast %cst_36 : f32 to vector<2x256xf32>
    %84 = arith.maximumf %82, %83 : vector<2x256xf32>
    %c656 = arith.constant 656 : index
    %c0_37 = arith.constant 0 : index
    %85 = vector.load %arg1[%c656, %c0_37] : memref<4144x512xf32, #tpu.memory_space<vmem>>, vector<256x256xf32>
    %cst_38 = arith.constant dense<0.000000e+00> : vector<2x256xf32>
    %86 = tpu.matmul %84, %85, %cst_38 {dimension_numbers = #tpu.dot_dimension_numbers<[1], [0], [0], [1], [0, 0, 1, 1], [], []>} : vector<2x256xf32>, vector<256x256xf32>, vector<2x256xf32> -> vector<2x256xf32>
    %c4048 = arith.constant 4048 : index
    %c0_39 = arith.constant 0 : index
    %87 = vector.load %arg1[%c4048, %c0_39] : memref<4144x512xf32, #tpu.memory_space<vmem>>, vector<1x256xf32>
    %88 = vector.broadcast %87 : vector<1x256xf32> to vector<2x256xf32>
    %89 = arith.addf %86, %88 : vector<2x256xf32>
    %90 = arith.addf %17, %89 : vector<2x256xf32>
    %cst_40 = arith.constant 0.000000e+00 : f32
    %91 = vector.broadcast %cst_40 : f32 to vector<2x256xf32>
    %92 = arith.maximumf %90, %91 : vector<2x256xf32>
    %c912 = arith.constant 912 : index
    %c0_41 = arith.constant 0 : index
    %93 = vector.load %arg1[%c912, %c0_41] : memref<4144x512xf32, #tpu.memory_space<vmem>>, vector<256x512xf32>
    %cst_42 = arith.constant dense<0.000000e+00> : vector<2x512xf32>
    %94 = tpu.matmul %92, %93, %cst_42 {dimension_numbers = #tpu.dot_dimension_numbers<[1], [0], [0], [1], [0, 0, 1, 1], [], []>} : vector<2x256xf32>, vector<256x512xf32>, vector<2x512xf32> -> vector<2x512xf32>
    %c4056 = arith.constant 4056 : index
    %c0_43 = arith.constant 0 : index
    %95 = vector.load %arg1[%c4056, %c0_43] : memref<4144x512xf32, #tpu.memory_space<vmem>>, vector<1x512xf32>
    %96 = vector.broadcast %95 : vector<1x512xf32> to vector<2x512xf32>
    %97 = arith.addf %94, %96 : vector<2x512xf32>
    %c1168 = arith.constant 1168 : index
    %c0_44 = arith.constant 0 : index
    %98 = vector.load %arg1[%c1168, %c0_44] : memref<4144x512xf32, #tpu.memory_space<vmem>>, vector<512x512xf32>
    %cst_45 = arith.constant dense<0.000000e+00> : vector<2x512xf32>
    %99 = tpu.matmul %97, %98, %cst_45 {dimension_numbers = #tpu.dot_dimension_numbers<[1], [0], [0], [1], [0, 0, 1, 1], [], []>} : vector<2x512xf32>, vector<512x512xf32>, vector<2x512xf32> -> vector<2x512xf32>
    %c4064 = arith.constant 4064 : index
    %c0_46 = arith.constant 0 : index
    %100 = vector.load %arg1[%c4064, %c0_46] : memref<4144x512xf32, #tpu.memory_space<vmem>>, vector<1x512xf32>
    %101 = vector.broadcast %100 : vector<1x512xf32> to vector<2x512xf32>
    %102 = arith.addf %99, %101 : vector<2x512xf32>
    %c3472 = arith.constant 3472 : index
    %c0_47 = arith.constant 0 : index
    %103 = vector.load %arg1[%c3472, %c0_47] : memref<4144x512xf32, #tpu.memory_space<vmem>>, vector<512x32xf32>
    %cst_48 = arith.constant dense<0.000000e+00> : vector<2x32xf32>
    %104 = tpu.matmul %97, %103, %cst_48 {dimension_numbers = #tpu.dot_dimension_numbers<[1], [0], [0], [1], [0, 0, 1, 1], [], []>} : vector<2x512xf32>, vector<512x32xf32>, vector<2x32xf32> -> vector<2x32xf32>
    %cst_49 = arith.constant dense<0.000000e+00> : vector<32xf32>
    %105 = vector.multi_reduction <add>, %104, %cst_49 [0] : vector<2x32xf32> to vector<32xf32>
    %106 = vector.shape_cast %105 : vector<32xf32> to vector<1x32xf32>
    %cst_50 = arith.constant 3.125000e-02 : f32
    %107 = vector.broadcast %cst_50 : f32 to vector<1x32xf32>
    %108 = arith.mulf %106, %107 : vector<1x32xf32>
    %109 = tpu.concatenate %108, %108, %108, %108, %108, %108, %108, %108, %108, %108, %108, %108, %108, %108, %108, %108 in 1 : vector<1x32xf32>, vector<1x32xf32>, vector<1x32xf32>, vector<1x32xf32>, vector<1x32xf32>, vector<1x32xf32>, vector<1x32xf32>, vector<1x32xf32>, vector<1x32xf32>, vector<1x32xf32>, vector<1x32xf32>, vector<1x32xf32>, vector<1x32xf32>, vector<1x32xf32>, vector<1x32xf32>, vector<1x32xf32> -> vector<1x512xf32>
    %110 = vector.broadcast %109 : vector<1x512xf32> to vector<2x512xf32>
    %111 = arith.subf %97, %110 : vector<2x512xf32>
    %112 = arith.mulf %111, %111 : vector<2x512xf32>
    %cst_51 = arith.constant dense<0.000000e+00> : vector<2x32xf32>
    %113 = tpu.matmul %112, %103, %cst_51 {dimension_numbers = #tpu.dot_dimension_numbers<[1], [0], [0], [1], [0, 0, 1, 1], [], []>} : vector<2x512xf32>, vector<512x32xf32>, vector<2x32xf32> -> vector<2x32xf32>
    %cst_52 = arith.constant dense<0.000000e+00> : vector<32xf32>
    %114 = vector.multi_reduction <add>, %113, %cst_52 [0] : vector<2x32xf32> to vector<32xf32>
    %115 = vector.shape_cast %114 : vector<32xf32> to vector<1x32xf32>
    %cst_53 = arith.constant 3.125000e-02 : f32
    %116 = vector.broadcast %cst_53 : f32 to vector<1x32xf32>
    %117 = arith.mulf %115, %116 : vector<1x32xf32>
    %c4072 = arith.constant 4072 : index
    %c0_54 = arith.constant 0 : index
    %118 = vector.load %arg1[%c4072, %c0_54] : memref<4144x512xf32, #tpu.memory_space<vmem>>, vector<1x32xf32>
    %cst_55 = arith.constant 9.99999974E-6 : f32
    %119 = vector.broadcast %cst_55 : f32 to vector<1x32xf32>
    %120 = arith.addf %117, %119 : vector<1x32xf32>
    %121 = math.rsqrt %120 : vector<1x32xf32>
    %122 = arith.mulf %118, %121 : vector<1x32xf32>
    %c4080 = arith.constant 4080 : index
    %c0_56 = arith.constant 0 : index
    %123 = vector.load %arg1[%c4080, %c0_56] : memref<4144x512xf32, #tpu.memory_space<vmem>>, vector<1x32xf32>
    %124 = arith.mulf %108, %122 : vector<1x32xf32>
    %125 = arith.subf %123, %124 : vector<1x32xf32>
    %126 = tpu.concatenate %122, %122, %122, %122, %122, %122, %122, %122, %122, %122, %122, %122, %122, %122, %122, %122 in 1 : vector<1x32xf32>, vector<1x32xf32>, vector<1x32xf32>, vector<1x32xf32>, vector<1x32xf32>, vector<1x32xf32>, vector<1x32xf32>, vector<1x32xf32>, vector<1x32xf32>, vector<1x32xf32>, vector<1x32xf32>, vector<1x32xf32>, vector<1x32xf32>, vector<1x32xf32>, vector<1x32xf32>, vector<1x32xf32> -> vector<1x512xf32>
    %127 = tpu.concatenate %125, %125, %125, %125, %125, %125, %125, %125, %125, %125, %125, %125, %125, %125, %125, %125 in 1 : vector<1x32xf32>, vector<1x32xf32>, vector<1x32xf32>, vector<1x32xf32>, vector<1x32xf32>, vector<1x32xf32>, vector<1x32xf32>, vector<1x32xf32>, vector<1x32xf32>, vector<1x32xf32>, vector<1x32xf32>, vector<1x32xf32>, vector<1x32xf32>, vector<1x32xf32>, vector<1x32xf32>, vector<1x32xf32> -> vector<1x512xf32>
    %128 = vector.broadcast %126 : vector<1x512xf32> to vector<2x512xf32>
    %129 = arith.mulf %97, %128 : vector<2x512xf32>
    %130 = vector.broadcast %127 : vector<1x512xf32> to vector<2x512xf32>
    %131 = arith.addf %129, %130 : vector<2x512xf32>
    %cst_57 = arith.constant 0.000000e+00 : f32
    %132 = vector.broadcast %cst_57 : f32 to vector<2x512xf32>
    %133 = arith.maximumf %131, %132 : vector<2x512xf32>
    %c1680 = arith.constant 1680 : index
    %c0_58 = arith.constant 0 : index
    %134 = vector.load %arg1[%c1680, %c0_58] : memref<4144x512xf32, #tpu.memory_space<vmem>>, vector<512x512xf32>
    %cst_59 = arith.constant dense<0.000000e+00> : vector<2x512xf32>
    %135 = tpu.matmul %133, %134, %cst_59 {dimension_numbers = #tpu.dot_dimension_numbers<[1], [0], [0], [1], [0, 0, 1, 1], [], []>} : vector<2x512xf32>, vector<512x512xf32>, vector<2x512xf32> -> vector<2x512xf32>
    %c4088 = arith.constant 4088 : index
    %c0_60 = arith.constant 0 : index
    %136 = vector.load %arg1[%c4088, %c0_60] : memref<4144x512xf32, #tpu.memory_space<vmem>>, vector<1x512xf32>
    %137 = vector.broadcast %136 : vector<1x512xf32> to vector<2x512xf32>
    %138 = arith.addf %135, %137 : vector<2x512xf32>
    %c3472_61 = arith.constant 3472 : index
    %c0_62 = arith.constant 0 : index
    %139 = vector.load %arg1[%c3472_61, %c0_62] : memref<4144x512xf32, #tpu.memory_space<vmem>>, vector<512x32xf32>
    %cst_63 = arith.constant dense<0.000000e+00> : vector<2x32xf32>
    %140 = tpu.matmul %138, %139, %cst_63 {dimension_numbers = #tpu.dot_dimension_numbers<[1], [0], [0], [1], [0, 0, 1, 1], [], []>} : vector<2x512xf32>, vector<512x32xf32>, vector<2x32xf32> -> vector<2x32xf32>
    %cst_64 = arith.constant dense<0.000000e+00> : vector<32xf32>
    %141 = vector.multi_reduction <add>, %140, %cst_64 [0] : vector<2x32xf32> to vector<32xf32>
    %142 = vector.shape_cast %141 : vector<32xf32> to vector<1x32xf32>
    %cst_65 = arith.constant 3.125000e-02 : f32
    %143 = vector.broadcast %cst_65 : f32 to vector<1x32xf32>
    %144 = arith.mulf %142, %143 : vector<1x32xf32>
    %145 = tpu.concatenate %144, %144, %144, %144, %144, %144, %144, %144, %144, %144, %144, %144, %144, %144, %144, %144 in 1 : vector<1x32xf32>, vector<1x32xf32>, vector<1x32xf32>, vector<1x32xf32>, vector<1x32xf32>, vector<1x32xf32>, vector<1x32xf32>, vector<1x32xf32>, vector<1x32xf32>, vector<1x32xf32>, vector<1x32xf32>, vector<1x32xf32>, vector<1x32xf32>, vector<1x32xf32>, vector<1x32xf32>, vector<1x32xf32> -> vector<1x512xf32>
    %146 = vector.broadcast %145 : vector<1x512xf32> to vector<2x512xf32>
    %147 = arith.subf %138, %146 : vector<2x512xf32>
    %148 = arith.mulf %147, %147 : vector<2x512xf32>
    %cst_66 = arith.constant dense<0.000000e+00> : vector<2x32xf32>
    %149 = tpu.matmul %148, %139, %cst_66 {dimension_numbers = #tpu.dot_dimension_numbers<[1], [0], [0], [1], [0, 0, 1, 1], [], []>} : vector<2x512xf32>, vector<512x32xf32>, vector<2x32xf32> -> vector<2x32xf32>
    %cst_67 = arith.constant dense<0.000000e+00> : vector<32xf32>
    %150 = vector.multi_reduction <add>, %149, %cst_67 [0] : vector<2x32xf32> to vector<32xf32>
    %151 = vector.shape_cast %150 : vector<32xf32> to vector<1x32xf32>
    %cst_68 = arith.constant 3.125000e-02 : f32
    %152 = vector.broadcast %cst_68 : f32 to vector<1x32xf32>
    %153 = arith.mulf %151, %152 : vector<1x32xf32>
    %c4096 = arith.constant 4096 : index
    %c0_69 = arith.constant 0 : index
    %154 = vector.load %arg1[%c4096, %c0_69] : memref<4144x512xf32, #tpu.memory_space<vmem>>, vector<1x32xf32>
    %cst_70 = arith.constant 9.99999974E-6 : f32
    %155 = vector.broadcast %cst_70 : f32 to vector<1x32xf32>
    %156 = arith.addf %153, %155 : vector<1x32xf32>
    %157 = math.rsqrt %156 : vector<1x32xf32>
    %158 = arith.mulf %154, %157 : vector<1x32xf32>
    %c4104 = arith.constant 4104 : index
    %c0_71 = arith.constant 0 : index
    %159 = vector.load %arg1[%c4104, %c0_71] : memref<4144x512xf32, #tpu.memory_space<vmem>>, vector<1x32xf32>
    %160 = arith.mulf %144, %158 : vector<1x32xf32>
    %161 = arith.subf %159, %160 : vector<1x32xf32>
    %162 = tpu.concatenate %158, %158, %158, %158, %158, %158, %158, %158, %158, %158, %158, %158, %158, %158, %158, %158 in 1 : vector<1x32xf32>, vector<1x32xf32>, vector<1x32xf32>, vector<1x32xf32>, vector<1x32xf32>, vector<1x32xf32>, vector<1x32xf32>, vector<1x32xf32>, vector<1x32xf32>, vector<1x32xf32>, vector<1x32xf32>, vector<1x32xf32>, vector<1x32xf32>, vector<1x32xf32>, vector<1x32xf32>, vector<1x32xf32> -> vector<1x512xf32>
    %163 = tpu.concatenate %161, %161, %161, %161, %161, %161, %161, %161, %161, %161, %161, %161, %161, %161, %161, %161 in 1 : vector<1x32xf32>, vector<1x32xf32>, vector<1x32xf32>, vector<1x32xf32>, vector<1x32xf32>, vector<1x32xf32>, vector<1x32xf32>, vector<1x32xf32>, vector<1x32xf32>, vector<1x32xf32>, vector<1x32xf32>, vector<1x32xf32>, vector<1x32xf32>, vector<1x32xf32>, vector<1x32xf32>, vector<1x32xf32> -> vector<1x512xf32>
    %164 = vector.broadcast %162 : vector<1x512xf32> to vector<2x512xf32>
    %165 = arith.mulf %138, %164 : vector<2x512xf32>
    %166 = vector.broadcast %163 : vector<1x512xf32> to vector<2x512xf32>
    %167 = arith.addf %165, %166 : vector<2x512xf32>
    %cst_72 = arith.constant 0.000000e+00 : f32
    %168 = vector.broadcast %cst_72 : f32 to vector<2x512xf32>
    %169 = arith.maximumf %167, %168 : vector<2x512xf32>
    %c2192 = arith.constant 2192 : index
    %c0_73 = arith.constant 0 : index
    %170 = vector.load %arg1[%c2192, %c0_73] : memref<4144x512xf32, #tpu.memory_space<vmem>>, vector<512x512xf32>
    %cst_74 = arith.constant dense<0.000000e+00> : vector<2x512xf32>
    %171 = tpu.matmul %169, %170, %cst_74 {dimension_numbers = #tpu.dot_dimension_numbers<[1], [0], [0], [1], [0, 0, 1, 1], [], []>} : vector<2x512xf32>, vector<512x512xf32>, vector<2x512xf32> -> vector<2x512xf32>
    %c4112 = arith.constant 4112 : index
    %c0_75 = arith.constant 0 : index
    %172 = vector.load %arg1[%c4112, %c0_75] : memref<4144x512xf32, #tpu.memory_space<vmem>>, vector<1x512xf32>
    %173 = vector.broadcast %172 : vector<1x512xf32> to vector<2x512xf32>
    %174 = arith.addf %171, %173 : vector<2x512xf32>
    %175 = arith.addf %102, %174 : vector<2x512xf32>
    %cst_76 = arith.constant 0.000000e+00 : f32
    %176 = vector.broadcast %cst_76 : f32 to vector<2x512xf32>
    %177 = arith.maximumf %175, %176 : vector<2x512xf32>
    %c3472_77 = arith.constant 3472 : index
    %c0_78 = arith.constant 0 : index
    %178 = vector.load %arg1[%c3472_77, %c0_78] : memref<4144x512xf32, #tpu.memory_space<vmem>>, vector<512x32xf32>
    %cst_79 = arith.constant dense<0.000000e+00> : vector<2x32xf32>
    %179 = tpu.matmul %177, %178, %cst_79 {dimension_numbers = #tpu.dot_dimension_numbers<[1], [0], [0], [1], [0, 0, 1, 1], [], []>} : vector<2x512xf32>, vector<512x32xf32>, vector<2x32xf32> -> vector<2x32xf32>
    %cst_80 = arith.constant dense<0.000000e+00> : vector<32xf32>
    %180 = vector.multi_reduction <add>, %179, %cst_80 [0] : vector<2x32xf32> to vector<32xf32>
    %181 = vector.shape_cast %180 : vector<32xf32> to vector<1x32xf32>
    %cst_81 = arith.constant 3.125000e-02 : f32
    %182 = vector.broadcast %cst_81 : f32 to vector<1x32xf32>
    %183 = arith.mulf %181, %182 : vector<1x32xf32>
    %184 = tpu.concatenate %183, %183, %183, %183, %183, %183, %183, %183, %183, %183, %183, %183, %183, %183, %183, %183 in 1 : vector<1x32xf32>, vector<1x32xf32>, vector<1x32xf32>, vector<1x32xf32>, vector<1x32xf32>, vector<1x32xf32>, vector<1x32xf32>, vector<1x32xf32>, vector<1x32xf32>, vector<1x32xf32>, vector<1x32xf32>, vector<1x32xf32>, vector<1x32xf32>, vector<1x32xf32>, vector<1x32xf32>, vector<1x32xf32> -> vector<1x512xf32>
    %185 = vector.broadcast %184 : vector<1x512xf32> to vector<2x512xf32>
    %186 = arith.subf %177, %185 : vector<2x512xf32>
    %187 = arith.mulf %186, %186 : vector<2x512xf32>
    %cst_82 = arith.constant dense<0.000000e+00> : vector<2x32xf32>
    %188 = tpu.matmul %187, %178, %cst_82 {dimension_numbers = #tpu.dot_dimension_numbers<[1], [0], [0], [1], [0, 0, 1, 1], [], []>} : vector<2x512xf32>, vector<512x32xf32>, vector<2x32xf32> -> vector<2x32xf32>
    %cst_83 = arith.constant dense<0.000000e+00> : vector<32xf32>
    %189 = vector.multi_reduction <add>, %188, %cst_83 [0] : vector<2x32xf32> to vector<32xf32>
    %190 = vector.shape_cast %189 : vector<32xf32> to vector<1x32xf32>
    %cst_84 = arith.constant 3.125000e-02 : f32
    %191 = vector.broadcast %cst_84 : f32 to vector<1x32xf32>
    %192 = arith.mulf %190, %191 : vector<1x32xf32>
    %c4120 = arith.constant 4120 : index
    %c0_85 = arith.constant 0 : index
    %193 = vector.load %arg1[%c4120, %c0_85] : memref<4144x512xf32, #tpu.memory_space<vmem>>, vector<1x32xf32>
    %cst_86 = arith.constant 9.99999974E-6 : f32
    %194 = vector.broadcast %cst_86 : f32 to vector<1x32xf32>
    %195 = arith.addf %192, %194 : vector<1x32xf32>
    %196 = math.rsqrt %195 : vector<1x32xf32>
    %197 = arith.mulf %193, %196 : vector<1x32xf32>
    %c4128 = arith.constant 4128 : index
    %c0_87 = arith.constant 0 : index
    %198 = vector.load %arg1[%c4128, %c0_87] : memref<4144x512xf32, #tpu.memory_space<vmem>>, vector<1x32xf32>
    %199 = arith.mulf %183, %197 : vector<1x32xf32>
    %200 = arith.subf %198, %199 : vector<1x32xf32>
    %201 = tpu.concatenate %197, %197, %197, %197, %197, %197, %197, %197, %197, %197, %197, %197, %197, %197, %197, %197 in 1 : vector<1x32xf32>, vector<1x32xf32>, vector<1x32xf32>, vector<1x32xf32>, vector<1x32xf32>, vector<1x32xf32>, vector<1x32xf32>, vector<1x32xf32>, vector<1x32xf32>, vector<1x32xf32>, vector<1x32xf32>, vector<1x32xf32>, vector<1x32xf32>, vector<1x32xf32>, vector<1x32xf32>, vector<1x32xf32> -> vector<1x512xf32>
    %202 = tpu.concatenate %200, %200, %200, %200, %200, %200, %200, %200, %200, %200, %200, %200, %200, %200, %200, %200 in 1 : vector<1x32xf32>, vector<1x32xf32>, vector<1x32xf32>, vector<1x32xf32>, vector<1x32xf32>, vector<1x32xf32>, vector<1x32xf32>, vector<1x32xf32>, vector<1x32xf32>, vector<1x32xf32>, vector<1x32xf32>, vector<1x32xf32>, vector<1x32xf32>, vector<1x32xf32>, vector<1x32xf32>, vector<1x32xf32> -> vector<1x512xf32>
    %203 = vector.broadcast %201 : vector<1x512xf32> to vector<2x512xf32>
    %204 = arith.mulf %177, %203 : vector<2x512xf32>
    %205 = vector.broadcast %202 : vector<1x512xf32> to vector<2x512xf32>
    %206 = arith.addf %204, %205 : vector<2x512xf32>
    %cst_88 = arith.constant 0.000000e+00 : f32
    %207 = vector.broadcast %cst_88 : f32 to vector<2x512xf32>
    %208 = arith.maximumf %206, %207 : vector<2x512xf32>
    %c2704 = arith.constant 2704 : index
    %c0_89 = arith.constant 0 : index
    %209 = vector.load %arg1[%c2704, %c0_89] : memref<4144x512xf32, #tpu.memory_space<vmem>>, vector<512x128xf32>
    %cst_90 = arith.constant dense<0.000000e+00> : vector<2x128xf32>
    %210 = tpu.matmul %208, %209, %cst_90 {dimension_numbers = #tpu.dot_dimension_numbers<[1], [0], [0], [1], [0, 0, 1, 1], [], []>} : vector<2x512xf32>, vector<512x128xf32>, vector<2x128xf32> -> vector<2x128xf32>
    %c4136 = arith.constant 4136 : index
    %c0_91 = arith.constant 0 : index
    %211 = vector.load %arg1[%c4136, %c0_91] : memref<4144x512xf32, #tpu.memory_space<vmem>>, vector<1x128xf32>
    %212 = vector.broadcast %211 : vector<1x128xf32> to vector<2x128xf32>
    %213 = arith.addf %210, %212 : vector<2x128xf32>
    %214 = math.tanh %213 : vector<2x128xf32>
    %c0_92 = arith.constant 0 : index
    %c0_93 = arith.constant 0 : index
    %215 = vector.load %arg2[%c0_92, %c0_93] : memref<2x128xf32, #tpu.memory_space<vmem>>, vector<2x128xf32>
    tpu.vector_store %arg2[%c0_92, %c0_93], %214 {strides = array<i32>} : memref<2x128xf32, #tpu.memory_space<vmem>>, vector<2x128xf32>,
    return
  }
}

</mosaic_0001>

<bundles_post_ra>
// kernel: generator_forward.1
= control target key start
LH: loop header
LB: loop body
LE: loop exit
PB: predicated region body
PF: predicated region fallthrough
CT: control target
= control target key end

     0   :  { %7 = vsyncpa [#allocation3], 0  ;;  %s5570_s0 = inlined_call_operand.hbm [shape: f32[2,16], index: 0, kind: input, shape index: {}]   ;;  %s5571_s1 = inlined_call_operand.hbm [shape: f32[4144,512], index: 1, kind: input, shape index: {}]   ;;  %s5572_s2 = inlined_call_operand.vmem [shape: f32[2,128], index: 2, kind: output, shape index: {}]  }
   0x1   :  { %s14_s11 = sshll.u32 %s5570_s0, 4  ;;  %s15_s11 = int_to_ptr.hbm [resolvable:$true] %s14_s11 }
   0x2   :  { %8 = vsyncpa [#allocation5], 0  ;;  %s4216_s12 = smov [#allocation2]   ;;  %s24_s16 = sshll.u32 %s5571_s1, 4  ;;  %s25_s16 = int_to_ptr.hbm [resolvable:$true] %s24_s16 }
   0x3   :  { %s16_s13 = sshll.u32 %s4216_s12, 4  ;;  %s4217_s17 = smov [#allocation4]   ;;  %s17_s13 = int_to_ptr.vmem [resolvable:$true] %s16_s13 }
   0x4   :  { %19 = dma.hbm_to_vmem [thread:$0]  %s15_s11, 32, %s17_s13, [#allocation3]  }
   0x5   :  { %s26_s18 = sshll.u32 %s4217_s17, 4  ;;  %s4218_s19 = smov 512   ;;  %s27_s18 = int_to_ptr.vmem [resolvable:$true] %s26_s18 }
   0x6   :  { %s4219_s20 = smov 32  }
   0x7   :  { %32 = dma.hbm_to_vmem [thread:$0]  %s25_s16, 265216, %s27_s18, [#allocation5], %s4218_s19, %s4218_s19, %s4219_s20  }
   0x8   :  { %4212 = dma.done.wait [#allocation3], 32  }
   0x9   :  { %4213 = vsyncadd [#allocation3], 4294967264 }
   0xa   :  { %4214 = dma.done.wait [#allocation5], 265216  }
   0xb   :  { %4215 = vsyncadd [#allocation5], 4294702080  ;;  %v43_v0 = vld [vmem:[#allocation4 + $0x20] sm:$0xff]  ;;  %v41_v2 = vld [vmem:[#allocation2] sm:$0x3]  ;;  %vm45_vm0 = vcmask 130048  }
   0xc   :  { %v42_v1 = vld [vmem:[#allocation4] sm:$0xff]  ;;  %63 = vmatpush.msra.mxu0 %v43_v0  ;;  %v101_v4 = vld [vmem:[#allocation4 + $0x228] sm:$0xff]  ;;  %vm372_vm1 = vcmask 254976   ;;  %s4220_s0 = smov 96   ;;  %s4221_s1 = smov 64   ;;  %vm391_vm2 = vcmask 261120  }
   0xd   :  { %v100_v3 = vld [vmem:[#allocation4 + $0x220] sm:$0xff]  ;;  %129 = vmatpush.msra.mxu2 %v101_v4  ;;  %v99_v6 = vld [vmem:[#allocation4 + $0x208] sm:$0xff]  ;;  %vm393_vm3 = vcmask 523264   ;;  %vm395_vm4 = vcmask 785408  }
   0xe   :  { %v98_v5 = vld [vmem:[#allocation4 + $0x200] sm:$0xff]  ;;  %109 = vmatpush.msra.mxu1 %v100_v3  ;;  %64 = vmatpush.msra.mxu0 %v42_v1  ;;  %v97_v8 = vld [vmem:[#allocation4 + $0x1e8] sm:$0xff] }
   0xf   :  { %v96_v7 = vld [vmem:[#allocation4 + $0x1e0] sm:$0xff]  ;;  %4017 = vmatmul.msk.f32.vlgmr.msra.gmra.mxu0 %vm45_vm0, %v41_v2  ;;  %130 = vmatpush.msra.mxu2 %v99_v6  ;;  %v95_v10 = vld [vmem:[#allocation4 + $0x1c8] sm:$0xff] }
  0x10   :  { %110 = vmatpush.msra.mxu1 %v98_v5  ;;  %v94_v9 = vld [vmem:[#allocation4 + $0x1c0] sm:$0xff]  ;;  %v93_v12 = vld [vmem:[#allocation4 + $0x1a8] sm:$0xff] }
  0x11   :  { %131 = vmatpush.msra.mxu2 %v97_v8  ;;  %v92_v11 = vld [vmem:[#allocation4 + $0x1a0] sm:$0xff]  ;;  %v91_v14 = vld [vmem:[#allocation4 + $0x188] sm:$0xff] }
  0x12   :  { %111 = vmatpush.msra.mxu1 %v96_v7  ;;  %v90_v13 = vld [vmem:[#allocation4 + $0x180] sm:$0xff]  ;;  %v89_v16 = vld [vmem:[#allocation4 + $0x168] sm:$0xff] }
  0x13   :  { %132 = vmatpush.msra.mxu2 %v95_v10  ;;  %v88_v15 = vld [vmem:[#allocation4 + $0x160] sm:$0xff]  ;;  %v87_v18 = vld [vmem:[#allocation4 + $0x148] sm:$0xff] }
  0x14   :  { %112 = vmatpush.msra.mxu1 %v94_v9  ;;  %v86_v17 = vld [vmem:[#allocation4 + $0x140] sm:$0xff]  ;;  %v85_v20 = vld [vmem:[#allocation4 + $0x128] sm:$0xff] }
  0x15   :  { %133 = vmatpush.msra.mxu2 %v93_v12  ;;  %v84_v19 = vld [vmem:[#allocation4 + $0x120] sm:$0xff]  ;;  %v83_v22 = vld [vmem:[#allocation4 + $0x108] sm:$0xff] }
  0x16   :  { %113 = vmatpush.msra.mxu1 %v92_v11  ;;  %v82_v21 = vld [vmem:[#allocation4 + $0x100] sm:$0xff]  ;;  %v81_v24 = vld [vmem:[#allocation4 + $0xe8] sm:$0xff] }
  0x17   :  { %134 = vmatpush.msra.mxu2 %v91_v14  ;;  %v80_v23 = vld [vmem:[#allocation4 + $0xe0] sm:$0xff]  ;;  %v79_v26 = vld [vmem:[#allocation4 + $0xc8] sm:$0xff] }
  0x18   :  { %114 = vmatpush.msra.mxu1 %v90_v13  ;;  %v78_v25 = vld [vmem:[#allocation4 + $0xc0] sm:$0xff]  ;;  %v77_v28 = vld [vmem:[#allocation4 + $0xa8] sm:$0xff] }
  0x19   :  { %135 = vmatpush.msra.mxu2 %v89_v16  ;;  %v76_v27 = vld [vmem:[#allocation4 + $0xa0] sm:$0xff]  ;;  %v75_v30 = vld [vmem:[#allocation4 + $0x88] sm:$0xff] }
  0x1a   :  { %115 = vmatpush.msra.mxu1 %v88_v15  ;;  %v74_v29 = vld [vmem:[#allocation4 + $0x80] sm:$0xff]  ;;  %v73_v32 = vld [vmem:[#allocation4 + $0x68] sm:$0xff] }
  0x1b   :  { %136 = vmatpush.msra.mxu2 %v87_v18  ;;  %v72_v31 = vld [vmem:[#allocation4 + $0x60] sm:$0xff]  ;;  %v71_v34 = vld [vmem:[#allocation4 + $0x48] sm:$0xff] }
  0x1c   :  { %116 = vmatpush.msra.mxu1 %v86_v17  ;;  %v70_v33 = vld [vmem:[#allocation4 + $0x40] sm:$0xff]  ;;  %v180_v45 = vld [vmem:[#allocation4 + $0x428] sm:$0xff] }
  0x1d   :  { %137 = vmatpush.msra.mxu2 %v85_v20  ;;  %v179_v35 = vld [vmem:[#allocation4 + $0x420] sm:$0xff]  ;;  %v178_v47 = vld [vmem:[#allocation4 + $0x408] sm:$0xff] }
  0x1e   :  { %117 = vmatpush.msra.mxu1 %v84_v19  ;;  %v177_v36 = vld [vmem:[#allocation4 + $0x400] sm:$0xff]  ;;  %220 = vmatpush.msra.mxu3 %v179_v35  ;;  %v176_v49 = vld [vmem:[#allocation4 + $0x3e8] sm:$0xff] }
  0x1f   :  { %138 = vmatpush.msra.mxu2 %v83_v22  ;;  %v211_v37 = vld [vmem:[#allocation4 + $0x620] sm:$0xff]  ;;  %v212_v51 = vld [vmem:[#allocation4 + $0x628] sm:$0xff] }
  0x20   :  { %118 = vmatpush.msra.mxu1 %v82_v21  ;;  %v175_v38 = vld [vmem:[#allocation4 + $0x3e0] sm:$0xff]  ;;  %240 = vmatpush.msrb.mxu0 %v211_v37  ;;  %v174_v53 = vld [vmem:[#allocation4 + $0x3c8] sm:$0xff] }
  0x21   :  { %139 = vmatpush.msra.mxu2 %v81_v24  ;;  %v209_v39 = vld [vmem:[#allocation4 + $0x600] sm:$0xff]  ;;  %221 = vmatpush.msra.mxu3 %v177_v36  ;;  %v210_v54 = vld [vmem:[#allocation4 + $0x608] sm:$0xff] }
  0x22   :  { %119 = vmatpush.msra.mxu1 %v80_v23  ;;  %v207_v40 = vld [vmem:[#allocation4 + $0x5e0] sm:$0xff]  ;;  %241 = vmatpush.msrb.mxu0 %v209_v39  ;;  %v172_v57 = vld [vmem:[#allocation4 + $0x3a8] sm:$0xff] }
  0x23   :  { %140 = vmatpush.msra.mxu2 %v79_v26  ;;  %v173_v41 = vld [vmem:[#allocation4 + $0x3c0] sm:$0xff]  ;;  %222 = vmatpush.msra.mxu3 %v175_v38  ;;  %v208_v58 = vld [vmem:[#allocation4 + $0x5e8] sm:$0xff] }
  0x24   :  { %120 = vmatpush.msra.mxu1 %v78_v25  ;;  %v205_v42 = vld [vmem:[#allocation4 + $0x5c0] sm:$0xff]  ;;  %242 = vmatpush.msrb.mxu0 %v207_v40  ;;  %v206_v60 = vld [vmem:[#allocation4 + $0x5c8] sm:$0xff] }
  0x25   :  { %141 = vmatpush.msra.mxu2 %v77_v28  ;;  %v171_v43 = vld [vmem:[#allocation4 + $0x3a0] sm:$0xff]  ;;  %223 = vmatpush.msra.mxu3 %v173_v41  ;;  %v170_v62 = vld [vmem:[#allocation4 + $0x388] sm:$0xff] }
  0x26   :  { %121 = vmatpush.msra.mxu1 %v76_v27  ;;  %v203_v44 = vld [vmem:[#allocation4 + $0x5a0] sm:$0xff]  ;;  %243 = vmatpush.msrb.mxu0 %v205_v42  ;;  %v204_v0 = vld [vmem:[#allocation4 + $0x5a8] sm:$0xff] }
  0x27   :  { %142 = vmatpush.msra.mxu2 %v75_v30  ;;  %v169_v46 = vld [vmem:[#allocation4 + $0x380] sm:$0xff]  ;;  %224 = vmatpush.msra.mxu3 %v171_v43  ;;  %v168_v2 = vld [vmem:[#allocation4 + $0x368] sm:$0xff] }
  0x28   :  { %122 = vmatpush.msra.mxu1 %v74_v29  ;;  %v201_v48 = vld [vmem:[#allocation4 + $0x580] sm:$0xff]  ;;  %244 = vmatpush.msrb.mxu0 %v203_v44  ;;  %v202_v4 = vld [vmem:[#allocation4 + $0x588] sm:$0xff] }
  0x29   :  { %143 = vmatpush.msra.mxu2 %v73_v32  ;;  %v167_v50 = vld [vmem:[#allocation4 + $0x360] sm:$0xff]  ;;  %225 = vmatpush.msra.mxu3 %v169_v46  ;;  %v166_v6 = vld [vmem:[#allocation4 + $0x348] sm:$0xff] }
  0x2a   :  { %123 = vmatpush.msra.mxu1 %v72_v31  ;;  %v199_v52 = vld [vmem:[#allocation4 + $0x560] sm:$0xff]  ;;  %245 = vmatpush.msrb.mxu0 %v201_v48  ;;  %v200_v8 = vld [vmem:[#allocation4 + $0x568] sm:$0xff] }
  0x2b   :  { %144 = vmatpush.msra.mxu2 %v71_v34  ;;  %v165_v55 = vld [vmem:[#allocation4 + $0x340] sm:$0xff]  ;;  %226 = vmatpush.msra.mxu3 %v167_v50  ;;  %v164_v10 = vld [vmem:[#allocation4 + $0x328] sm:$0xff] }
  0x2c   :  { %124 = vmatpush.msra.mxu1 %v70_v33  ;;  %v197_v56 = vld [vmem:[#allocation4 + $0x540] sm:$0xff]  ;;  %246 = vmatpush.msrb.mxu0 %v199_v52  ;;  %v198_v12 = vld [vmem:[#allocation4 + $0x548] sm:$0xff] }
  0x2d   :  { %280 = vmatpush.msrb.mxu2 %v212_v51  ;;  %v163_v59 = vld [vmem:[#allocation4 + $0x320] sm:$0xff]  ;;  %227 = vmatpush.msra.mxu3 %v165_v55  ;;  %v162_v14 = vld [vmem:[#allocation4 + $0x308] sm:$0xff] }
  0x2e   :  { %260 = vmatpush.msrb.mxu1 %v180_v45  ;;  %v195_v61 = vld [vmem:[#allocation4 + $0x520] sm:$0xff]  ;;  %247 = vmatpush.msrb.mxu0 %v197_v56  ;;  %v196_v16 = vld [vmem:[#allocation4 + $0x528] sm:$0xff] }
  0x2f   :  { %281 = vmatpush.msrb.mxu2 %v210_v54  ;;  %v161_v63 = vld [vmem:[#allocation4 + $0x300] sm:$0xff]  ;;  %228 = vmatpush.msra.mxu3 %v163_v59  ;;  %v160_v19 = vld [vmem:[#allocation4 + $0x2e8] sm:$0xff] }
  0x30   :  { %261 = vmatpush.msrb.mxu1 %v178_v47  ;;  %v193_v1 = vld [vmem:[#allocation4 + $0x500] sm:$0xff]  ;;  %248 = vmatpush.msrb.mxu0 %v195_v61  ;;  %v194_v21 = vld [vmem:[#allocation4 + $0x508] sm:$0xff] }
  0x31   :  { %282 = vmatpush.msrb.mxu2 %v208_v58  ;;  %v159_v3 = vld [vmem:[#allocation4 + $0x2e0] sm:$0xff]  ;;  %229 = vmatpush.msra.mxu3 %v161_v63  ;;  %v158_v24 = vld [vmem:[#allocation4 + $0x2c8] sm:$0xff] }
  0x32   :  { %262 = vmatpush.msrb.mxu1 %v176_v49  ;;  %v191_v5 = vld [vmem:[#allocation4 + $0x4e0] sm:$0xff]  ;;  %249 = vmatpush.msrb.mxu0 %v193_v1  ;;  %v192_v27 = vld [vmem:[#allocation4 + $0x4e8] sm:$0xff] }
  0x33   :  { %283 = vmatpush.msrb.mxu2 %v206_v60  ;;  %v157_v7 = vld [vmem:[#allocation4 + $0x2c0] sm:$0xff]  ;;  %230 = vmatpush.msra.mxu3 %v159_v3  ;;  %v156_v32 = vld [vmem:[#allocation4 + $0x2a8] sm:$0xff] }
  0x34   :  { %263 = vmatpush.msrb.mxu1 %v174_v53  ;;  %v189_v9 = vld [vmem:[#allocation4 + $0x4c0] sm:$0xff]  ;;  %250 = vmatpush.msrb.mxu0 %v191_v5  ;;  %v154_v35 = vld [vmem:[#allocation4 + $0x288] sm:$0xff] }
  0x35   :  { %284 = vmatpush.msrb.mxu2 %v204_v0  ;;  %v155_v11 = vld [vmem:[#allocation4 + $0x2a0] sm:$0xff]  ;;  %231 = vmatpush.msra.mxu3 %v157_v7  ;;  %v152_v49 = vld [vmem:[#allocation4 + $0x268] sm:$0xff] }
  0x36   :  { %264 = vmatpush.msrb.mxu1 %v172_v57  ;;  %v187_v13 = vld [vmem:[#allocation4 + $0x4a0] sm:$0xff]  ;;  %251 = vmatpush.msrb.mxu0 %v189_v9  ;;  %v190_v50 = vld [vmem:[#allocation4 + $0x4c8] sm:$0xff] }
  0x37   :  { %285 = vmatpush.msrb.mxu2 %v202_v4  ;;  %v153_v15 = vld [vmem:[#allocation4 + $0x280] sm:$0xff]  ;;  %232 = vmatpush.msra.mxu3 %v155_v11  ;;  %v150_v53 = vld [vmem:[#allocation4 + $0x248] sm:$0xff] }
  0x38   :  { %265 = vmatpush.msrb.mxu1 %v170_v62  ;;  %v44_v17 = vld [vmem:[#allocation4 + $0x3e40] ss:$0 sm:$0xff]  ;;  %252 = vmatpush.msrb.mxu0 %v187_v13  ;;  %v188_v54 = vld [vmem:[#allocation4 + $0x4a8] sm:$0xff] }
  0x39   :  { %286 = vmatpush.msrb.mxu2 %v200_v8  ;;  %v185_v18 = vld [vmem:[#allocation4 + $0x480] sm:$0xff]  ;;  %233 = vmatpush.msra.mxu3 %v153_v15  ;;  %v186_v57 = vld [vmem:[#allocation4 + $0x488] sm:$0xff] }
  0x3a   :  { %266 = vmatpush.msrb.mxu1 %v168_v2  ;;  %v151_v20 = vld [vmem:[#allocation4 + $0x260] sm:$0xff]  ;;  %253 = vmatpush.msrb.mxu0 %v185_v18  ;;  %v184_v60 = vld [vmem:[#allocation4 + $0x468] sm:$0xff] }
  0x3b   :  { %287 = vmatpush.msrb.mxu2 %v198_v12  ;;  %v183_v23 = vld [vmem:[#allocation4 + $0x460] sm:$0xff]  ;;  %234 = vmatpush.msra.mxu3 %v151_v20  ;;  %v182_v63 = vld [vmem:[#allocation4 + $0x448] sm:$0xff] }
  0x3c   :  { %267 = vmatpush.msrb.mxu1 %v166_v6  ;;  %v149_v26 = vld [vmem:[#allocation4 + $0x240] sm:$0xff]  ;;  %254 = vmatpush.msrb.mxu0 %v183_v23 }
  0x3d   :  { %288 = vmatpush.msrb.mxu2 %v196_v16  ;;  %v4244_v29 = vld [vmem:[#allocation4 + $0x3420] sm:$0xff]  ;;  %235 = vmatpush.msra.mxu3 %v149_v26 }
  0x3e   :  { %268 = vmatpush.msrb.mxu1 %v164_v10  ;;  %v181_v30 = vld [vmem:[#allocation4 + $0x440] sm:$0xff] }
  0x3f   :  { %289 = vmatpush.msrb.mxu2 %v194_v21  ;;  %v4246_v31 = vld [vmem:[#allocation4 + $0x3620] sm:$0xff]  ;;  %332 = vmatpush.msrb.mxu3 %v4244_v29 }
  0x40   :  { %269 = vmatpush.msrb.mxu1 %v162_v14  ;;  %v4248_v33 = vld [vmem:[#allocation4 + $0x3400] sm:$0xff]  ;;  %255 = vmatpush.msrb.mxu0 %v181_v30 }
  0x41   :  { %290 = vmatpush.msrb.mxu2 %v192_v27  ;;  %v4251_v34 = vld [vmem:[#allocation4 + $0x3600] sm:$0xff]  ;;  %333 = vmatpush.msrb.mxu3 %v4248_v33 }
  0x42   :  { %270 = vmatpush.msrb.mxu1 %v160_v19  ;;  %v4253_v36 = vld [vmem:[#allocation4 + $0x33e0] sm:$0xff]  ;;  %352 = vmatpush.msra.mxu0 %v4246_v31 }
  0x43   :  { %v4257_v37 = vld [vmem:[#allocation4 + $0x35e0] sm:$0xff]  ;;  %334 = vmatpush.msrb.mxu3 %v4253_v36  ;;  %291 = vmatpush.msrb.mxu2 %v190_v50 }
  0x44   :  { %271 = vmatpush.msrb.mxu1 %v158_v24  ;;  %v4259_v38 = vld [vmem:[#allocation4 + $0x33c0] sm:$0xff]  ;;  %353 = vmatpush.msra.mxu0 %v4251_v34 }
  0x45   :  { %v4263_v39 = vld [vmem:[#allocation4 + $0x35c0] sm:$0xff]  ;;  %335 = vmatpush.msrb.mxu3 %v4259_v38  ;;  %292 = vmatpush.msrb.mxu2 %v188_v54 }
  0x46   :  { %272 = vmatpush.msrb.mxu1 %v156_v32  ;;  %v4265_v40 = vld [vmem:[#allocation4 + $0x33a0] sm:$0xff]  ;;  %354 = vmatpush.msra.mxu0 %v4257_v37 }
  0x47   :  { %v4269_v41 = vld [vmem:[#allocation4 + $0x35a0] sm:$0xff]  ;;  %336 = vmatpush.msrb.mxu3 %v4265_v40  ;;  %293 = vmatpush.msrb.mxu2 %v186_v57 }
  0x48   :  { %273 = vmatpush.msrb.mxu1 %v154_v35  ;;  %v4271_v42 = vld [vmem:[#allocation4 + $0x3380] sm:$0xff]  ;;  %355 = vmatpush.msra.mxu0 %v4263_v39 }
  0x49   :  { %v4275_v43 = vld [vmem:[#allocation4 + $0x3580] sm:$0xff]  ;;  %337 = vmatpush.msrb.mxu3 %v4271_v42  ;;  %294 = vmatpush.msrb.mxu2 %v184_v60 }
  0x4a   :  { %v4277_v44 = vld [vmem:[#allocation4 + $0x3360] sm:$0xff]  ;;  %356 = vmatpush.msra.mxu0 %v4269_v41  ;;  %274 = vmatpush.msrb.mxu1 %v152_v49 }
  0x4b   :  { %v4281_v45 = vld [vmem:[#allocation4 + $0x3560] sm:$0xff]  ;;  %338 = vmatpush.msrb.mxu3 %v4277_v44  ;;  %295 = vmatpush.msrb.mxu2 %v182_v63 }
  0x4c   :  { %v4283_v46 = vld [vmem:[#allocation4 + $0x3340] sm:$0xff]  ;;  %357 = vmatpush.msra.mxu0 %v4275_v43  ;;  %275 = vmatpush.msrb.mxu1 %v150_v53 }
  0x4d   :  { %v4287_v47 = vld [vmem:[#allocation4 + $0x3320] sm:$0xff]  ;;  %339 = vmatpush.msrb.mxu3 %v4283_v46 }
  0x4e   :  { %358 = vmatpush.msra.mxu0 %v4281_v45  ;;  %v4291_v48 = vld [vmem:[#allocation4 + $0x3300] sm:$0xff] }
  0x4f   :  { %340 = vmatpush.msrb.mxu3 %v4287_v47  ;;  %v4295_v51 = vld [vmem:[#allocation4 + $0x32e0] sm:$0xff] }
  0x50   :  { %v4297_v52 = vld [vmem:[#allocation4 + $0x3540] sm:$0xff] }
  0x51   :  { %341 = vmatpush.msrb.mxu3 %v4291_v48  ;;  %359 = vmatpush.msra.mxu0 %v4297_v52  ;;  %v4301_v55 = vld [vmem:[#allocation4 + $0x32c0] sm:$0xff] }
  0x52   :  { %v4303_v56 = vld [vmem:[#allocation4 + $0x3520] sm:$0xff] }
  0x53   :  { %342 = vmatpush.msrb.mxu3 %v4295_v51  ;;  %360 = vmatpush.msra.mxu0 %v4303_v56  ;;  %v4307_v58 = vld [vmem:[#allocation4 + $0x32a0] sm:$0xff] }
  0x54   :  { %v4309_v59 = vld [vmem:[#allocation4 + $0x3500] sm:$0xff] }
  0x55   :  { %343 = vmatpush.msrb.mxu3 %v4301_v55  ;;  %361 = vmatpush.msra.mxu0 %v4309_v59  ;;  %v4314_v61 = vld [vmem:[#allocation4 + $0x3280] sm:$0xff] }
  0x56   :  { %v4316_v62 = vld [vmem:[#allocation4 + $0x34e0] sm:$0xff] }
  0x57   :  { %344 = vmatpush.msrb.mxu3 %v4307_v58  ;;  %362 = vmatpush.msra.mxu0 %v4316_v62  ;;  %v4321_v0 = vld [vmem:[#allocation4 + $0x3260] sm:$0xff] }
  0x58   :  { %v4323_v1 = vld [vmem:[#allocation4 + $0x34c0] sm:$0xff] }
  0x59   :  { %345 = vmatpush.msrb.mxu3 %v4314_v61  ;;  %363 = vmatpush.msra.mxu0 %v4323_v1  ;;  %v4328_v2 = vld [vmem:[#allocation4 + $0x3240] sm:$0xff] }
  0x5a   :  { %v4330_v3 = vld [vmem:[#allocation4 + $0x34a0] sm:$0xff] }
  0x5b   :  { %346 = vmatpush.msrb.mxu3 %v4321_v0  ;;  %364 = vmatpush.msra.mxu0 %v4330_v3  ;;  %v4336_v4 = vld [vmem:[#allocation4 + $0x3480] sm:$0xff] }
  0x5c   :  { %v4338_v5 = vld [vmem:[#allocation4 + $0x3460] sm:$0xff] }
  0x5d   :  { %347 = vmatpush.msrb.mxu3 %v4328_v2  ;;  %365 = vmatpush.msra.mxu0 %v4336_v4  ;;  %v4343_v6 = vld [vmem:[#allocation4 + $0x3440] sm:$0xff] }
  0x5e   :  { %v103_v7 = vld [vmem:[#allocation4 + $0x3e60] ss:$8 sm:$0x3] }
  0x5f   :  { %366 = vmatpush.msra.mxu0 %v4338_v5  ;;  %v105_v8 = vperm.slane %v103_v7, 0  ;;  %v106_v11 = vperm.slane %v103_v7, 1 }
  0x61   :  { %367 = vmatpush.msra.mxu0 %v4343_v6 }
  0x8c   :  { %v66_v22 = vpop.f32.mrf.mxu0 }
  0x8d   :  { %v67_v25 = vadd.f32 %v66_v22, %v44_v17 }
  0x8f   :  { %v69_v28 = vmax.f32 %v67_v25, 0.0 }
  0x91   :  { %125 = vmatmul.f32.vlgmr.msra.gmra.mxu1 %v69_v28  ;;  %145 = vmatmul.f32.vlgmr.msra.gmra.mxu2 %v69_v28 }
  0x92   :  { %402 = vmatpush.msra.mxu1 %v4244_v29  ;;  %422 = vmatpush.msra.mxu2 %v4246_v31 }
  0x94   :  { %403 = vmatpush.msra.mxu1 %v4248_v33  ;;  %423 = vmatpush.msra.mxu2 %v4251_v34 }
  0x96   :  { %404 = vmatpush.msra.mxu1 %v4253_v36  ;;  %424 = vmatpush.msra.mxu2 %v4257_v37 }
  0x98   :  { %405 = vmatpush.msra.mxu1 %v4259_v38  ;;  %425 = vmatpush.msra.mxu2 %v4263_v39 }
  0x9a   :  { %406 = vmatpush.msra.mxu1 %v4265_v40  ;;  %426 = vmatpush.msra.mxu2 %v4269_v41 }
  0x9c   :  { %407 = vmatpush.msra.mxu1 %v4271_v42  ;;  %427 = vmatpush.msra.mxu2 %v4275_v43 }
  0x9e   :  { %408 = vmatpush.msra.mxu1 %v4277_v44  ;;  %428 = vmatpush.msra.mxu2 %v4281_v45 }
  0xa0   :  { %409 = vmatpush.msra.mxu1 %v4283_v46  ;;  %429 = vmatpush.msra.mxu2 %v4297_v52 }
  0xa2   :  { %410 = vmatpush.msra.mxu1 %v4287_v47  ;;  %430 = vmatpush.msra.mxu2 %v4303_v56 }
  0xa4   :  { %411 = vmatpush.msra.mxu1 %v4291_v48  ;;  %431 = vmatpush.msra.mxu2 %v4309_v59 }
  0xa6   :  { %412 = vmatpush.msra.mxu1 %v4295_v51  ;;  %432 = vmatpush.msra.mxu2 %v4316_v62 }
  0xa8   :  { %413 = vmatpush.msra.mxu1 %v4301_v55  ;;  %433 = vmatpush.msra.mxu2 %v4323_v1 }
  0xaa   :  { %414 = vmatpush.msra.mxu1 %v4307_v58  ;;  %434 = vmatpush.msra.mxu2 %v4330_v3 }
  0xac   :  { %415 = vmatpush.msra.mxu1 %v4314_v61  ;;  %435 = vmatpush.msra.mxu2 %v4336_v4 }
  0xae   :  { %416 = vmatpush.msra.mxu1 %v4321_v0  ;;  %436 = vmatpush.msra.mxu2 %v4338_v5 }
  0xb0   :  { %417 = vmatpush.msra.mxu1 %v4328_v2  ;;  %437 = vmatpush.msra.mxu2 %v4343_v6 }
 0x10e   :  { %v126_v9 = vpop.f32.mrf.mxu1 }
 0x10f   :  { %v4367_v10 = vadd.f32 %v126_v9, %v105_v8 }
 0x111   :  { %236 = vmatmul.f32.vlgmr.msra.gmra.mxu3 %v4367_v10  ;;  %276 = vmatmul.f32.vlgmr.msrb.gmra.mxu1 %v4367_v10 }
 0x114   :  { %v146_v12 = vpop.f32.mrf.mxu2 }
 0x115   :  { %v4375_v13 = vadd.f32 %v146_v12, %v106_v11 }
 0x117   :  { %256 = vmatmul.f32.vlgmr.msrb.gmra.mxu0 %v4375_v13  ;;  %296 = vmatmul.f32.vlgmr.msrb.gmra.mxu2 %v4375_v13 }
 0x119   :  { %348 = vmatmul.f32.vlgmr.msrb.gmra.mxu3 %v4367_v10 }
 0x11f   :  { %368 = vmatmul.f32.vlgmr.msra.gmra.mxu0 %v4375_v13 }
 0x18e   :  { %v4395_v63 = vpop.f32.mrf.mxu1 }
 0x194   :  { %v4382_v14 = vpop.f32.mrf.mxu3  ;;  %v4384_v15 = vpop.f32.mrf.mxu0 }
 0x19a   :  { %v4397_v7 = vpop.f32.mrf.mxu2 }
 0x19c   :  { %v349_v16 = vpop.f32.mrf.mxu3  ;;  %v369_v17 = vpop.f32.mrf.mxu0 }
 0x19d   :  { %v370_v18 = vadd.f32 %v369_v17, %v349_v16 }
 0x19f   :  { %v373_v19 = vsel %vm372_vm1, %v370_v18, 0.0 }
 0x1a0   :  { %v374_v20 = vrot.slane %v373_v19, 4 }
 0x1a2   :  { %v375_v21 = vadd.f32 %v374_v20, %v373_v19 }
 0x1a4   :  { %v376_v22 = vrot.slane %v375_v21, 2 }
 0x1a6   :  { %v377_v23 = vadd.f32 %v376_v22, %v375_v21 }
 0x1a8   :  { %v378_v24 = vrot.slane %v377_v23, 1 }
 0x1aa   :  { %v379_v25 = vadd.f32 %v378_v24, %v377_v23 }
 0x1ac   :  { %v380_v26 = vmul.f32 0.0625, %v379_v25 }
 0x1ae   :  { %388 = vrot.lane.b32.xlu1 %v380_v26, %s4220_s0  ;;  %382 = vrot.lane.b32.xlu0 %v380_v26, %s4219_s20 }
 0x1b6   :  { %385 = vrot.lane.b32.xlu0 %v380_v26, %s4221_s1 }
 0x220   :  { %v383_v27 = vpop.permute.xlu0 %382  ;;  %v389_v32 = vpop.permute.xlu1 %388 }
 0x221   :  { %v392_v28 = vsel %vm391_vm2, %v380_v26, %v383_v27 }
 0x228   :  { %v386_v30 = vpop.permute.xlu0 %385 }
 0x229   :  { %v394_v35 = vsel %vm393_vm3, %v392_v28, %v386_v30 }
 0x22a   :  { %v396_v49 = vsel %vm395_vm4, %v394_v35, %v389_v32  ;;  %v450_v32 = vld [vmem:[#allocation4 + $0x3ea0] ss:$0 sm:$0xff] }
 0x22b   :  { %v397_v50 = vperm.slane %v396_v49, 0 }
 0x22d   :  { %v398_v53 = vsub.f32 %v4367_v10, %v397_v50  ;;  %v399_v54 = vsub.f32 %v4375_v13, %v397_v50 }
 0x22f   :  { %v400_v57 = vmul.f32 %v398_v53, %v398_v53  ;;  %v401_v60 = vmul.f32 %v399_v54, %v399_v54  ;;  %v463_v53 = vld [vmem:[#allocation4 + $0x3ec0] ss:$0 sm:$0xff] }
 0x231   :  { %418 = vmatmul.f32.vlgmr.msra.gmra.mxu1 %v400_v57  ;;  %438 = vmatmul.f32.vlgmr.msra.gmra.mxu2 %v401_v60  ;;  %v530_v60 = vld [vmem:[#allocation4 + $0x820] sm:$0xff] }
 0x232   :  { %571 = vmatpush.msra.mxu3 %v530_v60  ;;  %v518_v60 = vld [vmem:[#allocation4 + $0x760] sm:$0xff] }
 0x2ae   :  { %v419_v8 = vpop.f32.mrf.mxu1 }
 0x2b4   :  { %v439_v9 = vpop.f32.mrf.mxu2 }
 0x2b5   :  { %v440_v11 = vadd.f32 %v439_v9, %v419_v8  ;;  %v562_v8 = vld [vmem:[#allocation4 + $0xa20] sm:$0xff]  ;;  %v531_v9 = vld [vmem:[#allocation4 + $0x828] sm:$0xff] }
 0x2b6   :  { %591 = vmatpush.msrb.mxu0 %v562_v8  ;;  %611 = vmatpush.msrb.mxu1 %v531_v9  ;;  %v550_v8 = vld [vmem:[#allocation4 + $0x960] sm:$0xff]  ;;  %v519_v9 = vld [vmem:[#allocation4 + $0x768] sm:$0xff] }
 0x2b7   :  { %v442_v12 = vsel %vm372_vm1, %v440_v11, 0.0  ;;  %v528_v11 = vld [vmem:[#allocation4 + $0x800] sm:$0xff] }
 0x2b8   :  { %v443_v16 = vrot.slane %v442_v12, 4  ;;  %572 = vmatpush.msra.mxu3 %v528_v11  ;;  %v516_v11 = vld [vmem:[#allocation4 + $0x740] sm:$0xff] }
 0x2ba   :  { %v444_v17 = vadd.f32 %v443_v16, %v442_v12  ;;  %v560_v12 = vld [vmem:[#allocation4 + $0xa00] sm:$0xff]  ;;  %v529_v16 = vld [vmem:[#allocation4 + $0x808] sm:$0xff] }
 0x2bb   :  { %592 = vmatpush.msrb.mxu0 %v560_v12  ;;  %612 = vmatpush.msrb.mxu1 %v529_v16  ;;  %v548_v12 = vld [vmem:[#allocation4 + $0x940] sm:$0xff]  ;;  %v517_v16 = vld [vmem:[#allocation4 + $0x748] sm:$0xff] }
 0x2bc   :  { %v445_v18 = vrot.slane %v444_v17, 2 }
 0x2be   :  { %v446_v19 = vadd.f32 %v445_v18, %v444_v17  ;;  %v561_v17 = vld [vmem:[#allocation4 + $0xa08] sm:$0xff]  ;;  %v526_v18 = vld [vmem:[#allocation4 + $0x7e0] sm:$0xff] }
 0x2bf   :  { %573 = vmatpush.msra.mxu3 %v526_v18  ;;  %v514_v18 = vld [vmem:[#allocation4 + $0x720] sm:$0xff] }
 0x2c0   :  { %v447_v20 = vrot.slane %v446_v19, 1 }
 0x2c2   :  { %v448_v21 = vadd.f32 %v447_v20, %v446_v19  ;;  %v558_v19 = vld [vmem:[#allocation4 + $0x9e0] sm:$0xff]  ;;  %v527_v20 = vld [vmem:[#allocation4 + $0x7e8] sm:$0xff] }
 0x2c3   :  { %593 = vmatpush.msrb.mxu0 %v558_v19  ;;  %613 = vmatpush.msrb.mxu1 %v527_v20  ;;  %v546_v19 = vld [vmem:[#allocation4 + $0x920] sm:$0xff]  ;;  %v515_v20 = vld [vmem:[#allocation4 + $0x728] sm:$0xff] }
 0x2c4   :  { %v449_v22 = vmul.f32 0.0625, %v448_v21  ;;  %v559_v21 = vld [vmem:[#allocation4 + $0x9e8] sm:$0xff] }
 0x2c6   :  { %v451_v23 = vadd.f32 1e-05, %v449_v22  ;;  %v524_v22 = vld [vmem:[#allocation4 + $0x7c0] sm:$0xff] }
 0x2c7   :  { %574 = vmatpush.msra.mxu3 %v524_v22  ;;  %v512_v22 = vld [vmem:[#allocation4 + $0x700] sm:$0xff] }
 0x2c8   :  { %4024 = vrsqrt.f32 %v451_v23  ;;  %vm458_vm6 = vweird.f32 %v451_v23 }
 0x2ce   :  { %v4025_v24 = vpop.eup %4024 }
 0x2cf   :  { %v453_v25 = vmul.f32 %v4025_v24, %v451_v23  ;;  %vm459_vm5 = vweird.f32 %v4025_v24  ;;  %v556_v23 = vld [vmem:[#allocation4 + $0x9c0] sm:$0xff] }
 0x2d0   :  { %vm460_vm7 = vmor %vm458_vm6, %vm459_vm5  ;;  %594 = vmatpush.msrb.mxu0 %v556_v23  ;;  %v544_v23 = vld [vmem:[#allocation4 + $0x900] sm:$0xff] }
 0x2d1   :  { %v454_v27 = vmul.f32 %v4025_v24, %v453_v25  ;;  %v557_v25 = vld [vmem:[#allocation4 + $0x9c8] sm:$0xff] }
 0x2d3   :  { %v455_v28 = vmul.f32 0.5, %v454_v27  ;;  %v522_v27 = vld [vmem:[#allocation4 + $0x7a0] sm:$0xff] }
 0x2d4   :  { %575 = vmatpush.msra.mxu3 %v522_v27  ;;  %v510_v27 = vld [vmem:[#allocation4 + $0x6e0] sm:$0xff] }
 0x2d5   :  { %v456_v30 = vsub.f32 1.5, %v455_v28  ;;  %v554_v28 = vld [vmem:[#allocation4 + $0x9a0] sm:$0xff] }
 0x2d6   :  { %595 = vmatpush.msrb.mxu0 %v554_v28  ;;  %v542_v28 = vld [vmem:[#allocation4 + $0x8e0] sm:$0xff] }
 0x2d7   :  { %v457_v35 = vmul.f32 %v4025_v24, %v456_v30  ;;  %v523_v30 = vld [vmem:[#allocation4 + $0x7a8] sm:$0xff] }
 0x2d9   :  { %v461_v49 = vsel %vm460_vm7, %v4025_v24, %v457_v35  ;;  %v525_v24 = vld [vmem:[#allocation4 + $0x7c8] sm:$0xff]  ;;  %v520_v35 = vld [vmem:[#allocation4 + $0x780] sm:$0xff] }
 0x2da   :  { %v4400_v50 = vmul.f32 %v461_v49, %v450_v32  ;;  %614 = vmatpush.msrb.mxu1 %v525_v24  ;;  %v555_v32 = vld [vmem:[#allocation4 + $0x9a8] sm:$0xff]  ;;  %v552_v49 = vld [vmem:[#allocation4 + $0x980] sm:$0xff]  ;;  %576 = vmatpush.msra.mxu3 %v520_v35 }
 0x2db   :  { %596 = vmatpush.msrb.mxu0 %v552_v49  ;;  %v513_v24 = vld [vmem:[#allocation4 + $0x708] sm:$0xff]  ;;  %v508_v35 = vld [vmem:[#allocation4 + $0x6c0] sm:$0xff] }
 0x2dc   :  { %470 = vrot.lane.b32.xlu2 %v4400_v50, %s4221_s1  ;;  %467 = vrot.lane.b32.xlu1 %v4400_v50, %s4219_s20  ;;  %v464_v54 = vmul.f32 %v4400_v50, %v380_v26  ;;  %v563_v26 = vld [vmem:[#allocation4 + $0xa28] sm:$0xff]  ;;  %v540_v49 = vld [vmem:[#allocation4 + $0x8c0] sm:$0xff] }
 0x2dd   :  { %631 = vmatpush.msrb.mxu2 %v563_v26  ;;  %615 = vmatpush.msrb.mxu1 %v523_v30  ;;  %v551_v26 = vld [vmem:[#allocation4 + $0x968] sm:$0xff] }
 0x2de   :  { %v4407_v57 = vsub.f32 %v463_v53, %v464_v54  ;;  %v521_v53 = vld [vmem:[#allocation4 + $0x788] sm:$0xff]  ;;  %577 = vmatpush.msra.mxu3 %v518_v60  ;;  %597 = vmatpush.msrb.mxu0 %v550_v8  ;;  %v506_v60 = vld [vmem:[#allocation4 + $0x6a0] sm:$0xff] }
 0x2df   :  { %632 = vmatpush.msrb.mxu2 %v561_v17  ;;  %v553_v54 = vld [vmem:[#allocation4 + $0x988] sm:$0xff]  ;;  %616 = vmatpush.msrb.mxu1 %v521_v53  ;;  %v538_v8 = vld [vmem:[#allocation4 + $0x8a0] sm:$0xff] }
 0x2e0   :  { %480 = vrot.lane.b32.xlu0 %v4407_v57, %s4219_s20  ;;  %v549_v17 = vld [vmem:[#allocation4 + $0x948] sm:$0xff]  ;;  %578 = vmatpush.msra.mxu3 %v516_v11  ;;  %v504_v11 = vld [vmem:[#allocation4 + $0x680] sm:$0xff] }
 0x2e1   :  { %633 = vmatpush.msrb.mxu2 %v559_v21  ;;  %617 = vmatpush.msrb.mxu1 %v519_v9  ;;  %v547_v21 = vld [vmem:[#allocation4 + $0x928] sm:$0xff] }
 0x2e2   :  { %598 = vmatpush.msrb.mxu0 %v548_v12  ;;  %579 = vmatpush.msra.mxu3 %v514_v18  ;;  %v511_v30 = vld [vmem:[#allocation4 + $0x6e8] sm:$0xff]  ;;  %v536_v12 = vld [vmem:[#allocation4 + $0x880] sm:$0xff] }
 0x2e3   :  { %634 = vmatpush.msrb.mxu2 %v557_v25  ;;  %618 = vmatpush.msrb.mxu1 %v517_v16  ;;  %v545_v25 = vld [vmem:[#allocation4 + $0x908] sm:$0xff]  ;;  %v502_v18 = vld [vmem:[#allocation4 + $0x660] sm:$0xff] }
 0x2e4   :  { %473 = vrot.lane.b32.xlu2 %v4400_v50, %s4220_s0  ;;  %483 = vrot.lane.b32.xlu1 %v4407_v57, %s4221_s1  ;;  %v509_v53 = vld [vmem:[#allocation4 + $0x6c8] sm:$0xff] }
 0x2e5   :  { %635 = vmatpush.msrb.mxu2 %v555_v32  ;;  %599 = vmatpush.msrb.mxu0 %v546_v19  ;;  %v543_v32 = vld [vmem:[#allocation4 + $0x8e8] sm:$0xff]  ;;  %v534_v19 = vld [vmem:[#allocation4 + $0x860] sm:$0xff] }
 0x2e6   :  { %619 = vmatpush.msrb.mxu1 %v515_v20  ;;  %580 = vmatpush.msra.mxu3 %v512_v22  ;;  %v507_v9 = vld [vmem:[#allocation4 + $0x6a8] sm:$0xff]  ;;  %v500_v22 = vld [vmem:[#allocation4 + $0x640] sm:$0xff] }
 0x2e7   :  { %636 = vmatpush.msrb.mxu2 %v553_v54  ;;  %600 = vmatpush.msrb.mxu0 %v544_v23  ;;  %v541_v54 = vld [vmem:[#allocation4 + $0x8c8] sm:$0xff]  ;;  %v532_v23 = vld [vmem:[#allocation4 + $0x840] sm:$0xff] }
 0x2e8   :  { %620 = vmatpush.msrb.mxu1 %v513_v24  ;;  %581 = vmatpush.msra.mxu3 %v510_v27  ;;  %v505_v16 = vld [vmem:[#allocation4 + $0x688] sm:$0xff] }
 0x2e9   :  { %637 = vmatpush.msrb.mxu2 %v551_v26  ;;  %601 = vmatpush.msrb.mxu0 %v542_v28  ;;  %v539_v26 = vld [vmem:[#allocation4 + $0x8a8] sm:$0xff] }
 0x2ea   :  { %621 = vmatpush.msrb.mxu1 %v511_v30  ;;  %582 = vmatpush.msra.mxu3 %v508_v35  ;;  %v503_v20 = vld [vmem:[#allocation4 + $0x668] sm:$0xff] }
 0x2eb   :  { %638 = vmatpush.msrb.mxu2 %v549_v17  ;;  %602 = vmatpush.msrb.mxu0 %v540_v49  ;;  %v537_v17 = vld [vmem:[#allocation4 + $0x888] sm:$0xff] }
 0x2ec   :  { %486 = vrot.lane.b32.xlu2 %v4407_v57, %s4220_s0  ;;  %622 = vmatpush.msrb.mxu1 %v509_v53  ;;  %v501_v24 = vld [vmem:[#allocation4 + $0x648] sm:$0xff] }
 0x2ed   :  { %639 = vmatpush.msrb.mxu2 %v547_v21  ;;  %583 = vmatpush.msra.mxu3 %v506_v60  ;;  %v535_v21 = vld [vmem:[#allocation4 + $0x868] sm:$0xff] }
 0x2ee   :  { %603 = vmatpush.msrb.mxu0 %v538_v8  ;;  %623 = vmatpush.msrb.mxu1 %v507_v9 }
 0x2ef   :  { %640 = vmatpush.msrb.mxu2 %v545_v25  ;;  %584 = vmatpush.msra.mxu3 %v504_v11  ;;  %v533_v25 = vld [vmem:[#allocation4 + $0x848] sm:$0xff] }
 0x2f0   :  { %604 = vmatpush.msrb.mxu0 %v536_v12  ;;  %624 = vmatpush.msrb.mxu1 %v505_v16 }
 0x2f1   :  { %641 = vmatpush.msrb.mxu2 %v543_v32  ;;  %585 = vmatpush.msra.mxu3 %v502_v18 }
 0x2f2   :  { %605 = vmatpush.msrb.mxu0 %v534_v19  ;;  %625 = vmatpush.msrb.mxu1 %v503_v20 }
 0x2f3   :  { %642 = vmatpush.msrb.mxu2 %v541_v54  ;;  %586 = vmatpush.msra.mxu3 %v500_v22 }
 0x2f4   :  { %606 = vmatpush.msrb.mxu0 %v532_v23  ;;  %626 = vmatpush.msrb.mxu1 %v501_v24 }
 0x2f5   :  { %643 = vmatpush.msrb.mxu2 %v539_v26  ;;  %651 = vmatpush.msrb.mxu3 %v4244_v29 }
 0x2f6   :  { %671 = vmatpush.msra.mxu0 %v4246_v31  ;;  %717 = vmatpush.msra.mxu1 %v4244_v29 }
 0x2f7   :  { %644 = vmatpush.msrb.mxu2 %v537_v17  ;;  %652 = vmatpush.msrb.mxu3 %v4248_v33 }
 0x2f8   :  { %672 = vmatpush.msra.mxu0 %v4251_v34  ;;  %718 = vmatpush.msra.mxu1 %v4248_v33 }
 0x2f9   :  { %645 = vmatpush.msrb.mxu2 %v535_v21  ;;  %653 = vmatpush.msrb.mxu3 %v4253_v36 }
 0x2fa   :  { %673 = vmatpush.msra.mxu0 %v4257_v37  ;;  %719 = vmatpush.msra.mxu1 %v4253_v36 }
 0x2fb   :  { %646 = vmatpush.msrb.mxu2 %v533_v25  ;;  %654 = vmatpush.msrb.mxu3 %v4259_v38 }
 0x2fc   :  { %674 = vmatpush.msra.mxu0 %v4263_v39  ;;  %720 = vmatpush.msra.mxu1 %v4259_v38 }
 0x2fd   :  { %737 = vmatpush.msra.mxu2 %v4246_v31  ;;  %655 = vmatpush.msrb.mxu3 %v4265_v40 }
 0x2fe   :  { %675 = vmatpush.msra.mxu0 %v4269_v41  ;;  %721 = vmatpush.msra.mxu1 %v4265_v40 }
 0x2ff   :  { %738 = vmatpush.msra.mxu2 %v4251_v34  ;;  %656 = vmatpush.msrb.mxu3 %v4271_v42 }
 0x300   :  { %676 = vmatpush.msra.mxu0 %v4275_v43  ;;  %722 = vmatpush.msra.mxu1 %v4271_v42 }
 0x301   :  { %739 = vmatpush.msra.mxu2 %v4257_v37  ;;  %657 = vmatpush.msrb.mxu3 %v4277_v44 }
 0x302   :  { %677 = vmatpush.msra.mxu0 %v4281_v45  ;;  %723 = vmatpush.msra.mxu1 %v4277_v44 }
 0x303   :  { %740 = vmatpush.msra.mxu2 %v4263_v39  ;;  %658 = vmatpush.msrb.mxu3 %v4283_v46 }
 0x304   :  { %678 = vmatpush.msra.mxu0 %v4297_v52  ;;  %724 = vmatpush.msra.mxu1 %v4283_v46 }
 0x305   :  { %741 = vmatpush.msra.mxu2 %v4269_v41  ;;  %659 = vmatpush.msrb.mxu3 %v4287_v47 }
 0x306   :  { %679 = vmatpush.msra.mxu0 %v4303_v56  ;;  %725 = vmatpush.msra.mxu1 %v4287_v47 }
 0x307   :  { %742 = vmatpush.msra.mxu2 %v4275_v43  ;;  %660 = vmatpush.msrb.mxu3 %v4291_v48 }
 0x308   :  { %680 = vmatpush.msra.mxu0 %v4309_v59  ;;  %726 = vmatpush.msra.mxu1 %v4291_v48 }
 0x309   :  { %743 = vmatpush.msra.mxu2 %v4281_v45  ;;  %661 = vmatpush.msrb.mxu3 %v4295_v51 }
 0x30a   :  { %681 = vmatpush.msra.mxu0 %v4316_v62  ;;  %727 = vmatpush.msra.mxu1 %v4295_v51 }
 0x30b   :  { %744 = vmatpush.msra.mxu2 %v4297_v52  ;;  %662 = vmatpush.msrb.mxu3 %v4301_v55 }
 0x30c   :  { %682 = vmatpush.msra.mxu0 %v4323_v1  ;;  %728 = vmatpush.msra.mxu1 %v4301_v55  ;;  %v565_v55 = vld [vmem:[#allocation4 + $0x3ee0] ss:$8 sm:$0x3] }
 0x30d   :  { %745 = vmatpush.msra.mxu2 %v4303_v56  ;;  %663 = vmatpush.msrb.mxu3 %v4307_v58  ;;  %v568_v56 = vperm.slane %v565_v55, 1 }
 0x30e   :  { %683 = vmatpush.msra.mxu0 %v4330_v3  ;;  %729 = vmatpush.msra.mxu1 %v4307_v58 }
 0x30f   :  { %746 = vmatpush.msra.mxu2 %v4309_v59  ;;  %664 = vmatpush.msrb.mxu3 %v4314_v61  ;;  %v567_v59 = vperm.slane %v565_v55, 0  ;;  %v878_v55 = vld [vmem:[#allocation4 + $0xe28] sm:$0xff] }
 0x310   :  { %684 = vmatpush.msra.mxu0 %v4336_v4  ;;  %730 = vmatpush.msra.mxu1 %v4314_v61 }
 0x311   :  { %747 = vmatpush.msra.mxu2 %v4316_v62  ;;  %665 = vmatpush.msrb.mxu3 %v4321_v0 }
 0x312   :  { %685 = vmatpush.msra.mxu0 %v4338_v5  ;;  %731 = vmatpush.msra.mxu1 %v4321_v0 }
 0x313   :  { %748 = vmatpush.msra.mxu2 %v4323_v1  ;;  %666 = vmatpush.msrb.mxu3 %v4328_v2 }
 0x314   :  { %686 = vmatpush.msra.mxu0 %v4343_v6  ;;  %732 = vmatpush.msra.mxu1 %v4328_v2 }
 0x315   :  { %749 = vmatpush.msra.mxu2 %v4330_v3 }
 0x317   :  { %750 = vmatpush.msra.mxu2 %v4336_v4 }
 0x319   :  { %751 = vmatpush.msra.mxu2 %v4338_v5 }
 0x31b   :  { %752 = vmatpush.msra.mxu2 %v4343_v6 }
 0x336   :  { %v471_v27 = vpop.permute.xlu2 %470 }
 0x33e   :  { %v474_v29 = vpop.permute.xlu2 %473 }
 0x346   :  { %v487_v41 = vpop.permute.xlu2 %486 }
 0x34e   :  { %v468_v31 = vpop.permute.xlu1 %467 }
 0x34f   :  { %v476_v33 = vsel %vm391_vm2, %v4400_v50, %v468_v31 }
 0x350   :  { %v477_v34 = vsel %vm393_vm3, %v476_v33, %v471_v27 }
 0x351   :  { %v478_v36 = vsel %vm395_vm4, %v477_v34, %v474_v29 }
 0x352   :  { %v481_v37 = vpop.permute.xlu0 %480  ;;  %v492_v38 = vperm.slane %v478_v36, 0 }
 0x353   :  { %v489_v39 = vsel %vm391_vm2, %v4407_v57, %v481_v37 }
 0x354   :  { %v493_v44 = vmul.f32 %v492_v38, %v4367_v10  ;;  %v494_v45 = vmul.f32 %v492_v38, %v4375_v13 }
 0x356   :  { %v484_v40 = vpop.permute.xlu1 %483 }
 0x357   :  { %v490_v42 = vsel %vm393_vm3, %v489_v39, %v484_v40 }
 0x358   :  { %v491_v43 = vsel %vm395_vm4, %v490_v42, %v487_v41  ;;  %v765_v41 = vld [vmem:[#allocation4 + $0x3f00] ss:$0 sm:$0xff] }
 0x359   :  { %v495_v46 = vperm.slane %v491_v43, 0 }
 0x35b   :  { %v496_v47 = vadd.f32 %v495_v46, %v493_v44  ;;  %v497_v48 = vadd.f32 %v495_v46, %v494_v45  ;;  %v778_v46 = vld [vmem:[#allocation4 + $0x3f20] ss:$0 sm:$0xff] }
 0x35d   :  { %v498_v51 = vmax.f32 %v496_v47, 0.0  ;;  %v499_v52 = vmax.f32 %v497_v48, 0.0  ;;  %v845_v48 = vld [vmem:[#allocation4 + $0xc20] sm:$0xff] }
 0x35f   :  { %587 = vmatmul.f32.vlgmr.msra.gmra.mxu3 %v498_v51  ;;  %607 = vmatmul.f32.vlgmr.msrb.gmra.mxu0 %v499_v52 }
 0x360   :  { %627 = vmatmul.f32.vlgmr.msrb.gmra.mxu1 %v498_v51  ;;  %647 = vmatmul.f32.vlgmr.msrb.gmra.mxu2 %v499_v52  ;;  %v877_v51 = vld [vmem:[#allocation4 + $0xe20] sm:$0xff]  ;;  %v846_v52 = vld [vmem:[#allocation4 + $0xc28] sm:$0xff] }
 0x361   :  { %886 = vmatpush.msra.mxu3 %v845_v48  ;;  %906 = vmatpush.msrb.mxu0 %v877_v51  ;;  %v817_v48 = vld [vmem:[#allocation4 + $0xa60] sm:$0xff] }
 0x362   :  { %926 = vmatpush.msrb.mxu1 %v846_v52  ;;  %946 = vmatpush.msrb.mxu2 %v878_v55  ;;  %v849_v51 = vld [vmem:[#allocation4 + $0xc60] sm:$0xff]  ;;  %v818_v52 = vld [vmem:[#allocation4 + $0xa68] sm:$0xff] }
 0x363   :  { %v850_v55 = vld [vmem:[#allocation4 + $0xc68] sm:$0xff] }
 0x3dc   :  { %v608_v3 = vpop.f32.mrf.mxu0 }
 0x3dd   :  { %v628_v58 = vpop.f32.mrf.mxu1 }
 0x3de   :  { %v629_v61 = vadd.f32 %v628_v58, %v568_v56  ;;  %v843_v56 = vld [vmem:[#allocation4 + $0xc00] sm:$0xff] }
 0x3df   :  { %v875_v58 = vld [vmem:[#allocation4 + $0xe00] sm:$0xff]  ;;  %887 = vmatpush.msra.mxu3 %v843_v56 }
 0x3e0   :  { %907 = vmatpush.msrb.mxu0 %v875_v58  ;;  %v815_v56 = vld [vmem:[#allocation4 + $0xa40] sm:$0xff] }
 0x3e1   :  { %v847_v58 = vld [vmem:[#allocation4 + $0xc40] sm:$0xff] }
 0x3e2   :  { %v588_v62 = vpop.f32.mrf.mxu3 }
 0x3e3   :  { %v589_v0 = vadd.f32 %v588_v62, %v567_v59  ;;  %v648_v1 = vpop.f32.mrf.mxu2  ;;  %v844_v59 = vld [vmem:[#allocation4 + $0xc08] sm:$0xff]  ;;  %v841_v62 = vld [vmem:[#allocation4 + $0xbe0] sm:$0xff] }
 0x3e4   :  { %v4491_v4 = vadd.f32 %v648_v1, %v629_v61  ;;  %v876_v61 = vld [vmem:[#allocation4 + $0xe08] sm:$0xff]  ;;  %927 = vmatpush.msrb.mxu1 %v844_v59  ;;  %888 = vmatpush.msra.mxu3 %v841_v62  ;;  %v1094_v62 = vld [vmem:[#allocation4 + $0x1220] sm:$0xff] }
 0x3e5   :  { %v4493_v5 = vadd.f32 %v608_v3, %v589_v0  ;;  %v873_v0 = vld [vmem:[#allocation4 + $0xde0] sm:$0xff]  ;;  %v842_v1 = vld [vmem:[#allocation4 + $0xbe8] sm:$0xff]  ;;  %947 = vmatpush.msrb.mxu2 %v876_v61 }
 0x3e6   :  { %687 = vmatmul.f32.vlgmr.msra.gmra.mxu0 %v4491_v4  ;;  %v874_v3 = vld [vmem:[#allocation4 + $0xde8] sm:$0xff]  ;;  %928 = vmatpush.msrb.mxu1 %v842_v1  ;;  %v1030_v1 = vld [vmem:[#allocation4 + $0x1020] sm:$0xff] }
 0x3e7   :  { %667 = vmatmul.f32.vlgmr.msrb.gmra.mxu3 %v4493_v5  ;;  %908 = vmatpush.msrb.mxu0 %v873_v0  ;;  %v816_v59 = vld [vmem:[#allocation4 + $0xa48] sm:$0xff] }
 0x3e8   :  { %948 = vmatpush.msrb.mxu2 %v874_v3  ;;  %v848_v61 = vld [vmem:[#allocation4 + $0xc48] sm:$0xff]  ;;  %v1090_v3 = vld [vmem:[#allocation4 + $0x1200] sm:$0xff] }
 0x3e9   :  { %v1095_v0 = vld [vmem:[#allocation4 + $0x1228] sm:$0xff] }
 0x463   :  { %v688_v2 = vpop.f32.mrf.mxu0 }
 0x46a   :  { %v668_v10 = vpop.f32.mrf.mxu3 }
 0x46b   :  { %v689_v6 = vadd.f32 %v688_v2, %v668_v10  ;;  %v839_v2 = vld [vmem:[#allocation4 + $0xbc0] sm:$0xff] }
 0x46c   :  { %v871_v10 = vld [vmem:[#allocation4 + $0xdc0] sm:$0xff]  ;;  %889 = vmatpush.msra.mxu3 %v839_v2  ;;  %v1031_v2 = vld [vmem:[#allocation4 + $0x1028] sm:$0xff] }
 0x46d   :  { %v691_v13 = vsel %vm372_vm1, %v689_v6, 0.0  ;;  %v840_v6 = vld [vmem:[#allocation4 + $0xbc8] sm:$0xff]  ;;  %909 = vmatpush.msrb.mxu0 %v871_v10 }
 0x46e   :  { %v692_v50 = vrot.slane %v691_v13, 4  ;;  %929 = vmatpush.msrb.mxu1 %v840_v6  ;;  %v1091_v10 = vld [vmem:[#allocation4 + $0x1208] sm:$0xff]  ;;  %v1026_v6 = vld [vmem:[#allocation4 + $0x1000] sm:$0xff] }
 0x470   :  { %v693_v57 = vadd.f32 %v692_v50, %v691_v13  ;;  %v872_v13 = vld [vmem:[#allocation4 + $0xdc8] sm:$0xff]  ;;  %v837_v50 = vld [vmem:[#allocation4 + $0xba0] sm:$0xff] }
 0x471   :  { %949 = vmatpush.msrb.mxu2 %v872_v13  ;;  %890 = vmatpush.msra.mxu3 %v837_v50  ;;  %v1086_v13 = vld [vmem:[#allocation4 + $0x11e0] sm:$0xff]  ;;  %v1027_v50 = vld [vmem:[#allocation4 + $0x1008] sm:$0xff] }
 0x472   :  { %v694_v28 = vrot.slane %v693_v57, 2 }
 0x474   :  { %v695_v30 = vadd.f32 %v694_v28, %v693_v57  ;;  %v869_v57 = vld [vmem:[#allocation4 + $0xda0] sm:$0xff]  ;;  %v838_v28 = vld [vmem:[#allocation4 + $0xba8] sm:$0xff] }
 0x475   :  { %910 = vmatpush.msrb.mxu0 %v869_v57  ;;  %930 = vmatpush.msrb.mxu1 %v838_v28  ;;  %v1087_v57 = vld [vmem:[#allocation4 + $0x11e8] sm:$0xff]  ;;  %v1022_v28 = vld [vmem:[#allocation4 + $0xfe0] sm:$0xff] }
 0x476   :  { %v696_v32 = vrot.slane %v695_v30, 1 }
 0x478   :  { %v697_v35 = vadd.f32 %v696_v32, %v695_v30  ;;  %v870_v30 = vld [vmem:[#allocation4 + $0xda8] sm:$0xff]  ;;  %v835_v32 = vld [vmem:[#allocation4 + $0xb80] sm:$0xff] }
 0x479   :  { %950 = vmatpush.msrb.mxu2 %v870_v30  ;;  %891 = vmatpush.msra.mxu3 %v835_v32  ;;  %v1082_v30 = vld [vmem:[#allocation4 + $0x11c0] sm:$0xff]  ;;  %v1023_v32 = vld [vmem:[#allocation4 + $0xfe8] sm:$0xff] }
 0x47a   :  { %v698_v49 = vmul.f32 0.0625, %v697_v35  ;;  %v867_v35 = vld [vmem:[#allocation4 + $0xd80] sm:$0xff] }
 0x47b   :  { %911 = vmatpush.msrb.mxu0 %v867_v35  ;;  %v1083_v35 = vld [vmem:[#allocation4 + $0x11c8] sm:$0xff] }
 0x47c   :  { %706 = vrot.lane.b32.xlu2 %v698_v49, %s4220_s0  ;;  %703 = vrot.lane.b32.xlu1 %v698_v49, %s4221_s1 }
 0x47d   :  { %700 = vrot.lane.b32.xlu0 %v698_v49, %s4219_s20 }
 0x4d6   :  { %v707_v8 = vpop.permute.xlu2 %706 }
 0x4ee   :  { %v704_v53 = vpop.permute.xlu1 %703 }
 0x4ef   :  { %v701_v54 = vpop.permute.xlu0 %700 }
 0x4f0   :  { %v709_v60 = vsel %vm391_vm2, %v698_v49, %v701_v54  ;;  %v833_v54 = vld [vmem:[#allocation4 + $0xb60] sm:$0xff] }
 0x4f1   :  { %v710_v9 = vsel %vm393_vm3, %v709_v60, %v704_v53  ;;  %v868_v53 = vld [vmem:[#allocation4 + $0xd88] sm:$0xff]  ;;  %v865_v60 = vld [vmem:[#allocation4 + $0xd60] sm:$0xff]  ;;  %892 = vmatpush.msra.mxu3 %v833_v54 }
 0x4f2   :  { %v711_v26 = vsel %vm395_vm4, %v710_v9, %v707_v8  ;;  %v834_v8 = vld [vmem:[#allocation4 + $0xb68] sm:$0xff]  ;;  %951 = vmatpush.msrb.mxu2 %v868_v53  ;;  %912 = vmatpush.msrb.mxu0 %v865_v60  ;;  %v1078_v54 = vld [vmem:[#allocation4 + $0x11a0] sm:$0xff] }
 0x4f3   :  { %v712_v11 = vperm.slane %v711_v26, 0  ;;  %v866_v9 = vld [vmem:[#allocation4 + $0xd68] sm:$0xff]  ;;  %v831_v26 = vld [vmem:[#allocation4 + $0xb40] sm:$0xff] }
 0x4f4   :  { %952 = vmatpush.msrb.mxu2 %v866_v9  ;;  %893 = vmatpush.msra.mxu3 %v831_v26  ;;  %v1019_v53 = vld [vmem:[#allocation4 + $0xfc8] sm:$0xff]  ;;  %v1074_v26 = vld [vmem:[#allocation4 + $0x1180] sm:$0xff] }
 0x4f5   :  { %v713_v12 = vsub.f32 %v4493_v5, %v712_v11  ;;  %v714_v16 = vsub.f32 %v4491_v4, %v712_v11  ;;  %v863_v11 = vld [vmem:[#allocation4 + $0xd40] sm:$0xff]  ;;  %v1079_v60 = vld [vmem:[#allocation4 + $0x11a8] sm:$0xff] }
 0x4f6   :  { %913 = vmatpush.msrb.mxu0 %v863_v11  ;;  %v1015_v9 = vld [vmem:[#allocation4 + $0xfa8] sm:$0xff] }
 0x4f7   :  { %v715_v17 = vmul.f32 %v713_v12, %v713_v12  ;;  %v716_v18 = vmul.f32 %v714_v16, %v714_v16  ;;  %v832_v12 = vld [vmem:[#allocation4 + $0xb48] sm:$0xff] }
 0x4f8   :  { %v864_v16 = vld [vmem:[#allocation4 + $0xd48] sm:$0xff] }
 0x4f9   :  { %733 = vmatmul.f32.vlgmr.msra.gmra.mxu1 %v715_v17  ;;  %753 = vmatmul.f32.vlgmr.msra.gmra.mxu2 %v716_v18  ;;  %v829_v17 = vld [vmem:[#allocation4 + $0xb20] sm:$0xff]  ;;  %v1075_v11 = vld [vmem:[#allocation4 + $0x1188] sm:$0xff] }
 0x4fa   :  { %953 = vmatpush.msrb.mxu2 %v864_v16  ;;  %v861_v18 = vld [vmem:[#allocation4 + $0xd20] sm:$0xff]  ;;  %894 = vmatpush.msra.mxu3 %v829_v17  ;;  %v1011_v16 = vld [vmem:[#allocation4 + $0xf88] sm:$0xff] }
 0x4fb   :  { %914 = vmatpush.msrb.mxu0 %v861_v18  ;;  %v1070_v17 = vld [vmem:[#allocation4 + $0x1160] sm:$0xff]  ;;  %v1071_v18 = vld [vmem:[#allocation4 + $0x1168] sm:$0xff] }
 0x576   :  { %v734_v19 = vpop.f32.mrf.mxu1 }
 0x57c   :  { %v754_v20 = vpop.f32.mrf.mxu2 }
 0x57d   :  { %v755_v21 = vadd.f32 %v754_v20, %v734_v19  ;;  %v830_v19 = vld [vmem:[#allocation4 + $0xb28] sm:$0xff] }
 0x57e   :  { %v862_v20 = vld [vmem:[#allocation4 + $0xd28] sm:$0xff] }
 0x57f   :  { %v757_v22 = vsel %vm372_vm1, %v755_v21, 0.0  ;;  %954 = vmatpush.msrb.mxu2 %v862_v20  ;;  %v827_v21 = vld [vmem:[#allocation4 + $0xb00] sm:$0xff]  ;;  %v1007_v20 = vld [vmem:[#allocation4 + $0xf68] sm:$0xff] }
 0x580   :  { %v758_v23 = vrot.slane %v757_v22, 4  ;;  %895 = vmatpush.msra.mxu3 %v827_v21 }
 0x582   :  { %v759_v24 = vadd.f32 %v758_v23, %v757_v22  ;;  %v859_v22 = vld [vmem:[#allocation4 + $0xd00] sm:$0xff]  ;;  %v828_v23 = vld [vmem:[#allocation4 + $0xb08] sm:$0xff] }
 0x583   :  { %915 = vmatpush.msrb.mxu0 %v859_v22  ;;  %v1066_v22 = vld [vmem:[#allocation4 + $0x1140] sm:$0xff] }
 0x584   :  { %v760_v25 = vrot.slane %v759_v24, 2 }
 0x586   :  { %v761_v27 = vadd.f32 %v760_v25, %v759_v24  ;;  %v860_v24 = vld [vmem:[#allocation4 + $0xd08] sm:$0xff]  ;;  %v825_v25 = vld [vmem:[#allocation4 + $0xae0] sm:$0xff] }
 0x587   :  { %955 = vmatpush.msrb.mxu2 %v860_v24  ;;  %896 = vmatpush.msra.mxu3 %v825_v25 }
 0x588   :  { %v762_v29 = vrot.slane %v761_v27, 1 }
 0x58a   :  { %v763_v31 = vadd.f32 %v762_v29, %v761_v27  ;;  %v857_v27 = vld [vmem:[#allocation4 + $0xce0] sm:$0xff]  ;;  %v826_v29 = vld [vmem:[#allocation4 + $0xae8] sm:$0xff] }
 0x58b   :  { %916 = vmatpush.msrb.mxu0 %v857_v27  ;;  %v1002_v27 = vld [vmem:[#allocation4 + $0xf40] sm:$0xff] }
 0x58c   :  { %v764_v33 = vmul.f32 0.0625, %v763_v31  ;;  %v858_v31 = vld [vmem:[#allocation4 + $0xce8] sm:$0xff] }
 0x58d   :  { %956 = vmatpush.msrb.mxu2 %v858_v31 }
 0x58e   :  { %v766_v34 = vadd.f32 1e-05, %v764_v33  ;;  %v823_v33 = vld [vmem:[#allocation4 + $0xac0] sm:$0xff] }
 0x58f   :  { %897 = vmatpush.msra.mxu3 %v823_v33  ;;  %v1062_v33 = vld [vmem:[#allocation4 + $0x1120] sm:$0xff] }
 0x590   :  { %4026 = vrsqrt.f32 %v766_v34  ;;  %vm773_vm9 = vweird.f32 %v766_v34 }
 0x596   :  { %v4027_v36 = vpop.eup %4026 }
 0x597   :  { %v768_v37 = vmul.f32 %v4027_v36, %v766_v34  ;;  %vm774_vm8 = vweird.f32 %v4027_v36  ;;  %v855_v34 = vld [vmem:[#allocation4 + $0xcc0] sm:$0xff] }
 0x598   :  { %vm775_vm10 = vmor %vm773_vm9, %vm774_vm8  ;;  %917 = vmatpush.msrb.mxu0 %v855_v34  ;;  %v1063_v34 = vld [vmem:[#allocation4 + $0x1128] sm:$0xff] }
 0x599   :  { %v769_v38 = vmul.f32 %v4027_v36, %v768_v37  ;;  %v856_v37 = vld [vmem:[#allocation4 + $0xcc8] sm:$0xff] }
 0x59a   :  { %957 = vmatpush.msrb.mxu2 %v856_v37  ;;  %v998_v37 = vld [vmem:[#allocation4 + $0xf20] sm:$0xff] }
 0x59b   :  { %v770_v39 = vmul.f32 0.5, %v769_v38  ;;  %v821_v38 = vld [vmem:[#allocation4 + $0xaa0] sm:$0xff] }
 0x59c   :  { %898 = vmatpush.msra.mxu3 %v821_v38  ;;  %v999_v38 = vld [vmem:[#allocation4 + $0xf28] sm:$0xff] }
 0x59d   :  { %v771_v40 = vsub.f32 1.5, %v770_v39  ;;  %v853_v39 = vld [vmem:[#allocation4 + $0xca0] sm:$0xff] }
 0x59e   :  { %918 = vmatpush.msrb.mxu0 %v853_v39  ;;  %v1058_v39 = vld [vmem:[#allocation4 + $0x1100] sm:$0xff] }
 0x59f   :  { %v772_v42 = vmul.f32 %v4027_v36, %v771_v40  ;;  %v822_v40 = vld [vmem:[#allocation4 + $0xaa8] sm:$0xff] }
 0x5a1   :  { %v776_v43 = vsel %vm775_vm10, %v4027_v36, %v772_v42  ;;  %v824_v36 = vld [vmem:[#allocation4 + $0xac8] sm:$0xff]  ;;  %v819_v42 = vld [vmem:[#allocation4 + $0xa80] sm:$0xff] }
 0x5a2   :  { %v4507_v44 = vmul.f32 %v776_v43, %v765_v41  ;;  %v854_v41 = vld [vmem:[#allocation4 + $0xca8] sm:$0xff]  ;;  %v851_v43 = vld [vmem:[#allocation4 + $0xc80] sm:$0xff]  ;;  %899 = vmatpush.msra.mxu3 %v819_v42 }
 0x5a3   :  { %958 = vmatpush.msrb.mxu2 %v854_v41  ;;  %919 = vmatpush.msrb.mxu0 %v851_v43  ;;  %v994_v41 = vld [vmem:[#allocation4 + $0xf00] sm:$0xff]  ;;  %v995_v42 = vld [vmem:[#allocation4 + $0xf08] sm:$0xff] }
 0x5a4   :  { %788 = vrot.lane.b32.xlu2 %v4507_v44, %s4220_s0  ;;  %785 = vrot.lane.b32.xlu1 %v4507_v44, %s4221_s1  ;;  %v779_v45 = vmul.f32 %v4507_v44, %v698_v49  ;;  %v836_v49 = vld [vmem:[#allocation4 + $0xb88] sm:$0xff]  ;;  %v1054_v43 = vld [vmem:[#allocation4 + $0x10e0] sm:$0xff] }
 0x5a5   :  { %782 = vrot.lane.b32.xlu0 %v4507_v44, %s4219_s20  ;;  %931 = vmatpush.msrb.mxu1 %v836_v49  ;;  %v1018_v49 = vld [vmem:[#allocation4 + $0xfc0] sm:$0xff] }
 0x5a6   :  { %v4516_v47 = vsub.f32 %v778_v46, %v779_v45  ;;  %v820_v45 = vld [vmem:[#allocation4 + $0xa88] sm:$0xff]  ;;  %900 = vmatpush.msra.mxu3 %v817_v48  ;;  %920 = vmatpush.msrb.mxu0 %v849_v51 }
 0x5a7   :  { %932 = vmatpush.msrb.mxu1 %v834_v8  ;;  %v852_v46 = vld [vmem:[#allocation4 + $0xc88] sm:$0xff]  ;;  %v1014_v8 = vld [vmem:[#allocation4 + $0xfa0] sm:$0xff] }
 0x5a8   :  { %959 = vmatpush.msrb.mxu2 %v852_v46  ;;  %901 = vmatpush.msra.mxu3 %v815_v56  ;;  %v990_v46 = vld [vmem:[#allocation4 + $0xee0] sm:$0xff]  ;;  %v991_v48 = vld [vmem:[#allocation4 + $0xee8] sm:$0xff] }
 0x5a9   :  { %933 = vmatpush.msrb.mxu1 %v832_v12  ;;  %921 = vmatpush.msrb.mxu0 %v847_v58  ;;  %v1010_v12 = vld [vmem:[#allocation4 + $0xf80] sm:$0xff] }
 0x5aa   :  { %960 = vmatpush.msrb.mxu2 %v850_v55  ;;  %1109 = vmatpush.msrb.mxu3 %v1030_v1  ;;  %v1051_v55 = vld [vmem:[#allocation4 + $0x10c8] sm:$0xff] }
 0x5ab   :  { %934 = vmatpush.msrb.mxu1 %v830_v19  ;;  %1129 = vmatpush.msra.mxu0 %v1094_v62  ;;  %v1006_v19 = vld [vmem:[#allocation4 + $0xf60] sm:$0xff]  ;;  %v1047_v1 = vld [vmem:[#allocation4 + $0x10a8] sm:$0xff] }
 0x5ac   :  { %801 = vrot.lane.b32.xlu2 %v4516_v47, %s4220_s0  ;;  %798 = vrot.lane.b32.xlu1 %v4516_v47, %s4221_s1 }
 0x5ad   :  { %795 = vrot.lane.b32.xlu0 %v4516_v47, %s4219_s20  ;;  %935 = vmatpush.msrb.mxu1 %v828_v23  ;;  %v1067_v23 = vld [vmem:[#allocation4 + $0x1148] sm:$0xff] }
 0x5ae   :  { %961 = vmatpush.msrb.mxu2 %v848_v61  ;;  %1130 = vmatpush.msra.mxu0 %v1090_v3  ;;  %v987_v61 = vld [vmem:[#allocation4 + $0xec8] sm:$0xff] }
 0x5af   :  { %936 = vmatpush.msrb.mxu1 %v826_v29  ;;  %1110 = vmatpush.msrb.mxu3 %v1026_v6  ;;  %v1003_v29 = vld [vmem:[#allocation4 + $0xf48] sm:$0xff] }
 0x5b0   :  { %1169 = vmatpush.msra.mxu2 %v1095_v0  ;;  %1131 = vmatpush.msra.mxu0 %v1086_v13  ;;  %v1046_v0 = vld [vmem:[#allocation4 + $0x10a0] sm:$0xff]  ;;  %v983_v6 = vld [vmem:[#allocation4 + $0xea8] sm:$0xff] }
 0x5b1   :  { %937 = vmatpush.msrb.mxu1 %v824_v36  ;;  %1111 = vmatpush.msrb.mxu3 %v1022_v28 }
 0x5b2   :  { %1170 = vmatpush.msra.mxu2 %v1091_v10  ;;  %1132 = vmatpush.msra.mxu0 %v1082_v30  ;;  %v982_v10 = vld [vmem:[#allocation4 + $0xea0] sm:$0xff] }
 0x5b3   :  { %938 = vmatpush.msrb.mxu1 %v822_v40  ;;  %1112 = vmatpush.msrb.mxu3 %v1018_v49  ;;  %v1059_v40 = vld [vmem:[#allocation4 + $0x1108] sm:$0xff]  ;;  %v1038_v49 = vld [vmem:[#allocation4 + $0x1060] sm:$0xff] }
 0x5b4   :  { %1171 = vmatpush.msra.mxu2 %v1087_v57  ;;  %1133 = vmatpush.msra.mxu0 %v1078_v54  ;;  %v1043_v57 = vld [vmem:[#allocation4 + $0x1088] sm:$0xff] }
 0x5b5   :  { %939 = vmatpush.msrb.mxu1 %v820_v45  ;;  %1113 = vmatpush.msrb.mxu3 %v1014_v8  ;;  %v1055_v45 = vld [vmem:[#allocation4 + $0x10e8] sm:$0xff]  ;;  %v974_v8 = vld [vmem:[#allocation4 + $0xe60] sm:$0xff] }
 0x5b6   :  { %1172 = vmatpush.msra.mxu2 %v1083_v35  ;;  %1134 = vmatpush.msra.mxu0 %v1074_v26  ;;  %v979_v35 = vld [vmem:[#allocation4 + $0xe88] sm:$0xff] }
 0x5b7   :  { %940 = vmatpush.msrb.mxu1 %v818_v52  ;;  %1114 = vmatpush.msrb.mxu3 %v1010_v12  ;;  %v1050_v52 = vld [vmem:[#allocation4 + $0x10c0] sm:$0xff]  ;;  %v1096_v12 = vld [vmem:[#allocation4 + $0x1230] sm:$0xff] }
 0x5b8   :  { %1173 = vmatpush.msra.mxu2 %v1079_v60  ;;  %1135 = vmatpush.msra.mxu0 %v1070_v17  ;;  %v970_v17 = vld [vmem:[#allocation4 + $0xe40] sm:$0xff] }
 0x5b9   :  { %941 = vmatpush.msrb.mxu1 %v816_v59  ;;  %1115 = vmatpush.msrb.mxu3 %v1006_v19  ;;  %v986_v59 = vld [vmem:[#allocation4 + $0xec0] sm:$0xff]  ;;  %v1032_v19 = vld [vmem:[#allocation4 + $0x1030] sm:$0xff] }
 0x5ba   :  { %1174 = vmatpush.msra.mxu2 %v1075_v11  ;;  %1136 = vmatpush.msra.mxu0 %v1066_v22  ;;  %v1035_v11 = vld [vmem:[#allocation4 + $0x1048] sm:$0xff]  ;;  %v1093_v22 = vld [vmem:[#allocation4 + $0x1218] sm:$0xff] }
 0x5bb   :  { %1149 = vmatpush.msra.mxu1 %v1031_v2  ;;  %1116 = vmatpush.msrb.mxu3 %v1002_v27  ;;  %v1089_v27 = vld [vmem:[#allocation4 + $0x11f8] sm:$0xff] }
 0x5bc   :  { %1175 = vmatpush.msra.mxu2 %v1071_v18  ;;  %1137 = vmatpush.msra.mxu0 %v1062_v33  ;;  %v971_v18 = vld [vmem:[#allocation4 + $0xe48] sm:$0xff]  ;;  %v1025_v33 = vld [vmem:[#allocation4 + $0xff8] sm:$0xff] }
 0x5bd   :  { %1150 = vmatpush.msra.mxu1 %v1027_v50  ;;  %1117 = vmatpush.msrb.mxu3 %v998_v37  ;;  %v1042_v50 = vld [vmem:[#allocation4 + $0x1080] sm:$0xff]  ;;  %v1080_v37 = vld [vmem:[#allocation4 + $0x11b0] sm:$0xff] }
 0x5be   :  { %1176 = vmatpush.msra.mxu2 %v1067_v23  ;;  %1138 = vmatpush.msra.mxu0 %v1058_v39  ;;  %v1028_v23 = vld [vmem:[#allocation4 + $0x1010] sm:$0xff]  ;;  %v1081_v39 = vld [vmem:[#allocation4 + $0x11b8] sm:$0xff] }
 0x5bf   :  { %1151 = vmatpush.msra.mxu1 %v1023_v32  ;;  %1118 = vmatpush.msrb.mxu3 %v994_v41  ;;  %v978_v32 = vld [vmem:[#allocation4 + $0xe80] sm:$0xff]  ;;  %v1076_v41 = vld [vmem:[#allocation4 + $0x1190] sm:$0xff] }
 0x5c0   :  { %1177 = vmatpush.msra.mxu2 %v1063_v34  ;;  %1139 = vmatpush.msra.mxu0 %v1054_v43  ;;  %v1085_v34 = vld [vmem:[#allocation4 + $0x11d8] sm:$0xff]  ;;  %v1012_v43 = vld [vmem:[#allocation4 + $0xf90] sm:$0xff] }
 0x5c1   :  { %1152 = vmatpush.msra.mxu1 %v1019_v53  ;;  %1119 = vmatpush.msrb.mxu3 %v990_v46  ;;  %v1039_v53 = vld [vmem:[#allocation4 + $0x1068] sm:$0xff]  ;;  %v1013_v46 = vld [vmem:[#allocation4 + $0xf98] sm:$0xff] }
 0x5c2   :  { %1178 = vmatpush.msra.mxu2 %v1059_v40  ;;  %1140 = vmatpush.msra.mxu0 %v1050_v52  ;;  %v1016_v40 = vld [vmem:[#allocation4 + $0xfb0] sm:$0xff] }
 0x5c3   :  { %1153 = vmatpush.msra.mxu1 %v1015_v9  ;;  %1120 = vmatpush.msrb.mxu3 %v986_v59  ;;  %v975_v9 = vld [vmem:[#allocation4 + $0xe68] sm:$0xff]  ;;  %v1068_v52 = vld [vmem:[#allocation4 + $0x1150] sm:$0xff] }
 0x5c4   :  { %1179 = vmatpush.msra.mxu2 %v1055_v45  ;;  %1141 = vmatpush.msra.mxu0 %v1046_v0  ;;  %v1072_v45 = vld [vmem:[#allocation4 + $0x1170] sm:$0xff] }
 0x5c5   :  { %1154 = vmatpush.msra.mxu1 %v1011_v16  ;;  %1121 = vmatpush.msrb.mxu3 %v982_v10  ;;  %v1097_v16 = vld [vmem:[#allocation4 + $0x1238] sm:$0xff]  ;;  %v1064_v59 = vld [vmem:[#allocation4 + $0x1130] sm:$0xff] }
 0x5c6   :  { %1180 = vmatpush.msra.mxu2 %v1051_v55  ;;  %1142 = vmatpush.msra.mxu0 %v1042_v50  ;;  %v1009_v55 = vld [vmem:[#allocation4 + $0xf78] sm:$0xff]  ;;  %v1000_v0 = vld [vmem:[#allocation4 + $0xf30] sm:$0xff] }
 0x5c7   :  { %1155 = vmatpush.msra.mxu1 %v1007_v20  ;;  %1122 = vmatpush.msrb.mxu3 %v978_v32  ;;  %v1092_v20 = vld [vmem:[#allocation4 + $0x1210] sm:$0xff]  ;;  %v1057_v50 = vld [vmem:[#allocation4 + $0x10f8] sm:$0xff] }
 0x5c8   :  { %1181 = vmatpush.msra.mxu2 %v1047_v1  ;;  %1143 = vmatpush.msra.mxu0 %v1038_v49  ;;  %v1060_v1 = vld [vmem:[#allocation4 + $0x1110] sm:$0xff]  ;;  %v989_v49 = vld [vmem:[#allocation4 + $0xed8] sm:$0xff] }
 0x5c9   :  { %1156 = vmatpush.msra.mxu1 %v1003_v29  ;;  %1123 = vmatpush.msrb.mxu3 %v974_v8  ;;  %v1024_v29 = vld [vmem:[#allocation4 + $0xff0] sm:$0xff]  ;;  %v985_v8 = vld [vmem:[#allocation4 + $0xeb8] sm:$0xff] }
 0x5ca   :  { %1182 = vmatpush.msra.mxu2 %v1043_v57  ;;  %v996_v10 = vld [vmem:[#allocation4 + $0xf10] sm:$0xff] }
 0x5cb   :  { %1157 = vmatpush.msra.mxu1 %v999_v38  ;;  %1124 = vmatpush.msrb.mxu3 %v970_v17  ;;  %v1021_v38 = vld [vmem:[#allocation4 + $0xfd8] sm:$0xff]  ;;  %v992_v57 = vld [vmem:[#allocation4 + $0xef0] sm:$0xff] }
 0x5cc   :  { %1183 = vmatpush.msra.mxu2 %v1039_v53  ;;  %v988_v32 = vld [vmem:[#allocation4 + $0xed0] sm:$0xff]  ;;  %v1049_v53 = vld [vmem:[#allocation4 + $0x10b8] sm:$0xff] }
 0x5cd   :  { %1158 = vmatpush.msra.mxu1 %v995_v42  ;;  %v1017_v42 = vld [vmem:[#allocation4 + $0xfb8] sm:$0xff] }
 0x5ce   :  { %1184 = vmatpush.msra.mxu2 %v1035_v11  ;;  %v1041_v11 = vld [vmem:[#allocation4 + $0x1078] sm:$0xff] }
 0x5cf   :  { %1159 = vmatpush.msra.mxu1 %v991_v48  ;;  %v1073_v48 = vld [vmem:[#allocation4 + $0x1178] sm:$0xff] }
 0x5d0   :  { %v977_v17 = vld [vmem:[#allocation4 + $0xe78] sm:$0xff] }
 0x5d1   :  { %1160 = vmatpush.msra.mxu1 %v987_v61  ;;  %v1005_v61 = vld [vmem:[#allocation4 + $0xf58] sm:$0xff] }
 0x5d3   :  { %1161 = vmatpush.msra.mxu1 %v983_v6  ;;  %v1056_v6 = vld [vmem:[#allocation4 + $0x10f0] sm:$0xff] }
 0x5d5   :  { %1162 = vmatpush.msra.mxu1 %v979_v35  ;;  %v1048_v35 = vld [vmem:[#allocation4 + $0x10b0] sm:$0xff] }
 0x5d7   :  { %1163 = vmatpush.msra.mxu1 %v975_v9  ;;  %v1045_v9 = vld [vmem:[#allocation4 + $0x1098] sm:$0xff] }
 0x5d9   :  { %1164 = vmatpush.msra.mxu1 %v971_v18  ;;  %v1037_v18 = vld [vmem:[#allocation4 + $0x1058] sm:$0xff] }
 0x5fe   :  { %v789_v24 = vpop.permute.xlu2 %788 }
 0x606   :  { %v802_v3 = vpop.permute.xlu2 %801 }
 0x616   :  { %v786_v21 = vpop.permute.xlu1 %785 }
 0x617   :  { %v783_v25 = vpop.permute.xlu0 %782 }
 0x618   :  { %v791_v31 = vsel %vm391_vm2, %v4507_v44, %v783_v25  ;;  %v1029_v25 = vld [vmem:[#allocation4 + $0x1018] sm:$0xff] }
 0x619   :  { %v792_v36 = vsel %vm393_vm3, %v791_v31, %v786_v21  ;;  %v1033_v21 = vld [vmem:[#allocation4 + $0x1038] sm:$0xff]  ;;  %v1084_v31 = vld [vmem:[#allocation4 + $0x11d0] sm:$0xff] }
 0x61a   :  { %v793_v44 = vsel %vm395_vm4, %v792_v36, %v789_v24  ;;  %v1088_v24 = vld [vmem:[#allocation4 + $0x11f0] sm:$0xff] }
 0x61b   :  { %v807_v56 = vperm.slane %v793_v44, 0  ;;  %v1020_v36 = vld [vmem:[#allocation4 + $0xfd0] sm:$0xff]  ;;  %v1077_v44 = vld [vmem:[#allocation4 + $0x1198] sm:$0xff] }
 0x61d   :  { %v808_v28 = vmul.f32 %v807_v56, %v4493_v5 }
 0x61e   :  { %v799_v51 = vpop.permute.xlu1 %798 }
 0x61f   :  { %v796_v58 = vpop.permute.xlu0 %795 }
 0x620   :  { %v804_v62 = vsel %vm391_vm2, %v4516_v47, %v796_v58  ;;  %v809_v47 = vmul.f32 %v807_v56, %v4491_v4  ;;  %v1034_v4 = vld [vmem:[#allocation4 + $0x1040] sm:$0xff]  ;;  %v1069_v56 = vld [vmem:[#allocation4 + $0x1158] sm:$0xff]  ;;  %v1004_v58 = vld [vmem:[#allocation4 + $0xf50] sm:$0xff] }
 0x621   :  { %v805_v2 = vsel %vm393_vm3, %v804_v62, %v799_v51  ;;  %1144 = vmatpush.msra.mxu0 %v1034_v4  ;;  %v1008_v51 = vld [vmem:[#allocation4 + $0xf70] sm:$0xff]  ;;  %v1065_v62 = vld [vmem:[#allocation4 + $0x1138] sm:$0xff] }
 0x622   :  { %v806_v13 = vsel %vm395_vm4, %v805_v2, %v802_v3  ;;  %v1001_v3 = vld [vmem:[#allocation4 + $0xf38] sm:$0xff] }
 0x623   :  { %v810_v30 = vperm.slane %v806_v13, 0  ;;  %v1061_v2 = vld [vmem:[#allocation4 + $0x1118] sm:$0xff] }
 0x624   :  { %v997_v13 = vld [vmem:[#allocation4 + $0xf18] sm:$0xff] }
 0x625   :  { %v811_v54 = vadd.f32 %v810_v30, %v808_v28  ;;  %v812_v60 = vadd.f32 %v810_v30, %v809_v47  ;;  %v1052_v28 = vld [vmem:[#allocation4 + $0x10d0] sm:$0xff]  ;;  %v993_v47 = vld [vmem:[#allocation4 + $0xef8] sm:$0xff] }
 0x626   :  { %v1053_v30 = vld [vmem:[#allocation4 + $0x10d8] sm:$0xff] }
 0x627   :  { %v813_v5 = vmax.f32 %v811_v54, 0.0  ;;  %v814_v26 = vmax.f32 %v812_v60, 0.0  ;;  %v984_v54 = vld [vmem:[#allocation4 + $0xeb0] sm:$0xff]  ;;  %v981_v4 = vld [vmem:[#allocation4 + $0xe98] sm:$0xff] }
 0x628   :  { %v1044_v60 = vld [vmem:[#allocation4 + $0x1090] sm:$0xff] }
 0x629   :  { %902 = vmatmul.f32.vlgmr.msra.gmra.mxu3 %v813_v5  ;;  %922 = vmatmul.f32.vlgmr.msrb.gmra.mxu0 %v814_v26 }
 0x62a   :  { %942 = vmatmul.f32.vlgmr.msrb.gmra.mxu1 %v813_v5  ;;  %962 = vmatmul.f32.vlgmr.msrb.gmra.mxu2 %v814_v26  ;;  %v980_v5 = vld [vmem:[#allocation4 + $0xe90] sm:$0xff] }
 0x62b   :  { %1209 = vmatpush.msrb.mxu0 %v1096_v12  ;;  %1249 = vmatpush.msrb.mxu2 %v1097_v16  ;;  %v1040_v26 = vld [vmem:[#allocation4 + $0x1070] sm:$0xff] }
 0x62c   :  { %1189 = vmatpush.msra.mxu3 %v1032_v19  ;;  %1229 = vmatpush.msrb.mxu1 %v1033_v21  ;;  %v976_v12 = vld [vmem:[#allocation4 + $0xe70] sm:$0xff]  ;;  %v214_v21 = vld [vmem:[#allocation4 + $0x3e80] ss:$8 sm:$0x3] }
 0x62d   :  { %1210 = vmatpush.msrb.mxu0 %v1092_v20  ;;  %1250 = vmatpush.msrb.mxu2 %v1093_v22  ;;  %v1036_v16 = vld [vmem:[#allocation4 + $0x1050] sm:$0xff]  ;;  %v973_v20 = vld [vmem:[#allocation4 + $0xe58] sm:$0xff]  ;;  %v880_v22 = vld [vmem:[#allocation4 + $0x3f40] ss:$8 sm:$0x3] }
 0x62e   :  { %1190 = vmatpush.msra.mxu3 %v1028_v23  ;;  %1230 = vmatpush.msrb.mxu1 %v1029_v25  ;;  %v972_v19 = vld [vmem:[#allocation4 + $0xe50] sm:$0xff]  ;;  %v216_v23 = vperm.slane %v214_v21, 0  ;;  %v883_v25 = vperm.slane %v880_v22, 1 }
 0x62f   :  { %1211 = vmatpush.msrb.mxu0 %v1088_v24  ;;  %1251 = vmatpush.msrb.mxu2 %v1089_v27  ;;  %v217_v24 = vperm.slane %v214_v21, 1  ;;  %v1481_v21 = vld [vmem:[#allocation4 + $0x18e0] sm:$0xff] }
 0x630   :  { %1191 = vmatpush.msra.mxu3 %v1024_v29  ;;  %1231 = vmatpush.msrb.mxu1 %v1025_v33  ;;  %v882_v29 = vperm.slane %v880_v22, 0  ;;  %v1417_v22 = vld [vmem:[#allocation4 + $0x16e0] sm:$0xff] }
 0x631   :  { %1212 = vmatpush.msrb.mxu0 %v1084_v31  ;;  %1252 = vmatpush.msrb.mxu2 %v1085_v34  ;;  %v238_v31 = vadd.f32 %v4382_v14, %v216_v23  ;;  %v278_v33 = vadd.f32 %v4395_v63, %v217_v24  ;;  %v1521_v14 = vld [vmem:[#allocation4 + $0x1a20] sm:$0xff] }
 0x632   :  { %1192 = vmatpush.msra.mxu3 %v1020_v36  ;;  %1232 = vmatpush.msrb.mxu1 %v1021_v38  ;;  %v1457_v63 = vld [vmem:[#allocation4 + $0x1820] sm:$0xff] }
 0x633   :  { %1213 = vmatpush.msrb.mxu0 %v1080_v37  ;;  %1253 = vmatpush.msrb.mxu2 %v1081_v39  ;;  %v298_v39 = vadd.f32 %v4397_v7, %v278_v33  ;;  %v1517_v7 = vld [vmem:[#allocation4 + $0x1a00] sm:$0xff] }
 0x634   :  { %1193 = vmatpush.msra.mxu3 %v1016_v40  ;;  %1233 = vmatpush.msrb.mxu1 %v1017_v42  ;;  %v258_v42 = vadd.f32 %v4384_v15, %v238_v31  ;;  %v1385_v15 = vld [vmem:[#allocation4 + $0x15e0] sm:$0xff] }
 0x635   :  { %1214 = vmatpush.msrb.mxu0 %v1076_v41  ;;  %1254 = vmatpush.msrb.mxu2 %v1077_v44  ;;  %v1349_v23 = vld [vmem:[#allocation4 + $0x14c0] sm:$0xff] }
 0x636   :  { %1194 = vmatpush.msra.mxu3 %v1012_v43  ;;  %1234 = vmatpush.msrb.mxu1 %v1013_v46  ;;  %v1285_v24 = vld [vmem:[#allocation4 + $0x12c0] sm:$0xff] }
 0x637   :  { %1215 = vmatpush.msrb.mxu0 %v1072_v45  ;;  %1255 = vmatpush.msrb.mxu2 %v1073_v48  ;;  %v1281_v31 = vld [vmem:[#allocation4 + $0x12a0] sm:$0xff] }
 0x638   :  { %1195 = vmatpush.msra.mxu3 %v1008_v51  ;;  %1235 = vmatpush.msrb.mxu1 %v1009_v55  ;;  %v1393_v51 = vld [vmem:[#allocation4 + $0x1620] sm:$0xff] }
 0x639   :  { %1216 = vmatpush.msrb.mxu0 %v1068_v52  ;;  %1256 = vmatpush.msrb.mxu2 %v1069_v56  ;;  %v1329_v52 = vld [vmem:[#allocation4 + $0x1420] sm:$0xff] }
 0x63a   :  { %1196 = vmatpush.msra.mxu3 %v1004_v58  ;;  %1236 = vmatpush.msrb.mxu1 %v1005_v61  ;;  %v1389_v55 = vld [vmem:[#allocation4 + $0x1600] sm:$0xff] }
 0x63b   :  { %1217 = vmatpush.msrb.mxu0 %v1064_v59  ;;  %1257 = vmatpush.msrb.mxu2 %v1065_v62  ;;  %v1325_v56 = vld [vmem:[#allocation4 + $0x1400] sm:$0xff] }
 0x63c   :  { %1197 = vmatpush.msra.mxu3 %v1000_v0  ;;  %1237 = vmatpush.msrb.mxu1 %v1001_v3  ;;  %v1453_v58 = vld [vmem:[#allocation4 + $0x1800] sm:$0xff] }
 0x63d   :  { %1218 = vmatpush.msrb.mxu0 %v1060_v1  ;;  %1258 = vmatpush.msrb.mxu2 %v1061_v2  ;;  %v1321_v59 = vld [vmem:[#allocation4 + $0x13e0] sm:$0xff] }
 0x63e   :  { %1198 = vmatpush.msra.mxu3 %v996_v10  ;;  %1238 = vmatpush.msrb.mxu1 %v997_v13  ;;  %v1513_v61 = vld [vmem:[#allocation4 + $0x19e0] sm:$0xff] }
 0x63f   :  { %1219 = vmatpush.msrb.mxu0 %v1056_v6  ;;  %1259 = vmatpush.msrb.mxu2 %v1057_v50  ;;  %v1449_v62 = vld [vmem:[#allocation4 + $0x17e0] sm:$0xff] }
 0x640   :  { %1199 = vmatpush.msra.mxu3 %v992_v57  ;;  %1239 = vmatpush.msrb.mxu1 %v993_v47  ;;  %v1381_v0 = vld [vmem:[#allocation4 + $0x15c0] sm:$0xff] }
 0x641   :  { %1220 = vmatpush.msrb.mxu0 %v1052_v28  ;;  %1260 = vmatpush.msrb.mxu2 %v1053_v30  ;;  %v1317_v1 = vld [vmem:[#allocation4 + $0x13c0] sm:$0xff] }
 0x642   :  { %1200 = vmatpush.msra.mxu3 %v988_v32  ;;  %1240 = vmatpush.msrb.mxu1 %v989_v49  ;;  %v1509_v3 = vld [vmem:[#allocation4 + $0x19c0] sm:$0xff] }
 0x643   :  { %1221 = vmatpush.msrb.mxu0 %v1048_v35  ;;  %1261 = vmatpush.msrb.mxu2 %v1049_v53  ;;  %v1445_v2 = vld [vmem:[#allocation4 + $0x17c0] sm:$0xff] }
 0x644   :  { %1201 = vmatpush.msra.mxu3 %v984_v54  ;;  %1241 = vmatpush.msrb.mxu1 %v985_v8  ;;  %v1377_v10 = vld [vmem:[#allocation4 + $0x15a0] sm:$0xff] }
 0x645   :  { %1222 = vmatpush.msrb.mxu0 %v1044_v60  ;;  %1262 = vmatpush.msrb.mxu2 %v1045_v9  ;;  %v1313_v6 = vld [vmem:[#allocation4 + $0x13a0] sm:$0xff] }
 0x646   :  { %1202 = vmatpush.msra.mxu3 %v980_v5  ;;  %1242 = vmatpush.msrb.mxu1 %v981_v4  ;;  %v1505_v13 = vld [vmem:[#allocation4 + $0x19a0] sm:$0xff] }
 0x647   :  { %1223 = vmatpush.msrb.mxu0 %v1040_v26  ;;  %1263 = vmatpush.msrb.mxu2 %v1041_v11  ;;  %v1441_v50 = vld [vmem:[#allocation4 + $0x17a0] sm:$0xff] }
 0x648   :  { %1203 = vmatpush.msra.mxu3 %v976_v12  ;;  %1243 = vmatpush.msrb.mxu1 %v977_v17  ;;  %v1373_v57 = vld [vmem:[#allocation4 + $0x1580] sm:$0xff] }
 0x649   :  { %1224 = vmatpush.msrb.mxu0 %v1036_v16  ;;  %1264 = vmatpush.msrb.mxu2 %v1037_v18  ;;  %v1309_v28 = vld [vmem:[#allocation4 + $0x1380] sm:$0xff] }
 0x64a   :  { %1204 = vmatpush.msra.mxu3 %v972_v19  ;;  %1244 = vmatpush.msrb.mxu1 %v973_v20  ;;  %v1501_v47 = vld [vmem:[#allocation4 + $0x1980] sm:$0xff] }
 0x64b   :  { %v1437_v30 = vld [vmem:[#allocation4 + $0x1780] sm:$0xff] }
 0x64c   :  { %v1369_v32 = vld [vmem:[#allocation4 + $0x1560] sm:$0xff] }
 0x64d   :  { %v1305_v35 = vld [vmem:[#allocation4 + $0x1360] sm:$0xff] }
 0x64e   :  { %v1497_v49 = vld [vmem:[#allocation4 + $0x1960] sm:$0xff] }
 0x64f   :  { %v1433_v53 = vld [vmem:[#allocation4 + $0x1760] sm:$0xff] }
 0x650   :  { %v1365_v54 = vld [vmem:[#allocation4 + $0x1540] sm:$0xff] }
 0x651   :  { %v1301_v60 = vld [vmem:[#allocation4 + $0x1340] sm:$0xff] }
 0x652   :  { %v1493_v8 = vld [vmem:[#allocation4 + $0x1940] sm:$0xff] }
 0x653   :  { %v1429_v9 = vld [vmem:[#allocation4 + $0x1740] sm:$0xff] }
 0x654   :  { %v1361_v5 = vld [vmem:[#allocation4 + $0x1520] sm:$0xff] }
 0x655   :  { %v1297_v26 = vld [vmem:[#allocation4 + $0x1320] sm:$0xff] }
 0x656   :  { %v1489_v4 = vld [vmem:[#allocation4 + $0x1920] sm:$0xff] }
 0x657   :  { %v1425_v11 = vld [vmem:[#allocation4 + $0x1720] sm:$0xff] }
 0x658   :  { %v1357_v12 = vld [vmem:[#allocation4 + $0x1500] sm:$0xff] }
 0x659   :  { %v1293_v16 = vld [vmem:[#allocation4 + $0x1300] sm:$0xff] }
 0x65a   :  { %v1485_v17 = vld [vmem:[#allocation4 + $0x1900] sm:$0xff] }
 0x65b   :  { %v1421_v18 = vld [vmem:[#allocation4 + $0x1700] sm:$0xff] }
 0x65c   :  { %v1353_v19 = vld [vmem:[#allocation4 + $0x14e0] sm:$0xff] }
 0x65d   :  { %v1289_v20 = vld [vmem:[#allocation4 + $0x12e0] sm:$0xff] }
 0x65e   :  { %v1473_v33 = vld [vmem:[#allocation4 + $0x18a0] sm:$0xff] }
 0x6a6   :  { %v923_v40 = vpop.f32.mrf.mxu0 }
 0x6a7   :  { %v943_v27 = vpop.f32.mrf.mxu1 }
 0x6a8   :  { %v944_v34 = vadd.f32 %v943_v27, %v883_v25  ;;  %v1477_v25 = vld [vmem:[#allocation4 + $0x18c0] sm:$0xff] }
 0x6a9   :  { %v1413_v27 = vld [vmem:[#allocation4 + $0x16c0] sm:$0xff] }
 0x6ac   :  { %v903_v36 = vpop.f32.mrf.mxu3 }
 0x6ad   :  { %v904_v37 = vadd.f32 %v903_v36, %v882_v29  ;;  %v963_v38 = vpop.f32.mrf.mxu2  ;;  %v1345_v29 = vld [vmem:[#allocation4 + $0x14a0] sm:$0xff] }
 0x6ae   :  { %v964_v41 = vadd.f32 %v963_v38, %v944_v34  ;;  %v1409_v34 = vld [vmem:[#allocation4 + $0x16a0] sm:$0xff] }
 0x6af   :  { %v924_v44 = vadd.f32 %v923_v40, %v904_v37  ;;  %v1341_v36 = vld [vmem:[#allocation4 + $0x1480] sm:$0xff] }
 0x6b0   :  { %v967_v43 = vadd.f32 %v964_v41, %v298_v39  ;;  %v1277_v37 = vld [vmem:[#allocation4 + $0x1280] sm:$0xff] }
 0x6b1   :  { %v966_v45 = vadd.f32 %v924_v44, %v258_v42  ;;  %v1469_v38 = vld [vmem:[#allocation4 + $0x1880] sm:$0xff] }
 0x6b2   :  { %v969_v46 = vmax.f32 %v967_v43, 0.0  ;;  %v1405_v39 = vld [vmem:[#allocation4 + $0x1680] sm:$0xff] }
 0x6b3   :  { %v968_v48 = vmax.f32 %v966_v45, 0.0  ;;  %v1337_v40 = vld [vmem:[#allocation4 + $0x1460] sm:$0xff] }
 0x6b4   :  { %1145 = vmatmul.f32.vlgmr.msra.gmra.mxu0 %v969_v46  ;;  %1185 = vmatmul.f32.vlgmr.msra.gmra.mxu2 %v969_v46  ;;  %v1273_v41 = vld [vmem:[#allocation4 + $0x1260] sm:$0xff] }
 0x6b5   :  { %1125 = vmatmul.f32.vlgmr.msrb.gmra.mxu3 %v968_v48  ;;  %1165 = vmatmul.f32.vlgmr.msra.gmra.mxu1 %v968_v48  ;;  %v1465_v42 = vld [vmem:[#allocation4 + $0x1860] sm:$0xff] }
 0x6b6   :  { %1556 = vmatpush.msra.mxu0 %v1393_v51  ;;  %1536 = vmatpush.msrb.mxu3 %v1329_v52  ;;  %v1401_v44 = vld [vmem:[#allocation4 + $0x1660] sm:$0xff] }
 0x6b7   :  { %1596 = vmatpush.msra.mxu2 %v1521_v14  ;;  %1576 = vmatpush.msra.mxu1 %v1457_v63  ;;  %v1333_v43 = vld [vmem:[#allocation4 + $0x1440] sm:$0xff]  ;;  %v1390_v14 = vld [vmem:[#allocation4 + $0x1608] sm:$0xff] }
 0x6b8   :  { %1557 = vmatpush.msra.mxu0 %v1389_v55  ;;  %1537 = vmatpush.msrb.mxu3 %v1325_v56  ;;  %v1269_v45 = vld [vmem:[#allocation4 + $0x1240] sm:$0xff]  ;;  %v1326_v63 = vld [vmem:[#allocation4 + $0x1408] sm:$0xff] }
 0x6b9   :  { %1597 = vmatpush.msra.mxu2 %v1517_v7  ;;  %1577 = vmatpush.msra.mxu1 %v1453_v58  ;;  %v1461_v51 = vld [vmem:[#allocation4 + $0x1840] sm:$0xff]  ;;  %v1522_v55 = vld [vmem:[#allocation4 + $0x1a28] sm:$0xff] }
 0x6ba   :  { %1558 = vmatpush.msra.mxu0 %v1385_v15  ;;  %1538 = vmatpush.msrb.mxu3 %v1321_v59  ;;  %v1397_v52 = vld [vmem:[#allocation4 + $0x1640] sm:$0xff]  ;;  %v1458_v56 = vld [vmem:[#allocation4 + $0x1828] sm:$0xff] }
 0x6bb   :  { %1598 = vmatpush.msra.mxu2 %v1513_v61  ;;  %1578 = vmatpush.msra.mxu1 %v1449_v62  ;;  %v1386_v7 = vld [vmem:[#allocation4 + $0x15e8] sm:$0xff] }
 0x6bc   :  { %1225 = vmatmul.f32.vlgmr.msrb.gmra.mxu0 %v969_v46  ;;  %1265 = vmatmul.f32.vlgmr.msrb.gmra.mxu2 %v969_v46  ;;  %v1394_v46 = vld [vmem:[#allocation4 + $0x1628] sm:$0xff] }
 0x6bd   :  { %1205 = vmatmul.f32.vlgmr.msra.gmra.mxu3 %v968_v48  ;;  %1245 = vmatmul.f32.vlgmr.msrb.gmra.mxu1 %v968_v48  ;;  %v1330_v48 = vld [vmem:[#allocation4 + $0x1428] sm:$0xff] }
 0x6be   :  { %1559 = vmatpush.msra.mxu0 %v1381_v0  ;;  %1539 = vmatpush.msrb.mxu3 %v1317_v1  ;;  %v1322_v58 = vld [vmem:[#allocation4 + $0x13e8] sm:$0xff] }
 0x6bf   :  { %1599 = vmatpush.msra.mxu2 %v1509_v3  ;;  %1579 = vmatpush.msra.mxu1 %v1445_v2  ;;  %v1518_v15 = vld [vmem:[#allocation4 + $0x1a08] sm:$0xff] }
 0x6c0   :  { %1560 = vmatpush.msra.mxu0 %v1377_v10  ;;  %1540 = vmatpush.msrb.mxu3 %v1313_v6  ;;  %v1454_v59 = vld [vmem:[#allocation4 + $0x1808] sm:$0xff] }
 0x6c1   :  { %1600 = vmatpush.msra.mxu2 %v1505_v13  ;;  %1580 = vmatpush.msra.mxu1 %v1441_v50  ;;  %v1382_v61 = vld [vmem:[#allocation4 + $0x15c8] sm:$0xff] }
 0x6c2   :  { %1561 = vmatpush.msra.mxu0 %v1373_v57  ;;  %1541 = vmatpush.msrb.mxu3 %v1309_v28  ;;  %v1318_v62 = vld [vmem:[#allocation4 + $0x13c8] sm:$0xff] }
 0x6c3   :  { %1601 = vmatpush.msra.mxu2 %v1501_v47  ;;  %1581 = vmatpush.msra.mxu1 %v1437_v30  ;;  %v1514_v0 = vld [vmem:[#allocation4 + $0x19e8] sm:$0xff] }
 0x6c4   :  { %1562 = vmatpush.msra.mxu0 %v1369_v32  ;;  %1542 = vmatpush.msrb.mxu3 %v1305_v35  ;;  %v1450_v1 = vld [vmem:[#allocation4 + $0x17e8] sm:$0xff] }
 0x6c5   :  { %1602 = vmatpush.msra.mxu2 %v1497_v49  ;;  %1582 = vmatpush.msra.mxu1 %v1433_v53  ;;  %v1378_v3 = vld [vmem:[#allocation4 + $0x15a8] sm:$0xff] }
 0x6c6   :  { %1563 = vmatpush.msra.mxu0 %v1365_v54  ;;  %1543 = vmatpush.msrb.mxu3 %v1301_v60  ;;  %v1314_v2 = vld [vmem:[#allocation4 + $0x13a8] sm:$0xff] }
 0x6c7   :  { %1603 = vmatpush.msra.mxu2 %v1493_v8  ;;  %1583 = vmatpush.msra.mxu1 %v1429_v9  ;;  %v1510_v10 = vld [vmem:[#allocation4 + $0x19c8] sm:$0xff] }
 0x6c8   :  { %1564 = vmatpush.msra.mxu0 %v1361_v5  ;;  %1544 = vmatpush.msrb.mxu3 %v1297_v26  ;;  %v1446_v6 = vld [vmem:[#allocation4 + $0x17c8] sm:$0xff] }
 0x6c9   :  { %1604 = vmatpush.msra.mxu2 %v1489_v4  ;;  %1584 = vmatpush.msra.mxu1 %v1425_v11  ;;  %v1374_v13 = vld [vmem:[#allocation4 + $0x1588] sm:$0xff] }
 0x6ca   :  { %1565 = vmatpush.msra.mxu0 %v1357_v12  ;;  %1545 = vmatpush.msrb.mxu3 %v1293_v16  ;;  %v1310_v50 = vld [vmem:[#allocation4 + $0x1388] sm:$0xff] }
 0x6cb   :  { %1605 = vmatpush.msra.mxu2 %v1485_v17  ;;  %1585 = vmatpush.msra.mxu1 %v1421_v18  ;;  %v1506_v57 = vld [vmem:[#allocation4 + $0x19a8] sm:$0xff] }
 0x6cc   :  { %1566 = vmatpush.msra.mxu0 %v1353_v19  ;;  %1546 = vmatpush.msrb.mxu3 %v1289_v20  ;;  %v1442_v28 = vld [vmem:[#allocation4 + $0x17a8] sm:$0xff] }
 0x6cd   :  { %1606 = vmatpush.msra.mxu2 %v1481_v21  ;;  %1586 = vmatpush.msra.mxu1 %v1417_v22  ;;  %v1370_v47 = vld [vmem:[#allocation4 + $0x1568] sm:$0xff] }
 0x6ce   :  { %1567 = vmatpush.msra.mxu0 %v1349_v23  ;;  %1547 = vmatpush.msrb.mxu3 %v1285_v24  ;;  %v1306_v30 = vld [vmem:[#allocation4 + $0x1368] sm:$0xff] }
 0x6cf   :  { %1607 = vmatpush.msra.mxu2 %v1477_v25  ;;  %1587 = vmatpush.msra.mxu1 %v1413_v27  ;;  %v1502_v32 = vld [vmem:[#allocation4 + $0x1988] sm:$0xff] }
 0x6d0   :  { %1568 = vmatpush.msra.mxu0 %v1345_v29  ;;  %1548 = vmatpush.msrb.mxu3 %v1281_v31  ;;  %v1366_v35 = vld [vmem:[#allocation4 + $0x1548] sm:$0xff] }
 0x6d1   :  { %1608 = vmatpush.msra.mxu2 %v1473_v33  ;;  %1588 = vmatpush.msra.mxu1 %v1409_v34  ;;  %v1302_v49 = vld [vmem:[#allocation4 + $0x1348] sm:$0xff] }
 0x6d2   :  { %1569 = vmatpush.msra.mxu0 %v1341_v36  ;;  %1549 = vmatpush.msrb.mxu3 %v1277_v37  ;;  %v1498_v53 = vld [vmem:[#allocation4 + $0x1968] sm:$0xff] }
 0x6d3   :  { %1609 = vmatpush.msra.mxu2 %v1469_v38  ;;  %1589 = vmatpush.msra.mxu1 %v1405_v39  ;;  %v1362_v54 = vld [vmem:[#allocation4 + $0x1528] sm:$0xff] }
 0x6d4   :  { %1570 = vmatpush.msra.mxu0 %v1337_v40  ;;  %1550 = vmatpush.msrb.mxu3 %v1273_v41  ;;  %v1298_v60 = vld [vmem:[#allocation4 + $0x1328] sm:$0xff] }
 0x6d5   :  { %1610 = vmatpush.msra.mxu2 %v1465_v42  ;;  %1590 = vmatpush.msra.mxu1 %v1401_v44  ;;  %v1358_v8 = vld [vmem:[#allocation4 + $0x1508] sm:$0xff] }
 0x6d6   :  { %1571 = vmatpush.msra.mxu0 %v1333_v43  ;;  %1551 = vmatpush.msrb.mxu3 %v1269_v45  ;;  %v1354_v9 = vld [vmem:[#allocation4 + $0x14e8] sm:$0xff] }
 0x6d7   :  { %1611 = vmatpush.msra.mxu2 %v1461_v51  ;;  %1591 = vmatpush.msra.mxu1 %v1397_v52  ;;  %v1294_v5 = vld [vmem:[#allocation4 + $0x1308] sm:$0xff] }
 0x6d8   :  { %1636 = vmatpush.msrb.mxu0 %v1394_v46  ;;  %1616 = vmatpush.msra.mxu3 %v1330_v48  ;;  %v1350_v26 = vld [vmem:[#allocation4 + $0x14c8] sm:$0xff] }
 0x6d9   :  { %1676 = vmatpush.msrb.mxu2 %v1522_v55  ;;  %1656 = vmatpush.msrb.mxu1 %v1458_v56  ;;  %v1438_v4 = vld [vmem:[#allocation4 + $0x1788] sm:$0xff] }
 0x6da   :  { %1637 = vmatpush.msrb.mxu0 %v1390_v14  ;;  %1617 = vmatpush.msra.mxu3 %v1326_v63  ;;  %v1494_v11 = vld [vmem:[#allocation4 + $0x1948] sm:$0xff] }
 0x6db   :  { %1677 = vmatpush.msrb.mxu2 %v1518_v15  ;;  %1657 = vmatpush.msrb.mxu1 %v1454_v59  ;;  %v1290_v12 = vld [vmem:[#allocation4 + $0x12e8] sm:$0xff]  ;;  %v1395_v59 = vld [vmem:[#allocation4 + $0x1630] sm:$0xff] }
 0x6dc   :  { %1638 = vmatpush.msrb.mxu0 %v1386_v7  ;;  %1618 = vmatpush.msra.mxu3 %v1322_v58  ;;  %v1346_v16 = vld [vmem:[#allocation4 + $0x14a8] sm:$0xff] }
 0x6dd   :  { %1678 = vmatpush.msrb.mxu2 %v1514_v0  ;;  %1658 = vmatpush.msrb.mxu1 %v1450_v1  ;;  %v1434_v17 = vld [vmem:[#allocation4 + $0x1768] sm:$0xff]  ;;  %v1391_v0 = vld [vmem:[#allocation4 + $0x1610] sm:$0xff] }
 0x6de   :  { %1639 = vmatpush.msrb.mxu0 %v1382_v61  ;;  %1619 = vmatpush.msra.mxu3 %v1318_v62  ;;  %v1490_v18 = vld [vmem:[#allocation4 + $0x1928] sm:$0xff] }
 0x6df   :  { %1679 = vmatpush.msrb.mxu2 %v1510_v10  ;;  %1659 = vmatpush.msrb.mxu1 %v1446_v6  ;;  %v1286_v19 = vld [vmem:[#allocation4 + $0x12c8] sm:$0xff]  ;;  %v1387_v10 = vld [vmem:[#allocation4 + $0x15f0] sm:$0xff] }
 0x6e0   :  { %1640 = vmatpush.msrb.mxu0 %v1378_v3  ;;  %1620 = vmatpush.msra.mxu3 %v1314_v2  ;;  %v1342_v20 = vld [vmem:[#allocation4 + $0x1488] sm:$0xff]  ;;  %v1331_v2 = vld [vmem:[#allocation4 + $0x1430] sm:$0xff] }
 0x6e1   :  { %1680 = vmatpush.msrb.mxu2 %v1506_v57  ;;  %1660 = vmatpush.msrb.mxu1 %v1442_v28  ;;  %v1430_v21 = vld [vmem:[#allocation4 + $0x1748] sm:$0xff]  ;;  %v1327_v6 = vld [vmem:[#allocation4 + $0x1410] sm:$0xff] }
 0x6e2   :  { %1641 = vmatpush.msrb.mxu0 %v1374_v13  ;;  %1621 = vmatpush.msra.mxu3 %v1310_v50  ;;  %v1486_v22 = vld [vmem:[#allocation4 + $0x1908] sm:$0xff]  ;;  %v1383_v57 = vld [vmem:[#allocation4 + $0x15d0] sm:$0xff] }
 0x6e3   :  { %1681 = vmatpush.msrb.mxu2 %v1502_v32  ;;  %1661 = vmatpush.msrb.mxu1 %v1438_v4  ;;  %v1282_v23 = vld [vmem:[#allocation4 + $0x12a8] sm:$0xff]  ;;  %v1323_v32 = vld [vmem:[#allocation4 + $0x13f0] sm:$0xff] }
 0x6e4   :  { %1642 = vmatpush.msrb.mxu0 %v1370_v47  ;;  %1622 = vmatpush.msra.mxu3 %v1306_v30  ;;  %v1338_v24 = vld [vmem:[#allocation4 + $0x1468] sm:$0xff]  ;;  %v1315_v4 = vld [vmem:[#allocation4 + $0x13b0] sm:$0xff] }
 0x6e5   :  { %1682 = vmatpush.msrb.mxu2 %v1498_v53  ;;  %1662 = vmatpush.msrb.mxu1 %v1434_v17  ;;  %v1426_v25 = vld [vmem:[#allocation4 + $0x1728] sm:$0xff]  ;;  %v1523_v53 = vld [vmem:[#allocation4 + $0x1a30] sm:$0xff] }
 0x6e6   :  { %1643 = vmatpush.msrb.mxu0 %v1366_v35  ;;  %1623 = vmatpush.msra.mxu3 %v1302_v49  ;;  %v1482_v27 = vld [vmem:[#allocation4 + $0x18e8] sm:$0xff]  ;;  %v1379_v35 = vld [vmem:[#allocation4 + $0x15b0] sm:$0xff] }
 0x6e7   :  { %1683 = vmatpush.msrb.mxu2 %v1494_v11  ;;  %1663 = vmatpush.msrb.mxu1 %v1430_v21  ;;  %v1278_v29 = vld [vmem:[#allocation4 + $0x1288] sm:$0xff]  ;;  %v1459_v11 = vld [vmem:[#allocation4 + $0x1830] sm:$0xff] }
 0x6e8   :  { %1644 = vmatpush.msrb.mxu0 %v1362_v54  ;;  %1624 = vmatpush.msra.mxu3 %v1298_v60  ;;  %v1334_v31 = vld [vmem:[#allocation4 + $0x1448] sm:$0xff]  ;;  %v1319_v60 = vld [vmem:[#allocation4 + $0x13d0] sm:$0xff] }
 0x6e9   :  { %1684 = vmatpush.msrb.mxu2 %v1490_v18  ;;  %1664 = vmatpush.msrb.mxu1 %v1426_v25  ;;  %v1422_v33 = vld [vmem:[#allocation4 + $0x1708] sm:$0xff]  ;;  %v1311_v17 = vld [vmem:[#allocation4 + $0x1390] sm:$0xff] }
 0x6ea   :  { %1645 = vmatpush.msrb.mxu0 %v1358_v8  ;;  %1625 = vmatpush.msra.mxu3 %v1294_v5  ;;  %v1478_v34 = vld [vmem:[#allocation4 + $0x18c8] sm:$0xff]  ;;  %v1375_v8 = vld [vmem:[#allocation4 + $0x1590] sm:$0xff] }
 0x6eb   :  { %1685 = vmatpush.msrb.mxu2 %v1486_v22  ;;  %1665 = vmatpush.msrb.mxu1 %v1422_v33  ;;  %v1274_v36 = vld [vmem:[#allocation4 + $0x1268] sm:$0xff]  ;;  %v1519_v5 = vld [vmem:[#allocation4 + $0x1a10] sm:$0xff] }
 0x6ec   :  { %1646 = vmatpush.msrb.mxu0 %v1354_v9  ;;  %1626 = vmatpush.msra.mxu3 %v1290_v12  ;;  %v1418_v37 = vld [vmem:[#allocation4 + $0x16e8] sm:$0xff]  ;;  %v1515_v12 = vld [vmem:[#allocation4 + $0x19f0] sm:$0xff] }
 0x6ed   :  { %1686 = vmatpush.msrb.mxu2 %v1482_v27  ;;  %v1474_v38 = vld [vmem:[#allocation4 + $0x18a8] sm:$0xff]  ;;  %1666 = vmatpush.msrb.mxu1 %v1418_v37  ;;  %v1455_v18 = vld [vmem:[#allocation4 + $0x1810] sm:$0xff] }
 0x6ee   :  { %1647 = vmatpush.msrb.mxu0 %v1350_v26  ;;  %1627 = vmatpush.msra.mxu3 %v1286_v19  ;;  %v1270_v39 = vld [vmem:[#allocation4 + $0x1248] sm:$0xff]  ;;  %v1371_v26 = vld [vmem:[#allocation4 + $0x1570] sm:$0xff] }
 0x6ef   :  { %1687 = vmatpush.msrb.mxu2 %v1478_v34  ;;  %v1414_v40 = vld [vmem:[#allocation4 + $0x16c8] sm:$0xff]  ;;  %v1511_v19 = vld [vmem:[#allocation4 + $0x19d0] sm:$0xff] }
 0x6f0   :  { %1648 = vmatpush.msrb.mxu0 %v1346_v16  ;;  %1628 = vmatpush.msra.mxu3 %v1282_v23  ;;  %v1470_v41 = vld [vmem:[#allocation4 + $0x1888] sm:$0xff]  ;;  %v1367_v16 = vld [vmem:[#allocation4 + $0x1550] sm:$0xff] }
 0x6f1   :  { %1688 = vmatpush.msrb.mxu2 %v1474_v38  ;;  %1667 = vmatpush.msrb.mxu1 %v1414_v40  ;;  %v1410_v42 = vld [vmem:[#allocation4 + $0x16a8] sm:$0xff]  ;;  %v1307_v21 = vld [vmem:[#allocation4 + $0x1370] sm:$0xff] }
 0x6f2   :  { %1649 = vmatpush.msrb.mxu0 %v1342_v20  ;;  %1629 = vmatpush.msra.mxu3 %v1278_v29  ;;  %v1466_v44 = vld [vmem:[#allocation4 + $0x1868] sm:$0xff]  ;;  %v1363_v20 = vld [vmem:[#allocation4 + $0x1530] sm:$0xff] }
 0x6f3   :  { %1689 = vmatpush.msrb.mxu2 %v1470_v41  ;;  %1668 = vmatpush.msrb.mxu1 %v1410_v42  ;;  %v1406_v43 = vld [vmem:[#allocation4 + $0x1688] sm:$0xff]  ;;  %v1451_v22 = vld [vmem:[#allocation4 + $0x17f0] sm:$0xff] }
 0x6f4   :  { %1650 = vmatpush.msrb.mxu0 %v1338_v24  ;;  %1630 = vmatpush.msra.mxu3 %v1274_v36  ;;  %v1462_v45 = vld [vmem:[#allocation4 + $0x1848] sm:$0xff]  ;;  %v1507_v23 = vld [vmem:[#allocation4 + $0x19b0] sm:$0xff] }
 0x6f5   :  { %1690 = vmatpush.msrb.mxu2 %v1466_v44  ;;  %1669 = vmatpush.msrb.mxu1 %v1406_v43  ;;  %v1402_v46 = vld [vmem:[#allocation4 + $0x1668] sm:$0xff]  ;;  %v1303_v24 = vld [vmem:[#allocation4 + $0x1350] sm:$0xff] }
 0x6f6   :  { %1651 = vmatpush.msrb.mxu0 %v1334_v31  ;;  %1631 = vmatpush.msra.mxu3 %v1270_v39  ;;  %v1398_v48 = vld [vmem:[#allocation4 + $0x1648] sm:$0xff]  ;;  %v1359_v25 = vld [vmem:[#allocation4 + $0x1510] sm:$0xff] }
 0x6f7   :  { %1691 = vmatpush.msrb.mxu2 %v1462_v45  ;;  %1670 = vmatpush.msrb.mxu1 %v1402_v46  ;;  %v1099_v51 = vld [vmem:[#allocation4 + $0x3f60] ss:$8 sm:$0xf] }
 0x6f8   :  { %v1102_v52 = vperm.slane %v1099_v51, 1  ;;  %v1101_v63 = vperm.slane %v1099_v51, 0  ;;  %v1104_v62 = vperm.slane %v1099_v51, 3  ;;  %v1103_v13 = vperm.slane %v1099_v51, 2  ;;  %v1447_v27 = vld [vmem:[#allocation4 + $0x17d0] sm:$0xff] }
 0x6f9   :  { %1671 = vmatpush.msrb.mxu1 %v1398_v48  ;;  %v1503_v29 = vld [vmem:[#allocation4 + $0x1990] sm:$0xff] }
 0x6fa   :  { %v1299_v31 = vld [vmem:[#allocation4 + $0x1330] sm:$0xff] }
 0x6fb   :  { %v1355_v33 = vld [vmem:[#allocation4 + $0x14f0] sm:$0xff] }
 0x6fc   :  { %v1443_v34 = vld [vmem:[#allocation4 + $0x17b0] sm:$0xff] }
 0x6fd   :  { %v1499_v36 = vld [vmem:[#allocation4 + $0x1970] sm:$0xff] }
 0x6fe   :  { %v1295_v37 = vld [vmem:[#allocation4 + $0x1310] sm:$0xff] }
 0x6ff   :  { %v1351_v38 = vld [vmem:[#allocation4 + $0x14d0] sm:$0xff] }
 0x700   :  { %v1439_v39 = vld [vmem:[#allocation4 + $0x1790] sm:$0xff] }
 0x701   :  { %v1495_v40 = vld [vmem:[#allocation4 + $0x1950] sm:$0xff] }
 0x702   :  { %v1291_v41 = vld [vmem:[#allocation4 + $0x12f0] sm:$0xff] }
 0x703   :  { %v1347_v42 = vld [vmem:[#allocation4 + $0x14b0] sm:$0xff] }
 0x704   :  { %v1435_v44 = vld [vmem:[#allocation4 + $0x1770] sm:$0xff] }
 0x705   :  { %v1491_v43 = vld [vmem:[#allocation4 + $0x1930] sm:$0xff] }
 0x706   :  { %v1287_v45 = vld [vmem:[#allocation4 + $0x12d0] sm:$0xff] }
 0x707   :  { %v1343_v46 = vld [vmem:[#allocation4 + $0x1490] sm:$0xff] }
 0x708   :  { %v1431_v48 = vld [vmem:[#allocation4 + $0x1750] sm:$0xff] }
 0x709   :  { %v1487_v51 = vld [vmem:[#allocation4 + $0x1910] sm:$0xff] }
 0x731   :  { %v1146_v7 = vpop.f32.mrf.mxu0 }
 0x732   :  { %v1166_v14 = vpop.f32.mrf.mxu1 }
 0x733   :  { %v1167_v55 = vadd.f32 %v1166_v14, %v1102_v52  ;;  %v1283_v52 = vld [vmem:[#allocation4 + $0x12b0] sm:$0xff] }
 0x734   :  { %v1339_v14 = vld [vmem:[#allocation4 + $0x1470] sm:$0xff] }
 0x737   :  { %v1186_v56 = vpop.f32.mrf.mxu2 }
 0x738   :  { %v4538_v58 = vadd.f32 %v1186_v56, %v1167_v55  ;;  %v1126_v15 = vpop.f32.mrf.mxu3  ;;  %v1483_v55 = vld [vmem:[#allocation4 + $0x18f0] sm:$0xff] }
 0x739   :  { %v1127_v61 = vadd.f32 %v1126_v15, %v1101_v63  ;;  %v1226_v54 = vpop.f32.mrf.mxu0  ;;  %v1427_v63 = vld [vmem:[#allocation4 + $0x1730] sm:$0xff] }
 0x73a   :  { %5578 = vst [vmem:[#allocation8_spill] sm:$0xff] %v4538_v58  ;;  %1572 = vmatmul.f32.vlgmr.msra.gmra.mxu0 %v4538_v58  ;;  %v1246_v3 = vpop.f32.mrf.mxu1  ;;  %v1279_v56 = vld [vmem:[#allocation4 + $0x1290] sm:$0xff] }
 0x73b   :  { %v4541_v1 = vadd.f32 %v1146_v7, %v1127_v61  ;;  %1716 = vmatpush.msra.mxu0 %v1395_v59  ;;  %v1247_v50 = vadd.f32 %v1246_v3, %v1104_v62  ;;  %v1335_v7 = vld [vmem:[#allocation4 + $0x1450] sm:$0xff]  ;;  %v1396_v61 = vld [vmem:[#allocation4 + $0x1638] sm:$0xff] }
 0x73c   :  { %v1423_v15 = vld [vmem:[#allocation4 + $0x1710] sm:$0xff] }
 0x73d   :  { %5579 = vst [vmem:[#allocation9_spill] sm:$0xff] %v4541_v1  ;;  %1717 = vmatpush.msra.mxu0 %v1391_v0  ;;  %1552 = vmatmul.f32.vlgmr.msrb.gmra.mxu3 %v4541_v1  ;;  %v1479_v59 = vld [vmem:[#allocation4 + $0x18d0] sm:$0xff] }
 0x73e   :  { %1696 = vmatpush.msrb.mxu3 %v1331_v2  ;;  %v1275_v62 = vld [vmem:[#allocation4 + $0x1270] sm:$0xff]  ;;  %v1392_v2 = vld [vmem:[#allocation4 + $0x1618] sm:$0xff] }
 0x73f   :  { %1718 = vmatpush.msra.mxu0 %v1387_v10  ;;  %v1266_v28 = vpop.f32.mrf.mxu2  ;;  %v1419_v0 = vld [vmem:[#allocation4 + $0x16f0] sm:$0xff] }
 0x740   :  { %v4544_v47 = vadd.f32 %v1266_v28, %v1247_v50  ;;  %1697 = vmatpush.msrb.mxu3 %v1327_v6  ;;  %v1206_v30 = vpop.f32.mrf.mxu3  ;;  %v1475_v3 = vld [vmem:[#allocation4 + $0x18b0] sm:$0xff]  ;;  %v1388_v50 = vld [vmem:[#allocation4 + $0x15f8] sm:$0xff] }
 0x741   :  { %1719 = vmatpush.msra.mxu0 %v1383_v57  ;;  %v1207_v49 = vadd.f32 %v1206_v30, %v1103_v13  ;;  %v1271_v10 = vld [vmem:[#allocation4 + $0x1250] sm:$0xff]  ;;  %v1332_v57 = vld [vmem:[#allocation4 + $0x1438] sm:$0xff] }
 0x742   :  { %1612 = vmatmul.f32.vlgmr.msra.gmra.mxu2 %v4544_v47  ;;  %1652 = vmatmul.f32.vlgmr.msrb.gmra.mxu0 %v4538_v58  ;;  %v1415_v6 = vld [vmem:[#allocation4 + $0x16d0] sm:$0xff] }
 0x743   :  { %v4548_v9 = vadd.f32 %v1226_v54, %v1207_v49  ;;  %1698 = vmatpush.msrb.mxu3 %v1323_v32  ;;  %1720 = vmatpush.msra.mxu0 %v1379_v35  ;;  %v1471_v13 = vld [vmem:[#allocation4 + $0x1890] sm:$0xff]  ;;  %v1384_v32 = vld [vmem:[#allocation4 + $0x15d8] sm:$0xff] }
 0x744   :  { %1756 = vmatpush.msra.mxu2 %v1523_v53  ;;  %v1411_v28 = vld [vmem:[#allocation4 + $0x16b0] sm:$0xff]  ;;  %v1328_v35 = vld [vmem:[#allocation4 + $0x1418] sm:$0xff] }
 0x745   :  { %1699 = vmatpush.msrb.mxu3 %v1319_v60  ;;  %1721 = vmatpush.msra.mxu0 %v1375_v8  ;;  %v1467_v30 = vld [vmem:[#allocation4 + $0x1870] sm:$0xff]  ;;  %v1380_v54 = vld [vmem:[#allocation4 + $0x15b8] sm:$0xff] }
 0x746   :  { %1757 = vmatpush.msra.mxu2 %v1519_v5  ;;  %1592 = vmatmul.f32.vlgmr.msra.gmra.mxu1 %v4548_v9  ;;  %v1407_v49 = vld [vmem:[#allocation4 + $0x1690] sm:$0xff]  ;;  %v1324_v60 = vld [vmem:[#allocation4 + $0x13f8] sm:$0xff] }
 0x747   :  { %1632 = vmatmul.f32.vlgmr.msra.gmra.mxu3 %v4541_v1  ;;  %1722 = vmatpush.msra.mxu0 %v1371_v26  ;;  %v1463_v53 = vld [vmem:[#allocation4 + $0x1850] sm:$0xff]  ;;  %v1524_v8 = vld [vmem:[#allocation4 + $0x1a38] sm:$0xff] }
 0x748   :  { %1700 = vmatpush.msrb.mxu3 %v1315_v4  ;;  %1736 = vmatpush.msra.mxu1 %v1459_v11  ;;  %v1403_v5 = vld [vmem:[#allocation4 + $0x1670] sm:$0xff]  ;;  %v1320_v26 = vld [vmem:[#allocation4 + $0x13d8] sm:$0xff] }
 0x749   :  { %1758 = vmatpush.msra.mxu2 %v1515_v12  ;;  %1723 = vmatpush.msra.mxu0 %v1367_v16  ;;  %v1376_v4 = vld [vmem:[#allocation4 + $0x1598] sm:$0xff]  ;;  %v1399_v12 = vld [vmem:[#allocation4 + $0x1650] sm:$0xff] }
 0x74a   :  { %1701 = vmatpush.msrb.mxu3 %v1311_v17  ;;  %1737 = vmatpush.msra.mxu1 %v1455_v18  ;;  %v1520_v11 = vld [vmem:[#allocation4 + $0x1a18] sm:$0xff] }
 0x74b   :  { %1759 = vmatpush.msra.mxu2 %v1511_v19  ;;  %1724 = vmatpush.msra.mxu0 %v1363_v20  ;;  %v1316_v16 = vld [vmem:[#allocation4 + $0x13b8] sm:$0xff] }
 0x74c   :  { %1692 = vmatmul.f32.vlgmr.msrb.gmra.mxu2 %v4544_v47  ;;  %1702 = vmatpush.msrb.mxu3 %v1307_v21  ;;  %v1372_v17 = vld [vmem:[#allocation4 + $0x1578] sm:$0xff] }
 0x74d   :  { %1738 = vmatpush.msra.mxu1 %v1451_v22  ;;  %1760 = vmatpush.msra.mxu2 %v1507_v23  ;;  %v1460_v18 = vld [vmem:[#allocation4 + $0x1838] sm:$0xff] }
 0x74e   :  { %1703 = vmatpush.msrb.mxu3 %v1303_v24  ;;  %1725 = vmatpush.msra.mxu0 %v1359_v25  ;;  %v1516_v19 = vld [vmem:[#allocation4 + $0x19f8] sm:$0xff] }
 0x74f   :  { %1739 = vmatpush.msra.mxu1 %v1447_v27  ;;  %1761 = vmatpush.msra.mxu2 %v1503_v29  ;;  %v1312_v20 = vld [vmem:[#allocation4 + $0x1398] sm:$0xff] }
 0x750   :  { %1672 = vmatmul.f32.vlgmr.msrb.gmra.mxu1 %v4548_v9  ;;  %1704 = vmatpush.msrb.mxu3 %v1299_v31  ;;  %v1368_v21 = vld [vmem:[#allocation4 + $0x1558] sm:$0xff] }
 0x751   :  { %1726 = vmatpush.msra.mxu0 %v1355_v33  ;;  %1740 = vmatpush.msra.mxu1 %v1443_v34  ;;  %v1456_v22 = vld [vmem:[#allocation4 + $0x1818] sm:$0xff] }
 0x752   :  { %1762 = vmatpush.msra.mxu2 %v1499_v36  ;;  %1705 = vmatpush.msrb.mxu3 %v1295_v37  ;;  %v1512_v23 = vld [vmem:[#allocation4 + $0x19d8] sm:$0xff] }
 0x753   :  { %1727 = vmatpush.msra.mxu0 %v1351_v38  ;;  %1741 = vmatpush.msra.mxu1 %v1439_v39  ;;  %v1308_v24 = vld [vmem:[#allocation4 + $0x1378] sm:$0xff] }
 0x754   :  { %1763 = vmatpush.msra.mxu2 %v1495_v40  ;;  %1706 = vmatpush.msrb.mxu3 %v1291_v41  ;;  %v1364_v25 = vld [vmem:[#allocation4 + $0x1538] sm:$0xff] }
 0x755   :  { %1728 = vmatpush.msra.mxu0 %v1347_v42  ;;  %1742 = vmatpush.msra.mxu1 %v1435_v44  ;;  %v1452_v27 = vld [vmem:[#allocation4 + $0x17f8] sm:$0xff] }
 0x756   :  { %1764 = vmatpush.msra.mxu2 %v1491_v43  ;;  %1707 = vmatpush.msrb.mxu3 %v1287_v45  ;;  %v1508_v29 = vld [vmem:[#allocation4 + $0x19b8] sm:$0xff] }
 0x757   :  { %1729 = vmatpush.msra.mxu0 %v1343_v46  ;;  %1743 = vmatpush.msra.mxu1 %v1431_v48  ;;  %v1304_v31 = vld [vmem:[#allocation4 + $0x1358] sm:$0xff] }
 0x758   :  { %1765 = vmatpush.msra.mxu2 %v1487_v51  ;;  %1708 = vmatpush.msrb.mxu3 %v1283_v52  ;;  %v1360_v33 = vld [vmem:[#allocation4 + $0x1518] sm:$0xff] }
 0x759   :  { %1730 = vmatpush.msra.mxu0 %v1339_v14  ;;  %1744 = vmatpush.msra.mxu1 %v1427_v63  ;;  %v1448_v34 = vld [vmem:[#allocation4 + $0x17d8] sm:$0xff] }
 0x75a   :  { %1766 = vmatpush.msra.mxu2 %v1483_v55  ;;  %1709 = vmatpush.msrb.mxu3 %v1279_v56  ;;  %v1504_v36 = vld [vmem:[#allocation4 + $0x1998] sm:$0xff] }
 0x75b   :  { %1731 = vmatpush.msra.mxu0 %v1335_v7  ;;  %1745 = vmatpush.msra.mxu1 %v1423_v15  ;;  %v1300_v37 = vld [vmem:[#allocation4 + $0x1338] sm:$0xff] }
 0x75c   :  { %1767 = vmatpush.msra.mxu2 %v1479_v59  ;;  %1732 = vmatmul.f32.vlgmr.msra.gmra.mxu0 %v4538_v58  ;;  %v1356_v38 = vld [vmem:[#allocation4 + $0x14f8] sm:$0xff] }
 0x75d   :  { %1796 = vmatpush.msrb.mxu0 %v1396_v61  ;;  %1710 = vmatpush.msrb.mxu3 %v1275_v62  ;;  %v1444_v39 = vld [vmem:[#allocation4 + $0x17b8] sm:$0xff] }
 0x75e   :  { %1746 = vmatpush.msra.mxu1 %v1419_v0  ;;  %1768 = vmatpush.msra.mxu2 %v1475_v3  ;;  %v1500_v40 = vld [vmem:[#allocation4 + $0x1978] sm:$0xff] }
 0x75f   :  { %1797 = vmatpush.msrb.mxu0 %v1392_v2  ;;  %1711 = vmatpush.msrb.mxu3 %v1271_v10  ;;  %v1296_v41 = vld [vmem:[#allocation4 + $0x1318] sm:$0xff]  ;;  %v4558_v2 = vld [vmem:[#allocation4 + $0x3a20] sm:$0xff] }
 0x760   :  { %1747 = vmatpush.msra.mxu1 %v1415_v6  ;;  %1769 = vmatpush.msra.mxu2 %v1471_v13  ;;  %v1352_v42 = vld [vmem:[#allocation4 + $0x14d8] sm:$0xff] }
 0x761   :  { %1712 = vmatmul.f32.vlgmr.msrb.gmra.mxu3 %v4541_v1  ;;  %1798 = vmatpush.msrb.mxu0 %v1388_v50  ;;  %v1440_v44 = vld [vmem:[#allocation4 + $0x1798] sm:$0xff]  ;;  %v4561_v50 = vld [vmem:[#allocation4 + $0x3a00] sm:$0xff] }
 0x762   :  { %1776 = vmatpush.msra.mxu3 %v1332_v57  ;;  %1748 = vmatpush.msra.mxu1 %v1411_v28  ;;  %v1496_v43 = vld [vmem:[#allocation4 + $0x1958] sm:$0xff] }
 0x763   :  { %1770 = vmatpush.msra.mxu2 %v1467_v30  ;;  %1799 = vmatpush.msrb.mxu0 %v1384_v32  ;;  %v1292_v45 = vld [vmem:[#allocation4 + $0x12f8] sm:$0xff]  ;;  %v4564_v32 = vld [vmem:[#allocation4 + $0x39e0] sm:$0xff] }
 0x764   :  { %1777 = vmatpush.msra.mxu3 %v1328_v35  ;;  %1749 = vmatpush.msra.mxu1 %v1407_v49  ;;  %v1348_v46 = vld [vmem:[#allocation4 + $0x14b8] sm:$0xff]  ;;  %v4567_v35 = vld [vmem:[#allocation4 + $0x3820] sm:$0xff] }
 0x765   :  { %1771 = vmatpush.msra.mxu2 %v1463_v53  ;;  %1800 = vmatpush.msrb.mxu0 %v1380_v54  ;;  %v1436_v48 = vld [vmem:[#allocation4 + $0x1778] sm:$0xff]  ;;  %v4569_v54 = vld [vmem:[#allocation4 + $0x39c0] sm:$0xff] }
 0x766   :  { %1772 = vmatmul.f32.vlgmr.msra.gmra.mxu2 %v4544_v47  ;;  %1778 = vmatpush.msra.mxu3 %v1324_v60  ;;  %v1492_v51 = vld [vmem:[#allocation4 + $0x1938] sm:$0xff]  ;;  %v4573_v60 = vld [vmem:[#allocation4 + $0x3800] sm:$0xff] }
 0x767   :  { %1836 = vmatpush.msrb.mxu2 %v1524_v8  ;;  %1750 = vmatpush.msra.mxu1 %v1403_v5  ;;  %v1288_v52 = vld [vmem:[#allocation4 + $0x12d8] sm:$0xff] }
 0x768   :  { %1779 = vmatpush.msra.mxu3 %v1320_v26  ;;  %1801 = vmatpush.msrb.mxu0 %v1376_v4  ;;  %v1344_v14 = vld [vmem:[#allocation4 + $0x1498] sm:$0xff]  ;;  %v4576_v26 = vld [vmem:[#allocation4 + $0x39a0] sm:$0xff] }
 0x769   :  { %1837 = vmatpush.msrb.mxu2 %v1520_v11  ;;  %1751 = vmatpush.msra.mxu1 %v1399_v12  ;;  %v1432_v63 = vld [vmem:[#allocation4 + $0x1758] sm:$0xff]  ;;  %v4579_v4 = vld [vmem:[#allocation4 + $0x37e0] sm:$0xff] }
 0x76a   :  { %1752 = vmatmul.f32.vlgmr.msra.gmra.mxu1 %v4548_v9  ;;  %1780 = vmatpush.msra.mxu3 %v1316_v16  ;;  %v1488_v55 = vld [vmem:[#allocation4 + $0x1918] sm:$0xff]  ;;  %v4582_v11 = vld [vmem:[#allocation4 + $0x3e20] sm:$0xff] }
 0x76b   :  { %1802 = vmatpush.msrb.mxu0 %v1372_v17  ;;  %1816 = vmatpush.msrb.mxu1 %v1460_v18  ;;  %v1284_v56 = vld [vmem:[#allocation4 + $0x12b8] sm:$0xff]  ;;  %v4585_v16 = vld [vmem:[#allocation4 + $0x37c0] sm:$0xff] }
 0x76c   :  { %1838 = vmatpush.msrb.mxu2 %v1516_v19  ;;  %1781 = vmatpush.msra.mxu3 %v1312_v20  ;;  %v1340_v7 = vld [vmem:[#allocation4 + $0x1478] sm:$0xff]  ;;  %v4587_v17 = vld [vmem:[#allocation4 + $0x3980] sm:$0xff] }
 0x76d   :  { %1803 = vmatpush.msrb.mxu0 %v1368_v21  ;;  %1817 = vmatpush.msrb.mxu1 %v1456_v22  ;;  %v1428_v15 = vld [vmem:[#allocation4 + $0x1738] sm:$0xff]  ;;  %v4591_v18 = vld [vmem:[#allocation4 + $0x3e00] sm:$0xff] }
 0x76e   :  { %1839 = vmatpush.msrb.mxu2 %v1512_v23  ;;  %1782 = vmatpush.msra.mxu3 %v1308_v24  ;;  %v1484_v59 = vld [vmem:[#allocation4 + $0x18f8] sm:$0xff]  ;;  %v4594_v20 = vld [vmem:[#allocation4 + $0x37a0] sm:$0xff] }
 0x76f   :  { %1804 = vmatpush.msrb.mxu0 %v1364_v25  ;;  %1818 = vmatpush.msrb.mxu1 %v1452_v27  ;;  %v1280_v61 = vld [vmem:[#allocation4 + $0x1298] sm:$0xff]  ;;  %v4598_v21 = vld [vmem:[#allocation4 + $0x3960] sm:$0xff] }
 0x770   :  { %1840 = vmatpush.msrb.mxu2 %v1508_v29  ;;  %1783 = vmatpush.msra.mxu3 %v1304_v31  ;;  %v1336_v62 = vld [vmem:[#allocation4 + $0x1458] sm:$0xff]  ;;  %v4600_v22 = vld [vmem:[#allocation4 + $0x3c20] sm:$0xff] }
 0x771   :  { %1805 = vmatpush.msrb.mxu0 %v1360_v33  ;;  %1819 = vmatpush.msrb.mxu1 %v1448_v34  ;;  %v1424_v0 = vld [vmem:[#allocation4 + $0x1718] sm:$0xff]  ;;  %v4603_v23 = vld [vmem:[#allocation4 + $0x3de0] sm:$0xff] }
 0x772   :  { %1841 = vmatpush.msrb.mxu2 %v1504_v36  ;;  %1784 = vmatpush.msra.mxu3 %v1300_v37  ;;  %v1480_v3 = vld [vmem:[#allocation4 + $0x18d8] sm:$0xff]  ;;  %v4605_v24 = vld [vmem:[#allocation4 + $0x3780] sm:$0xff] }
 0x773   :  { %1806 = vmatpush.msrb.mxu0 %v1356_v38  ;;  %1820 = vmatpush.msrb.mxu1 %v1444_v39  ;;  %v1276_v10 = vld [vmem:[#allocation4 + $0x1278] sm:$0xff]  ;;  %v4609_v25 = vld [vmem:[#allocation4 + $0x3940] sm:$0xff] }
 0x774   :  { %1842 = vmatpush.msrb.mxu2 %v1500_v40  ;;  %1785 = vmatpush.msra.mxu3 %v1296_v41  ;;  %v1420_v6 = vld [vmem:[#allocation4 + $0x16f8] sm:$0xff]  ;;  %v4611_v27 = vld [vmem:[#allocation4 + $0x3c00] sm:$0xff] }
 0x775   :  { %1807 = vmatpush.msrb.mxu0 %v1352_v42  ;;  %1821 = vmatpush.msrb.mxu1 %v1440_v44  ;;  %v1476_v13 = vld [vmem:[#allocation4 + $0x18b8] sm:$0xff]  ;;  %v4615_v29 = vld [vmem:[#allocation4 + $0x3dc0] sm:$0xff] }
 0x776   :  { %1843 = vmatpush.msrb.mxu2 %v1496_v43  ;;  %1786 = vmatpush.msra.mxu3 %v1292_v45  ;;  %v1272_v57 = vld [vmem:[#allocation4 + $0x1258] sm:$0xff]  ;;  %v4617_v31 = vld [vmem:[#allocation4 + $0x3760] sm:$0xff] }
 0x777   :  { %1808 = vmatpush.msrb.mxu0 %v1348_v46  ;;  %1822 = vmatpush.msrb.mxu1 %v1436_v48  ;;  %v1416_v28 = vld [vmem:[#allocation4 + $0x16d8] sm:$0xff]  ;;  %v4621_v33 = vld [vmem:[#allocation4 + $0x3920] sm:$0xff] }
 0x778   :  { %1844 = vmatpush.msrb.mxu2 %v1492_v51  ;;  %1787 = vmatpush.msra.mxu3 %v1288_v52  ;;  %v1472_v30 = vld [vmem:[#allocation4 + $0x1898] sm:$0xff]  ;;  %v4623_v34 = vld [vmem:[#allocation4 + $0x3be0] sm:$0xff] }
 0x779   :  { %1809 = vmatpush.msrb.mxu0 %v1344_v14  ;;  %1823 = vmatpush.msrb.mxu1 %v1432_v63  ;;  %v1412_v49 = vld [vmem:[#allocation4 + $0x16b8] sm:$0xff]  ;;  %v4627_v36 = vld [vmem:[#allocation4 + $0x3da0] sm:$0xff] }
 0x77a   :  { %1845 = vmatpush.msrb.mxu2 %v1488_v55  ;;  %1788 = vmatpush.msra.mxu3 %v1284_v56  ;;  %v1468_v53 = vld [vmem:[#allocation4 + $0x1878] sm:$0xff]  ;;  %v4629_v37 = vld [vmem:[#allocation4 + $0x3740] sm:$0xff] }
 0x77b   :  { %1810 = vmatpush.msrb.mxu0 %v1340_v7  ;;  %1824 = vmatpush.msrb.mxu1 %v1428_v15  ;;  %v1408_v8 = vld [vmem:[#allocation4 + $0x1698] sm:$0xff]  ;;  %v4633_v38 = vld [vmem:[#allocation4 + $0x3900] sm:$0xff] }
 0x77c   :  { %1846 = vmatpush.msrb.mxu2 %v1484_v59  ;;  %1789 = vmatpush.msra.mxu3 %v1280_v61  ;;  %v1464_v5 = vld [vmem:[#allocation4 + $0x1858] sm:$0xff]  ;;  %v4635_v39 = vld [vmem:[#allocation4 + $0x3bc0] sm:$0xff] }
 0x77d   :  { %1811 = vmatpush.msrb.mxu0 %v1336_v62  ;;  %1825 = vmatpush.msrb.mxu1 %v1424_v0  ;;  %v1404_v12 = vld [vmem:[#allocation4 + $0x1678] sm:$0xff]  ;;  %v4639_v40 = vld [vmem:[#allocation4 + $0x3d80] sm:$0xff] }
 0x77e   :  { %1847 = vmatpush.msrb.mxu2 %v1480_v3  ;;  %1812 = vmatmul.f32.vlgmr.msrb.gmra.mxu0 %v4538_v58  ;;  %v1400_v19 = vld [vmem:[#allocation4 + $0x1658] sm:$0xff]  ;;  %v4641_v41 = vld [vmem:[#allocation4 + $0x3720] sm:$0xff] }
 0x77f   :  { %1940 = vmatpush.msra.mxu0 %v4558_v2  ;;  %1790 = vmatpush.msra.mxu3 %v1276_v10  ;;  %v4645_v42 = vld [vmem:[#allocation4 + $0x38e0] sm:$0xff] }
 0x780   :  { %1826 = vmatpush.msrb.mxu1 %v1420_v6  ;;  %1848 = vmatpush.msrb.mxu2 %v1476_v13  ;;  %v4647_v44 = vld [vmem:[#allocation4 + $0x3ba0] sm:$0xff] }
 0x781   :  { %1941 = vmatpush.msra.mxu0 %v4561_v50  ;;  %1791 = vmatpush.msra.mxu3 %v1272_v57  ;;  %v4651_v43 = vld [vmem:[#allocation4 + $0x3d60] sm:$0xff] }
 0x782   :  { %1827 = vmatpush.msrb.mxu1 %v1416_v28  ;;  %1849 = vmatpush.msrb.mxu2 %v1472_v30  ;;  %v4653_v45 = vld [vmem:[#allocation4 + $0x3700] sm:$0xff] }
 0x783   :  { %1792 = vmatmul.f32.vlgmr.msra.gmra.mxu3 %v4541_v1  ;;  %1942 = vmatpush.msra.mxu0 %v4564_v32  ;;  %v4657_v46 = vld [vmem:[#allocation4 + $0x38c0] sm:$0xff] }
 0x784   :  { %1920 = vmatpush.msrb.mxu3 %v4567_v35  ;;  %1828 = vmatpush.msrb.mxu1 %v1412_v49  ;;  %v4659_v48 = vld [vmem:[#allocation4 + $0x3b80] sm:$0xff] }
 0x785   :  { %1850 = vmatpush.msrb.mxu2 %v1468_v53  ;;  %1943 = vmatpush.msra.mxu0 %v4569_v54  ;;  %v4663_v51 = vld [vmem:[#allocation4 + $0x3d40] sm:$0xff] }
 0x786   :  { %1921 = vmatpush.msrb.mxu3 %v4573_v60  ;;  %1829 = vmatpush.msrb.mxu1 %v1408_v8  ;;  %v4665_v52 = vld [vmem:[#allocation4 + $0x36e0] sm:$0xff] }
 0x787   :  { %1851 = vmatpush.msrb.mxu2 %v1464_v5  ;;  %1944 = vmatpush.msra.mxu0 %v4576_v26  ;;  %v4669_v14 = vld [vmem:[#allocation4 + $0x38a0] sm:$0xff] }
 0x788   :  { %1852 = vmatmul.f32.vlgmr.msrb.gmra.mxu2 %v4544_v47  ;;  %1922 = vmatpush.msrb.mxu3 %v4579_v4  ;;  %v4671_v63 = vld [vmem:[#allocation4 + $0x3b60] sm:$0xff] }
 0x789   :  { %1980 = vmatpush.msra.mxu2 %v4582_v11  ;;  %1830 = vmatpush.msrb.mxu1 %v1404_v12  ;;  %v4675_v55 = vld [vmem:[#allocation4 + $0x3d20] sm:$0xff] }
 0x78a   :  { %1923 = vmatpush.msrb.mxu3 %v4585_v16  ;;  %1945 = vmatpush.msra.mxu0 %v4587_v17  ;;  %v4677_v56 = vld [vmem:[#allocation4 + $0x36c0] sm:$0xff] }
 0x78b   :  { %1981 = vmatpush.msra.mxu2 %v4591_v18  ;;  %1831 = vmatpush.msrb.mxu1 %v1400_v19  ;;  %v4681_v7 = vld [vmem:[#allocation4 + $0x3880] sm:$0xff] }
 0x78c   :  { %1832 = vmatmul.f32.vlgmr.msrb.gmra.mxu1 %v4548_v9  ;;  %1924 = vmatpush.msrb.mxu3 %v4594_v20  ;;  %v4683_v15 = vld [vmem:[#allocation4 + $0x3b40] sm:$0xff] }
 0x78d   :  { %1946 = vmatpush.msra.mxu0 %v4598_v21  ;;  %1960 = vmatpush.msra.mxu1 %v4600_v22  ;;  %v4687_v59 = vld [vmem:[#allocation4 + $0x3d00] sm:$0xff] }
 0x78e   :  { %1982 = vmatpush.msra.mxu2 %v4603_v23  ;;  %1925 = vmatpush.msrb.mxu3 %v4605_v24  ;;  %v4689_v61 = vld [vmem:[#allocation4 + $0x36a0] sm:$0xff] }
 0x78f   :  { %1947 = vmatpush.msra.mxu0 %v4609_v25  ;;  %1961 = vmatpush.msra.mxu1 %v4611_v27  ;;  %v4693_v62 = vld [vmem:[#allocation4 + $0x3860] sm:$0xff] }
 0x790   :  { %1983 = vmatpush.msra.mxu2 %v4615_v29  ;;  %1926 = vmatpush.msrb.mxu3 %v4617_v31  ;;  %v4695_v0 = vld [vmem:[#allocation4 + $0x3b20] sm:$0xff] }
 0x791   :  { %1948 = vmatpush.msra.mxu0 %v4621_v33  ;;  %1962 = vmatpush.msra.mxu1 %v4623_v34  ;;  %v4699_v3 = vld [vmem:[#allocation4 + $0x3ce0] sm:$0xff] }
 0x792   :  { %1984 = vmatpush.msra.mxu2 %v4627_v36  ;;  %1927 = vmatpush.msrb.mxu3 %v4629_v37  ;;  %v4701_v10 = vld [vmem:[#allocation4 + $0x3680] sm:$0xff] }
 0x793   :  { %1949 = vmatpush.msra.mxu0 %v4633_v38  ;;  %1963 = vmatpush.msra.mxu1 %v4635_v39  ;;  %v4705_v6 = vld [vmem:[#allocation4 + $0x3840] sm:$0xff] }
 0x794   :  { %1985 = vmatpush.msra.mxu2 %v4639_v40  ;;  %1928 = vmatpush.msrb.mxu3 %v4641_v41  ;;  %5580 = vst [vmem:[#allocation10_spill] sm:$0xff] %v4705_v6  ;;  %v4707_v13 = vld [vmem:[#allocation4 + $0x3b00] sm:$0xff] }
 0x795   :  { %1950 = vmatpush.msra.mxu0 %v4645_v42  ;;  %1964 = vmatpush.msra.mxu1 %v4647_v44  ;;  %v4711_v57 = vld [vmem:[#allocation4 + $0x3cc0] sm:$0xff] }
 0x796   :  { %1986 = vmatpush.msra.mxu2 %v4651_v43  ;;  %1929 = vmatpush.msrb.mxu3 %v4653_v45  ;;  %v4715_v28 = vld [vmem:[#allocation4 + $0x3660] sm:$0xff] }
 0x797   :  { %1951 = vmatpush.msra.mxu0 %v4657_v46  ;;  %1965 = vmatpush.msra.mxu1 %v4659_v48  ;;  %v4717_v30 = vld [vmem:[#allocation4 + $0x3ae0] sm:$0xff] }
 0x798   :  { %1987 = vmatpush.msra.mxu2 %v4663_v51  ;;  %1930 = vmatpush.msrb.mxu3 %v4665_v52  ;;  %v4721_v49 = vld [vmem:[#allocation4 + $0x3ca0] sm:$0xff] }
 0x799   :  { %1952 = vmatpush.msra.mxu0 %v4669_v14  ;;  %1966 = vmatpush.msra.mxu1 %v4671_v63  ;;  %v4725_v53 = vld [vmem:[#allocation4 + $0x3640] sm:$0xff] }
 0x79a   :  { %1988 = vmatpush.msra.mxu2 %v4675_v55  ;;  %1931 = vmatpush.msrb.mxu3 %v4677_v56  ;;  %v4727_v8 = vld [vmem:[#allocation4 + $0x3ac0] sm:$0xff] }
 0x79b   :  { %1953 = vmatpush.msra.mxu0 %v4681_v7  ;;  %1967 = vmatpush.msra.mxu1 %v4683_v15  ;;  %v4731_v5 = vld [vmem:[#allocation4 + $0x3c80] sm:$0xff] }
 0x79c   :  { %1989 = vmatpush.msra.mxu2 %v4687_v59  ;;  %1932 = vmatpush.msrb.mxu3 %v4689_v61  ;;  %v4734_v12 = vld [vmem:[#allocation4 + $0x3aa0] sm:$0xff] }
 0x79d   :  { %1954 = vmatpush.msra.mxu0 %v4693_v62  ;;  %1968 = vmatpush.msra.mxu1 %v4695_v0  ;;  %v4739_v19 = vld [vmem:[#allocation4 + $0x3c60] sm:$0xff] }
 0x79e   :  { %1990 = vmatpush.msra.mxu2 %v4699_v3  ;;  %1933 = vmatpush.msrb.mxu3 %v4701_v10 }
 0x79f   :  { %1955 = vmatpush.msra.mxu0 %v4705_v6  ;;  %1969 = vmatpush.msra.mxu1 %v4707_v13  ;;  %v4746_v6 = vld [vmem:[#allocation4 + $0x3c40] sm:$0xff] }
 0x7a0   :  { %1991 = vmatpush.msra.mxu2 %v4711_v57  ;;  %1956 = vmatmul.f32.vlgmr.msra.gmra.mxu0 %v4538_v58  ;;  %v4743_v58 = vld [vmem:[#allocation4 + $0x3a80] sm:$0xff] }
 0x7a1   :  { %1934 = vmatpush.msrb.mxu3 %v4715_v28  ;;  %1970 = vmatpush.msra.mxu1 %v4717_v30 }
 0x7a2   :  { %1992 = vmatpush.msra.mxu2 %v4721_v49  ;;  %2050 = vmatpush.msrb.mxu0 %v4558_v2  ;;  %v4750_v2 = vld [vmem:[#allocation4 + $0x3a60] sm:$0xff] }
 0x7a3   :  { %1935 = vmatpush.msrb.mxu3 %v4725_v53  ;;  %1971 = vmatpush.msra.mxu1 %v4727_v8 }
 0x7a4   :  { %1993 = vmatpush.msra.mxu2 %v4731_v5  ;;  %1936 = vmatmul.f32.vlgmr.msrb.gmra.mxu3 %v4541_v1  ;;  %v4756_v1 = vld [vmem:[#allocation4 + $0x3a40] sm:$0xff] }
 0x7a5   :  { %1972 = vmatpush.msra.mxu1 %v4734_v12  ;;  %2030 = vmatpush.msra.mxu3 %v4567_v35 }
 0x7a6   :  { %1994 = vmatpush.msra.mxu2 %v4739_v19  ;;  %2051 = vmatpush.msrb.mxu0 %v4561_v50  ;;  %v1526_v50 = vld [vmem:[#allocation4 + $0x3f80] ss:$8 sm:$0xf] }
 0x7a7   :  { %1973 = vmatpush.msra.mxu1 %v4743_v58  ;;  %2031 = vmatpush.msra.mxu3 %v4573_v60 }
 0x7a8   :  { %1995 = vmatpush.msra.mxu2 %v4746_v6  ;;  %2052 = vmatpush.msrb.mxu0 %v4564_v32  ;;  %v1528_v32 = vperm.slane %v1526_v50, 0 }
 0x7a9   :  { %1996 = vmatmul.f32.vlgmr.msra.gmra.mxu2 %v4544_v47  ;;  %1974 = vmatpush.msra.mxu1 %v4750_v2 }
 0x7aa   :  { %2090 = vmatpush.msrb.mxu2 %v4582_v11  ;;  %2032 = vmatpush.msra.mxu3 %v4579_v4  ;;  %v5581_v11 = vld [vmem:[#allocation10_spill] sm:$0xff] }
 0x7ab   :  { %1975 = vmatpush.msra.mxu1 %v4756_v1  ;;  %2053 = vmatpush.msrb.mxu0 %v4569_v54 }
 0x7ac   :  { %1976 = vmatmul.f32.vlgmr.msra.gmra.mxu1 %v4548_v9  ;;  %2091 = vmatpush.msrb.mxu2 %v4591_v18 }
 0x7ad   :  { %2070 = vmatpush.msrb.mxu1 %v4600_v22  ;;  %2033 = vmatpush.msra.mxu3 %v4585_v16 }
 0x7ae   :  { %2092 = vmatpush.msrb.mxu2 %v4603_v23  ;;  %2054 = vmatpush.msrb.mxu0 %v4576_v26 }
 0x7af   :  { %2071 = vmatpush.msrb.mxu1 %v4611_v27  ;;  %2034 = vmatpush.msra.mxu3 %v4594_v20  ;;  %v1529_v20 = vperm.slane %v1526_v50, 1 }
 0x7b0   :  { %2093 = vmatpush.msrb.mxu2 %v4615_v29  ;;  %2055 = vmatpush.msrb.mxu0 %v4587_v17 }
 0x7b1   :  { %2072 = vmatpush.msrb.mxu1 %v4623_v34  ;;  %2035 = vmatpush.msra.mxu3 %v4605_v24 }
 0x7b2   :  { %2094 = vmatpush.msrb.mxu2 %v4627_v36  ;;  %2056 = vmatpush.msrb.mxu0 %v4598_v21 }
 0x7b3   :  { %2073 = vmatpush.msrb.mxu1 %v4635_v39  ;;  %2036 = vmatpush.msra.mxu3 %v4617_v31 }
 0x7b4   :  { %2095 = vmatpush.msrb.mxu2 %v4639_v40  ;;  %2057 = vmatpush.msrb.mxu0 %v4609_v25 }
 0x7b5   :  { %2074 = vmatpush.msrb.mxu1 %v4647_v44  ;;  %2037 = vmatpush.msra.mxu3 %v4629_v37 }
 0x7b6   :  { %2096 = vmatpush.msrb.mxu2 %v4651_v43  ;;  %2058 = vmatpush.msrb.mxu0 %v4621_v33  ;;  %v1530_v33 = vperm.slane %v1526_v50, 2 }
 0x7b7   :  { %2075 = vmatpush.msrb.mxu1 %v4659_v48  ;;  %2038 = vmatpush.msra.mxu3 %v4641_v41  ;;  %v1573_v60 = vpop.f32.mrf.mxu0 }
 0x7b8   :  { %2097 = vmatpush.msrb.mxu2 %v4663_v51  ;;  %2059 = vmatpush.msrb.mxu0 %v4633_v38 }
 0x7b9   :  { %2076 = vmatpush.msrb.mxu1 %v4671_v63  ;;  %2039 = vmatpush.msra.mxu3 %v4653_v45 }
 0x7ba   :  { %2098 = vmatpush.msrb.mxu2 %v4675_v55  ;;  %2060 = vmatpush.msrb.mxu0 %v4645_v42  ;;  %v1531_v42 = vperm.slane %v1526_v50, 3  ;;  %v5587_v50 = vld [vmem:[#allocation8_spill] sm:$0xff] }
 0x7bb   :  { %2077 = vmatpush.msrb.mxu1 %v4683_v15  ;;  %2040 = vmatpush.msra.mxu3 %v4665_v52 }
 0x7bc   :  { %2099 = vmatpush.msrb.mxu2 %v4687_v59  ;;  %2061 = vmatpush.msrb.mxu0 %v4657_v46 }
 0x7bd   :  { %2078 = vmatpush.msrb.mxu1 %v4695_v0  ;;  %2041 = vmatpush.msra.mxu3 %v4677_v56 }
 0x7be   :  { %2100 = vmatpush.msrb.mxu2 %v4699_v3  ;;  %2062 = vmatpush.msrb.mxu0 %v4669_v14 }
 0x7bf   :  { %2079 = vmatpush.msrb.mxu1 %v4707_v13  ;;  %2042 = vmatpush.msra.mxu3 %v4689_v61  ;;  %v1653_v23 = vpop.f32.mrf.mxu0 }
 0x7c0   :  { %v1553_v35 = vpop.f32.mrf.mxu3  ;;  %2101 = vmatpush.msrb.mxu2 %v4711_v57  ;;  %2063 = vmatpush.msrb.mxu0 %v4681_v7 }
 0x7c1   :  { %v1554_v54 = vadd.f32 %v1553_v35, %v1528_v32  ;;  %2080 = vmatpush.msrb.mxu1 %v4717_v30  ;;  %2043 = vmatpush.msra.mxu3 %v4701_v10 }
 0x7c2   :  { %2102 = vmatpush.msrb.mxu2 %v4721_v49  ;;  %2064 = vmatpush.msrb.mxu0 %v4693_v62 }
 0x7c3   :  { %v1574_v26 = vadd.f32 %v1573_v60, %v1554_v54  ;;  %2081 = vmatpush.msrb.mxu1 %v4727_v8  ;;  %2044 = vmatpush.msra.mxu3 %v4715_v28  ;;  %v1593_v4 = vpop.f32.mrf.mxu1 }
 0x7c4   :  { %2103 = vmatpush.msrb.mxu2 %v4731_v5  ;;  %2065 = vmatpush.msrb.mxu0 %v5581_v11 }
 0x7c5   :  { %v1594_v16 = vadd.f32 %v1593_v4, %v1574_v26  ;;  %2082 = vmatpush.msrb.mxu1 %v4734_v12  ;;  %2045 = vmatpush.msra.mxu3 %v4725_v53  ;;  %v1613_v17 = vpop.f32.mrf.mxu2 }
 0x7c6   :  { %2104 = vmatpush.msrb.mxu2 %v4739_v19  ;;  %v5586_v19 = vld [vmem:[#allocation9_spill] sm:$0xff] }
 0x7c7   :  { %v4818_v18 = vadd.f32 %v1613_v17, %v1594_v16  ;;  %2083 = vmatpush.msrb.mxu1 %v4743_v58 }
 0x7c8   :  { %2105 = vmatpush.msrb.mxu2 %v4746_v6 }
 0x7c9   :  { %5582 = vst [vmem:[#allocation10_spill] sm:$0xff] %v4818_v18  ;;  %2084 = vmatpush.msrb.mxu1 %v4750_v2  ;;  %v5097_v18 = vld [vmem:[#allocation4 + $0x3c40] sm:$0xff] }
 0x7ca   :  { %v1633_v21 = vpop.f32.mrf.mxu3 }
 0x7cb   :  { %v1634_v22 = vadd.f32 %v1633_v21, %v1529_v20  ;;  %2085 = vmatpush.msrb.mxu1 %v4756_v1 }
 0x7cd   :  { %v1654_v24 = vadd.f32 %v1653_v23, %v1634_v22  ;;  %v1673_v25 = vpop.f32.mrf.mxu1 }
 0x7cf   :  { %v1674_v27 = vadd.f32 %v1673_v25, %v1654_v24  ;;  %v1693_v29 = vpop.f32.mrf.mxu2 }
 0x7d1   :  { %v4824_v31 = vadd.f32 %v1693_v29, %v1674_v27 }
 0x7d3   :  { %5583 = vst [vmem:[#allocation11_spill] sm:$0xff] %v4824_v31  ;;  %v5094_v31 = vld [vmem:[#allocation4 + $0x3a40] sm:$0xff] }
 0x7d9   :  { %v1733_v37 = vpop.f32.mrf.mxu0 }
 0x7e4   :  { %v1713_v34 = vpop.f32.mrf.mxu3 }
 0x7e5   :  { %v1714_v36 = vadd.f32 %v1713_v34, %v1530_v33 }
 0x7e7   :  { %v1734_v58 = vadd.f32 %v1733_v37, %v1714_v36  ;;  %v1753_v38 = vpop.f32.mrf.mxu1 }
 0x7e9   :  { %v1754_v39 = vadd.f32 %v1753_v38, %v1734_v58  ;;  %v1773_v40 = vpop.f32.mrf.mxu2  ;;  %v2234_v38 = vld [vmem:[#allocation4 + $0x1c20] sm:$0xff] }
 0x7ea   :  { %2441 = vmatpush.msrb.mxu3 %v2234_v38  ;;  %v2131_v38 = vld [vmem:[#allocation4 + $0x3fc0] ss:$0 sm:$0xff] }
 0x7eb   :  { %v4826_v41 = vadd.f32 %v1773_v40, %v1754_v39  ;;  %v2298_v39 = vld [vmem:[#allocation4 + $0x1e20] sm:$0xff] }
 0x7ec   :  { %v2362_v40 = vld [vmem:[#allocation4 + $0x2020] sm:$0xff]  ;;  %2461 = vmatpush.msra.mxu0 %v2298_v39 }
 0x7ed   :  { %5584 = vst [vmem:[#allocation12_spill] sm:$0xff] %v4826_v41  ;;  %2481 = vmatpush.msra.mxu1 %v2362_v40  ;;  %v2190_v40 = vld [vmem:[#allocation4 + $0x1ac0] sm:$0xff] }
 0x7ee   :  { %v5091_v41 = vld [vmem:[#allocation4 + $0x3840] sm:$0xff] }
 0x7fb   :  { %v1813_v43 = vpop.f32.mrf.mxu0 }
 0x806   :  { %v1793_v44 = vpop.f32.mrf.mxu3 }
 0x807   :  { %v1794_v1 = vadd.f32 %v1793_v44, %v1531_v42  ;;  %v2426_v44 = vld [vmem:[#allocation4 + $0x2220] sm:$0xff] }
 0x808   :  { %2501 = vmatpush.msra.mxu2 %v2426_v44  ;;  %v2318_v44 = vld [vmem:[#allocation4 + $0x1ec0] sm:$0xff] }
 0x809   :  { %v1814_v45 = vadd.f32 %v1813_v43, %v1794_v1  ;;  %v1833_v46 = vpop.f32.mrf.mxu1  ;;  %v2230_v1 = vld [vmem:[#allocation4 + $0x1c00] sm:$0xff] }
 0x80a   :  { %v2294_v43 = vld [vmem:[#allocation4 + $0x1e00] sm:$0xff]  ;;  %2442 = vmatpush.msrb.mxu3 %v2230_v1 }
 0x80b   :  { %v1834_v48 = vadd.f32 %v1833_v46, %v1814_v45  ;;  %v1853_v51 = vpop.f32.mrf.mxu2  ;;  %v2358_v45 = vld [vmem:[#allocation4 + $0x2000] sm:$0xff]  ;;  %2462 = vmatpush.msra.mxu0 %v2294_v43 }
 0x80c   :  { %v2422_v46 = vld [vmem:[#allocation4 + $0x2200] sm:$0xff]  ;;  %2482 = vmatpush.msra.mxu1 %v2358_v45 }
 0x80d   :  { %v4828_v52 = vadd.f32 %v1853_v51, %v1834_v48  ;;  %v2226_v48 = vld [vmem:[#allocation4 + $0x1be0] sm:$0xff]  ;;  %2502 = vmatpush.msra.mxu2 %v2422_v46 }
 0x80e   :  { %v2290_v51 = vld [vmem:[#allocation4 + $0x1de0] sm:$0xff]  ;;  %2443 = vmatpush.msrb.mxu3 %v2226_v48 }
 0x80f   :  { %5585 = vst [vmem:[#allocation13_spill] sm:$0xff] %v4828_v52  ;;  %2463 = vmatpush.msra.mxu0 %v2290_v51  ;;  %v2382_v1 = vld [vmem:[#allocation4 + $0x20c0] sm:$0xff] }
 0x810   :  { %v2186_v43 = vld [vmem:[#allocation4 + $0x1aa0] sm:$0xff] }
 0x811   :  { %v2314_v45 = vld [vmem:[#allocation4 + $0x1ea0] sm:$0xff] }
 0x812   :  { %v2378_v46 = vld [vmem:[#allocation4 + $0x20a0] sm:$0xff] }
 0x813   :  { %v2182_v48 = vld [vmem:[#allocation4 + $0x1a80] sm:$0xff] }
 0x814   :  { %v2246_v51 = vld [vmem:[#allocation4 + $0x1c80] sm:$0xff] }
 0x815   :  { %v5088_v52 = vld [vmem:[#allocation4 + $0x3640] sm:$0xff] }
 0x81d   :  { %v1957_v14 = vpop.f32.mrf.mxu0 }
 0x827   :  { %v1937_v63 = vpop.f32.mrf.mxu3 }
 0x828   :  { %v1958_v55 = vadd.f32 %v1957_v14, %v1937_v63  ;;  %v2354_v14 = vld [vmem:[#allocation4 + $0x1fe0] sm:$0xff] }
 0x829   :  { %v1977_v56 = vpop.f32.mrf.mxu1  ;;  %v2418_v63 = vld [vmem:[#allocation4 + $0x21e0] sm:$0xff]  ;;  %2483 = vmatpush.msra.mxu1 %v2354_v14 }
 0x82a   :  { %v1978_v7 = vadd.f32 %v1977_v56, %v1958_v55  ;;  %v2222_v55 = vld [vmem:[#allocation4 + $0x1bc0] sm:$0xff]  ;;  %2503 = vmatpush.msra.mxu2 %v2418_v63 }
 0x82b   :  { %v2286_v56 = vld [vmem:[#allocation4 + $0x1dc0] sm:$0xff]  ;;  %2444 = vmatpush.msrb.mxu3 %v2222_v55 }
 0x82c   :  { %v1997_v15 = vpop.f32.mrf.mxu2  ;;  %2464 = vmatpush.msra.mxu0 %v2286_v56  ;;  %v2310_v14 = vld [vmem:[#allocation4 + $0x1e80] sm:$0xff] }
 0x82d   :  { %v1998_v59 = vadd.f32 %v1997_v15, %v1978_v7  ;;  %v2350_v7 = vld [vmem:[#allocation4 + $0x1fc0] sm:$0xff] }
 0x82e   :  { %v2414_v15 = vld [vmem:[#allocation4 + $0x21c0] sm:$0xff]  ;;  %2484 = vmatpush.msra.mxu1 %v2350_v7 }
 0x82f   :  { %v2000_v61 = vsel %vm372_vm1, %v1998_v59, 0.0  ;;  %v2218_v59 = vld [vmem:[#allocation4 + $0x1ba0] sm:$0xff]  ;;  %2504 = vmatpush.msra.mxu2 %v2414_v15 }
 0x830   :  { %v2001_v62 = vrot.slane %v2000_v61, 4  ;;  %2445 = vmatpush.msrb.mxu3 %v2218_v59  ;;  %v2374_v63 = vld [vmem:[#allocation4 + $0x2080] sm:$0xff] }
 0x831   :  { %v2178_v55 = vld [vmem:[#allocation4 + $0x1a60] sm:$0xff] }
 0x832   :  { %v2002_v0 = vadd.f32 %v2001_v62, %v2000_v61  ;;  %v2282_v61 = vld [vmem:[#allocation4 + $0x1da0] sm:$0xff] }
 0x833   :  { %v2346_v62 = vld [vmem:[#allocation4 + $0x1fa0] sm:$0xff]  ;;  %2465 = vmatpush.msra.mxu0 %v2282_v61 }
 0x834   :  { %v2003_v3 = vrot.slane %v2002_v0, 2  ;;  %2485 = vmatpush.msra.mxu1 %v2346_v62  ;;  %v2242_v56 = vld [vmem:[#allocation4 + $0x1c60] sm:$0xff] }
 0x835   :  { %v2306_v7 = vld [vmem:[#allocation4 + $0x1e60] sm:$0xff] }
 0x836   :  { %v2004_v10 = vadd.f32 %v2003_v3, %v2002_v0  ;;  %v2410_v0 = vld [vmem:[#allocation4 + $0x21a0] sm:$0xff] }
 0x837   :  { %v2214_v3 = vld [vmem:[#allocation4 + $0x1b80] sm:$0xff]  ;;  %2505 = vmatpush.msra.mxu2 %v2410_v0 }
 0x838   :  { %v2005_v6 = vrot.slane %v2004_v10, 1  ;;  %2446 = vmatpush.msrb.mxu3 %v2214_v3  ;;  %v2370_v15 = vld [vmem:[#allocation4 + $0x2060] sm:$0xff]  ;;  %v2235_v3 = vld [vmem:[#allocation4 + $0x1c28] sm:$0xff] }
 0x839   :  { %v2174_v59 = vld [vmem:[#allocation4 + $0x1a40] sm:$0xff] }
 0x83a   :  { %v2006_v13 = vadd.f32 %v2005_v6, %v2004_v10  ;;  %v2278_v10 = vld [vmem:[#allocation4 + $0x1d80] sm:$0xff] }
 0x83b   :  { %2466 = vmatpush.msra.mxu0 %v2278_v10  ;;  %v2238_v61 = vld [vmem:[#allocation4 + $0x1c40] sm:$0xff]  ;;  %v2299_v10 = vld [vmem:[#allocation4 + $0x1e28] sm:$0xff] }
 0x83c   :  { %v4831_v57 = vmul.f32 0.03125, %v2006_v13  ;;  %v2342_v13 = vld [vmem:[#allocation4 + $0x1f80] sm:$0xff] }
 0x83d   :  { %2486 = vmatpush.msra.mxu1 %v2342_v13  ;;  %v2302_v62 = vld [vmem:[#allocation4 + $0x1e40] sm:$0xff]  ;;  %v2427_v13 = vld [vmem:[#allocation4 + $0x2228] sm:$0xff] }
 0x83e   :  { %2015 = vrot.lane.b32.xlu2 %v4831_v57, %s4220_s0  ;;  %2012 = vrot.lane.b32.xlu1 %v4831_v57, %s4221_s1  ;;  %v2366_v0 = vld [vmem:[#allocation4 + $0x2040] sm:$0xff] }
 0x83f   :  { %2009 = vrot.lane.b32.xlu0 %v4831_v57, %s4219_s20 }
 0x898   :  { %v2016_v53 = vpop.permute.xlu2 %2015 }
 0x8b0   :  { %v2013_v28 = vpop.permute.xlu1 %2012 }
 0x8b1   :  { %v2010_v30 = vpop.permute.xlu0 %2009 }
 0x8b2   :  { %v2018_v49 = vsel %vm391_vm2, %v4831_v57, %v2010_v30 }
 0x8b3   :  { %v2019_v8 = vsel %vm393_vm3, %v2018_v49, %v2013_v28  ;;  %v2406_v28 = vld [vmem:[#allocation4 + $0x2180] sm:$0xff] }
 0x8b4   :  { %v2020_v5 = vsel %vm395_vm4, %v2019_v8, %v2016_v53  ;;  %v2210_v49 = vld [vmem:[#allocation4 + $0x1b60] sm:$0xff]  ;;  %2506 = vmatpush.msra.mxu2 %v2406_v28  ;;  %v2231_v28 = vld [vmem:[#allocation4 + $0x1c08] sm:$0xff] }
 0x8b5   :  { %v2021_v12 = vperm.slane %v2020_v5, 0  ;;  %v2274_v53 = vld [vmem:[#allocation4 + $0x1d60] sm:$0xff]  ;;  %2447 = vmatpush.msrb.mxu3 %v2210_v49  ;;  %v2359_v49 = vld [vmem:[#allocation4 + $0x2008] sm:$0xff] }
 0x8b6   :  { %v2338_v8 = vld [vmem:[#allocation4 + $0x1f60] sm:$0xff]  ;;  %2467 = vmatpush.msra.mxu0 %v2274_v53  ;;  %v2423_v53 = vld [vmem:[#allocation4 + $0x2208] sm:$0xff] }
 0x8b7   :  { %v2022_v2 = vsub.f32 %v5586_v19, %v2021_v12  ;;  %v2023_v32 = vsub.f32 %v5587_v50, %v2021_v12  ;;  %v2024_v35 = vsub.f32 %v4548_v9, %v2021_v12  ;;  %v2025_v54 = vsub.f32 %v4544_v47, %v2021_v12  ;;  %v2402_v5 = vld [vmem:[#allocation4 + $0x2160] sm:$0xff]  ;;  %2487 = vmatpush.msra.mxu1 %v2338_v8  ;;  %v2227_v8 = vld [vmem:[#allocation4 + $0x1be8] sm:$0xff] }
 0x8b8   :  { %2507 = vmatpush.msra.mxu2 %v2402_v5  ;;  %v2291_v5 = vld [vmem:[#allocation4 + $0x1de8] sm:$0xff] }
 0x8b9   :  { %v2026_v60 = vmul.f32 %v2022_v2, %v2022_v2  ;;  %v2027_v26 = vmul.f32 %v2023_v32, %v2023_v32  ;;  %v2028_v4 = vmul.f32 %v2024_v35, %v2024_v35  ;;  %v2029_v11 = vmul.f32 %v2025_v54, %v2025_v54  ;;  %v2206_v2 = vld [vmem:[#allocation4 + $0x1b40] sm:$0xff] }
 0x8ba   :  { %v2270_v32 = vld [vmem:[#allocation4 + $0x1d40] sm:$0xff]  ;;  %2448 = vmatpush.msrb.mxu3 %v2206_v2  ;;  %v2419_v2 = vld [vmem:[#allocation4 + $0x21e8] sm:$0xff] }
 0x8bb   :  { %2046 = vmatmul.f32.vlgmr.msra.gmra.mxu3 %v2026_v60  ;;  %2066 = vmatmul.f32.vlgmr.msrb.gmra.mxu0 %v2027_v26  ;;  %v2334_v35 = vld [vmem:[#allocation4 + $0x1f40] sm:$0xff] }
 0x8bc   :  { %2086 = vmatmul.f32.vlgmr.msrb.gmra.mxu1 %v2028_v4  ;;  %2106 = vmatmul.f32.vlgmr.msrb.gmra.mxu2 %v2029_v11  ;;  %v2398_v54 = vld [vmem:[#allocation4 + $0x2140] sm:$0xff] }
 0x8bd   :  { %v2202_v26 = vld [vmem:[#allocation4 + $0x1b20] sm:$0xff]  ;;  %2468 = vmatpush.msra.mxu0 %v2270_v32  ;;  %2488 = vmatpush.msra.mxu1 %v2334_v35  ;;  %v2223_v32 = vld [vmem:[#allocation4 + $0x1bc8] sm:$0xff] }
 0x8be   :  { %v2266_v4 = vld [vmem:[#allocation4 + $0x1d20] sm:$0xff]  ;;  %2508 = vmatpush.msra.mxu2 %v2398_v54  ;;  %2449 = vmatpush.msrb.mxu3 %v2202_v26  ;;  %v2287_v35 = vld [vmem:[#allocation4 + $0x1dc8] sm:$0xff] }
 0x8bf   :  { %v2330_v11 = vld [vmem:[#allocation4 + $0x1f20] sm:$0xff]  ;;  %2469 = vmatpush.msra.mxu0 %v2266_v4  ;;  %v2351_v54 = vld [vmem:[#allocation4 + $0x1fc8] sm:$0xff] }
 0x8c0   :  { %2489 = vmatpush.msra.mxu1 %v2330_v11  ;;  %v2219_v26 = vld [vmem:[#allocation4 + $0x1ba8] sm:$0xff] }
 0x8c1   :  { %v2283_v4 = vld [vmem:[#allocation4 + $0x1da8] sm:$0xff] }
 0x8c2   :  { %v2347_v11 = vld [vmem:[#allocation4 + $0x1fa8] sm:$0xff] }
 0x938   :  { %v2067_v16 = vpop.f32.mrf.mxu0 }
 0x939   :  { %v2087_v21 = vpop.f32.mrf.mxu1 }
 0x93e   :  { %v2047_v17 = vpop.f32.mrf.mxu3 }
 0x93f   :  { %v2068_v20 = vadd.f32 %v2067_v16, %v2047_v17  ;;  %v2107_v23 = vpop.f32.mrf.mxu2  ;;  %v2394_v16 = vld [vmem:[#allocation4 + $0x2120] sm:$0xff] }
 0x940   :  { %2509 = vmatpush.msra.mxu2 %v2394_v16  ;;  %v2411_v16 = vld [vmem:[#allocation4 + $0x21a8] sm:$0xff] }
 0x941   :  { %v2088_v22 = vadd.f32 %v2087_v21, %v2068_v20  ;;  %v2198_v20 = vld [vmem:[#allocation4 + $0x1b00] sm:$0xff] }
 0x942   :  { %v2262_v21 = vld [vmem:[#allocation4 + $0x1d00] sm:$0xff]  ;;  %2450 = vmatpush.msrb.mxu3 %v2198_v20  ;;  %v2279_v20 = vld [vmem:[#allocation4 + $0x1d88] sm:$0xff] }
 0x943   :  { %v2108_v24 = vadd.f32 %v2107_v23, %v2088_v22  ;;  %v2326_v22 = vld [vmem:[#allocation4 + $0x1f00] sm:$0xff]  ;;  %2470 = vmatpush.msra.mxu0 %v2262_v21  ;;  %v2343_v21 = vld [vmem:[#allocation4 + $0x1f88] sm:$0xff] }
 0x944   :  { %v2390_v23 = vld [vmem:[#allocation4 + $0x2100] sm:$0xff]  ;;  %2490 = vmatpush.msra.mxu1 %v2326_v22  ;;  %v2407_v22 = vld [vmem:[#allocation4 + $0x2188] sm:$0xff] }
 0x945   :  { %v2110_v25 = vsel %vm372_vm1, %v2108_v24, 0.0  ;;  %v2118_v24 = vld [vmem:[#allocation4 + $0x3fa0] ss:$0 sm:$0xff]  ;;  %2510 = vmatpush.msra.mxu2 %v2390_v23  ;;  %v2211_v23 = vld [vmem:[#allocation4 + $0x1b68] sm:$0xff] }
 0x946   :  { %v2111_v27 = vrot.slane %v2110_v25, 4 }
 0x948   :  { %v2112_v29 = vadd.f32 %v2111_v27, %v2110_v25  ;;  %v2194_v27 = vld [vmem:[#allocation4 + $0x1ae0] sm:$0xff] }
 0x949   :  { %2451 = vmatpush.msrb.mxu3 %v2194_v27  ;;  %v2403_v27 = vld [vmem:[#allocation4 + $0x2168] sm:$0xff] }
 0x94a   :  { %v2113_v33 = vrot.slane %v2112_v29, 2 }
 0x94b   :  { %2452 = vmatpush.msrb.mxu3 %v2190_v40  ;;  %v2331_v40 = vld [vmem:[#allocation4 + $0x1f28] sm:$0xff] }
 0x94c   :  { %v2114_v34 = vadd.f32 %v2113_v33, %v2112_v29  ;;  %v2258_v29 = vld [vmem:[#allocation4 + $0x1ce0] sm:$0xff] }
 0x94d   :  { %v2322_v33 = vld [vmem:[#allocation4 + $0x1ee0] sm:$0xff]  ;;  %2471 = vmatpush.msra.mxu0 %v2258_v29  ;;  %2453 = vmatpush.msrb.mxu3 %v2186_v43  ;;  %v2207_v29 = vld [vmem:[#allocation4 + $0x1b48] sm:$0xff] }
 0x94e   :  { %v2115_v36 = vrot.slane %v2114_v34, 1  ;;  %2491 = vmatpush.msra.mxu1 %v2322_v33  ;;  %v2271_v33 = vld [vmem:[#allocation4 + $0x1d48] sm:$0xff] }
 0x94f   :  { %2454 = vmatpush.msrb.mxu3 %v2182_v48  ;;  %v2327_v43 = vld [vmem:[#allocation4 + $0x1f08] sm:$0xff] }
 0x950   :  { %v2116_v37 = vadd.f32 %v2115_v36, %v2114_v34  ;;  %v2386_v34 = vld [vmem:[#allocation4 + $0x20e0] sm:$0xff]  ;;  %2492 = vmatpush.msra.mxu1 %v2318_v44  ;;  %v2199_v44 = vld [vmem:[#allocation4 + $0x1b08] sm:$0xff] }
 0x951   :  { %2511 = vmatpush.msra.mxu2 %v2386_v34  ;;  %2455 = vmatpush.msrb.mxu3 %v2178_v55  ;;  %v2335_v34 = vld [vmem:[#allocation4 + $0x1f48] sm:$0xff] }
 0x952   :  { %v2117_v58 = vmul.f32 0.03125, %v2116_v37  ;;  %2493 = vmatpush.msra.mxu1 %v2314_v45  ;;  %v2195_v45 = vld [vmem:[#allocation4 + $0x1ae8] sm:$0xff] }
 0x953   :  { %2512 = vmatpush.msra.mxu2 %v2382_v1  ;;  %2456 = vmatpush.msrb.mxu3 %v2174_v59  ;;  %v2263_v1 = vld [vmem:[#allocation4 + $0x1d08] sm:$0xff] }
 0x954   :  { %v4848_v42 = vadd.f32 1e-05, %v2117_v58  ;;  %2494 = vmatpush.msra.mxu1 %v2310_v14  ;;  %v2323_v48 = vld [vmem:[#allocation4 + $0x1ee8] sm:$0xff] }
 0x955   :  { %2513 = vmatpush.msra.mxu2 %v2378_v46  ;;  %2521 = vmatpush.msra.mxu3 %v2235_v3  ;;  %v2259_v46 = vld [vmem:[#allocation4 + $0x1ce8] sm:$0xff] }
 0x956   :  { %4028 = vrsqrt.f32 %v4848_v42  ;;  %vm2126_vm12 = vweird.f32 %v4848_v42  ;;  %2495 = vmatpush.msra.mxu1 %v2306_v7  ;;  %v2191_v14 = vld [vmem:[#allocation4 + $0x1ac8] sm:$0xff] }
 0x957   :  { %2514 = vmatpush.msra.mxu2 %v2374_v63  ;;  %2522 = vmatpush.msra.mxu3 %v2231_v28  ;;  %v2255_v63 = vld [vmem:[#allocation4 + $0x1cc8] sm:$0xff] }
 0x958   :  { %2496 = vmatpush.msra.mxu1 %v2302_v62  ;;  %v2319_v55 = vld [vmem:[#allocation4 + $0x1ec8] sm:$0xff] }
 0x959   :  { %2515 = vmatpush.msra.mxu2 %v2370_v15  ;;  %2523 = vmatpush.msra.mxu3 %v2227_v8  ;;  %v2187_v7 = vld [vmem:[#allocation4 + $0x1aa8] sm:$0xff] }
 0x95a   :  { %v2251_v15 = vld [vmem:[#allocation4 + $0x1ca8] sm:$0xff] }
 0x95b   :  { %2516 = vmatpush.msra.mxu2 %v2366_v0  ;;  %2524 = vmatpush.msra.mxu3 %v2223_v32  ;;  %v2315_v59 = vld [vmem:[#allocation4 + $0x1ea8] sm:$0xff] }
 0x95c   :  { %v4029_v6 = vpop.eup %4028  ;;  %v2183_v62 = vld [vmem:[#allocation4 + $0x1a88] sm:$0xff] }
 0x95d   :  { %v2121_v30 = vmul.f32 %v4029_v6, %v4848_v42  ;;  %vm2127_vm11 = vweird.f32 %v4029_v6  ;;  %v2254_v42 = vld [vmem:[#allocation4 + $0x1cc0] sm:$0xff]  ;;  %2581 = vmatpush.msrb.mxu2 %v2427_v13  ;;  %2525 = vmatpush.msra.mxu3 %v2219_v26  ;;  %v2247_v0 = vld [vmem:[#allocation4 + $0x1c88] sm:$0xff] }
 0x95e   :  { %vm2128_vm13 = vmor %vm2126_vm12, %vm2127_vm11  ;;  %2472 = vmatpush.msra.mxu0 %v2254_v42  ;;  %v2395_v42 = vld [vmem:[#allocation4 + $0x2128] sm:$0xff] }
 0x95f   :  { %v2122_v12 = vmul.f32 %v4029_v6, %v2121_v30  ;;  %v2295_v30 = vld [vmem:[#allocation4 + $0x1e08] sm:$0xff]  ;;  %2582 = vmatpush.msrb.mxu2 %v2423_v53 }
 0x960   :  { %v2311_v3 = vld [vmem:[#allocation4 + $0x1e88] sm:$0xff] }
 0x961   :  { %v2123_v60 = vmul.f32 0.5, %v2122_v12  ;;  %v2355_v12 = vld [vmem:[#allocation4 + $0x1fe8] sm:$0xff]  ;;  %2583 = vmatpush.msrb.mxu2 %v2419_v2 }
 0x962   :  { %v2243_v13 = vld [vmem:[#allocation4 + $0x1c68] sm:$0xff] }
 0x963   :  { %v2124_v17 = vsub.f32 1.5, %v2123_v60  ;;  %v2415_v60 = vld [vmem:[#allocation4 + $0x21c8] sm:$0xff] }
 0x964   :  { %2584 = vmatpush.msrb.mxu2 %v2415_v60  ;;  %v2307_v28 = vld [vmem:[#allocation4 + $0x1e68] sm:$0xff] }
 0x965   :  { %v2125_v25 = vmul.f32 %v4029_v6, %v2124_v17  ;;  %v2215_v17 = vld [vmem:[#allocation4 + $0x1b88] sm:$0xff] }
 0x966   :  { %2585 = vmatpush.msrb.mxu2 %v2411_v16  ;;  %2526 = vmatpush.msra.mxu3 %v2215_v17  ;;  %v2239_v53 = vld [vmem:[#allocation4 + $0x1c48] sm:$0xff] }
 0x967   :  { %v2129_v36 = vsel %vm2128_vm13, %v4029_v6, %v2125_v25  ;;  %v2363_v6 = vld [vmem:[#allocation4 + $0x2028] sm:$0xff] }
 0x968   :  { %v4854_v37 = vmul.f32 %v2129_v36, %v2118_v24  ;;  %2561 = vmatpush.msrb.mxu1 %v2363_v6  ;;  %v2275_v24 = vld [vmem:[#allocation4 + $0x1d68] sm:$0xff]  ;;  %2586 = vmatpush.msrb.mxu2 %v2407_v22 }
 0x969   :  { %v2339_v25 = vld [vmem:[#allocation4 + $0x1f68] sm:$0xff]  ;;  %2527 = vmatpush.msra.mxu3 %v2211_v23 }
 0x96a   :  { %2141 = vrot.lane.b32.xlu2 %v4854_v37, %s4220_s0  ;;  %2138 = vrot.lane.b32.xlu1 %v4854_v37, %s4221_s1  ;;  %v2132_v58 = vmul.f32 %v4854_v37, %v4831_v57  ;;  %v2250_v57 = vld [vmem:[#allocation4 + $0x1ca0] sm:$0xff]  ;;  %v2399_v36 = vld [vmem:[#allocation4 + $0x2148] sm:$0xff] }
 0x96b   :  { %2135 = vrot.lane.b32.xlu0 %v4854_v37, %s4219_s20  ;;  %2473 = vmatpush.msra.mxu0 %v2250_v57  ;;  %v2391_v57 = vld [vmem:[#allocation4 + $0x2108] sm:$0xff] }
 0x96c   :  { %v4864_v39 = vsub.f32 %v2131_v38, %v2132_v58  ;;  %2562 = vmatpush.msrb.mxu1 %v2359_v49  ;;  %2587 = vmatpush.msrb.mxu2 %v2403_v27  ;;  %v2203_v58 = vld [vmem:[#allocation4 + $0x1b28] sm:$0xff] }
 0x96d   :  { %2474 = vmatpush.msra.mxu0 %v2246_v51  ;;  %2528 = vmatpush.msra.mxu3 %v2207_v29  ;;  %v2267_v38 = vld [vmem:[#allocation4 + $0x1d28] sm:$0xff] }
 0x96e   :  { %2563 = vmatpush.msrb.mxu1 %v2355_v12  ;;  %2588 = vmatpush.msrb.mxu2 %v2399_v36  ;;  %v2387_v51 = vld [vmem:[#allocation4 + $0x20e8] sm:$0xff] }
 0x96f   :  { %2475 = vmatpush.msra.mxu0 %v2242_v56  ;;  %2529 = vmatpush.msra.mxu3 %v2203_v58  ;;  %v2383_v56 = vld [vmem:[#allocation4 + $0x20c8] sm:$0xff] }
 0x970   :  { %2564 = vmatpush.msrb.mxu1 %v2351_v54  ;;  %2589 = vmatpush.msrb.mxu2 %v2395_v42  ;;  %v2179_v6 = vld [vmem:[#allocation4 + $0x1a68] sm:$0xff]  ;;  %v2296_v42 = vld [vmem:[#allocation4 + $0x1e10] sm:$0xff] }
 0x971   :  { %2476 = vmatpush.msra.mxu0 %v2238_v61  ;;  %2530 = vmatpush.msra.mxu3 %v2199_v44  ;;  %v2379_v61 = vld [vmem:[#allocation4 + $0x20a8] sm:$0xff]  ;;  %v2360_v44 = vld [vmem:[#allocation4 + $0x2010] sm:$0xff] }
 0x972   :  { %2154 = vrot.lane.b32.xlu2 %v4864_v39, %s4220_s0  ;;  %2151 = vrot.lane.b32.xlu1 %v4864_v39, %s4221_s1  ;;  %v2175_v49 = vld [vmem:[#allocation4 + $0x1a48] sm:$0xff] }
 0x973   :  { %2148 = vrot.lane.b32.xlu0 %v4864_v39, %s4219_s20  ;;  %2541 = vmatpush.msrb.mxu0 %v2299_v10  ;;  %v2375_v10 = vld [vmem:[#allocation4 + $0x2088] sm:$0xff] }
 0x974   :  { %2565 = vmatpush.msrb.mxu1 %v2347_v11  ;;  %2590 = vmatpush.msrb.mxu2 %v2391_v57  ;;  %v2303_v8 = vld [vmem:[#allocation4 + $0x1e48] sm:$0xff]  ;;  %v2292_v57 = vld [vmem:[#allocation4 + $0x1df0] sm:$0xff] }
 0x975   :  { %2542 = vmatpush.msrb.mxu0 %v2295_v30  ;;  %2531 = vmatpush.msra.mxu3 %v2195_v45  ;;  %v2371_v30 = vld [vmem:[#allocation4 + $0x2068] sm:$0xff]  ;;  %v2356_v45 = vld [vmem:[#allocation4 + $0x1ff0] sm:$0xff] }
 0x976   :  { %2566 = vmatpush.msrb.mxu1 %v2343_v21  ;;  %2591 = vmatpush.msrb.mxu2 %v2387_v51  ;;  %v2288_v51 = vld [vmem:[#allocation4 + $0x1dd0] sm:$0xff] }
 0x977   :  { %2543 = vmatpush.msrb.mxu0 %v2291_v5  ;;  %2532 = vmatpush.msra.mxu3 %v2191_v14  ;;  %v2367_v5 = vld [vmem:[#allocation4 + $0x2048] sm:$0xff]  ;;  %v2352_v14 = vld [vmem:[#allocation4 + $0x1fd0] sm:$0xff] }
 0x978   :  { %2567 = vmatpush.msrb.mxu1 %v2339_v25  ;;  %2592 = vmatpush.msrb.mxu2 %v2383_v56  ;;  %v2284_v56 = vld [vmem:[#allocation4 + $0x1db0] sm:$0xff] }
 0x979   :  { %2544 = vmatpush.msrb.mxu0 %v2287_v35  ;;  %2533 = vmatpush.msra.mxu3 %v2187_v7  ;;  %v2348_v7 = vld [vmem:[#allocation4 + $0x1fb0] sm:$0xff] }
 0x97a   :  { %2568 = vmatpush.msrb.mxu1 %v2335_v34  ;;  %2593 = vmatpush.msrb.mxu2 %v2379_v61  ;;  %v2280_v61 = vld [vmem:[#allocation4 + $0x1d90] sm:$0xff] }
 0x97b   :  { %2545 = vmatpush.msrb.mxu0 %v2283_v4  ;;  %2534 = vmatpush.msra.mxu3 %v2183_v62  ;;  %v2344_v62 = vld [vmem:[#allocation4 + $0x1f90] sm:$0xff] }
 0x97c   :  { %2569 = vmatpush.msrb.mxu1 %v2331_v40  ;;  %2594 = vmatpush.msrb.mxu2 %v2375_v10  ;;  %v2300_v40 = vld [vmem:[#allocation4 + $0x1e30] sm:$0xff] }
 0x97d   :  { %2546 = vmatpush.msrb.mxu0 %v2279_v20  ;;  %2535 = vmatpush.msra.mxu3 %v2179_v6  ;;  %v2276_v10 = vld [vmem:[#allocation4 + $0x1d70] sm:$0xff] }
 0x97e   :  { %2570 = vmatpush.msrb.mxu1 %v2327_v43  ;;  %2595 = vmatpush.msrb.mxu2 %v2371_v30  ;;  %v2228_v43 = vld [vmem:[#allocation4 + $0x1bf0] sm:$0xff] }
 0x97f   :  { %2547 = vmatpush.msrb.mxu0 %v2275_v24  ;;  %2536 = vmatpush.msra.mxu3 %v2175_v49  ;;  %v2340_v6 = vld [vmem:[#allocation4 + $0x1f70] sm:$0xff] }
 0x980   :  { %2571 = vmatpush.msrb.mxu1 %v2323_v48  ;;  %2596 = vmatpush.msrb.mxu2 %v2367_v5  ;;  %v2224_v48 = vld [vmem:[#allocation4 + $0x1bd0] sm:$0xff] }
 0x981   :  { %2548 = vmatpush.msrb.mxu0 %v2271_v33  ;;  %v2272_v30 = vld [vmem:[#allocation4 + $0x1d50] sm:$0xff] }
 0x982   :  { %2572 = vmatpush.msrb.mxu1 %v2319_v55  ;;  %v2220_v55 = vld [vmem:[#allocation4 + $0x1bb0] sm:$0xff] }
 0x983   :  { %2549 = vmatpush.msrb.mxu0 %v2267_v38  ;;  %v2336_v49 = vld [vmem:[#allocation4 + $0x1f50] sm:$0xff] }
 0x984   :  { %2573 = vmatpush.msrb.mxu1 %v2315_v59  ;;  %v2216_v59 = vld [vmem:[#allocation4 + $0x1b90] sm:$0xff] }
 0x985   :  { %2550 = vmatpush.msrb.mxu0 %v2263_v1  ;;  %v2424_v1 = vld [vmem:[#allocation4 + $0x2210] sm:$0xff] }
 0x986   :  { %2574 = vmatpush.msrb.mxu1 %v2311_v3  ;;  %v2212_v3 = vld [vmem:[#allocation4 + $0x1b70] sm:$0xff] }
 0x987   :  { %2551 = vmatpush.msrb.mxu0 %v2259_v46  ;;  %v2420_v46 = vld [vmem:[#allocation4 + $0x21f0] sm:$0xff] }
 0x988   :  { %2575 = vmatpush.msrb.mxu1 %v2307_v28  ;;  %v2208_v28 = vld [vmem:[#allocation4 + $0x1b50] sm:$0xff] }
 0x989   :  { %2552 = vmatpush.msrb.mxu0 %v2255_v63  ;;  %v2416_v63 = vld [vmem:[#allocation4 + $0x21d0] sm:$0xff] }
 0x98a   :  { %2576 = vmatpush.msrb.mxu1 %v2303_v8  ;;  %v2204_v8 = vld [vmem:[#allocation4 + $0x1b30] sm:$0xff] }
 0x98b   :  { %2553 = vmatpush.msrb.mxu0 %v2251_v15  ;;  %v2412_v15 = vld [vmem:[#allocation4 + $0x21b0] sm:$0xff] }
 0x98c   :  { %v2268_v5 = vld [vmem:[#allocation4 + $0x1d30] sm:$0xff] }
 0x98d   :  { %2554 = vmatpush.msrb.mxu0 %v2247_v0  ;;  %v2408_v0 = vld [vmem:[#allocation4 + $0x2190] sm:$0xff] }
 0x98f   :  { %2555 = vmatpush.msrb.mxu0 %v2243_v13  ;;  %v2404_v13 = vld [vmem:[#allocation4 + $0x2170] sm:$0xff] }
 0x991   :  { %2556 = vmatpush.msrb.mxu0 %v2239_v53  ;;  %v2400_v53 = vld [vmem:[#allocation4 + $0x2150] sm:$0xff] }
 0x9c4   :  { %v2142_v2 = vpop.permute.xlu2 %2141 }
 0x9cc   :  { %v2155_v17 = vpop.permute.xlu2 %2154 }
 0x9dc   :  { %v2139_v12 = vpop.permute.xlu1 %2138 }
 0x9dd   :  { %v2136_v32 = vpop.permute.xlu0 %2135 }
 0x9de   :  { %v2144_v35 = vsel %vm391_vm2, %v4854_v37, %v2136_v32  ;;  %v2200_v32 = vld [vmem:[#allocation4 + $0x1b10] sm:$0xff] }
 0x9df   :  { %v2145_v54 = vsel %vm393_vm3, %v2144_v35, %v2139_v12  ;;  %v2332_v12 = vld [vmem:[#allocation4 + $0x1f30] sm:$0xff] }
 0x9e0   :  { %v2146_v60 = vsel %vm395_vm4, %v2145_v54, %v2142_v2  ;;  %v2396_v2 = vld [vmem:[#allocation4 + $0x2130] sm:$0xff] }
 0x9e1   :  { %v2160_v26 = vperm.slane %v2146_v60, 0  ;;  %v2264_v35 = vld [vmem:[#allocation4 + $0x1d10] sm:$0xff] }
 0x9e2   :  { %v2328_v54 = vld [vmem:[#allocation4 + $0x1f10] sm:$0xff] }
 0x9e3   :  { %v2161_v22 = vmul.f32 %v2160_v26, %v5586_v19  ;;  %v2162_v37 = vmul.f32 %v2160_v26, %v5587_v50  ;;  %v2163_v24 = vmul.f32 %v2160_v26, %v4548_v9  ;;  %v2164_v25 = vmul.f32 %v2160_v26, %v4544_v47  ;;  %v2236_v19 = vld [vmem:[#allocation4 + $0x1c30] sm:$0xff] }
 0x9e4   :  { %v2152_v4 = vpop.permute.xlu1 %2151  ;;  %v2364_v9 = vld [vmem:[#allocation4 + $0x2030] sm:$0xff] }
 0x9e5   :  { %v2149_v11 = vpop.permute.xlu0 %2148  ;;  %v2428_v47 = vld [vmem:[#allocation4 + $0x2230] sm:$0xff] }
 0x9e6   :  { %v2157_v16 = vsel %vm391_vm2, %v4864_v39, %v2149_v11  ;;  %v2232_v50 = vld [vmem:[#allocation4 + $0x1c10] sm:$0xff] }
 0x9e7   :  { %v2158_v20 = vsel %vm393_vm3, %v2157_v16, %v2152_v4  ;;  %v2392_v60 = vld [vmem:[#allocation4 + $0x2110] sm:$0xff] }
 0x9e8   :  { %v2159_v21 = vsel %vm395_vm4, %v2158_v20, %v2155_v17  ;;  %v2196_v26 = vld [vmem:[#allocation4 + $0x1af0] sm:$0xff] }
 0x9e9   :  { %v2165_v23 = vperm.slane %v2159_v21, 0  ;;  %v2260_v4 = vld [vmem:[#allocation4 + $0x1cf0] sm:$0xff] }
 0x9ea   :  { %v2324_v11 = vld [vmem:[#allocation4 + $0x1ef0] sm:$0xff] }
 0x9eb   :  { %v2166_v27 = vadd.f32 %v2165_v23, %v2161_v22  ;;  %v2167_v29 = vadd.f32 %v2165_v23, %v2162_v37  ;;  %v2168_v33 = vadd.f32 %v2165_v23, %v2163_v24  ;;  %v2169_v34 = vadd.f32 %v2165_v23, %v2164_v25  ;;  %v2388_v16 = vld [vmem:[#allocation4 + $0x20f0] sm:$0xff] }
 0x9ec   :  { %v2192_v17 = vld [vmem:[#allocation4 + $0x1ad0] sm:$0xff] }
 0x9ed   :  { %v4884_v36 = vmax.f32 %v2166_v27, 0.0  ;;  %v4886_v39 = vmax.f32 %v2167_v29, 0.0  ;;  %v4888_v58 = vmax.f32 %v2168_v33, 0.0  ;;  %v4890_v38 = vmax.f32 %v2169_v34, 0.0  ;;  %v2256_v20 = vld [vmem:[#allocation4 + $0x1cd0] sm:$0xff] }
 0x9ee   :  { %v2320_v21 = vld [vmem:[#allocation4 + $0x1ed0] sm:$0xff] }
 0x9ef   :  { %2457 = vmatmul.f32.vlgmr.msrb.gmra.mxu3 %v4884_v36  ;;  %2477 = vmatmul.f32.vlgmr.msra.gmra.mxu0 %v4886_v39  ;;  %v2384_v22 = vld [vmem:[#allocation4 + $0x20d0] sm:$0xff] }
 0x9f0   :  { %2497 = vmatmul.f32.vlgmr.msra.gmra.mxu1 %v4888_v58  ;;  %2517 = vmatmul.f32.vlgmr.msra.gmra.mxu2 %v4890_v38  ;;  %v2188_v23 = vld [vmem:[#allocation4 + $0x1ab0] sm:$0xff] }
 0x9f1   :  { %2601 = vmatpush.msrb.mxu3 %v2236_v19  ;;  %2621 = vmatpush.msra.mxu0 %v2300_v40  ;;  %v2252_v37 = vld [vmem:[#allocation4 + $0x1cb0] sm:$0xff] }
 0x9f2   :  { %2641 = vmatpush.msra.mxu1 %v2364_v9  ;;  %2661 = vmatpush.msra.mxu2 %v2428_v47  ;;  %v2316_v24 = vld [vmem:[#allocation4 + $0x1eb0] sm:$0xff] }
 0x9f3   :  { %2602 = vmatpush.msrb.mxu3 %v2232_v50  ;;  %2622 = vmatpush.msra.mxu0 %v2296_v42  ;;  %v2380_v25 = vld [vmem:[#allocation4 + $0x20b0] sm:$0xff] }
 0x9f4   :  { %2642 = vmatpush.msra.mxu1 %v2360_v44  ;;  %2662 = vmatpush.msra.mxu2 %v2424_v1  ;;  %v2184_v27 = vld [vmem:[#allocation4 + $0x1a90] sm:$0xff] }
 0x9f5   :  { %2603 = vmatpush.msrb.mxu3 %v2228_v43  ;;  %2623 = vmatpush.msra.mxu0 %v2292_v57  ;;  %v2248_v29 = vld [vmem:[#allocation4 + $0x1c90] sm:$0xff]  ;;  %v2237_v43 = vld [vmem:[#allocation4 + $0x1c38] sm:$0xff] }
 0x9f6   :  { %2643 = vmatpush.msra.mxu1 %v2356_v45  ;;  %2663 = vmatpush.msra.mxu2 %v2420_v46  ;;  %v2312_v33 = vld [vmem:[#allocation4 + $0x1e90] sm:$0xff]  ;;  %v2301_v57 = vld [vmem:[#allocation4 + $0x1e38] sm:$0xff] }
 0x9f7   :  { %2604 = vmatpush.msrb.mxu3 %v2224_v48  ;;  %2624 = vmatpush.msra.mxu0 %v2288_v51  ;;  %v2376_v34 = vld [vmem:[#allocation4 + $0x2090] sm:$0xff]  ;;  %v2365_v45 = vld [vmem:[#allocation4 + $0x2038] sm:$0xff] }
 0x9f8   :  { %2644 = vmatpush.msra.mxu1 %v2352_v14  ;;  %2664 = vmatpush.msra.mxu2 %v2416_v63  ;;  %v2180_v19 = vld [vmem:[#allocation4 + $0x1a70] sm:$0xff]  ;;  %v2429_v46 = vld [vmem:[#allocation4 + $0x2238] sm:$0xff] }
 0x9f9   :  { %2537 = vmatmul.f32.vlgmr.msra.gmra.mxu3 %v4884_v36  ;;  %2557 = vmatmul.f32.vlgmr.msrb.gmra.mxu0 %v4886_v39  ;;  %v2244_v40 = vld [vmem:[#allocation4 + $0x1c70] sm:$0xff]  ;;  %v2233_v48 = vld [vmem:[#allocation4 + $0x1c18] sm:$0xff] }
 0x9fa   :  { %2577 = vmatmul.f32.vlgmr.msrb.gmra.mxu1 %v4888_v58  ;;  %2597 = vmatmul.f32.vlgmr.msrb.gmra.mxu2 %v4890_v38  ;;  %v2308_v9 = vld [vmem:[#allocation4 + $0x1e70] sm:$0xff]  ;;  %v2297_v51 = vld [vmem:[#allocation4 + $0x1e18] sm:$0xff] }
 0x9fb   :  { %2605 = vmatpush.msrb.mxu3 %v2220_v55  ;;  %2625 = vmatpush.msra.mxu0 %v2284_v56  ;;  %v2372_v47 = vld [vmem:[#allocation4 + $0x2070] sm:$0xff]  ;;  %v2361_v14 = vld [vmem:[#allocation4 + $0x2018] sm:$0xff] }
 0x9fc   :  { %2645 = vmatpush.msra.mxu1 %v2348_v7  ;;  %2665 = vmatpush.msra.mxu2 %v2412_v15  ;;  %v2176_v50 = vld [vmem:[#allocation4 + $0x1a50] sm:$0xff]  ;;  %v2425_v63 = vld [vmem:[#allocation4 + $0x2218] sm:$0xff] }
 0x9fd   :  { %2606 = vmatpush.msrb.mxu3 %v2216_v59  ;;  %2626 = vmatpush.msra.mxu0 %v2280_v61  ;;  %v2240_v42 = vld [vmem:[#allocation4 + $0x1c50] sm:$0xff]  ;;  %v2229_v55 = vld [vmem:[#allocation4 + $0x1bf8] sm:$0xff] }
 0x9fe   :  { %2646 = vmatpush.msra.mxu1 %v2344_v62  ;;  %2666 = vmatpush.msra.mxu2 %v2408_v0  ;;  %v2304_v44 = vld [vmem:[#allocation4 + $0x1e50] sm:$0xff]  ;;  %v2293_v56 = vld [vmem:[#allocation4 + $0x1df8] sm:$0xff] }
 0x9ff   :  { %2607 = vmatpush.msrb.mxu3 %v2212_v3  ;;  %2627 = vmatpush.msra.mxu0 %v2276_v10  ;;  %v2368_v1 = vld [vmem:[#allocation4 + $0x2050] sm:$0xff]  ;;  %v2357_v7 = vld [vmem:[#allocation4 + $0x1ff8] sm:$0xff] }
 0xa00   :  { %2647 = vmatpush.msra.mxu1 %v2340_v6  ;;  %2667 = vmatpush.msra.mxu2 %v2404_v13  ;;  %v2421_v15 = vld [vmem:[#allocation4 + $0x21f8] sm:$0xff] }
 0xa01   :  { %2608 = vmatpush.msrb.mxu3 %v2208_v28  ;;  %2628 = vmatpush.msra.mxu0 %v2272_v30  ;;  %v2225_v59 = vld [vmem:[#allocation4 + $0x1bd8] sm:$0xff] }
 0xa02   :  { %2648 = vmatpush.msra.mxu1 %v2336_v49  ;;  %2668 = vmatpush.msra.mxu2 %v2400_v53  ;;  %v2289_v61 = vld [vmem:[#allocation4 + $0x1dd8] sm:$0xff] }
 0xa03   :  { %2609 = vmatpush.msrb.mxu3 %v2204_v8  ;;  %2629 = vmatpush.msra.mxu0 %v2268_v5  ;;  %v2353_v62 = vld [vmem:[#allocation4 + $0x1fd8] sm:$0xff] }
 0xa04   :  { %2649 = vmatpush.msra.mxu1 %v2332_v12  ;;  %2669 = vmatpush.msra.mxu2 %v2396_v2  ;;  %v2417_v0 = vld [vmem:[#allocation4 + $0x21d8] sm:$0xff] }
 0xa05   :  { %2610 = vmatpush.msrb.mxu3 %v2200_v32  ;;  %2630 = vmatpush.msra.mxu0 %v2264_v35  ;;  %v2221_v3 = vld [vmem:[#allocation4 + $0x1bb8] sm:$0xff] }
 0xa06   :  { %2650 = vmatpush.msra.mxu1 %v2328_v54  ;;  %2670 = vmatpush.msra.mxu2 %v2392_v60  ;;  %v2285_v10 = vld [vmem:[#allocation4 + $0x1db8] sm:$0xff] }
 0xa07   :  { %2611 = vmatpush.msrb.mxu3 %v2196_v26  ;;  %2631 = vmatpush.msra.mxu0 %v2260_v4  ;;  %v2349_v6 = vld [vmem:[#allocation4 + $0x1fb8] sm:$0xff] }
 0xa08   :  { %2651 = vmatpush.msra.mxu1 %v2324_v11  ;;  %2671 = vmatpush.msra.mxu2 %v2388_v16  ;;  %v2413_v13 = vld [vmem:[#allocation4 + $0x21b8] sm:$0xff] }
 0xa09   :  { %2612 = vmatpush.msrb.mxu3 %v2192_v17  ;;  %2632 = vmatpush.msra.mxu0 %v2256_v20  ;;  %v2217_v28 = vld [vmem:[#allocation4 + $0x1b98] sm:$0xff] }
 0xa0a   :  { %2652 = vmatpush.msra.mxu1 %v2320_v21  ;;  %2672 = vmatpush.msra.mxu2 %v2384_v22  ;;  %v2281_v30 = vld [vmem:[#allocation4 + $0x1d98] sm:$0xff] }
 0xa0b   :  { %2613 = vmatpush.msrb.mxu3 %v2188_v23  ;;  %2633 = vmatpush.msra.mxu0 %v2252_v37  ;;  %v2345_v49 = vld [vmem:[#allocation4 + $0x1f98] sm:$0xff] }
 0xa0c   :  { %2653 = vmatpush.msra.mxu1 %v2316_v24  ;;  %2673 = vmatpush.msra.mxu2 %v2380_v25  ;;  %v2409_v53 = vld [vmem:[#allocation4 + $0x2198] sm:$0xff] }
 0xa0d   :  { %2614 = vmatpush.msrb.mxu3 %v2184_v27  ;;  %2634 = vmatpush.msra.mxu0 %v2248_v29  ;;  %v2213_v8 = vld [vmem:[#allocation4 + $0x1b78] sm:$0xff] }
 0xa0e   :  { %2654 = vmatpush.msra.mxu1 %v2312_v33  ;;  %2674 = vmatpush.msra.mxu2 %v2376_v34  ;;  %v2277_v5 = vld [vmem:[#allocation4 + $0x1d78] sm:$0xff] }
 0xa0f   :  { %2615 = vmatpush.msrb.mxu3 %v2180_v19  ;;  %2635 = vmatpush.msra.mxu0 %v2244_v40  ;;  %v2341_v12 = vld [vmem:[#allocation4 + $0x1f78] sm:$0xff] }
 0xa10   :  { %2655 = vmatpush.msra.mxu1 %v2308_v9  ;;  %2675 = vmatpush.msra.mxu2 %v2372_v47  ;;  %v2405_v2 = vld [vmem:[#allocation4 + $0x2178] sm:$0xff] }
 0xa11   :  { %2616 = vmatpush.msrb.mxu3 %v2176_v50  ;;  %2636 = vmatpush.msra.mxu0 %v2240_v42  ;;  %v2209_v32 = vld [vmem:[#allocation4 + $0x1b58] sm:$0xff] }
 0xa12   :  { %2656 = vmatpush.msra.mxu1 %v2304_v44  ;;  %2676 = vmatpush.msra.mxu2 %v2368_v1  ;;  %v2273_v35 = vld [vmem:[#allocation4 + $0x1d58] sm:$0xff] }
 0xa13   :  { %2617 = vmatmul.f32.vlgmr.msrb.gmra.mxu3 %v4884_v36  ;;  %2637 = vmatmul.f32.vlgmr.msra.gmra.mxu0 %v4886_v39  ;;  %v2337_v54 = vld [vmem:[#allocation4 + $0x1f58] sm:$0xff] }
 0xa14   :  { %2657 = vmatmul.f32.vlgmr.msra.gmra.mxu1 %v4888_v58  ;;  %2677 = vmatmul.f32.vlgmr.msra.gmra.mxu2 %v4890_v38  ;;  %v2401_v60 = vld [vmem:[#allocation4 + $0x2158] sm:$0xff] }
 0xa15   :  { %2681 = vmatpush.msra.mxu3 %v2237_v43  ;;  %2701 = vmatpush.msrb.mxu0 %v2301_v57  ;;  %v2205_v26 = vld [vmem:[#allocation4 + $0x1b38] sm:$0xff] }
 0xa16   :  { %2721 = vmatpush.msrb.mxu1 %v2365_v45  ;;  %2741 = vmatpush.msrb.mxu2 %v2429_v46  ;;  %v2269_v4 = vld [vmem:[#allocation4 + $0x1d38] sm:$0xff] }
 0xa17   :  { %2682 = vmatpush.msra.mxu3 %v2233_v48  ;;  %2702 = vmatpush.msrb.mxu0 %v2297_v51  ;;  %v2333_v11 = vld [vmem:[#allocation4 + $0x1f38] sm:$0xff] }
 0xa18   :  { %2722 = vmatpush.msrb.mxu1 %v2361_v14  ;;  %2742 = vmatpush.msrb.mxu2 %v2425_v63  ;;  %v2397_v16 = vld [vmem:[#allocation4 + $0x2138] sm:$0xff] }
 0xa19   :  { %2683 = vmatpush.msra.mxu3 %v2229_v55  ;;  %2703 = vmatpush.msrb.mxu0 %v2293_v56  ;;  %v2201_v17 = vld [vmem:[#allocation4 + $0x1b18] sm:$0xff]  ;;  %v4908_v55 = vld [vmem:[#allocation4 + $0x3820] sm:$0xff] }
 0xa1a   :  { %2723 = vmatpush.msrb.mxu1 %v2357_v7  ;;  %2743 = vmatpush.msrb.mxu2 %v2421_v15  ;;  %v2265_v20 = vld [vmem:[#allocation4 + $0x1d18] sm:$0xff]  ;;  %v4911_v56 = vld [vmem:[#allocation4 + $0x3a20] sm:$0xff] }
 0xa1b   :  { %2684 = vmatpush.msra.mxu3 %v2225_v59  ;;  %2704 = vmatpush.msrb.mxu0 %v2289_v61  ;;  %v2329_v21 = vld [vmem:[#allocation4 + $0x1f18] sm:$0xff]  ;;  %v4914_v7 = vld [vmem:[#allocation4 + $0x3c20] sm:$0xff] }
 0xa1c   :  { %2724 = vmatpush.msrb.mxu1 %v2353_v62  ;;  %2744 = vmatpush.msrb.mxu2 %v2417_v0  ;;  %v2393_v22 = vld [vmem:[#allocation4 + $0x2118] sm:$0xff]  ;;  %v4917_v15 = vld [vmem:[#allocation4 + $0x3e20] sm:$0xff] }
 0xa1d   :  { %2685 = vmatpush.msra.mxu3 %v2221_v3  ;;  %2705 = vmatpush.msrb.mxu0 %v2285_v10  ;;  %v2197_v23 = vld [vmem:[#allocation4 + $0x1af8] sm:$0xff]  ;;  %v4932_v59 = vld [vmem:[#allocation4 + $0x37e0] sm:$0xff] }
 0xa1e   :  { %2725 = vmatpush.msrb.mxu1 %v2349_v6  ;;  %2745 = vmatpush.msrb.mxu2 %v2413_v13  ;;  %v2261_v37 = vld [vmem:[#allocation4 + $0x1cf8] sm:$0xff]  ;;  %v4935_v61 = vld [vmem:[#allocation4 + $0x39e0] sm:$0xff] }
 0xa1f   :  { %2686 = vmatpush.msra.mxu3 %v2217_v28  ;;  %2706 = vmatpush.msrb.mxu0 %v2281_v30  ;;  %v2325_v24 = vld [vmem:[#allocation4 + $0x1ef8] sm:$0xff]  ;;  %v4938_v62 = vld [vmem:[#allocation4 + $0x3be0] sm:$0xff] }
 0xa20   :  { %2726 = vmatpush.msrb.mxu1 %v2345_v49  ;;  %2746 = vmatpush.msrb.mxu2 %v2409_v53  ;;  %v2389_v25 = vld [vmem:[#allocation4 + $0x20f8] sm:$0xff]  ;;  %v4941_v0 = vld [vmem:[#allocation4 + $0x3de0] sm:$0xff] }
 0xa21   :  { %2687 = vmatpush.msra.mxu3 %v2213_v8  ;;  %2707 = vmatpush.msrb.mxu0 %v2277_v5  ;;  %v2193_v27 = vld [vmem:[#allocation4 + $0x1ad8] sm:$0xff]  ;;  %v4944_v3 = vld [vmem:[#allocation4 + $0x37c0] sm:$0xff] }
 0xa22   :  { %2727 = vmatpush.msrb.mxu1 %v2341_v12  ;;  %2747 = vmatpush.msrb.mxu2 %v2405_v2  ;;  %v2257_v29 = vld [vmem:[#allocation4 + $0x1cd8] sm:$0xff]  ;;  %v4947_v10 = vld [vmem:[#allocation4 + $0x39c0] sm:$0xff] }
 0xa23   :  { %2688 = vmatpush.msra.mxu3 %v2209_v32  ;;  %2708 = vmatpush.msrb.mxu0 %v2273_v35  ;;  %v2321_v33 = vld [vmem:[#allocation4 + $0x1ed8] sm:$0xff]  ;;  %v4950_v6 = vld [vmem:[#allocation4 + $0x3bc0] sm:$0xff] }
 0xa24   :  { %2728 = vmatpush.msrb.mxu1 %v2337_v54  ;;  %2748 = vmatpush.msrb.mxu2 %v2401_v60  ;;  %v2385_v34 = vld [vmem:[#allocation4 + $0x20d8] sm:$0xff]  ;;  %v4953_v13 = vld [vmem:[#allocation4 + $0x3dc0] sm:$0xff] }
 0xa25   :  { %2689 = vmatpush.msra.mxu3 %v2205_v26  ;;  %2709 = vmatpush.msrb.mxu0 %v2269_v4  ;;  %v2189_v19 = vld [vmem:[#allocation4 + $0x1ab8] sm:$0xff]  ;;  %v4956_v28 = vld [vmem:[#allocation4 + $0x37a0] sm:$0xff] }
 0xa26   :  { %2729 = vmatpush.msrb.mxu1 %v2333_v11  ;;  %2749 = vmatpush.msrb.mxu2 %v2397_v16  ;;  %v2253_v40 = vld [vmem:[#allocation4 + $0x1cb8] sm:$0xff]  ;;  %v4959_v30 = vld [vmem:[#allocation4 + $0x39a0] sm:$0xff] }
 0xa27   :  { %2690 = vmatpush.msra.mxu3 %v2201_v17  ;;  %2710 = vmatpush.msrb.mxu0 %v2265_v20  ;;  %v2317_v9 = vld [vmem:[#allocation4 + $0x1eb8] sm:$0xff]  ;;  %v4962_v49 = vld [vmem:[#allocation4 + $0x3ba0] sm:$0xff] }
 0xa28   :  { %2730 = vmatpush.msrb.mxu1 %v2329_v21  ;;  %2750 = vmatpush.msrb.mxu2 %v2393_v22  ;;  %v2381_v47 = vld [vmem:[#allocation4 + $0x20b8] sm:$0xff]  ;;  %v4965_v53 = vld [vmem:[#allocation4 + $0x3da0] sm:$0xff] }
 0xa29   :  { %2691 = vmatpush.msra.mxu3 %v2197_v23  ;;  %2711 = vmatpush.msrb.mxu0 %v2261_v37  ;;  %v2185_v50 = vld [vmem:[#allocation4 + $0x1a98] sm:$0xff]  ;;  %v4968_v8 = vld [vmem:[#allocation4 + $0x3780] sm:$0xff] }
 0xa2a   :  { %2731 = vmatpush.msrb.mxu1 %v2325_v24  ;;  %2751 = vmatpush.msrb.mxu2 %v2389_v25  ;;  %v2249_v42 = vld [vmem:[#allocation4 + $0x1c98] sm:$0xff]  ;;  %v4971_v5 = vld [vmem:[#allocation4 + $0x3980] sm:$0xff] }
 0xa2b   :  { %2692 = vmatpush.msra.mxu3 %v2193_v27  ;;  %2712 = vmatpush.msrb.mxu0 %v2257_v29  ;;  %v2313_v44 = vld [vmem:[#allocation4 + $0x1e98] sm:$0xff]  ;;  %v4974_v12 = vld [vmem:[#allocation4 + $0x3b80] sm:$0xff] }
 0xa2c   :  { %2732 = vmatpush.msrb.mxu1 %v2321_v33  ;;  %2752 = vmatpush.msrb.mxu2 %v2385_v34  ;;  %v2377_v1 = vld [vmem:[#allocation4 + $0x2098] sm:$0xff]  ;;  %v4977_v2 = vld [vmem:[#allocation4 + $0x3d80] sm:$0xff] }
 0xa2d   :  { %2693 = vmatpush.msra.mxu3 %v2189_v19  ;;  %2713 = vmatpush.msrb.mxu0 %v2253_v40  ;;  %v2181_v43 = vld [vmem:[#allocation4 + $0x1a78] sm:$0xff]  ;;  %v4980_v32 = vld [vmem:[#allocation4 + $0x3760] sm:$0xff] }
 0xa2e   :  { %2733 = vmatpush.msrb.mxu1 %v2317_v9  ;;  %2753 = vmatpush.msrb.mxu2 %v2381_v47  ;;  %v2245_v57 = vld [vmem:[#allocation4 + $0x1c78] sm:$0xff]  ;;  %v4983_v35 = vld [vmem:[#allocation4 + $0x3960] sm:$0xff] }
 0xa2f   :  { %2694 = vmatpush.msra.mxu3 %v2185_v50  ;;  %2714 = vmatpush.msrb.mxu0 %v2249_v42  ;;  %v2309_v45 = vld [vmem:[#allocation4 + $0x1e78] sm:$0xff]  ;;  %v4986_v54 = vld [vmem:[#allocation4 + $0x3b60] sm:$0xff] }
 0xa30   :  { %v2373_v46 = vld [vmem:[#allocation4 + $0x2078] sm:$0xff]  ;;  %2734 = vmatpush.msrb.mxu1 %v2313_v44  ;;  %2754 = vmatpush.msrb.mxu2 %v2377_v1  ;;  %v4989_v60 = vld [vmem:[#allocation4 + $0x3d60] sm:$0xff] }
 0xa31   :  { %v2177_v48 = vld [vmem:[#allocation4 + $0x1a58] sm:$0xff]  ;;  %2695 = vmatpush.msra.mxu3 %v2181_v43  ;;  %2715 = vmatpush.msrb.mxu0 %v2245_v57  ;;  %v4992_v26 = vld [vmem:[#allocation4 + $0x3740] sm:$0xff] }
 0xa32   :  { %v2241_v51 = vld [vmem:[#allocation4 + $0x1c58] sm:$0xff]  ;;  %2735 = vmatpush.msrb.mxu1 %v2309_v45  ;;  %2755 = vmatpush.msrb.mxu2 %v2373_v46  ;;  %v4995_v4 = vld [vmem:[#allocation4 + $0x3940] sm:$0xff] }
 0xa33   :  { %v2305_v14 = vld [vmem:[#allocation4 + $0x1e58] sm:$0xff]  ;;  %2696 = vmatpush.msra.mxu3 %v2177_v48  ;;  %2716 = vmatpush.msrb.mxu0 %v2241_v51  ;;  %v4998_v11 = vld [vmem:[#allocation4 + $0x3b40] sm:$0xff] }
 0xa34   :  { %v2369_v63 = vld [vmem:[#allocation4 + $0x2058] sm:$0xff]  ;;  %2736 = vmatpush.msrb.mxu1 %v2305_v14  ;;  %2697 = vmatmul.f32.vlgmr.msra.gmra.mxu3 %v4884_v36  ;;  %v4920_v36 = vld [vmem:[#allocation4 + $0x3800] sm:$0xff] }
 0xa35   :  { %2756 = vmatpush.msrb.mxu2 %v2369_v63  ;;  %2717 = vmatmul.f32.vlgmr.msrb.gmra.mxu0 %v4886_v39  ;;  %v4923_v39 = vld [vmem:[#allocation4 + $0x3a00] sm:$0xff] }
 0xa36   :  { %2737 = vmatmul.f32.vlgmr.msrb.gmra.mxu1 %v4888_v58  ;;  %2757 = vmatmul.f32.vlgmr.msrb.gmra.mxu2 %v4890_v38  ;;  %v4926_v58 = vld [vmem:[#allocation4 + $0x3c00] sm:$0xff] }
 0xa37   :  { %2761 = vmatpush.msrb.mxu3 %v4908_v55  ;;  %2781 = vmatpush.msra.mxu0 %v4911_v56  ;;  %v4929_v38 = vld [vmem:[#allocation4 + $0x3e00] sm:$0xff] }
 0xa38   :  { %2801 = vmatpush.msra.mxu1 %v4914_v7  ;;  %2821 = vmatpush.msra.mxu2 %v4917_v15  ;;  %v5001_v16 = vld [vmem:[#allocation4 + $0x3d40] sm:$0xff] }
 0xa39   :  { %2762 = vmatpush.msrb.mxu3 %v4920_v36  ;;  %2782 = vmatpush.msra.mxu0 %v4923_v39  ;;  %v5004_v17 = vld [vmem:[#allocation4 + $0x3720] sm:$0xff] }
 0xa3a   :  { %2802 = vmatpush.msra.mxu1 %v4926_v58  ;;  %2822 = vmatpush.msra.mxu2 %v4929_v38  ;;  %v5007_v20 = vld [vmem:[#allocation4 + $0x3920] sm:$0xff] }
 0xa3b   :  { %2763 = vmatpush.msrb.mxu3 %v4932_v59  ;;  %2783 = vmatpush.msra.mxu0 %v4935_v61  ;;  %v5010_v21 = vld [vmem:[#allocation4 + $0x3b20] sm:$0xff] }
 0xa3c   :  { %2803 = vmatpush.msra.mxu1 %v4938_v62  ;;  %2823 = vmatpush.msra.mxu2 %v4941_v0  ;;  %v5013_v22 = vld [vmem:[#allocation4 + $0x3d20] sm:$0xff] }
 0xa3d   :  { %2764 = vmatpush.msrb.mxu3 %v4944_v3  ;;  %2784 = vmatpush.msra.mxu0 %v4947_v10  ;;  %v5016_v23 = vld [vmem:[#allocation4 + $0x3700] sm:$0xff] }
 0xa3e   :  { %2804 = vmatpush.msra.mxu1 %v4950_v6  ;;  %2824 = vmatpush.msra.mxu2 %v4953_v13  ;;  %v5019_v37 = vld [vmem:[#allocation4 + $0x3900] sm:$0xff] }
 0xa3f   :  { %2765 = vmatpush.msrb.mxu3 %v4956_v28  ;;  %2785 = vmatpush.msra.mxu0 %v4959_v30  ;;  %v5022_v24 = vld [vmem:[#allocation4 + $0x3b00] sm:$0xff] }
 0xa40   :  { %2805 = vmatpush.msra.mxu1 %v4962_v49  ;;  %2825 = vmatpush.msra.mxu2 %v4965_v53  ;;  %v5025_v25 = vld [vmem:[#allocation4 + $0x3d00] sm:$0xff] }
 0xa41   :  { %2766 = vmatpush.msrb.mxu3 %v4968_v8  ;;  %2786 = vmatpush.msra.mxu0 %v4971_v5  ;;  %v5028_v27 = vld [vmem:[#allocation4 + $0x36e0] sm:$0xff] }
 0xa42   :  { %2806 = vmatpush.msra.mxu1 %v4974_v12  ;;  %2826 = vmatpush.msra.mxu2 %v4977_v2  ;;  %v5031_v29 = vld [vmem:[#allocation4 + $0x38e0] sm:$0xff] }
 0xa43   :  { %2767 = vmatpush.msrb.mxu3 %v4980_v32  ;;  %2787 = vmatpush.msra.mxu0 %v4983_v35  ;;  %v5034_v33 = vld [vmem:[#allocation4 + $0x3ae0] sm:$0xff] }
 0xa44   :  { %2807 = vmatpush.msra.mxu1 %v4986_v54  ;;  %2827 = vmatpush.msra.mxu2 %v4989_v60  ;;  %v5037_v34 = vld [vmem:[#allocation4 + $0x3ce0] sm:$0xff] }
 0xa45   :  { %2768 = vmatpush.msrb.mxu3 %v4992_v26  ;;  %2788 = vmatpush.msra.mxu0 %v4995_v4  ;;  %v5040_v19 = vld [vmem:[#allocation4 + $0x36c0] sm:$0xff] }
 0xa46   :  { %2808 = vmatpush.msra.mxu1 %v4998_v11  ;;  %2828 = vmatpush.msra.mxu2 %v5001_v16  ;;  %v5043_v40 = vld [vmem:[#allocation4 + $0x38c0] sm:$0xff] }
 0xa47   :  { %2769 = vmatpush.msrb.mxu3 %v5004_v17  ;;  %2789 = vmatpush.msra.mxu0 %v5007_v20  ;;  %v5046_v9 = vld [vmem:[#allocation4 + $0x3ac0] sm:$0xff] }
 0xa48   :  { %2809 = vmatpush.msra.mxu1 %v5010_v21  ;;  %2829 = vmatpush.msra.mxu2 %v5013_v22  ;;  %v5049_v47 = vld [vmem:[#allocation4 + $0x3cc0] sm:$0xff] }
 0xa49   :  { %2770 = vmatpush.msrb.mxu3 %v5016_v23  ;;  %2790 = vmatpush.msra.mxu0 %v5019_v37  ;;  %v5052_v50 = vld [vmem:[#allocation4 + $0x36a0] sm:$0xff] }
 0xa4a   :  { %2810 = vmatpush.msra.mxu1 %v5022_v24  ;;  %2830 = vmatpush.msra.mxu2 %v5025_v25  ;;  %v5055_v42 = vld [vmem:[#allocation4 + $0x38a0] sm:$0xff] }
 0xa4b   :  { %2771 = vmatpush.msrb.mxu3 %v5028_v27  ;;  %2791 = vmatpush.msra.mxu0 %v5031_v29  ;;  %v5058_v44 = vld [vmem:[#allocation4 + $0x3aa0] sm:$0xff] }
 0xa4c   :  { %2811 = vmatpush.msra.mxu1 %v5034_v33  ;;  %2831 = vmatpush.msra.mxu2 %v5037_v34  ;;  %v5061_v1 = vld [vmem:[#allocation4 + $0x3ca0] sm:$0xff] }
 0xa4d   :  { %2772 = vmatpush.msrb.mxu3 %v5040_v19  ;;  %2792 = vmatpush.msra.mxu0 %v5043_v40  ;;  %v5064_v43 = vld [vmem:[#allocation4 + $0x3680] sm:$0xff] }
 0xa4e   :  { %2812 = vmatpush.msra.mxu1 %v5046_v9  ;;  %2832 = vmatpush.msra.mxu2 %v5049_v47  ;;  %v5067_v57 = vld [vmem:[#allocation4 + $0x3880] sm:$0xff] }
 0xa4f   :  { %2773 = vmatpush.msrb.mxu3 %v5052_v50  ;;  %2793 = vmatpush.msra.mxu0 %v5055_v42  ;;  %v5070_v45 = vld [vmem:[#allocation4 + $0x3a80] sm:$0xff] }
 0xa50   :  { %2813 = vmatpush.msra.mxu1 %v5058_v44  ;;  %2833 = vmatpush.msra.mxu2 %v5061_v1  ;;  %v5073_v46 = vld [vmem:[#allocation4 + $0x3c80] sm:$0xff] }
 0xa51   :  { %2774 = vmatpush.msrb.mxu3 %v5064_v43  ;;  %2794 = vmatpush.msra.mxu0 %v5067_v57  ;;  %v5076_v48 = vld [vmem:[#allocation4 + $0x3660] sm:$0xff] }
 0xa52   :  { %2814 = vmatpush.msra.mxu1 %v5070_v45  ;;  %2834 = vmatpush.msra.mxu2 %v5073_v46  ;;  %v5079_v51 = vld [vmem:[#allocation4 + $0x3860] sm:$0xff] }
 0xa53   :  { %2775 = vmatpush.msrb.mxu3 %v5076_v48  ;;  %2795 = vmatpush.msra.mxu0 %v5079_v51  ;;  %v5082_v14 = vld [vmem:[#allocation4 + $0x3a60] sm:$0xff] }
 0xa54   :  { %2815 = vmatpush.msra.mxu1 %v5082_v14  ;;  %v5085_v63 = vld [vmem:[#allocation4 + $0x3c60] sm:$0xff] }
 0xa55   :  { %2835 = vmatpush.msra.mxu2 %v5085_v63  ;;  %2776 = vmatpush.msrb.mxu3 %v5088_v52 }
 0xa56   :  { %2796 = vmatpush.msra.mxu0 %v5091_v41  ;;  %2816 = vmatpush.msra.mxu1 %v5094_v31 }
 0xa57   :  { %2836 = vmatpush.msra.mxu2 %v5097_v18  ;;  %2871 = vmatpush.msra.mxu3 %v4908_v55  ;;  %v2431_v55 = vld [vmem:[#allocation4 + $0x3fe0] ss:$8 sm:$0xf] }
 0xa58   :  { %2891 = vmatpush.msrb.mxu0 %v4911_v56  ;;  %2911 = vmatpush.msrb.mxu1 %v4914_v7  ;;  %v2433_v56 = vperm.slane %v2431_v55, 0 }
 0xa59   :  { %2931 = vmatpush.msrb.mxu2 %v4917_v15  ;;  %2872 = vmatpush.msra.mxu3 %v4920_v36 }
 0xa5a   :  { %2892 = vmatpush.msrb.mxu0 %v4923_v39  ;;  %2912 = vmatpush.msrb.mxu1 %v4926_v58 }
 0xa5b   :  { %2932 = vmatpush.msrb.mxu2 %v4929_v38  ;;  %2873 = vmatpush.msra.mxu3 %v4932_v59 }
 0xa5c   :  { %2893 = vmatpush.msrb.mxu0 %v4935_v61  ;;  %2913 = vmatpush.msrb.mxu1 %v4938_v62  ;;  %v2434_v62 = vperm.slane %v2431_v55, 1 }
 0xa5d   :  { %2933 = vmatpush.msrb.mxu2 %v4941_v0  ;;  %2874 = vmatpush.msra.mxu3 %v4944_v3 }
 0xa5e   :  { %2894 = vmatpush.msrb.mxu0 %v4947_v10  ;;  %2914 = vmatpush.msrb.mxu1 %v4950_v6 }
 0xa5f   :  { %2934 = vmatpush.msrb.mxu2 %v4953_v13  ;;  %2875 = vmatpush.msra.mxu3 %v4956_v28 }
 0xa60   :  { %2895 = vmatpush.msrb.mxu0 %v4959_v30  ;;  %2915 = vmatpush.msrb.mxu1 %v4962_v49 }
 0xa61   :  { %2935 = vmatpush.msrb.mxu2 %v4965_v53  ;;  %2876 = vmatpush.msra.mxu3 %v4968_v8 }
 0xa62   :  { %2896 = vmatpush.msrb.mxu0 %v4971_v5  ;;  %2916 = vmatpush.msrb.mxu1 %v4974_v12 }
 0xa63   :  { %2936 = vmatpush.msrb.mxu2 %v4977_v2  ;;  %2877 = vmatpush.msra.mxu3 %v4980_v32  ;;  %v2436_v32 = vperm.slane %v2431_v55, 3 }
 0xa64   :  { %2897 = vmatpush.msrb.mxu0 %v4983_v35  ;;  %2917 = vmatpush.msrb.mxu1 %v4986_v54 }
 0xa65   :  { %2937 = vmatpush.msrb.mxu2 %v4989_v60  ;;  %2878 = vmatpush.msra.mxu3 %v4992_v26 }
 0xa66   :  { %2898 = vmatpush.msrb.mxu0 %v4995_v4  ;;  %2918 = vmatpush.msrb.mxu1 %v4998_v11 }
 0xa67   :  { %2938 = vmatpush.msrb.mxu2 %v5001_v16  ;;  %2879 = vmatpush.msra.mxu3 %v5004_v17 }
 0xa68   :  { %2899 = vmatpush.msrb.mxu0 %v5007_v20  ;;  %2919 = vmatpush.msrb.mxu1 %v5010_v21 }
 0xa69   :  { %2939 = vmatpush.msrb.mxu2 %v5013_v22  ;;  %2880 = vmatpush.msra.mxu3 %v5016_v23 }
 0xa6a   :  { %2900 = vmatpush.msrb.mxu0 %v5019_v37  ;;  %2920 = vmatpush.msrb.mxu1 %v5022_v24 }
 0xa6b   :  { %2940 = vmatpush.msrb.mxu2 %v5025_v25  ;;  %2881 = vmatpush.msra.mxu3 %v5028_v27 }
 0xa6c   :  { %2901 = vmatpush.msrb.mxu0 %v5031_v29  ;;  %2921 = vmatpush.msrb.mxu1 %v5034_v33  ;;  %v2478_v36 = vpop.f32.mrf.mxu0 }
 0xa6d   :  { %2941 = vmatpush.msrb.mxu2 %v5037_v34  ;;  %2882 = vmatpush.msra.mxu3 %v5040_v19  ;;  %v2498_v58 = vpop.f32.mrf.mxu1 }
 0xa6e   :  { %2902 = vmatpush.msrb.mxu0 %v5043_v40  ;;  %2922 = vmatpush.msrb.mxu1 %v5046_v9 }
 0xa6f   :  { %2942 = vmatpush.msrb.mxu2 %v5049_v47  ;;  %2883 = vmatpush.msra.mxu3 %v5052_v50 }
 0xa70   :  { %2903 = vmatpush.msrb.mxu0 %v5055_v42  ;;  %2923 = vmatpush.msrb.mxu1 %v5058_v44 }
 0xa71   :  { %2943 = vmatpush.msrb.mxu2 %v5061_v1  ;;  %2884 = vmatpush.msra.mxu3 %v5064_v43 }
 0xa72   :  { %2904 = vmatpush.msrb.mxu0 %v5067_v57  ;;  %v2458_v7 = vpop.f32.mrf.mxu3  ;;  %2924 = vmatpush.msrb.mxu1 %v5070_v45 }
 0xa73   :  { %2944 = vmatpush.msrb.mxu2 %v5073_v46  ;;  %v2459_v15 = vadd.f32 %v2458_v7, %v2433_v56  ;;  %2885 = vmatpush.msra.mxu3 %v5076_v48  ;;  %v2518_v59 = vpop.f32.mrf.mxu2 }
 0xa74   :  { %2905 = vmatpush.msrb.mxu0 %v5079_v51  ;;  %2925 = vmatpush.msrb.mxu1 %v5082_v14 }
 0xa75   :  { %2945 = vmatpush.msrb.mxu2 %v5085_v63  ;;  %v2479_v39 = vadd.f32 %v2478_v36, %v2459_v15  ;;  %2886 = vmatpush.msra.mxu3 %v5088_v52 }
 0xa76   :  { %2906 = vmatpush.msrb.mxu0 %v5091_v41  ;;  %2926 = vmatpush.msrb.mxu1 %v5094_v31  ;;  %v2558_v10 = vpop.f32.mrf.mxu0  ;;  %v2435_v31 = vperm.slane %v2431_v55, 2 }
 0xa77   :  { %2946 = vmatpush.msrb.mxu2 %v5097_v18  ;;  %v2499_v38 = vadd.f32 %v2498_v58, %v2479_v39  ;;  %v2578_v13 = vpop.f32.mrf.mxu1 }
 0xa79   :  { %v5164_v61 = vadd.f32 %v2518_v59, %v2499_v38 }
 0xa7b   :  { %2777 = vmatmul.f32.vlgmr.msrb.gmra.mxu3 %v5164_v61 }
 0xa7c   :  { %v2538_v0 = vpop.f32.mrf.mxu3 }
 0xa7d   :  { %v2539_v3 = vadd.f32 %v2538_v0, %v2434_v62  ;;  %v2598_v28 = vpop.f32.mrf.mxu2 }
 0xa7f   :  { %v2559_v6 = vadd.f32 %v2558_v10, %v2539_v3 }
 0xa81   :  { %v2579_v52 = vadd.f32 %v2578_v13, %v2559_v6 }
 0xa83   :  { %v5167_v41 = vadd.f32 %v2598_v28, %v2579_v52 }
 0xa85   :  { %2797 = vmatmul.f32.vlgmr.msra.gmra.mxu0 %v5167_v41 }
 0xa90   :  { %v2638_v49 = vpop.f32.mrf.mxu0 }
 0xa91   :  { %v2658_v8 = vpop.f32.mrf.mxu1 }
 0xa96   :  { %v2618_v18 = vpop.f32.mrf.mxu3 }
 0xa97   :  { %v2619_v30 = vadd.f32 %v2618_v18, %v2435_v31  ;;  %v2678_v12 = vpop.f32.mrf.mxu2  ;;  %v3075_v18 = vld [vmem:[#allocation4 + $0x2420] sm:$0xff] }
 0xa98   :  { %3282 = vmatpush.msrb.mxu3 %v3075_v18  ;;  %v3159_v18 = vld [vmem:[#allocation4 + $0x26c0] sm:$0xff] }
 0xa99   :  { %v2639_v53 = vadd.f32 %v2638_v49, %v2619_v30  ;;  %v3139_v30 = vld [vmem:[#allocation4 + $0x2620] sm:$0xff] }
 0xa9a   :  { %v3203_v49 = vld [vmem:[#allocation4 + $0x2820] sm:$0xff]  ;;  %3302 = vmatpush.msra.mxu0 %v3139_v30 }
 0xa9b   :  { %v2659_v5 = vadd.f32 %v2658_v8, %v2639_v53  ;;  %v3267_v8 = vld [vmem:[#allocation4 + $0x2a20] sm:$0xff] }
 0xa9c   :  { %v3223_v30 = vld [vmem:[#allocation4 + $0x28c0] sm:$0xff] }
 0xa9d   :  { %v5170_v2 = vadd.f32 %v2678_v12, %v2659_v5  ;;  %v3071_v5 = vld [vmem:[#allocation4 + $0x2400] sm:$0xff] }
 0xa9e   :  { %v3135_v12 = vld [vmem:[#allocation4 + $0x2600] sm:$0xff]  ;;  %3283 = vmatpush.msrb.mxu3 %v3071_v5 }
 0xa9f   :  { %2817 = vmatmul.f32.vlgmr.msra.gmra.mxu1 %v5170_v2  ;;  %3303 = vmatpush.msra.mxu0 %v3135_v12  ;;  %v3023_v5 = vld [vmem:[#allocation4 + $0x2280] sm:$0xff] }
 0xaa0   :  { %3322 = vmatpush.msra.mxu1 %v3203_v49  ;;  %v3027_v49 = vld [vmem:[#allocation4 + $0x22a0] sm:$0xff] }
 0xaa1   :  { %v3087_v12 = vld [vmem:[#allocation4 + $0x2480] sm:$0xff] }
 0xab2   :  { %v2718_v60 = vpop.f32.mrf.mxu0 }
 0xab3   :  { %v2738_v4 = vpop.f32.mrf.mxu1 }
 0xab7   :  { %v2698_v35 = vpop.f32.mrf.mxu3 }
 0xab8   :  { %v2699_v54 = vadd.f32 %v2698_v35, %v2436_v32  ;;  %v3199_v32 = vld [vmem:[#allocation4 + $0x2800] sm:$0xff] }
 0xab9   :  { %v2758_v16 = vpop.f32.mrf.mxu2  ;;  %v3263_v35 = vld [vmem:[#allocation4 + $0x2a00] sm:$0xff]  ;;  %3323 = vmatpush.msra.mxu1 %v3199_v32 }
 0xaba   :  { %v2719_v26 = vadd.f32 %v2718_v60, %v2699_v54  ;;  %v3067_v54 = vld [vmem:[#allocation4 + $0x23e0] sm:$0xff] }
 0xabb   :  { %v3131_v60 = vld [vmem:[#allocation4 + $0x25e0] sm:$0xff]  ;;  %3284 = vmatpush.msrb.mxu3 %v3067_v54 }
 0xabc   :  { %v2739_v11 = vadd.f32 %v2738_v4, %v2719_v26  ;;  %v3195_v26 = vld [vmem:[#allocation4 + $0x27e0] sm:$0xff]  ;;  %3304 = vmatpush.msra.mxu0 %v3131_v60 }
 0xabd   :  { %v3259_v4 = vld [vmem:[#allocation4 + $0x29e0] sm:$0xff]  ;;  %3324 = vmatpush.msra.mxu1 %v3195_v26 }
 0xabe   :  { %v5173_v17 = vadd.f32 %v2758_v16, %v2739_v11  ;;  %v3063_v11 = vld [vmem:[#allocation4 + $0x23c0] sm:$0xff] }
 0xabf   :  { %v3127_v16 = vld [vmem:[#allocation4 + $0x25c0] sm:$0xff]  ;;  %3285 = vmatpush.msrb.mxu3 %v3063_v11 }
 0xac0   :  { %2837 = vmatmul.f32.vlgmr.msra.gmra.mxu2 %v5173_v17  ;;  %3305 = vmatpush.msra.mxu0 %v3127_v16  ;;  %v3151_v32 = vld [vmem:[#allocation4 + $0x2680] sm:$0xff] }
 0xac1   :  { %3342 = vmatpush.msra.mxu2 %v3267_v8  ;;  %v3219_v8 = vld [vmem:[#allocation4 + $0x28a0] sm:$0xff] }
 0xac2   :  { %v3019_v54 = vld [vmem:[#allocation4 + $0x2260] sm:$0xff] }
 0xac3   :  { %3343 = vmatpush.msra.mxu2 %v3263_v35  ;;  %v3215_v35 = vld [vmem:[#allocation4 + $0x2880] sm:$0xff] }
 0xac4   :  { %v3083_v60 = vld [vmem:[#allocation4 + $0x2460] sm:$0xff] }
 0xac5   :  { %3344 = vmatpush.msra.mxu2 %v3259_v4  ;;  %v3147_v26 = vld [vmem:[#allocation4 + $0x2660] sm:$0xff] }
 0xac6   :  { %v3211_v4 = vld [vmem:[#allocation4 + $0x2860] sm:$0xff] }
 0xac7   :  { %v3015_v11 = vld [vmem:[#allocation4 + $0x2240] sm:$0xff] }
 0xac8   :  { %v3079_v16 = vld [vmem:[#allocation4 + $0x2440] sm:$0xff] }
 0xafe   :  { %v2778_v21 = vpop.f32.mrf.mxu3 }
 0xb02   :  { %v2798_v20 = vpop.f32.mrf.mxu0 }
 0xb03   :  { %v2799_v23 = vadd.f32 %v2798_v20, %v2778_v21  ;;  %v3191_v20 = vld [vmem:[#allocation4 + $0x27c0] sm:$0xff] }
 0xb04   :  { %v3255_v21 = vld [vmem:[#allocation4 + $0x29c0] sm:$0xff]  ;;  %3325 = vmatpush.msra.mxu1 %v3191_v20 }
 0xb05   :  { %3345 = vmatpush.msra.mxu2 %v3255_v21  ;;  %v3143_v20 = vld [vmem:[#allocation4 + $0x2640] sm:$0xff] }
 0xb06   :  { %v3207_v21 = vld [vmem:[#allocation4 + $0x2840] sm:$0xff] }
 0xb1c   :  { %v2818_v22 = vpop.f32.mrf.mxu1 }
 0xb1d   :  { %v2819_v37 = vadd.f32 %v2818_v22, %v2799_v23  ;;  %v3059_v22 = vld [vmem:[#allocation4 + $0x23a0] sm:$0xff] }
 0xb1e   :  { %v3123_v23 = vld [vmem:[#allocation4 + $0x25a0] sm:$0xff]  ;;  %3286 = vmatpush.msrb.mxu3 %v3059_v22  ;;  %v3076_v22 = vld [vmem:[#allocation4 + $0x2428] sm:$0xff] }
 0xb1f   :  { %3306 = vmatpush.msra.mxu0 %v3123_v23  ;;  %v3140_v23 = vld [vmem:[#allocation4 + $0x2628] sm:$0xff] }
 0xb43   :  { %v2838_v24 = vpop.f32.mrf.mxu2 }
 0xb44   :  { %v2839_v25 = vadd.f32 %v2838_v24, %v2819_v37  ;;  %v3187_v37 = vld [vmem:[#allocation4 + $0x27a0] sm:$0xff] }
 0xb45   :  { %v3251_v24 = vld [vmem:[#allocation4 + $0x29a0] sm:$0xff]  ;;  %3326 = vmatpush.msra.mxu1 %v3187_v37  ;;  %v3204_v37 = vld [vmem:[#allocation4 + $0x2828] sm:$0xff] }
 0xb46   :  { %v2841_v27 = vsel %vm372_vm1, %v2839_v25, 0.0  ;;  %v3055_v25 = vld [vmem:[#allocation4 + $0x2380] sm:$0xff]  ;;  %3346 = vmatpush.msra.mxu2 %v3251_v24  ;;  %v3268_v24 = vld [vmem:[#allocation4 + $0x2a28] sm:$0xff] }
 0xb47   :  { %v2842_v29 = vrot.slane %v2841_v27, 4  ;;  %3287 = vmatpush.msrb.mxu3 %v3055_v25  ;;  %v3072_v25 = vld [vmem:[#allocation4 + $0x2408] sm:$0xff] }
 0xb49   :  { %v2843_v33 = vadd.f32 %v2842_v29, %v2841_v27  ;;  %v3119_v27 = vld [vmem:[#allocation4 + $0x2580] sm:$0xff] }
 0xb4a   :  { %3307 = vmatpush.msra.mxu0 %v3119_v27  ;;  %v3136_v27 = vld [vmem:[#allocation4 + $0x2608] sm:$0xff] }
 0xb4b   :  { %v2844_v34 = vrot.slane %v2843_v33, 2 }
 0xb4d   :  { %v2845_v19 = vadd.f32 %v2844_v34, %v2843_v33  ;;  %v3183_v33 = vld [vmem:[#allocation4 + $0x2780] sm:$0xff] }
 0xb4e   :  { %v3247_v34 = vld [vmem:[#allocation4 + $0x2980] sm:$0xff]  ;;  %3327 = vmatpush.msra.mxu1 %v3183_v33  ;;  %v3264_v33 = vld [vmem:[#allocation4 + $0x2a08] sm:$0xff] }
 0xb4f   :  { %v2846_v40 = vrot.slane %v2845_v19, 1  ;;  %3347 = vmatpush.msra.mxu2 %v3247_v34  ;;  %v3068_v34 = vld [vmem:[#allocation4 + $0x23e8] sm:$0xff] }
 0xb51   :  { %v2847_v9 = vadd.f32 %v2846_v40, %v2845_v19  ;;  %v3051_v40 = vld [vmem:[#allocation4 + $0x2360] sm:$0xff] }
 0xb52   :  { %3288 = vmatpush.msrb.mxu3 %v3051_v40  ;;  %v3196_v40 = vld [vmem:[#allocation4 + $0x27e8] sm:$0xff] }
 0xb53   :  { %v5177_v47 = vmul.f32 0.03125, %v2847_v9  ;;  %v3115_v9 = vld [vmem:[#allocation4 + $0x2560] sm:$0xff] }
 0xb54   :  { %3308 = vmatpush.msra.mxu0 %v3115_v9  ;;  %v3260_v9 = vld [vmem:[#allocation4 + $0x29e8] sm:$0xff] }
 0xb55   :  { %2856 = vrot.lane.b32.xlu2 %v5177_v47, %s4220_s0  ;;  %2853 = vrot.lane.b32.xlu1 %v5177_v47, %s4221_s1 }
 0xb56   :  { %2850 = vrot.lane.b32.xlu0 %v5177_v47, %s4219_s20 }
 0xbaf   :  { %v2857_v1 = vpop.permute.xlu2 %2856 }
 0xbc7   :  { %v2854_v50 = vpop.permute.xlu1 %2853 }
 0xbc8   :  { %v2851_v42 = vpop.permute.xlu0 %2850 }
 0xbc9   :  { %v2859_v44 = vsel %vm391_vm2, %v5177_v47, %v2851_v42  ;;  %v3243_v42 = vld [vmem:[#allocation4 + $0x2960] sm:$0xff] }
 0xbca   :  { %v2860_v43 = vsel %vm393_vm3, %v2859_v44, %v2854_v50  ;;  %v3179_v50 = vld [vmem:[#allocation4 + $0x2760] sm:$0xff]  ;;  %3348 = vmatpush.msra.mxu2 %v3243_v42  ;;  %v3128_v42 = vld [vmem:[#allocation4 + $0x25c8] sm:$0xff] }
 0xbcb   :  { %v2861_v57 = vsel %vm395_vm4, %v2860_v43, %v2857_v1  ;;  %v3047_v1 = vld [vmem:[#allocation4 + $0x2340] sm:$0xff]  ;;  %3328 = vmatpush.msra.mxu1 %v3179_v50  ;;  %v3064_v50 = vld [vmem:[#allocation4 + $0x23c8] sm:$0xff] }
 0xbcc   :  { %v2862_v45 = vperm.slane %v2861_v57, 0  ;;  %v3111_v43 = vld [vmem:[#allocation4 + $0x2540] sm:$0xff]  ;;  %3289 = vmatpush.msrb.mxu3 %v3047_v1  ;;  %v3256_v1 = vld [vmem:[#allocation4 + $0x29c8] sm:$0xff] }
 0xbcd   :  { %v3175_v57 = vld [vmem:[#allocation4 + $0x2740] sm:$0xff]  ;;  %3309 = vmatpush.msra.mxu0 %v3111_v43  ;;  %v3060_v43 = vld [vmem:[#allocation4 + $0x23a8] sm:$0xff] }
 0xbce   :  { %v2863_v46 = vsub.f32 %v5164_v61, %v2862_v45  ;;  %v2864_v48 = vsub.f32 %v5167_v41, %v2862_v45  ;;  %v2865_v51 = vsub.f32 %v5170_v2, %v2862_v45  ;;  %v2866_v14 = vsub.f32 %v5173_v17, %v2862_v45  ;;  %v3239_v45 = vld [vmem:[#allocation4 + $0x2940] sm:$0xff]  ;;  %3329 = vmatpush.msra.mxu1 %v3175_v57  ;;  %v3124_v57 = vld [vmem:[#allocation4 + $0x25a8] sm:$0xff] }
 0xbcf   :  { %3349 = vmatpush.msra.mxu2 %v3239_v45  ;;  %v3188_v45 = vld [vmem:[#allocation4 + $0x27a8] sm:$0xff] }
 0xbd0   :  { %v2867_v63 = vmul.f32 %v2863_v46, %v2863_v46  ;;  %v2868_v55 = vmul.f32 %v2864_v48, %v2864_v48  ;;  %v2869_v56 = vmul.f32 %v2865_v51, %v2865_v51  ;;  %v2870_v7 = vmul.f32 %v2866_v14, %v2866_v14  ;;  %v3043_v48 = vld [vmem:[#allocation4 + $0x2320] sm:$0xff] }
 0xbd1   :  { %v3107_v51 = vld [vmem:[#allocation4 + $0x2520] sm:$0xff]  ;;  %3290 = vmatpush.msrb.mxu3 %v3043_v48  ;;  %v3056_v48 = vld [vmem:[#allocation4 + $0x2388] sm:$0xff] }
 0xbd2   :  { %2887 = vmatmul.f32.vlgmr.msra.gmra.mxu3 %v2867_v63  ;;  %2907 = vmatmul.f32.vlgmr.msrb.gmra.mxu0 %v2868_v55  ;;  %v3171_v14 = vld [vmem:[#allocation4 + $0x2720] sm:$0xff] }
 0xbd3   :  { %2927 = vmatmul.f32.vlgmr.msrb.gmra.mxu1 %v2869_v56  ;;  %2947 = vmatmul.f32.vlgmr.msrb.gmra.mxu2 %v2870_v7  ;;  %v3235_v63 = vld [vmem:[#allocation4 + $0x2920] sm:$0xff] }
 0xbd4   :  { %v3039_v56 = vld [vmem:[#allocation4 + $0x2300] sm:$0xff]  ;;  %3310 = vmatpush.msra.mxu0 %v3107_v51  ;;  %3330 = vmatpush.msra.mxu1 %v3171_v14  ;;  %v3120_v51 = vld [vmem:[#allocation4 + $0x2588] sm:$0xff] }
 0xbd5   :  { %v3103_v7 = vld [vmem:[#allocation4 + $0x2500] sm:$0xff]  ;;  %3350 = vmatpush.msra.mxu2 %v3235_v63  ;;  %3291 = vmatpush.msrb.mxu3 %v3039_v56  ;;  %v3184_v14 = vld [vmem:[#allocation4 + $0x2788] sm:$0xff] }
 0xbd6   :  { %3311 = vmatpush.msra.mxu0 %v3103_v7  ;;  %v3248_v63 = vld [vmem:[#allocation4 + $0x2988] sm:$0xff] }
 0xbd7   :  { %v3116_v56 = vld [vmem:[#allocation4 + $0x2568] sm:$0xff] }
 0xbd8   :  { %v3180_v7 = vld [vmem:[#allocation4 + $0x2768] sm:$0xff] }
 0xc4f   :  { %v2908_v15 = vpop.f32.mrf.mxu0 }
 0xc50   :  { %v2928_v58 = vpop.f32.mrf.mxu1 }
 0xc55   :  { %v2888_v36 = vpop.f32.mrf.mxu3 }
 0xc56   :  { %v2909_v39 = vadd.f32 %v2908_v15, %v2888_v36  ;;  %v2948_v59 = vpop.f32.mrf.mxu2  ;;  %v3167_v15 = vld [vmem:[#allocation4 + $0x2700] sm:$0xff] }
 0xc57   :  { %v3231_v36 = vld [vmem:[#allocation4 + $0x2900] sm:$0xff]  ;;  %3331 = vmatpush.msra.mxu1 %v3167_v15  ;;  %v3244_v15 = vld [vmem:[#allocation4 + $0x2968] sm:$0xff] }
 0xc58   :  { %v2929_v38 = vadd.f32 %v2928_v58, %v2909_v39  ;;  %v2959_v39 = vld [vmem:[#allocation4 + $0x4000] ss:$0 sm:$0xff]  ;;  %3351 = vmatpush.msra.mxu2 %v3231_v36  ;;  %v3048_v36 = vld [vmem:[#allocation4 + $0x2348] sm:$0xff] }
 0xc5a   :  { %v2949_v62 = vadd.f32 %v2948_v59, %v2929_v38  ;;  %v3035_v38 = vld [vmem:[#allocation4 + $0x22e0] sm:$0xff] }
 0xc5b   :  { %v3099_v59 = vld [vmem:[#allocation4 + $0x24e0] sm:$0xff]  ;;  %3292 = vmatpush.msrb.mxu3 %v3035_v38  ;;  %v3240_v38 = vld [vmem:[#allocation4 + $0x2948] sm:$0xff] }
 0xc5c   :  { %v2951_v0 = vsel %vm372_vm1, %v2949_v62, 0.0  ;;  %v3163_v62 = vld [vmem:[#allocation4 + $0x26e0] sm:$0xff]  ;;  %3312 = vmatpush.msra.mxu0 %v3099_v59  ;;  %v3044_v59 = vld [vmem:[#allocation4 + $0x2328] sm:$0xff] }
 0xc5d   :  { %v2952_v3 = vrot.slane %v2951_v0, 4  ;;  %3332 = vmatpush.msra.mxu1 %v3163_v62  ;;  %v3108_v62 = vld [vmem:[#allocation4 + $0x2528] sm:$0xff] }
 0xc5f   :  { %v2953_v10 = vadd.f32 %v2952_v3, %v2951_v0  ;;  %v3227_v0 = vld [vmem:[#allocation4 + $0x28e0] sm:$0xff]  ;;  %3333 = vmatpush.msra.mxu1 %v3159_v18  ;;  %v3036_v18 = vld [vmem:[#allocation4 + $0x22e8] sm:$0xff] }
 0xc60   :  { %3352 = vmatpush.msra.mxu2 %v3227_v0  ;;  %v3172_v0 = vld [vmem:[#allocation4 + $0x2728] sm:$0xff] }
 0xc61   :  { %v2954_v6 = vrot.slane %v2953_v10, 2 }
 0xc62   :  { %3353 = vmatpush.msra.mxu2 %v3223_v30  ;;  %v3100_v30 = vld [vmem:[#allocation4 + $0x24e8] sm:$0xff] }
 0xc63   :  { %v2955_v13 = vadd.f32 %v2954_v6, %v2953_v10 }
 0xc64   :  { %3354 = vmatpush.msra.mxu2 %v3219_v8  ;;  %v3096_v8 = vld [vmem:[#allocation4 + $0x24c8] sm:$0xff] }
 0xc65   :  { %v2956_v52 = vrot.slane %v2955_v13, 1 }
 0xc66   :  { %3355 = vmatpush.msra.mxu2 %v3215_v35  ;;  %v3092_v35 = vld [vmem:[#allocation4 + $0x24a8] sm:$0xff] }
 0xc67   :  { %v2957_v28 = vadd.f32 %v2956_v52, %v2955_v13  ;;  %v2972_v13 = vld [vmem:[#allocation4 + $0x4020] ss:$0 sm:$0xff] }
 0xc68   :  { %3356 = vmatpush.msra.mxu2 %v3211_v4  ;;  %v3088_v4 = vld [vmem:[#allocation4 + $0x2488] sm:$0xff] }
 0xc69   :  { %v2958_v31 = vmul.f32 0.03125, %v2957_v28  ;;  %v3031_v28 = vld [vmem:[#allocation4 + $0x22c0] sm:$0xff] }
 0xc6a   :  { %3293 = vmatpush.msrb.mxu3 %v3031_v28  ;;  %3357 = vmatpush.msra.mxu2 %v3207_v21  ;;  %v3168_v28 = vld [vmem:[#allocation4 + $0x2708] sm:$0xff] }
 0xc6b   :  { %v5194_v53 = vadd.f32 1e-05, %v2958_v31  ;;  %v3095_v31 = vld [vmem:[#allocation4 + $0x24c0] sm:$0xff]  ;;  %v3084_v21 = vld [vmem:[#allocation4 + $0x2468] sm:$0xff] }
 0xc6c   :  { %3313 = vmatpush.msra.mxu0 %v3095_v31  ;;  %3294 = vmatpush.msrb.mxu3 %v3027_v49  ;;  %v3232_v31 = vld [vmem:[#allocation4 + $0x2908] sm:$0xff] }
 0xc6d   :  { %4030 = vrsqrt.f32 %v5194_v53  ;;  %vm2967_vm15 = vweird.f32 %v5194_v53  ;;  %3422 = vmatpush.msrb.mxu2 %v3268_v24  ;;  %v3164_v49 = vld [vmem:[#allocation4 + $0x26e8] sm:$0xff] }
 0xc6e   :  { %3295 = vmatpush.msrb.mxu3 %v3023_v5  ;;  %v3160_v5 = vld [vmem:[#allocation4 + $0x26c8] sm:$0xff] }
 0xc6f   :  { %3423 = vmatpush.msrb.mxu2 %v3264_v33  ;;  %v3080_v24 = vld [vmem:[#allocation4 + $0x2448] sm:$0xff] }
 0xc70   :  { %3296 = vmatpush.msrb.mxu3 %v3019_v54  ;;  %v3156_v54 = vld [vmem:[#allocation4 + $0x26a8] sm:$0xff] }
 0xc71   :  { %3424 = vmatpush.msrb.mxu2 %v3260_v9 }
 0xc72   :  { %3297 = vmatpush.msrb.mxu3 %v3015_v11  ;;  %v3152_v11 = vld [vmem:[#allocation4 + $0x2688] sm:$0xff] }
 0xc73   :  { %v4031_v29 = vpop.eup %4030  ;;  %3425 = vmatpush.msrb.mxu2 %v3256_v1 }
 0xc74   :  { %v2962_v19 = vmul.f32 %v4031_v29, %v5194_v53  ;;  %vm2968_vm14 = vweird.f32 %v4031_v29  ;;  %v3155_v53 = vld [vmem:[#allocation4 + $0x26a0] sm:$0xff]  ;;  %3362 = vmatpush.msra.mxu3 %v3076_v22  ;;  %v3148_v22 = vld [vmem:[#allocation4 + $0x2668] sm:$0xff] }
 0xc75   :  { %vm2969_vm0 = vmor %vm2967_vm15, %vm2968_vm14  ;;  %3334 = vmatpush.msra.mxu1 %v3155_v53  ;;  %v3032_v53 = vld [vmem:[#allocation4 + $0x22c8] sm:$0xff] }
 0xc76   :  { %v2963_v44 = vmul.f32 %v4031_v29, %v2962_v19  ;;  %v3132_v19 = vld [vmem:[#allocation4 + $0x25e8] sm:$0xff]  ;;  %3363 = vmatpush.msra.mxu3 %v3072_v25 }
 0xc77   :  { %3335 = vmatpush.msra.mxu1 %v3151_v32  ;;  %v3028_v32 = vld [vmem:[#allocation4 + $0x22a8] sm:$0xff] }
 0xc78   :  { %v2964_v46 = vmul.f32 0.5, %v2963_v44  ;;  %3364 = vmatpush.msra.mxu3 %v3068_v34  ;;  %v3192_v44 = vld [vmem:[#allocation4 + $0x27c8] sm:$0xff] }
 0xc79   :  { %3336 = vmatpush.msra.mxu1 %v3147_v26  ;;  %v3024_v26 = vld [vmem:[#allocation4 + $0x2288] sm:$0xff] }
 0xc7a   :  { %v2965_v55 = vsub.f32 1.5, %v2964_v46  ;;  %3365 = vmatpush.msra.mxu3 %v3064_v50  ;;  %v3252_v46 = vld [vmem:[#allocation4 + $0x29a8] sm:$0xff] }
 0xc7b   :  { %3337 = vmatpush.msra.mxu1 %v3143_v20  ;;  %3426 = vmatpush.msrb.mxu2 %v3252_v46  ;;  %v3020_v20 = vld [vmem:[#allocation4 + $0x2268] sm:$0xff] }
 0xc7c   :  { %v2966_v58 = vmul.f32 %v4031_v29, %v2965_v55  ;;  %3366 = vmatpush.msra.mxu3 %v3060_v43  ;;  %v3052_v55 = vld [vmem:[#allocation4 + $0x2368] sm:$0xff] }
 0xc7d   :  { %3402 = vmatpush.msrb.mxu1 %v3204_v37  ;;  %3427 = vmatpush.msrb.mxu2 %v3248_v63  ;;  %v3016_v37 = vld [vmem:[#allocation4 + $0x2248] sm:$0xff] }
 0xc7e   :  { %v2970_v3 = vsel %vm2969_vm0, %v4031_v29, %v2966_v58  ;;  %v3200_v29 = vld [vmem:[#allocation4 + $0x2808] sm:$0xff]  ;;  %3367 = vmatpush.msra.mxu3 %v3056_v48 }
 0xc7f   :  { %v5200_v10 = vmul.f32 %v2970_v3, %v2959_v39  ;;  %3403 = vmatpush.msrb.mxu1 %v3200_v29  ;;  %3428 = vmatpush.msrb.mxu2 %v3244_v15  ;;  %v3112_v39 = vld [vmem:[#allocation4 + $0x2548] sm:$0xff] }
 0xc80   :  { %3368 = vmatpush.msra.mxu3 %v3052_v55  ;;  %v3176_v58 = vld [vmem:[#allocation4 + $0x2748] sm:$0xff] }
 0xc81   :  { %2982 = vrot.lane.b32.xlu2 %v5200_v10, %s4220_s0  ;;  %2979 = vrot.lane.b32.xlu1 %v5200_v10, %s4221_s1  ;;  %v2973_v6 = vmul.f32 %v5200_v10, %v5177_v47  ;;  %v3091_v47 = vld [vmem:[#allocation4 + $0x24a0] sm:$0xff]  ;;  %v3236_v3 = vld [vmem:[#allocation4 + $0x2928] sm:$0xff] }
 0xc82   :  { %2976 = vrot.lane.b32.xlu0 %v5200_v10, %s4219_s20  ;;  %3314 = vmatpush.msra.mxu0 %v3091_v47  ;;  %v3228_v47 = vld [vmem:[#allocation4 + $0x28e8] sm:$0xff] }
 0xc83   :  { %v5210_v52 = vsub.f32 %v2972_v13, %v2973_v6  ;;  %3404 = vmatpush.msrb.mxu1 %v3196_v40  ;;  %3369 = vmatpush.msra.mxu3 %v3048_v36  ;;  %v3040_v6 = vld [vmem:[#allocation4 + $0x2308] sm:$0xff] }
 0xc84   :  { %3315 = vmatpush.msra.mxu0 %v3087_v12  ;;  %3429 = vmatpush.msrb.mxu2 %v3240_v38  ;;  %v3104_v13 = vld [vmem:[#allocation4 + $0x2508] sm:$0xff]  ;;  %v3137_v38 = vld [vmem:[#allocation4 + $0x2610] sm:$0xff] }
 0xc85   :  { %3405 = vmatpush.msrb.mxu1 %v3192_v44  ;;  %3370 = vmatpush.msra.mxu3 %v3044_v59  ;;  %v3224_v12 = vld [vmem:[#allocation4 + $0x28c8] sm:$0xff]  ;;  %v3201_v59 = vld [vmem:[#allocation4 + $0x2810] sm:$0xff] }
 0xc86   :  { %3316 = vmatpush.msra.mxu0 %v3083_v60  ;;  %3430 = vmatpush.msrb.mxu2 %v3236_v3  ;;  %v3220_v60 = vld [vmem:[#allocation4 + $0x28a8] sm:$0xff]  ;;  %v3133_v3 = vld [vmem:[#allocation4 + $0x25f0] sm:$0xff] }
 0xc87   :  { %3406 = vmatpush.msrb.mxu1 %v3188_v45  ;;  %3371 = vmatpush.msra.mxu3 %v3040_v6  ;;  %v3144_v25 = vld [vmem:[#allocation4 + $0x2648] sm:$0xff]  ;;  %v3197_v6 = vld [vmem:[#allocation4 + $0x27f0] sm:$0xff] }
 0xc88   :  { %3317 = vmatpush.msra.mxu0 %v3079_v16  ;;  %3431 = vmatpush.msrb.mxu2 %v3232_v31  ;;  %v3216_v16 = vld [vmem:[#allocation4 + $0x2888] sm:$0xff]  ;;  %v3129_v31 = vld [vmem:[#allocation4 + $0x25d0] sm:$0xff] }
 0xc89   :  { %2995 = vrot.lane.b32.xlu2 %v5210_v52, %s4220_s0  ;;  %2992 = vrot.lane.b32.xlu1 %v5210_v52, %s4221_s1 }
 0xc8a   :  { %2989 = vrot.lane.b32.xlu0 %v5210_v52, %s4219_s20  ;;  %3382 = vmatpush.msrb.mxu0 %v3140_v23  ;;  %v3212_v23 = vld [vmem:[#allocation4 + $0x2868] sm:$0xff] }
 0xc8b   :  { %3407 = vmatpush.msrb.mxu1 %v3184_v14  ;;  %3372 = vmatpush.msra.mxu3 %v3036_v18  ;;  %v3193_v18 = vld [vmem:[#allocation4 + $0x27d0] sm:$0xff] }
 0xc8c   :  { %3383 = vmatpush.msrb.mxu0 %v3136_v27  ;;  %3432 = vmatpush.msrb.mxu2 %v3228_v47  ;;  %v3208_v27 = vld [vmem:[#allocation4 + $0x2848] sm:$0xff]  ;;  %v3125_v47 = vld [vmem:[#allocation4 + $0x25b0] sm:$0xff] }
 0xc8d   :  { %3408 = vmatpush.msrb.mxu1 %v3180_v7  ;;  %3373 = vmatpush.msra.mxu3 %v3032_v53  ;;  %v3189_v53 = vld [vmem:[#allocation4 + $0x27b0] sm:$0xff] }
 0xc8e   :  { %3384 = vmatpush.msrb.mxu0 %v3132_v19  ;;  %3433 = vmatpush.msrb.mxu2 %v3224_v12  ;;  %v3121_v12 = vld [vmem:[#allocation4 + $0x2590] sm:$0xff] }
 0xc8f   :  { %3409 = vmatpush.msrb.mxu1 %v3176_v58  ;;  %3374 = vmatpush.msra.mxu3 %v3028_v32  ;;  %v3141_v58 = vld [vmem:[#allocation4 + $0x2630] sm:$0xff] }
 0xc90   :  { %3385 = vmatpush.msrb.mxu0 %v3128_v42  ;;  %3434 = vmatpush.msrb.mxu2 %v3220_v60  ;;  %v3185_v32 = vld [vmem:[#allocation4 + $0x2790] sm:$0xff] }
 0xc91   :  { %3410 = vmatpush.msrb.mxu1 %v3172_v0  ;;  %3375 = vmatpush.msra.mxu3 %v3024_v26  ;;  %v3069_v0 = vld [vmem:[#allocation4 + $0x23f0] sm:$0xff] }
 0xc92   :  { %3386 = vmatpush.msrb.mxu0 %v3124_v57  ;;  %3435 = vmatpush.msrb.mxu2 %v3216_v16  ;;  %v3117_v60 = vld [vmem:[#allocation4 + $0x2570] sm:$0xff] }
 0xc93   :  { %3411 = vmatpush.msrb.mxu1 %v3168_v28  ;;  %3376 = vmatpush.msra.mxu3 %v3020_v20  ;;  %v3065_v28 = vld [vmem:[#allocation4 + $0x23d0] sm:$0xff] }
 0xc94   :  { %3387 = vmatpush.msrb.mxu0 %v3120_v51  ;;  %3436 = vmatpush.msrb.mxu2 %v3212_v23  ;;  %v3181_v26 = vld [vmem:[#allocation4 + $0x2770] sm:$0xff] }
 0xc95   :  { %3412 = vmatpush.msrb.mxu1 %v3164_v49  ;;  %3377 = vmatpush.msra.mxu3 %v3016_v37  ;;  %v3061_v49 = vld [vmem:[#allocation4 + $0x23b0] sm:$0xff] }
 0xc96   :  { %3388 = vmatpush.msrb.mxu0 %v3116_v56  ;;  %3437 = vmatpush.msrb.mxu2 %v3208_v27  ;;  %v3113_v16 = vld [vmem:[#allocation4 + $0x2550] sm:$0xff] }
 0xc97   :  { %3413 = vmatpush.msrb.mxu1 %v3160_v5  ;;  %v3057_v5 = vld [vmem:[#allocation4 + $0x2390] sm:$0xff] }
 0xc98   :  { %3389 = vmatpush.msrb.mxu0 %v3112_v39  ;;  %v3177_v20 = vld [vmem:[#allocation4 + $0x2750] sm:$0xff] }
 0xc99   :  { %3414 = vmatpush.msrb.mxu1 %v3156_v54  ;;  %v3053_v54 = vld [vmem:[#allocation4 + $0x2370] sm:$0xff] }
 0xc9a   :  { %3390 = vmatpush.msrb.mxu0 %v3108_v62  ;;  %v3265_v62 = vld [vmem:[#allocation4 + $0x2a10] sm:$0xff] }
 0xc9b   :  { %3415 = vmatpush.msrb.mxu1 %v3152_v11  ;;  %v3049_v11 = vld [vmem:[#allocation4 + $0x2350] sm:$0xff] }
 0xc9c   :  { %3391 = vmatpush.msrb.mxu0 %v3104_v13  ;;  %v3261_v13 = vld [vmem:[#allocation4 + $0x29f0] sm:$0xff] }
 0xc9d   :  { %3416 = vmatpush.msrb.mxu1 %v3148_v22  ;;  %v3045_v22 = vld [vmem:[#allocation4 + $0x2330] sm:$0xff] }
 0xc9e   :  { %3392 = vmatpush.msrb.mxu0 %v3100_v30  ;;  %v3257_v30 = vld [vmem:[#allocation4 + $0x29d0] sm:$0xff] }
 0xc9f   :  { %3417 = vmatpush.msrb.mxu1 %v3144_v25  ;;  %v3109_v23 = vld [vmem:[#allocation4 + $0x2530] sm:$0xff] }
 0xca0   :  { %3393 = vmatpush.msrb.mxu0 %v3096_v8  ;;  %v3253_v8 = vld [vmem:[#allocation4 + $0x29b0] sm:$0xff] }
 0xca1   :  { %v3173_v37 = vld [vmem:[#allocation4 + $0x2730] sm:$0xff] }
 0xca2   :  { %3394 = vmatpush.msrb.mxu0 %v3092_v35  ;;  %v3249_v35 = vld [vmem:[#allocation4 + $0x2990] sm:$0xff] }
 0xca3   :  { %v3041_v25 = vld [vmem:[#allocation4 + $0x2310] sm:$0xff] }
 0xca4   :  { %3395 = vmatpush.msrb.mxu0 %v3088_v4  ;;  %v3245_v4 = vld [vmem:[#allocation4 + $0x2970] sm:$0xff] }
 0xca5   :  { %v3105_v27 = vld [vmem:[#allocation4 + $0x2510] sm:$0xff] }
 0xca6   :  { %3396 = vmatpush.msrb.mxu0 %v3084_v21  ;;  %v3241_v21 = vld [vmem:[#allocation4 + $0x2950] sm:$0xff] }
 0xca8   :  { %3397 = vmatpush.msrb.mxu0 %v3080_v24  ;;  %v3237_v24 = vld [vmem:[#allocation4 + $0x2930] sm:$0xff] }
 0xcdb   :  { %v2983_v33 = vpop.permute.xlu2 %2982 }
 0xce3   :  { %v2996_v43 = vpop.permute.xlu2 %2995 }
 0xcf3   :  { %v2980_v29 = vpop.permute.xlu1 %2979 }
 0xcf4   :  { %v2977_v34 = vpop.permute.xlu0 %2976 }
 0xcf5   :  { %v2985_v19 = vsel %vm391_vm2, %v5200_v10, %v2977_v34  ;;  %v3037_v34 = vld [vmem:[#allocation4 + $0x22f0] sm:$0xff] }
 0xcf6   :  { %v2986_v40 = vsel %vm393_vm3, %v2985_v19, %v2980_v29  ;;  %v3169_v29 = vld [vmem:[#allocation4 + $0x2710] sm:$0xff] }
 0xcf7   :  { %v2987_v9 = vsel %vm395_vm4, %v2986_v40, %v2983_v33  ;;  %v3233_v33 = vld [vmem:[#allocation4 + $0x2910] sm:$0xff] }
 0xcf8   :  { %v3001_v50 = vperm.slane %v2987_v9, 0  ;;  %v3101_v19 = vld [vmem:[#allocation4 + $0x24f0] sm:$0xff] }
 0xcf9   :  { %v3165_v40 = vld [vmem:[#allocation4 + $0x26f0] sm:$0xff] }
 0xcfa   :  { %v3002_v46 = vmul.f32 %v3001_v50, %v5164_v61  ;;  %v3003_v10 = vmul.f32 %v3001_v50, %v5167_v41  ;;  %v3004_v51 = vmul.f32 %v3001_v50, %v5170_v2  ;;  %v3005_v14 = vmul.f32 %v3001_v50, %v5173_v17  ;;  %v3077_v61 = vld [vmem:[#allocation4 + $0x2430] sm:$0xff] }
 0xcfb   :  { %v2993_v42 = vpop.permute.xlu1 %2992  ;;  %v3205_v41 = vld [vmem:[#allocation4 + $0x2830] sm:$0xff] }
 0xcfc   :  { %v2990_v44 = vpop.permute.xlu0 %2989  ;;  %v3269_v2 = vld [vmem:[#allocation4 + $0x2a30] sm:$0xff] }
 0xcfd   :  { %v2998_v1 = vsel %vm391_vm2, %v5210_v52, %v2990_v44  ;;  %v3073_v17 = vld [vmem:[#allocation4 + $0x2410] sm:$0xff] }
 0xcfe   :  { %v2999_v57 = vsel %vm393_vm3, %v2998_v1, %v2993_v42  ;;  %v3229_v9 = vld [vmem:[#allocation4 + $0x28f0] sm:$0xff] }
 0xcff   :  { %v3000_v45 = vsel %vm395_vm4, %v2999_v57, %v2996_v43  ;;  %v3033_v50 = vld [vmem:[#allocation4 + $0x22d0] sm:$0xff] }
 0xd00   :  { %v3006_v48 = vperm.slane %v3000_v45, 0  ;;  %v3097_v42 = vld [vmem:[#allocation4 + $0x24d0] sm:$0xff] }
 0xd01   :  { %v3161_v44 = vld [vmem:[#allocation4 + $0x26d0] sm:$0xff] }
 0xd02   :  { %v3007_v63 = vadd.f32 %v3006_v48, %v3002_v46  ;;  %v3008_v55 = vadd.f32 %v3006_v48, %v3003_v10  ;;  %v3009_v56 = vadd.f32 %v3006_v48, %v3004_v51  ;;  %v3010_v7 = vadd.f32 %v3006_v48, %v3005_v14  ;;  %v3225_v1 = vld [vmem:[#allocation4 + $0x28d0] sm:$0xff] }
 0xd03   :  { %v3029_v43 = vld [vmem:[#allocation4 + $0x22b0] sm:$0xff] }
 0xd04   :  { %v5230_v15 = vmax.f32 %v3007_v63, 0.0  ;;  %v5232_v52 = vmax.f32 %v3008_v55, 0.0  ;;  %v5234_v36 = vmax.f32 %v3009_v56, 0.0  ;;  %v5236_v39 = vmax.f32 %v3010_v7, 0.0  ;;  %v3093_v57 = vld [vmem:[#allocation4 + $0x24b0] sm:$0xff] }
 0xd05   :  { %v3157_v45 = vld [vmem:[#allocation4 + $0x26b0] sm:$0xff] }
 0xd06   :  { %3298 = vmatmul.f32.vlgmr.msrb.gmra.mxu3 %v5230_v15  ;;  %3318 = vmatmul.f32.vlgmr.msra.gmra.mxu0 %v5232_v52  ;;  %v3221_v46 = vld [vmem:[#allocation4 + $0x28b0] sm:$0xff] }
 0xd07   :  { %3338 = vmatmul.f32.vlgmr.msra.gmra.mxu1 %v5234_v36  ;;  %3358 = vmatmul.f32.vlgmr.msra.gmra.mxu2 %v5236_v39  ;;  %v3025_v48 = vld [vmem:[#allocation4 + $0x2290] sm:$0xff] }
 0xd08   :  { %3442 = vmatpush.msrb.mxu3 %v3077_v61  ;;  %3462 = vmatpush.msra.mxu0 %v3141_v58  ;;  %v3089_v10 = vld [vmem:[#allocation4 + $0x2490] sm:$0xff] }
 0xd09   :  { %3482 = vmatpush.msra.mxu1 %v3205_v41  ;;  %3502 = vmatpush.msra.mxu2 %v3269_v2  ;;  %v3153_v51 = vld [vmem:[#allocation4 + $0x2690] sm:$0xff] }
 0xd0a   :  { %3443 = vmatpush.msrb.mxu3 %v3073_v17  ;;  %3463 = vmatpush.msra.mxu0 %v3137_v38  ;;  %v3217_v14 = vld [vmem:[#allocation4 + $0x2890] sm:$0xff]  ;;  %v3078_v17 = vld [vmem:[#allocation4 + $0x2438] sm:$0xff] }
 0xd0b   :  { %3483 = vmatpush.msra.mxu1 %v3201_v59  ;;  %3503 = vmatpush.msra.mxu2 %v3265_v62  ;;  %v3021_v63 = vld [vmem:[#allocation4 + $0x2270] sm:$0xff]  ;;  %v3142_v38 = vld [vmem:[#allocation4 + $0x2638] sm:$0xff] }
 0xd0c   :  { %3444 = vmatpush.msrb.mxu3 %v3069_v0  ;;  %3464 = vmatpush.msra.mxu0 %v3133_v3  ;;  %v3085_v55 = vld [vmem:[#allocation4 + $0x2470] sm:$0xff]  ;;  %v3206_v59 = vld [vmem:[#allocation4 + $0x2838] sm:$0xff] }
 0xd0d   :  { %3484 = vmatpush.msra.mxu1 %v3197_v6  ;;  %3504 = vmatpush.msra.mxu2 %v3261_v13  ;;  %v3149_v56 = vld [vmem:[#allocation4 + $0x2670] sm:$0xff]  ;;  %v3270_v62 = vld [vmem:[#allocation4 + $0x2a38] sm:$0xff] }
 0xd0e   :  { %3445 = vmatpush.msrb.mxu3 %v3065_v28  ;;  %3465 = vmatpush.msra.mxu0 %v3129_v31  ;;  %v3213_v7 = vld [vmem:[#allocation4 + $0x2870] sm:$0xff]  ;;  %v3074_v0 = vld [vmem:[#allocation4 + $0x2418] sm:$0xff] }
 0xd0f   :  { %3485 = vmatpush.msra.mxu1 %v3193_v18  ;;  %3505 = vmatpush.msra.mxu2 %v3257_v30  ;;  %v3017_v61 = vld [vmem:[#allocation4 + $0x2250] sm:$0xff]  ;;  %v3138_v3 = vld [vmem:[#allocation4 + $0x2618] sm:$0xff] }
 0xd10   :  { %3378 = vmatmul.f32.vlgmr.msra.gmra.mxu3 %v5230_v15  ;;  %3398 = vmatmul.f32.vlgmr.msrb.gmra.mxu0 %v5232_v52  ;;  %v3081_v58 = vld [vmem:[#allocation4 + $0x2450] sm:$0xff]  ;;  %v3202_v6 = vld [vmem:[#allocation4 + $0x2818] sm:$0xff] }
 0xd11   :  { %3418 = vmatmul.f32.vlgmr.msrb.gmra.mxu1 %v5234_v36  ;;  %3438 = vmatmul.f32.vlgmr.msrb.gmra.mxu2 %v5236_v39  ;;  %v3145_v41 = vld [vmem:[#allocation4 + $0x2650] sm:$0xff]  ;;  %v3266_v13 = vld [vmem:[#allocation4 + $0x2a18] sm:$0xff] }
 0xd12   :  { %3446 = vmatpush.msrb.mxu3 %v3061_v49  ;;  %3466 = vmatpush.msra.mxu0 %v3125_v47  ;;  %v3209_v2 = vld [vmem:[#allocation4 + $0x2850] sm:$0xff]  ;;  %v3070_v28 = vld [vmem:[#allocation4 + $0x23f8] sm:$0xff] }
 0xd13   :  { %3486 = vmatpush.msra.mxu1 %v3189_v53  ;;  %3506 = vmatpush.msra.mxu2 %v3253_v8  ;;  %v3134_v31 = vld [vmem:[#allocation4 + $0x25f8] sm:$0xff] }
 0xd14   :  { %3447 = vmatpush.msrb.mxu3 %v3057_v5  ;;  %3467 = vmatpush.msra.mxu0 %v3121_v12  ;;  %v3198_v18 = vld [vmem:[#allocation4 + $0x27f8] sm:$0xff] }
 0xd15   :  { %3487 = vmatpush.msra.mxu1 %v3185_v32  ;;  %3507 = vmatpush.msra.mxu2 %v3249_v35  ;;  %v3262_v30 = vld [vmem:[#allocation4 + $0x29f8] sm:$0xff] }
 0xd16   :  { %3448 = vmatpush.msrb.mxu3 %v3053_v54  ;;  %3468 = vmatpush.msra.mxu0 %v3117_v60  ;;  %v3066_v49 = vld [vmem:[#allocation4 + $0x23d8] sm:$0xff] }
 0xd17   :  { %3488 = vmatpush.msra.mxu1 %v3181_v26  ;;  %3508 = vmatpush.msra.mxu2 %v3245_v4  ;;  %v3130_v47 = vld [vmem:[#allocation4 + $0x25d8] sm:$0xff] }
 0xd18   :  { %3449 = vmatpush.msrb.mxu3 %v3049_v11  ;;  %3469 = vmatpush.msra.mxu0 %v3113_v16  ;;  %v3194_v53 = vld [vmem:[#allocation4 + $0x27d8] sm:$0xff] }
 0xd19   :  { %3489 = vmatpush.msra.mxu1 %v3177_v20  ;;  %3509 = vmatpush.msra.mxu2 %v3241_v21  ;;  %v3258_v8 = vld [vmem:[#allocation4 + $0x29d8] sm:$0xff] }
 0xd1a   :  { %3450 = vmatpush.msrb.mxu3 %v3045_v22  ;;  %3470 = vmatpush.msra.mxu0 %v3109_v23  ;;  %v3062_v5 = vld [vmem:[#allocation4 + $0x23b8] sm:$0xff] }
 0xd1b   :  { %3490 = vmatpush.msra.mxu1 %v3173_v37  ;;  %3510 = vmatpush.msra.mxu2 %v3237_v24  ;;  %v3126_v12 = vld [vmem:[#allocation4 + $0x25b8] sm:$0xff] }
 0xd1c   :  { %3451 = vmatpush.msrb.mxu3 %v3041_v25  ;;  %3471 = vmatpush.msra.mxu0 %v3105_v27  ;;  %v3190_v32 = vld [vmem:[#allocation4 + $0x27b8] sm:$0xff] }
 0xd1d   :  { %3491 = vmatpush.msra.mxu1 %v3169_v29  ;;  %3511 = vmatpush.msra.mxu2 %v3233_v33  ;;  %v3254_v35 = vld [vmem:[#allocation4 + $0x29b8] sm:$0xff] }
 0xd1e   :  { %3452 = vmatpush.msrb.mxu3 %v3037_v34  ;;  %3472 = vmatpush.msra.mxu0 %v3101_v19  ;;  %v3058_v54 = vld [vmem:[#allocation4 + $0x2398] sm:$0xff] }
 0xd1f   :  { %3492 = vmatpush.msra.mxu1 %v3165_v40  ;;  %3512 = vmatpush.msra.mxu2 %v3229_v9  ;;  %v3122_v60 = vld [vmem:[#allocation4 + $0x2598] sm:$0xff] }
 0xd20   :  { %3453 = vmatpush.msrb.mxu3 %v3033_v50  ;;  %3473 = vmatpush.msra.mxu0 %v3097_v42  ;;  %v3186_v26 = vld [vmem:[#allocation4 + $0x2798] sm:$0xff] }
 0xd21   :  { %3493 = vmatpush.msra.mxu1 %v3161_v44  ;;  %3513 = vmatpush.msra.mxu2 %v3225_v1  ;;  %v3250_v4 = vld [vmem:[#allocation4 + $0x2998] sm:$0xff] }
 0xd22   :  { %3454 = vmatpush.msrb.mxu3 %v3029_v43  ;;  %3474 = vmatpush.msra.mxu0 %v3093_v57  ;;  %v3054_v11 = vld [vmem:[#allocation4 + $0x2378] sm:$0xff] }
 0xd23   :  { %3494 = vmatpush.msra.mxu1 %v3157_v45  ;;  %3514 = vmatpush.msra.mxu2 %v3221_v46  ;;  %v3118_v16 = vld [vmem:[#allocation4 + $0x2578] sm:$0xff] }
 0xd24   :  { %3455 = vmatpush.msrb.mxu3 %v3025_v48  ;;  %3475 = vmatpush.msra.mxu0 %v3089_v10  ;;  %v3182_v20 = vld [vmem:[#allocation4 + $0x2778] sm:$0xff] }
 0xd25   :  { %3495 = vmatpush.msra.mxu1 %v3153_v51  ;;  %3515 = vmatpush.msra.mxu2 %v3217_v14  ;;  %v3246_v21 = vld [vmem:[#allocation4 + $0x2978] sm:$0xff] }
 0xd26   :  { %3456 = vmatpush.msrb.mxu3 %v3021_v63  ;;  %3476 = vmatpush.msra.mxu0 %v3085_v55  ;;  %v3050_v22 = vld [vmem:[#allocation4 + $0x2358] sm:$0xff] }
 0xd27   :  { %3496 = vmatpush.msra.mxu1 %v3149_v56  ;;  %3516 = vmatpush.msra.mxu2 %v3213_v7  ;;  %v3114_v23 = vld [vmem:[#allocation4 + $0x2558] sm:$0xff] }
 0xd28   :  { %3457 = vmatpush.msrb.mxu3 %v3017_v61  ;;  %3477 = vmatpush.msra.mxu0 %v3081_v58  ;;  %v3178_v37 = vld [vmem:[#allocation4 + $0x2758] sm:$0xff] }
 0xd29   :  { %3497 = vmatpush.msra.mxu1 %v3145_v41  ;;  %3517 = vmatpush.msra.mxu2 %v3209_v2  ;;  %v3242_v24 = vld [vmem:[#allocation4 + $0x2958] sm:$0xff] }
 0xd2a   :  { %3458 = vmatmul.f32.vlgmr.msrb.gmra.mxu3 %v5230_v15  ;;  %3478 = vmatmul.f32.vlgmr.msra.gmra.mxu0 %v5232_v52  ;;  %v3046_v25 = vld [vmem:[#allocation4 + $0x2338] sm:$0xff] }
 0xd2b   :  { %3498 = vmatmul.f32.vlgmr.msra.gmra.mxu1 %v5234_v36  ;;  %3518 = vmatmul.f32.vlgmr.msra.gmra.mxu2 %v5236_v39  ;;  %v3110_v27 = vld [vmem:[#allocation4 + $0x2538] sm:$0xff] }
 0xd2c   :  { %3522 = vmatpush.msra.mxu3 %v3078_v17  ;;  %3542 = vmatpush.msrb.mxu0 %v3142_v38  ;;  %v3174_v29 = vld [vmem:[#allocation4 + $0x2738] sm:$0xff] }
 0xd2d   :  { %3562 = vmatpush.msrb.mxu1 %v3206_v59  ;;  %3582 = vmatpush.msrb.mxu2 %v3270_v62  ;;  %v3238_v33 = vld [vmem:[#allocation4 + $0x2938] sm:$0xff] }
 0xd2e   :  { %3523 = vmatpush.msra.mxu3 %v3074_v0  ;;  %3543 = vmatpush.msrb.mxu0 %v3138_v3  ;;  %v3042_v34 = vld [vmem:[#allocation4 + $0x2318] sm:$0xff]  ;;  %v5254_v0 = vld [vmem:[#allocation4 + $0x3820] sm:$0xff] }
 0xd2f   :  { %3563 = vmatpush.msrb.mxu1 %v3202_v6  ;;  %3583 = vmatpush.msrb.mxu2 %v3266_v13  ;;  %v3106_v19 = vld [vmem:[#allocation4 + $0x2518] sm:$0xff]  ;;  %v5257_v3 = vld [vmem:[#allocation4 + $0x3a20] sm:$0xff] }
 0xd30   :  { %3524 = vmatpush.msra.mxu3 %v3070_v28  ;;  %3544 = vmatpush.msrb.mxu0 %v3134_v31  ;;  %v3170_v40 = vld [vmem:[#allocation4 + $0x2718] sm:$0xff]  ;;  %v5260_v6 = vld [vmem:[#allocation4 + $0x3c20] sm:$0xff] }
 0xd31   :  { %3564 = vmatpush.msrb.mxu1 %v3198_v18  ;;  %3584 = vmatpush.msrb.mxu2 %v3262_v30  ;;  %v3234_v9 = vld [vmem:[#allocation4 + $0x2918] sm:$0xff]  ;;  %v5263_v13 = vld [vmem:[#allocation4 + $0x3e20] sm:$0xff] }
 0xd32   :  { %3525 = vmatpush.msra.mxu3 %v3066_v49  ;;  %3545 = vmatpush.msrb.mxu0 %v3130_v47  ;;  %v3038_v50 = vld [vmem:[#allocation4 + $0x22f8] sm:$0xff]  ;;  %v5278_v28 = vld [vmem:[#allocation4 + $0x37e0] sm:$0xff] }
 0xd33   :  { %3565 = vmatpush.msrb.mxu1 %v3194_v53  ;;  %3585 = vmatpush.msrb.mxu2 %v3258_v8  ;;  %v3102_v42 = vld [vmem:[#allocation4 + $0x24f8] sm:$0xff]  ;;  %v5281_v31 = vld [vmem:[#allocation4 + $0x39e0] sm:$0xff] }
 0xd34   :  { %3526 = vmatpush.msra.mxu3 %v3062_v5  ;;  %3546 = vmatpush.msrb.mxu0 %v3126_v12  ;;  %v3166_v44 = vld [vmem:[#allocation4 + $0x26f8] sm:$0xff]  ;;  %v5284_v18 = vld [vmem:[#allocation4 + $0x3be0] sm:$0xff] }
 0xd35   :  { %3566 = vmatpush.msrb.mxu1 %v3190_v32  ;;  %3586 = vmatpush.msrb.mxu2 %v3254_v35  ;;  %v3230_v1 = vld [vmem:[#allocation4 + $0x28f8] sm:$0xff]  ;;  %v5287_v30 = vld [vmem:[#allocation4 + $0x3de0] sm:$0xff] }
 0xd36   :  { %3527 = vmatpush.msra.mxu3 %v3058_v54  ;;  %3547 = vmatpush.msrb.mxu0 %v3122_v60  ;;  %v3034_v43 = vld [vmem:[#allocation4 + $0x22d8] sm:$0xff]  ;;  %v5290_v49 = vld [vmem:[#allocation4 + $0x37c0] sm:$0xff] }
 0xd37   :  { %3567 = vmatpush.msrb.mxu1 %v3186_v26  ;;  %3587 = vmatpush.msrb.mxu2 %v3250_v4  ;;  %v3098_v57 = vld [vmem:[#allocation4 + $0x24d8] sm:$0xff]  ;;  %v5293_v47 = vld [vmem:[#allocation4 + $0x39c0] sm:$0xff] }
 0xd38   :  { %3528 = vmatpush.msra.mxu3 %v3054_v11  ;;  %3548 = vmatpush.msrb.mxu0 %v3118_v16  ;;  %v3162_v45 = vld [vmem:[#allocation4 + $0x26d8] sm:$0xff]  ;;  %v5296_v53 = vld [vmem:[#allocation4 + $0x3bc0] sm:$0xff] }
 0xd39   :  { %3568 = vmatpush.msrb.mxu1 %v3182_v20  ;;  %3588 = vmatpush.msrb.mxu2 %v3246_v21  ;;  %v3226_v46 = vld [vmem:[#allocation4 + $0x28d8] sm:$0xff]  ;;  %v5299_v8 = vld [vmem:[#allocation4 + $0x3dc0] sm:$0xff] }
 0xd3a   :  { %3529 = vmatpush.msra.mxu3 %v3050_v22  ;;  %3549 = vmatpush.msrb.mxu0 %v3114_v23  ;;  %v3030_v48 = vld [vmem:[#allocation4 + $0x22b8] sm:$0xff]  ;;  %v5302_v5 = vld [vmem:[#allocation4 + $0x37a0] sm:$0xff] }
 0xd3b   :  { %3569 = vmatpush.msrb.mxu1 %v3178_v37  ;;  %3589 = vmatpush.msrb.mxu2 %v3242_v24  ;;  %v3094_v10 = vld [vmem:[#allocation4 + $0x24b8] sm:$0xff]  ;;  %v5305_v12 = vld [vmem:[#allocation4 + $0x39a0] sm:$0xff] }
 0xd3c   :  { %3530 = vmatpush.msra.mxu3 %v3046_v25  ;;  %3550 = vmatpush.msrb.mxu0 %v3110_v27  ;;  %v3158_v51 = vld [vmem:[#allocation4 + $0x26b8] sm:$0xff]  ;;  %v5308_v32 = vld [vmem:[#allocation4 + $0x3ba0] sm:$0xff] }
 0xd3d   :  { %3570 = vmatpush.msrb.mxu1 %v3174_v29  ;;  %3590 = vmatpush.msrb.mxu2 %v3238_v33  ;;  %v3222_v14 = vld [vmem:[#allocation4 + $0x28b8] sm:$0xff]  ;;  %v5311_v35 = vld [vmem:[#allocation4 + $0x3da0] sm:$0xff] }
 0xd3e   :  { %3531 = vmatpush.msra.mxu3 %v3042_v34  ;;  %3551 = vmatpush.msrb.mxu0 %v3106_v19  ;;  %v3026_v63 = vld [vmem:[#allocation4 + $0x2298] sm:$0xff]  ;;  %v5314_v54 = vld [vmem:[#allocation4 + $0x3780] sm:$0xff] }
 0xd3f   :  { %3571 = vmatpush.msrb.mxu1 %v3170_v40  ;;  %3591 = vmatpush.msrb.mxu2 %v3234_v9  ;;  %v3090_v55 = vld [vmem:[#allocation4 + $0x2498] sm:$0xff]  ;;  %v5317_v60 = vld [vmem:[#allocation4 + $0x3980] sm:$0xff] }
 0xd40   :  { %3532 = vmatpush.msra.mxu3 %v3038_v50  ;;  %3552 = vmatpush.msrb.mxu0 %v3102_v42  ;;  %v3154_v56 = vld [vmem:[#allocation4 + $0x2698] sm:$0xff]  ;;  %v5320_v26 = vld [vmem:[#allocation4 + $0x3b80] sm:$0xff] }
 0xd41   :  { %3572 = vmatpush.msrb.mxu1 %v3166_v44  ;;  %3592 = vmatpush.msrb.mxu2 %v3230_v1  ;;  %v3218_v7 = vld [vmem:[#allocation4 + $0x2898] sm:$0xff]  ;;  %v5323_v4 = vld [vmem:[#allocation4 + $0x3d80] sm:$0xff] }
 0xd42   :  { %3533 = vmatpush.msra.mxu3 %v3034_v43  ;;  %3553 = vmatpush.msrb.mxu0 %v3098_v57  ;;  %v3022_v61 = vld [vmem:[#allocation4 + $0x2278] sm:$0xff]  ;;  %v5326_v11 = vld [vmem:[#allocation4 + $0x3760] sm:$0xff] }
 0xd43   :  { %3573 = vmatpush.msrb.mxu1 %v3162_v45  ;;  %3593 = vmatpush.msrb.mxu2 %v3226_v46  ;;  %v3086_v58 = vld [vmem:[#allocation4 + $0x2478] sm:$0xff]  ;;  %v5329_v16 = vld [vmem:[#allocation4 + $0x3960] sm:$0xff] }
 0xd44   :  { %3534 = vmatpush.msra.mxu3 %v3030_v48  ;;  %3554 = vmatpush.msrb.mxu0 %v3094_v10  ;;  %v3150_v41 = vld [vmem:[#allocation4 + $0x2678] sm:$0xff]  ;;  %v5332_v20 = vld [vmem:[#allocation4 + $0x3b60] sm:$0xff] }
 0xd45   :  { %3574 = vmatpush.msrb.mxu1 %v3158_v51  ;;  %3594 = vmatpush.msrb.mxu2 %v3222_v14  ;;  %v3214_v2 = vld [vmem:[#allocation4 + $0x2878] sm:$0xff]  ;;  %v5335_v21 = vld [vmem:[#allocation4 + $0x3d60] sm:$0xff] }
 0xd46   :  { %3535 = vmatpush.msra.mxu3 %v3026_v63  ;;  %3555 = vmatpush.msrb.mxu0 %v3090_v55  ;;  %v3018_v17 = vld [vmem:[#allocation4 + $0x2258] sm:$0xff]  ;;  %v5338_v22 = vld [vmem:[#allocation4 + $0x3740] sm:$0xff] }
 0xd47   :  { %3575 = vmatpush.msrb.mxu1 %v3154_v56  ;;  %3595 = vmatpush.msrb.mxu2 %v3218_v7  ;;  %v3082_v38 = vld [vmem:[#allocation4 + $0x2458] sm:$0xff]  ;;  %v5341_v23 = vld [vmem:[#allocation4 + $0x3940] sm:$0xff] }
 0xd48   :  { %3536 = vmatpush.msra.mxu3 %v3022_v61  ;;  %3556 = vmatpush.msrb.mxu0 %v3086_v58  ;;  %v3146_v59 = vld [vmem:[#allocation4 + $0x2658] sm:$0xff]  ;;  %v5344_v37 = vld [vmem:[#allocation4 + $0x3b40] sm:$0xff] }
 0xd49   :  { %v3210_v62 = vld [vmem:[#allocation4 + $0x2858] sm:$0xff]  ;;  %3576 = vmatpush.msrb.mxu1 %v3150_v41  ;;  %3596 = vmatpush.msrb.mxu2 %v3214_v2  ;;  %v5347_v24 = vld [vmem:[#allocation4 + $0x3d40] sm:$0xff] }
 0xd4a   :  { %3537 = vmatpush.msra.mxu3 %v3018_v17  ;;  %3557 = vmatpush.msrb.mxu0 %v3082_v38  ;;  %v5350_v25 = vld [vmem:[#allocation4 + $0x3720] sm:$0xff] }
 0xd4b   :  { %3577 = vmatpush.msrb.mxu1 %v3146_v59  ;;  %3597 = vmatpush.msrb.mxu2 %v3210_v62  ;;  %v5353_v27 = vld [vmem:[#allocation4 + $0x3920] sm:$0xff] }
 0xd4c   :  { %3538 = vmatmul.f32.vlgmr.msra.gmra.mxu3 %v5230_v15  ;;  %3558 = vmatmul.f32.vlgmr.msrb.gmra.mxu0 %v5232_v52  ;;  %v5266_v15 = vld [vmem:[#allocation4 + $0x3800] sm:$0xff] }
 0xd4d   :  { %3578 = vmatmul.f32.vlgmr.msrb.gmra.mxu1 %v5234_v36  ;;  %3598 = vmatmul.f32.vlgmr.msrb.gmra.mxu2 %v5236_v39  ;;  %v5269_v52 = vld [vmem:[#allocation4 + $0x3a00] sm:$0xff] }
 0xd4e   :  { %3610 = vmatpush.msrb.mxu3 %v5254_v0  ;;  %3630 = vmatpush.msra.mxu0 %v5257_v3  ;;  %v5272_v36 = vld [vmem:[#allocation4 + $0x3c00] sm:$0xff] }
 0xd4f   :  { %3650 = vmatpush.msra.mxu1 %v5260_v6  ;;  %3670 = vmatpush.msra.mxu2 %v5263_v13  ;;  %v5275_v39 = vld [vmem:[#allocation4 + $0x3e00] sm:$0xff] }
 0xd50   :  { %3611 = vmatpush.msrb.mxu3 %v5266_v15  ;;  %3631 = vmatpush.msra.mxu0 %v5269_v52  ;;  %v5356_v29 = vld [vmem:[#allocation4 + $0x3b20] sm:$0xff] }
 0xd51   :  { %3651 = vmatpush.msra.mxu1 %v5272_v36  ;;  %3671 = vmatpush.msra.mxu2 %v5275_v39  ;;  %v5359_v33 = vld [vmem:[#allocation4 + $0x3d20] sm:$0xff] }
 0xd52   :  { %3612 = vmatpush.msrb.mxu3 %v5278_v28  ;;  %3632 = vmatpush.msra.mxu0 %v5281_v31  ;;  %v5362_v34 = vld [vmem:[#allocation4 + $0x3700] sm:$0xff] }
 0xd53   :  { %3652 = vmatpush.msra.mxu1 %v5284_v18  ;;  %3672 = vmatpush.msra.mxu2 %v5287_v30  ;;  %v5365_v19 = vld [vmem:[#allocation4 + $0x3900] sm:$0xff] }
 0xd54   :  { %3613 = vmatpush.msrb.mxu3 %v5290_v49  ;;  %3633 = vmatpush.msra.mxu0 %v5293_v47  ;;  %v5368_v40 = vld [vmem:[#allocation4 + $0x3b00] sm:$0xff] }
 0xd55   :  { %3653 = vmatpush.msra.mxu1 %v5296_v53  ;;  %3673 = vmatpush.msra.mxu2 %v5299_v8  ;;  %v5371_v9 = vld [vmem:[#allocation4 + $0x3d00] sm:$0xff] }
 0xd56   :  { %3614 = vmatpush.msrb.mxu3 %v5302_v5  ;;  %3634 = vmatpush.msra.mxu0 %v5305_v12  ;;  %v5374_v50 = vld [vmem:[#allocation4 + $0x36e0] sm:$0xff] }
 0xd57   :  { %3654 = vmatpush.msra.mxu1 %v5308_v32  ;;  %3674 = vmatpush.msra.mxu2 %v5311_v35  ;;  %v5377_v42 = vld [vmem:[#allocation4 + $0x38e0] sm:$0xff] }
 0xd58   :  { %3615 = vmatpush.msrb.mxu3 %v5314_v54  ;;  %3635 = vmatpush.msra.mxu0 %v5317_v60  ;;  %v5380_v44 = vld [vmem:[#allocation4 + $0x3ae0] sm:$0xff] }
 0xd59   :  { %3655 = vmatpush.msra.mxu1 %v5320_v26  ;;  %3675 = vmatpush.msra.mxu2 %v5323_v4  ;;  %v5383_v1 = vld [vmem:[#allocation4 + $0x3ce0] sm:$0xff] }
 0xd5a   :  { %3616 = vmatpush.msrb.mxu3 %v5326_v11  ;;  %3636 = vmatpush.msra.mxu0 %v5329_v16  ;;  %v5386_v43 = vld [vmem:[#allocation4 + $0x36c0] sm:$0xff] }
 0xd5b   :  { %3656 = vmatpush.msra.mxu1 %v5332_v20  ;;  %3676 = vmatpush.msra.mxu2 %v5335_v21  ;;  %v5389_v57 = vld [vmem:[#allocation4 + $0x38c0] sm:$0xff] }
 0xd5c   :  { %3617 = vmatpush.msrb.mxu3 %v5338_v22  ;;  %3637 = vmatpush.msra.mxu0 %v5341_v23  ;;  %v5392_v45 = vld [vmem:[#allocation4 + $0x3ac0] sm:$0xff] }
 0xd5d   :  { %3657 = vmatpush.msra.mxu1 %v5344_v37  ;;  %3677 = vmatpush.msra.mxu2 %v5347_v24  ;;  %v5395_v46 = vld [vmem:[#allocation4 + $0x3cc0] sm:$0xff] }
 0xd5e   :  { %3618 = vmatpush.msrb.mxu3 %v5350_v25  ;;  %3638 = vmatpush.msra.mxu0 %v5353_v27  ;;  %v5398_v48 = vld [vmem:[#allocation4 + $0x36a0] sm:$0xff] }
 0xd5f   :  { %3658 = vmatpush.msra.mxu1 %v5356_v29  ;;  %3678 = vmatpush.msra.mxu2 %v5359_v33  ;;  %v5401_v10 = vld [vmem:[#allocation4 + $0x38a0] sm:$0xff] }
 0xd60   :  { %3619 = vmatpush.msrb.mxu3 %v5362_v34  ;;  %3639 = vmatpush.msra.mxu0 %v5365_v19  ;;  %v5404_v51 = vld [vmem:[#allocation4 + $0x3aa0] sm:$0xff] }
 0xd61   :  { %3659 = vmatpush.msra.mxu1 %v5368_v40  ;;  %3679 = vmatpush.msra.mxu2 %v5371_v9  ;;  %v5407_v14 = vld [vmem:[#allocation4 + $0x3ca0] sm:$0xff] }
 0xd62   :  { %3620 = vmatpush.msrb.mxu3 %v5374_v50  ;;  %3640 = vmatpush.msra.mxu0 %v5377_v42  ;;  %v5410_v63 = vld [vmem:[#allocation4 + $0x3680] sm:$0xff] }
 0xd63   :  { %3660 = vmatpush.msra.mxu1 %v5380_v44  ;;  %3680 = vmatpush.msra.mxu2 %v5383_v1  ;;  %v5413_v55 = vld [vmem:[#allocation4 + $0x3880] sm:$0xff] }
 0xd64   :  { %3621 = vmatpush.msrb.mxu3 %v5386_v43  ;;  %3641 = vmatpush.msra.mxu0 %v5389_v57  ;;  %v5416_v56 = vld [vmem:[#allocation4 + $0x3a80] sm:$0xff] }
 0xd65   :  { %3661 = vmatpush.msra.mxu1 %v5392_v45  ;;  %3681 = vmatpush.msra.mxu2 %v5395_v46  ;;  %v5419_v7 = vld [vmem:[#allocation4 + $0x3c80] sm:$0xff] }
 0xd66   :  { %3622 = vmatpush.msrb.mxu3 %v5398_v48  ;;  %3642 = vmatpush.msra.mxu0 %v5401_v10  ;;  %v5422_v61 = vld [vmem:[#allocation4 + $0x3660] sm:$0xff] }
 0xd67   :  { %3662 = vmatpush.msra.mxu1 %v5404_v51  ;;  %3682 = vmatpush.msra.mxu2 %v5407_v14  ;;  %v5425_v58 = vld [vmem:[#allocation4 + $0x3860] sm:$0xff] }
 0xd68   :  { %3623 = vmatpush.msrb.mxu3 %v5410_v63  ;;  %3643 = vmatpush.msra.mxu0 %v5413_v55  ;;  %v5428_v41 = vld [vmem:[#allocation4 + $0x3a60] sm:$0xff] }
 0xd69   :  { %3663 = vmatpush.msra.mxu1 %v5416_v56  ;;  %3683 = vmatpush.msra.mxu2 %v5419_v7  ;;  %v5431_v2 = vld [vmem:[#allocation4 + $0x3c60] sm:$0xff] }
 0xd6a   :  { %3624 = vmatpush.msrb.mxu3 %v5422_v61  ;;  %3644 = vmatpush.msra.mxu0 %v5425_v58  ;;  %v5434_v17 = vld [vmem:[#allocation4 + $0x3640] sm:$0xff] }
 0xd6b   :  { %3664 = vmatpush.msra.mxu1 %v5428_v41  ;;  %3684 = vmatpush.msra.mxu2 %v5431_v2  ;;  %v5437_v38 = vld [vmem:[#allocation4 + $0x3840] sm:$0xff] }
 0xd6c   :  { %3625 = vmatpush.msrb.mxu3 %v5434_v17  ;;  %3645 = vmatpush.msra.mxu0 %v5437_v38  ;;  %v5440_v59 = vld [vmem:[#allocation4 + $0x3a40] sm:$0xff] }
 0xd6d   :  { %3665 = vmatpush.msra.mxu1 %v5440_v59  ;;  %v5443_v62 = vld [vmem:[#allocation4 + $0x3c40] sm:$0xff] }
 0xd6e   :  { %3685 = vmatpush.msra.mxu2 %v5443_v62  ;;  %3720 = vmatpush.msra.mxu3 %v5254_v0  ;;  %v3272_v0 = vld [vmem:[#allocation4 + $0x4040] ss:$8 sm:$0xf] }
 0xd6f   :  { %3740 = vmatpush.msrb.mxu0 %v5257_v3  ;;  %3760 = vmatpush.msrb.mxu1 %v5260_v6  ;;  %v3274_v3 = vperm.slane %v3272_v0, 0 }
 0xd70   :  { %3780 = vmatpush.msrb.mxu2 %v5263_v13  ;;  %3721 = vmatpush.msra.mxu3 %v5266_v15 }
 0xd71   :  { %3741 = vmatpush.msrb.mxu0 %v5269_v52  ;;  %3761 = vmatpush.msrb.mxu1 %v5272_v36 }
 0xd72   :  { %3781 = vmatpush.msrb.mxu2 %v5275_v39  ;;  %3722 = vmatpush.msra.mxu3 %v5278_v28 }
 0xd73   :  { %3742 = vmatpush.msrb.mxu0 %v5281_v31  ;;  %3762 = vmatpush.msrb.mxu1 %v5284_v18  ;;  %v3275_v18 = vperm.slane %v3272_v0, 1 }
 0xd74   :  { %3782 = vmatpush.msrb.mxu2 %v5287_v30  ;;  %3723 = vmatpush.msra.mxu3 %v5290_v49  ;;  %v5588_v30 = vld [vmem:[#allocation10_spill] sm:$0xff] }
 0xd75   :  { %3743 = vmatpush.msrb.mxu0 %v5293_v47  ;;  %3763 = vmatpush.msrb.mxu1 %v5296_v53 }
 0xd76   :  { %3783 = vmatpush.msrb.mxu2 %v5299_v8  ;;  %3724 = vmatpush.msra.mxu3 %v5302_v5 }
 0xd77   :  { %3744 = vmatpush.msrb.mxu0 %v5305_v12  ;;  %3764 = vmatpush.msrb.mxu1 %v5308_v32 }
 0xd78   :  { %3784 = vmatpush.msrb.mxu2 %v5311_v35  ;;  %3725 = vmatpush.msra.mxu3 %v5314_v54 }
 0xd79   :  { %3745 = vmatpush.msrb.mxu0 %v5317_v60  ;;  %3765 = vmatpush.msrb.mxu1 %v5320_v26  ;;  %v5589_v26 = vld [vmem:[#allocation11_spill] sm:$0xff] }
 0xd7a   :  { %3785 = vmatpush.msrb.mxu2 %v5323_v4  ;;  %3726 = vmatpush.msra.mxu3 %v5326_v11 }
 0xd7b   :  { %3746 = vmatpush.msrb.mxu0 %v5329_v16  ;;  %3766 = vmatpush.msrb.mxu1 %v5332_v20  ;;  %v3276_v16 = vperm.slane %v3272_v0, 2 }
 0xd7c   :  { %3786 = vmatpush.msrb.mxu2 %v5335_v21  ;;  %3727 = vmatpush.msra.mxu3 %v5338_v22 }
 0xd7d   :  { %3747 = vmatpush.msrb.mxu0 %v5341_v23  ;;  %3767 = vmatpush.msrb.mxu1 %v5344_v37 }
 0xd7e   :  { %3787 = vmatpush.msrb.mxu2 %v5347_v24  ;;  %3728 = vmatpush.msra.mxu3 %v5350_v25 }
 0xd7f   :  { %3748 = vmatpush.msrb.mxu0 %v5353_v27  ;;  %3768 = vmatpush.msrb.mxu1 %v5356_v29  ;;  %v5590_v29 = vld [vmem:[#allocation12_spill] sm:$0xff] }
 0xd80   :  { %3788 = vmatpush.msrb.mxu2 %v5359_v33  ;;  %3729 = vmatpush.msra.mxu3 %v5362_v34 }
 0xd81   :  { %3749 = vmatpush.msrb.mxu0 %v5365_v19  ;;  %3769 = vmatpush.msrb.mxu1 %v5368_v40  ;;  %v3277_v19 = vperm.slane %v3272_v0, 3 }
 0xd82   :  { %3789 = vmatpush.msrb.mxu2 %v5371_v9  ;;  %3730 = vmatpush.msra.mxu3 %v5374_v50 }
 0xd83   :  { %3750 = vmatpush.msrb.mxu0 %v5377_v42  ;;  %3770 = vmatpush.msrb.mxu1 %v5380_v44  ;;  %v3319_v15 = vpop.f32.mrf.mxu0 }
 0xd84   :  { %3790 = vmatpush.msrb.mxu2 %v5383_v1  ;;  %3731 = vmatpush.msra.mxu3 %v5386_v43  ;;  %v3339_v36 = vpop.f32.mrf.mxu1 }
 0xd85   :  { %3751 = vmatpush.msrb.mxu0 %v5389_v57  ;;  %3771 = vmatpush.msrb.mxu1 %v5392_v45  ;;  %v5591_v45 = vld [vmem:[#allocation13_spill] sm:$0xff] }
 0xd86   :  { %3791 = vmatpush.msrb.mxu2 %v5395_v46  ;;  %3732 = vmatpush.msra.mxu3 %v5398_v48 }
 0xd87   :  { %3752 = vmatpush.msrb.mxu0 %v5401_v10  ;;  %3772 = vmatpush.msrb.mxu1 %v5404_v51 }
 0xd88   :  { %3792 = vmatpush.msrb.mxu2 %v5407_v14  ;;  %3733 = vmatpush.msra.mxu3 %v5410_v63 }
 0xd89   :  { %3753 = vmatpush.msrb.mxu0 %v5413_v55  ;;  %v3299_v6 = vpop.f32.mrf.mxu3  ;;  %3773 = vmatpush.msrb.mxu1 %v5416_v56 }
 0xd8a   :  { %3793 = vmatpush.msrb.mxu2 %v5419_v7  ;;  %v3300_v13 = vadd.f32 %v3299_v6, %v3274_v3  ;;  %3734 = vmatpush.msra.mxu3 %v5422_v61  ;;  %v3359_v28 = vpop.f32.mrf.mxu2 }
 0xd8b   :  { %3754 = vmatpush.msrb.mxu0 %v5425_v58  ;;  %3774 = vmatpush.msrb.mxu1 %v5428_v41 }
 0xd8c   :  { %3794 = vmatpush.msrb.mxu2 %v5431_v2  ;;  %v3320_v52 = vadd.f32 %v3319_v15, %v3300_v13  ;;  %3735 = vmatpush.msra.mxu3 %v5434_v17 }
 0xd8d   :  { %3755 = vmatpush.msrb.mxu0 %v5437_v38  ;;  %3775 = vmatpush.msrb.mxu1 %v5440_v59  ;;  %v3399_v5 = vpop.f32.mrf.mxu0 }
 0xd8e   :  { %3795 = vmatpush.msrb.mxu2 %v5443_v62  ;;  %v3340_v39 = vadd.f32 %v3339_v36, %v3320_v52  ;;  %v3419_v32 = vpop.f32.mrf.mxu1 }
 0xd90   :  { %v3360_v31 = vadd.f32 %v3359_v28, %v3340_v39 }
 0xd92   :  { %v3602_v49 = vadd.f32 %v3360_v31, %v5588_v30 }
 0xd93   :  { %v3379_v47 = vpop.f32.mrf.mxu3 }
 0xd94   :  { %v5511_v53 = vmax.f32 %v3602_v49, 0.0  ;;  %v3380_v8 = vadd.f32 %v3379_v47, %v3275_v18  ;;  %v3439_v54 = vpop.f32.mrf.mxu2 }
 0xd96   :  { %v3400_v12 = vadd.f32 %v3399_v5, %v3380_v8  ;;  %3626 = vmatmul.f32.vlgmr.msrb.gmra.mxu3 %v5511_v53 }
 0xd98   :  { %v3420_v35 = vadd.f32 %v3419_v32, %v3400_v12 }
 0xd9a   :  { %v3440_v60 = vadd.f32 %v3439_v54, %v3420_v35 }
 0xd9c   :  { %v3603_v4 = vadd.f32 %v3440_v60, %v5589_v26 }
 0xd9e   :  { %v5515_v11 = vmax.f32 %v3603_v4, 0.0 }
 0xda0   :  { %3646 = vmatmul.f32.vlgmr.msra.gmra.mxu0 %v5515_v11 }
 0xda7   :  { %v3479_v22 = vpop.f32.mrf.mxu0 }
 0xda8   :  { %v3499_v37 = vpop.f32.mrf.mxu1 }
 0xdad   :  { %v3459_v20 = vpop.f32.mrf.mxu3 }
 0xdae   :  { %v3460_v21 = vadd.f32 %v3459_v20, %v3276_v16  ;;  %v3519_v25 = vpop.f32.mrf.mxu2 }
 0xdb0   :  { %v3480_v23 = vadd.f32 %v3479_v22, %v3460_v21 }
 0xdb2   :  { %v3500_v24 = vadd.f32 %v3499_v37, %v3480_v23 }
 0xdb4   :  { %v3520_v27 = vadd.f32 %v3519_v25, %v3500_v24 }
 0xdb6   :  { %v3604_v33 = vadd.f32 %v3520_v27, %v5590_v29 }
 0xdb8   :  { %v5519_v34 = vmax.f32 %v3604_v33, 0.0 }
 0xdba   :  { %3666 = vmatmul.f32.vlgmr.msra.gmra.mxu1 %v5519_v34 }
 0xdc9   :  { %v3559_v50 = vpop.f32.mrf.mxu0 }
 0xdca   :  { %v3579_v44 = vpop.f32.mrf.mxu1 }
 0xdcf   :  { %v3539_v40 = vpop.f32.mrf.mxu3 }
 0xdd0   :  { %v3540_v9 = vadd.f32 %v3539_v40, %v3277_v19  ;;  %v3599_v43 = vpop.f32.mrf.mxu2 }
 0xdd2   :  { %v3560_v42 = vadd.f32 %v3559_v50, %v3540_v9  ;;  %v3808_v9 = vld [vmem:[#allocation4 + $0x4060] ss:$0 sm:$0xff] }
 0xdd4   :  { %v3580_v1 = vadd.f32 %v3579_v44, %v3560_v42 }
 0xdd6   :  { %v3600_v57 = vadd.f32 %v3599_v43, %v3580_v1  ;;  %v3821_v43 = vld [vmem:[#allocation4 + $0x4080] ss:$0 sm:$0xff] }
 0xdd8   :  { %v3605_v46 = vadd.f32 %v3600_v57, %v5591_v45  ;;  %v3879_v45 = vld [vmem:[#allocation4 + $0x2c20] sm:$0xff] }
 0xdd9   :  { %3929 = vmatpush.msrb.mxu3 %v3879_v45  ;;  %v3897_v45 = vld [vmem:[#allocation4 + $0x2e60] sm:$0xff] }
 0xdda   :  { %v5523_v48 = vmax.f32 %v3605_v46, 0.0  ;;  %v3895_v46 = vld [vmem:[#allocation4 + $0x2e20] sm:$0xff] }
 0xddb   :  { %3949 = vmatpush.msra.mxu0 %v3895_v46  ;;  %v3913_v46 = vld [vmem:[#allocation4 + $0x3060] sm:$0xff] }
 0xddc   :  { %3686 = vmatmul.f32.vlgmr.msra.gmra.mxu2 %v5523_v48 }
 0xe19   :  { %v3627_v51 = vpop.f32.mrf.mxu3 }
 0xe1d   :  { %v3647_v10 = vpop.f32.mrf.mxu0 }
 0xe1e   :  { %v3648_v63 = vadd.f32 %v3647_v10, %v3627_v51  ;;  %v3911_v10 = vld [vmem:[#allocation4 + $0x3020] sm:$0xff] }
 0xe1f   :  { %v3927_v51 = vld [vmem:[#allocation4 + $0x3220] sm:$0xff]  ;;  %3969 = vmatpush.msra.mxu1 %v3911_v10 }
 0xe20   :  { %3989 = vmatpush.msra.mxu2 %v3927_v51  ;;  %v3864_v10 = vld [vmem:[#allocation4 + $0x2a40] sm:$0xff] }
 0xe21   :  { %v3880_v51 = vld [vmem:[#allocation4 + $0x2c40] sm:$0xff] }
 0xe37   :  { %v3667_v14 = vpop.f32.mrf.mxu1 }
 0xe38   :  { %v3668_v55 = vadd.f32 %v3667_v14, %v3648_v63  ;;  %v3878_v14 = vld [vmem:[#allocation4 + $0x2c00] sm:$0xff] }
 0xe39   :  { %v3894_v63 = vld [vmem:[#allocation4 + $0x2e00] sm:$0xff]  ;;  %3930 = vmatpush.msrb.mxu3 %v3878_v14 }
 0xe3a   :  { %3950 = vmatpush.msra.mxu0 %v3894_v63  ;;  %v3896_v14 = vld [vmem:[#allocation4 + $0x2e40] sm:$0xff] }
 0xe3b   :  { %v3912_v63 = vld [vmem:[#allocation4 + $0x3040] sm:$0xff] }
 0xe5f   :  { %v3687_v56 = vpop.f32.mrf.mxu2 }
 0xe60   :  { %v3688_v7 = vadd.f32 %v3687_v56, %v3668_v55  ;;  %v3910_v55 = vld [vmem:[#allocation4 + $0x3000] sm:$0xff] }
 0xe61   :  { %v3926_v56 = vld [vmem:[#allocation4 + $0x3200] sm:$0xff]  ;;  %3970 = vmatpush.msra.mxu1 %v3910_v55 }
 0xe62   :  { %v3690_v61 = vsel %vm372_vm1, %v3688_v7, 0.0  ;;  %v3877_v7 = vld [vmem:[#allocation4 + $0x2be0] sm:$0xff]  ;;  %3990 = vmatpush.msra.mxu2 %v3926_v56 }
 0xe63   :  { %v3691_v58 = vrot.slane %v3690_v61, 4  ;;  %3931 = vmatpush.msrb.mxu3 %v3877_v7 }
 0xe65   :  { %v3692_v41 = vadd.f32 %v3691_v58, %v3690_v61  ;;  %v3893_v61 = vld [vmem:[#allocation4 + $0x2de0] sm:$0xff] }
 0xe66   :  { %v3909_v58 = vld [vmem:[#allocation4 + $0x2fe0] sm:$0xff]  ;;  %3951 = vmatpush.msra.mxu0 %v3893_v61 }
 0xe67   :  { %v3693_v2 = vrot.slane %v3692_v41, 2  ;;  %3971 = vmatpush.msra.mxu1 %v3909_v58 }
 0xe69   :  { %v3694_v17 = vadd.f32 %v3693_v2, %v3692_v41  ;;  %v3925_v41 = vld [vmem:[#allocation4 + $0x31e0] sm:$0xff] }
 0xe6a   :  { %v3876_v2 = vld [vmem:[#allocation4 + $0x2bc0] sm:$0xff]  ;;  %3991 = vmatpush.msra.mxu2 %v3925_v41 }
 0xe6b   :  { %v3695_v38 = vrot.slane %v3694_v17, 1  ;;  %3932 = vmatpush.msrb.mxu3 %v3876_v2 }
 0xe6d   :  { %v3696_v59 = vadd.f32 %v3695_v38, %v3694_v17  ;;  %v3892_v17 = vld [vmem:[#allocation4 + $0x2dc0] sm:$0xff] }
 0xe6e   :  { %v3908_v38 = vld [vmem:[#allocation4 + $0x2fc0] sm:$0xff]  ;;  %3952 = vmatpush.msra.mxu0 %v3892_v17 }
 0xe6f   :  { %v3697_v62 = vmul.f32 0.03125, %v3696_v59  ;;  %v3924_v59 = vld [vmem:[#allocation4 + $0x31c0] sm:$0xff]  ;;  %3972 = vmatpush.msra.mxu1 %v3908_v38 }
 0xe70   :  { %3992 = vmatpush.msra.mxu2 %v3924_v59 }
 0xe71   :  { %3705 = vrot.lane.b32.xlu2 %v3697_v62, %s4220_s0  ;;  %3702 = vrot.lane.b32.xlu1 %v3697_v62, %s4221_s1 }
 0xe72   :  { %3699 = vrot.lane.b32.xlu0 %v3697_v62, %s4219_s20 }
 0xecb   :  { %v3706_v13 = vpop.permute.xlu2 %3705 }
 0xee3   :  { %v3703_v0 = vpop.permute.xlu1 %3702 }
 0xee4   :  { %v3700_v3 = vpop.permute.xlu0 %3699 }
 0xee5   :  { %v3708_v6 = vsel %vm391_vm2, %v3697_v62, %v3700_v3  ;;  %v3907_v3 = vld [vmem:[#allocation4 + $0x2fa0] sm:$0xff] }
 0xee6   :  { %v3709_v15 = vsel %vm393_vm3, %v3708_v6, %v3703_v0  ;;  %v3891_v0 = vld [vmem:[#allocation4 + $0x2da0] sm:$0xff]  ;;  %3973 = vmatpush.msra.mxu1 %v3907_v3 }
 0xee7   :  { %v3710_v52 = vsel %vm395_vm4, %v3709_v15, %v3706_v13  ;;  %v3923_v6 = vld [vmem:[#allocation4 + $0x31a0] sm:$0xff]  ;;  %3953 = vmatpush.msra.mxu0 %v3891_v0 }
 0xee8   :  { %v3711_v36 = vperm.slane %v3710_v52, 0  ;;  %v3874_v13 = vld [vmem:[#allocation4 + $0x2b80] sm:$0xff]  ;;  %3993 = vmatpush.msra.mxu2 %v3923_v6 }
 0xee9   :  { %v3890_v15 = vld [vmem:[#allocation4 + $0x2d80] sm:$0xff] }
 0xeea   :  { %v3712_v39 = vsub.f32 %v5511_v53, %v3711_v36  ;;  %v3713_v28 = vsub.f32 %v5515_v11, %v3711_v36  ;;  %v3714_v31 = vsub.f32 %v5519_v34, %v3711_v36  ;;  %v3715_v18 = vsub.f32 %v5523_v48, %v3711_v36  ;;  %v3906_v52 = vld [vmem:[#allocation4 + $0x2f80] sm:$0xff]  ;;  %3954 = vmatpush.msra.mxu0 %v3890_v15 }
 0xeeb   :  { %v3922_v36 = vld [vmem:[#allocation4 + $0x3180] sm:$0xff]  ;;  %3974 = vmatpush.msra.mxu1 %v3906_v52 }
 0xeec   :  { %v3716_v30 = vmul.f32 %v3712_v39, %v3712_v39  ;;  %v3717_v49 = vmul.f32 %v3713_v28, %v3713_v28  ;;  %v3718_v47 = vmul.f32 %v3714_v31, %v3714_v31  ;;  %v3719_v8 = vmul.f32 %v3715_v18, %v3715_v18  ;;  %v3873_v39 = vld [vmem:[#allocation4 + $0x2b60] sm:$0xff]  ;;  %3994 = vmatpush.msra.mxu2 %v3922_v36 }
 0xeed   :  { %v3889_v28 = vld [vmem:[#allocation4 + $0x2d60] sm:$0xff] }
 0xeee   :  { %3736 = vmatmul.f32.vlgmr.msra.gmra.mxu3 %v3716_v30  ;;  %3756 = vmatmul.f32.vlgmr.msrb.gmra.mxu0 %v3717_v49  ;;  %v3905_v31 = vld [vmem:[#allocation4 + $0x2f60] sm:$0xff] }
 0xeef   :  { %3776 = vmatmul.f32.vlgmr.msrb.gmra.mxu1 %v3718_v47  ;;  %3796 = vmatmul.f32.vlgmr.msrb.gmra.mxu2 %v3719_v8  ;;  %v3921_v18 = vld [vmem:[#allocation4 + $0x3160] sm:$0xff] }
 0xef0   :  { %3955 = vmatpush.msra.mxu0 %v3889_v28  ;;  %3975 = vmatpush.msra.mxu1 %v3905_v31  ;;  %v3872_v30 = vld [vmem:[#allocation4 + $0x2b40] sm:$0xff] }
 0xef1   :  { %3995 = vmatpush.msra.mxu2 %v3921_v18  ;;  %v3888_v49 = vld [vmem:[#allocation4 + $0x2d40] sm:$0xff] }
 0xef2   :  { %v3904_v47 = vld [vmem:[#allocation4 + $0x2f40] sm:$0xff]  ;;  %3956 = vmatpush.msra.mxu0 %v3888_v49 }
 0xef3   :  { %v3920_v8 = vld [vmem:[#allocation4 + $0x3140] sm:$0xff]  ;;  %3976 = vmatpush.msra.mxu1 %v3904_v47 }
 0xef4   :  { %3996 = vmatpush.msra.mxu2 %v3920_v8 }
 0xf6b   :  { %v3757_v5 = vpop.f32.mrf.mxu0 }
 0xf6c   :  { %v3777_v35 = vpop.f32.mrf.mxu1 }
 0xf71   :  { %v3737_v12 = vpop.f32.mrf.mxu3 }
 0xf72   :  { %v3758_v32 = vadd.f32 %v3757_v5, %v3737_v12  ;;  %v3797_v60 = vpop.f32.mrf.mxu2  ;;  %v3871_v5 = vld [vmem:[#allocation4 + $0x2b20] sm:$0xff] }
 0xf73   :  { %v3887_v12 = vld [vmem:[#allocation4 + $0x2d20] sm:$0xff] }
 0xf74   :  { %v3778_v54 = vadd.f32 %v3777_v35, %v3758_v32  ;;  %v3903_v32 = vld [vmem:[#allocation4 + $0x2f20] sm:$0xff]  ;;  %3957 = vmatpush.msra.mxu0 %v3887_v12 }
 0xf75   :  { %v3919_v35 = vld [vmem:[#allocation4 + $0x3120] sm:$0xff]  ;;  %3977 = vmatpush.msra.mxu1 %v3903_v32 }
 0xf76   :  { %v3798_v26 = vadd.f32 %v3797_v60, %v3778_v54  ;;  %3997 = vmatpush.msra.mxu2 %v3919_v35  ;;  %v3870_v54 = vld [vmem:[#allocation4 + $0x2b00] sm:$0xff] }
 0xf77   :  { %v3886_v60 = vld [vmem:[#allocation4 + $0x2d00] sm:$0xff] }
 0xf78   :  { %v3800_v4 = vsel %vm372_vm1, %v3798_v26, 0.0  ;;  %v3902_v26 = vld [vmem:[#allocation4 + $0x2f00] sm:$0xff]  ;;  %3958 = vmatpush.msra.mxu0 %v3886_v60 }
 0xf79   :  { %v3801_v16 = vrot.slane %v3800_v4, 4  ;;  %3978 = vmatpush.msra.mxu1 %v3902_v26 }
 0xf7b   :  { %v3802_v20 = vadd.f32 %v3801_v16, %v3800_v4  ;;  %v3918_v4 = vld [vmem:[#allocation4 + $0x3100] sm:$0xff] }
 0xf7c   :  { %v3869_v16 = vld [vmem:[#allocation4 + $0x2ae0] sm:$0xff]  ;;  %3998 = vmatpush.msra.mxu2 %v3918_v4 }
 0xf7d   :  { %v3803_v21 = vrot.slane %v3802_v20, 2 }
 0xf7f   :  { %v3804_v22 = vadd.f32 %v3803_v21, %v3802_v20  ;;  %v3885_v20 = vld [vmem:[#allocation4 + $0x2ce0] sm:$0xff] }
 0xf80   :  { %v3901_v21 = vld [vmem:[#allocation4 + $0x2ee0] sm:$0xff]  ;;  %3959 = vmatpush.msra.mxu0 %v3885_v20 }
 0xf81   :  { %v3805_v23 = vrot.slane %v3804_v22, 1  ;;  %3979 = vmatpush.msra.mxu1 %v3901_v21 }
 0xf83   :  { %v3806_v37 = vadd.f32 %v3805_v23, %v3804_v22  ;;  %v3917_v22 = vld [vmem:[#allocation4 + $0x30e0] sm:$0xff] }
 0xf84   :  { %3999 = vmatpush.msra.mxu2 %v3917_v22  ;;  %v3868_v23 = vld [vmem:[#allocation4 + $0x2ac0] sm:$0xff] }
 0xf85   :  { %v3807_v24 = vmul.f32 0.03125, %v3806_v37  ;;  %v3884_v37 = vld [vmem:[#allocation4 + $0x2cc0] sm:$0xff] }
 0xf86   :  { %3960 = vmatpush.msra.mxu0 %v3884_v37 }
 0xf87   :  { %v3809_v25 = vadd.f32 1e-05, %v3807_v24  ;;  %v3900_v24 = vld [vmem:[#allocation4 + $0x2ec0] sm:$0xff] }
 0xf88   :  { %3980 = vmatpush.msra.mxu1 %v3900_v24 }
 0xf89   :  { %4032 = vrsqrt.f32 %v3809_v25  ;;  %vm3816_vm6 = vweird.f32 %v3809_v25 }
 0xf8f   :  { %v4033_v27 = vpop.eup %4032 }
 0xf90   :  { %v3811_v29 = vmul.f32 %v4033_v27, %v3809_v25  ;;  %vm3817_vm5 = vweird.f32 %v4033_v27  ;;  %v3916_v25 = vld [vmem:[#allocation4 + $0x30c0] sm:$0xff] }
 0xf91   :  { %vm3818_vm7 = vmor %vm3816_vm6, %vm3817_vm5  ;;  %4000 = vmatpush.msra.mxu2 %v3916_v25 }
 0xf92   :  { %v3812_v33 = vmul.f32 %v4033_v27, %v3811_v29  ;;  %v3883_v29 = vld [vmem:[#allocation4 + $0x2ca0] sm:$0xff] }
 0xf93   :  { %3961 = vmatpush.msra.mxu0 %v3883_v29 }
 0xf94   :  { %v3813_v19 = vmul.f32 0.5, %v3812_v33  ;;  %v3899_v33 = vld [vmem:[#allocation4 + $0x2ea0] sm:$0xff] }
 0xf95   :  { %3981 = vmatpush.msra.mxu1 %v3899_v33 }
 0xf96   :  { %v3814_v40 = vsub.f32 1.5, %v3813_v19  ;;  %v3915_v19 = vld [vmem:[#allocation4 + $0x30a0] sm:$0xff] }
 0xf97   :  { %4001 = vmatpush.msra.mxu2 %v3915_v19 }
 0xf98   :  { %v3815_v50 = vmul.f32 %v4033_v27, %v3814_v40  ;;  %v3866_v40 = vld [vmem:[#allocation4 + $0x2a80] sm:$0xff] }
 0xf9a   :  { %v3819_v42 = vsel %vm3818_vm7, %v4033_v27, %v3815_v50  ;;  %v3867_v27 = vld [vmem:[#allocation4 + $0x2aa0] sm:$0xff] }
 0xf9b   :  { %v5538_v44 = vmul.f32 %v3819_v42, %v3808_v9  ;;  %v3882_v9 = vld [vmem:[#allocation4 + $0x2c80] sm:$0xff] }
 0xf9c   :  { %v3898_v50 = vld [vmem:[#allocation4 + $0x2e80] sm:$0xff]  ;;  %3962 = vmatpush.msra.mxu0 %v3882_v9 }
 0xf9d   :  { %3831 = vrot.lane.b32.xlu2 %v5538_v44, %s4220_s0  ;;  %3828 = vrot.lane.b32.xlu1 %v5538_v44, %s4221_s1  ;;  %v3822_v1 = vmul.f32 %v5538_v44, %v3697_v62  ;;  %v3875_v62 = vld [vmem:[#allocation4 + $0x2ba0] sm:$0xff] }
 0xf9e   :  { %3825 = vrot.lane.b32.xlu0 %v5538_v44, %s4219_s20  ;;  %3933 = vmatpush.msrb.mxu3 %v3875_v62  ;;  %v3914_v42 = vld [vmem:[#allocation4 + $0x3080] sm:$0xff] }
 0xf9f   :  { %v5547_v57 = vsub.f32 %v3821_v43, %v3822_v1  ;;  %v3865_v1 = vld [vmem:[#allocation4 + $0x2a60] sm:$0xff]  ;;  %3982 = vmatpush.msra.mxu1 %v3898_v50  ;;  %4002 = vmatpush.msra.mxu2 %v3914_v42 }
 0xfa0   :  { %3934 = vmatpush.msrb.mxu3 %v3874_v13  ;;  %v3881_v43 = vld [vmem:[#allocation4 + $0x2c60] sm:$0xff] }
 0xfa1   :  { %3963 = vmatpush.msra.mxu0 %v3881_v43  ;;  %3983 = vmatpush.msra.mxu1 %v3897_v45 }
 0xfa2   :  { %3935 = vmatpush.msrb.mxu3 %v3873_v39  ;;  %4003 = vmatpush.msra.mxu2 %v3913_v46 }
 0xfa3   :  { %3964 = vmatpush.msra.mxu0 %v3880_v51  ;;  %3984 = vmatpush.msra.mxu1 %v3896_v14 }
 0xfa4   :  { %3936 = vmatpush.msrb.mxu3 %v3872_v30  ;;  %4004 = vmatpush.msra.mxu2 %v3912_v63 }
 0xfa5   :  { %3844 = vrot.lane.b32.xlu2 %v5547_v57, %s4220_s0  ;;  %3841 = vrot.lane.b32.xlu1 %v5547_v57, %s4221_s1 }
 0xfa6   :  { %3838 = vrot.lane.b32.xlu0 %v5547_v57, %s4219_s20  ;;  %3937 = vmatpush.msrb.mxu3 %v3871_v5 }
 0xfa8   :  { %3938 = vmatpush.msrb.mxu3 %v3870_v54 }
 0xfaa   :  { %3939 = vmatpush.msrb.mxu3 %v3869_v16 }
 0xfac   :  { %3940 = vmatpush.msrb.mxu3 %v3868_v23 }
 0xfae   :  { %3941 = vmatpush.msrb.mxu3 %v3867_v27 }
 0xfb0   :  { %3942 = vmatpush.msrb.mxu3 %v3866_v40 }
 0xfb2   :  { %3943 = vmatpush.msrb.mxu3 %v3865_v1 }
 0xfb4   :  { %3944 = vmatpush.msrb.mxu3 %v3864_v10 }
 0xff7   :  { %v3832_v56 = vpop.permute.xlu2 %3831 }
 0xfff   :  { %v3845_v62 = vpop.permute.xlu2 %3844 }
0x100f   :  { %v3829_v55 = vpop.permute.xlu1 %3828 }
0x1010   :  { %v3826_v7 = vpop.permute.xlu0 %3825 }
0x1011   :  { %v3834_v61 = vsel %vm391_vm2, %v5538_v44, %v3826_v7 }
0x1012   :  { %v3835_v58 = vsel %vm393_vm3, %v3834_v61, %v3829_v55 }
0x1013   :  { %v3836_v41 = vsel %vm395_vm4, %v3835_v58, %v3832_v56 }
0x1014   :  { %v3850_v2 = vperm.slane %v3836_v41, 0 }
0x1016   :  { %v3851_v6 = vmul.f32 %v3850_v2, %v5511_v53  ;;  %v3852_v44 = vmul.f32 %v3850_v2, %v5515_v11  ;;  %v3853_v15 = vmul.f32 %v3850_v2, %v5519_v34  ;;  %v3854_v52 = vmul.f32 %v3850_v2, %v5523_v48  ;;  %v3928_v53 = vld [vmem:[#allocation4 + $0x40a0] ss:$0 sm:$0xff] }
0x1017   :  { %v3842_v17 = vpop.permute.xlu1 %3841 }
0x1018   :  { %v3839_v38 = vpop.permute.xlu0 %3838 }
0x1019   :  { %v3847_v59 = vsel %vm391_vm2, %v5547_v57, %v3839_v38 }
0x101a   :  { %v3848_v0 = vsel %vm393_vm3, %v3847_v59, %v3842_v17 }
0x101b   :  { %v3849_v3 = vsel %vm395_vm4, %v3848_v0, %v3845_v62 }
0x101c   :  { %v3855_v13 = vperm.slane %v3849_v3, 0 }
0x101e   :  { %v3856_v36 = vadd.f32 %v3855_v13, %v3851_v6  ;;  %v3857_v39 = vadd.f32 %v3855_v13, %v3852_v44  ;;  %v3858_v28 = vadd.f32 %v3855_v13, %v3853_v15  ;;  %v3859_v31 = vadd.f32 %v3855_v13, %v3854_v52 }
0x1020   :  { %v3860_v18 = vmax.f32 %v3856_v36, 0.0  ;;  %v3861_v57 = vmax.f32 %v3857_v39, 0.0  ;;  %v3862_v30 = vmax.f32 %v3858_v28, 0.0  ;;  %v3863_v49 = vmax.f32 %v3859_v31, 0.0 }
0x1022   :  { %3945 = vmatmul.f32.vlgmr.msrb.gmra.mxu3 %v3860_v18  ;;  %3965 = vmatmul.f32.vlgmr.msra.gmra.mxu0 %v3861_v57 }
0x1023   :  { %3985 = vmatmul.f32.vlgmr.msra.gmra.mxu1 %v3862_v30  ;;  %4005 = vmatmul.f32.vlgmr.msra.gmra.mxu2 %v3863_v49 }
0x109f   :  { %v3966_v11 = vpop.f32.mrf.mxu0 }
0x10a0   :  { %v3986_v34 = vpop.f32.mrf.mxu1 }
0x10a5   :  { %v3946_v47 = vpop.f32.mrf.mxu3 }
0x10a6   :  { %v3947_v8 = vadd.f32 %v3946_v47, %v3928_v53  ;;  %v4006_v48 = vpop.f32.mrf.mxu2 }
0x10a8   :  { %v3967_v5 = vadd.f32 %v3966_v11, %v3947_v8 }
0x10aa   :  { %v3987_v12 = vadd.f32 %v3986_v34, %v3967_v5 }
0x10ac   :  { %v4007_v32 = vadd.f32 %v4006_v48, %v3987_v12 }
0x10ae   :  { %4034 = vtanh.f32 %v4007_v32 }
0x10b4   :  { %v4035_v35 = vpop.eup %4034 }
0x10b5   :  { %4010 = vst [vmem:[%s5572_s2] sm:$0x3] %v4035_v35 }
0x10b6   :  { %4015 = vsyncpa [#allocation3], 1 }
0x10b7   :  { %4016 = vsyncpa [#allocation5], 1 }

</bundles_post_ra>
